<compile_context>
chip_gen: v5e
topology: v5e:2x2
jax: 0.10.0
libtpu: 0.0.40
codegen_flags: <defaults>
</compile_context>

<pallas_src>
import jax
import jax.numpy as jnp
from jax.experimental import pallas as pl
from jax.experimental.pallas import tpu as pltpu

# ---------------- small shapes consistent with the module ----------------
B = 2            # batch
CHANS = 8        # EEG channels        (module default 22)
T = 128          # time points         (module default 1000)
K1 = 8           # temporal kernel     (module default 32)
F1 = 4           # f1
D_MULT = 2       # d
F2 = 8           # f2 (= d * f1, required by the grouped convs)
PK1 = 4
PK2 = 8
K3 = 16          # hard-coded (1, 16) depthwise kernel in block3
L = 16           # mamba seq_len       (module default 1000)
D_MODEL = 16
D2 = 2 * D_MODEL
STATE = 8        # state_size
OUT_DIM = 4      # output_dim / classes
T1 = T // PK1
T2 = T1 // PK2
LINEAR_SIZE = F2 * T2

EPS_BN = 1e-5
EPS_RMS = 1e-5


# ---------------- small helpers ----------------
def _elu(x):
    # NOTE: exp(x) may overflow to inf in the branch that jnp.where discards; harmless.
    return jnp.where(x > 0, x, jnp.exp(x) - 1.0)


def _silu(x):
    return x * (1.0 / (1.0 + jnp.exp(-x)))


def _softplus(x):
    # PyTorch softplus (beta=1, threshold=20); dead-branch exp overflow is discarded.
    return jnp.where(x > 20.0, x, jnp.log(1.0 + jnp.exp(x)))


# ---------------- the single fused kernel ----------------
def cnn_mamba_kernel(x_ref, w1_ref, b1_ref, w2g_ref, b2_ref, w3dw_ref, w3p_ref,
                     b3_ref, fcw_ref, fcb_ref, win_ref, bin_ref,
                     rms_ref, wnd_ref, bnd_ref, wconv_ref, bconv_ref,
                     wcl_ref, bcl_ref, wfc_ref, bfc_ref, wout_ref, bout_ref,
                     wproj_ref, bproj_ref,
                     mamba_out_ref, final_out_ref,
                     pad1_ref, pad3_ref, xpad_ref):
    f32 = jnp.float32
    BC, BF2, BL = B * CHANS, B * F2, B * L

    # ================= EEGNet (batch folded into the sublane axis) =================
    # block1: Conv2d(1, f1, (1, K1), padding='same') with BN1 folded into the weights.
    left1 = (K1 - 1) // 2
    # zero the halo columns only (interior is fully overwritten right below)
    pad1_ref[:, :left1] = jnp.zeros((BC, left1), f32)
    pad1_ref[:, left1 + T:] = jnp.zeros((BC, K1 - 1 - left1), f32)
    pad1_ref[:, left1:left1 + T] = x_ref[...].reshape(BC, T)

    shifts1 = [pad1_ref[:, k:k + T] for k in range(K1)]          # K1 x (B*CHANS, T)
    y1_parts = []
    for f in range(F1):
        acc = w1_ref[f, 0] * shifts1[0]
        for k in range(1, K1):
            acc = acc + w1_ref[f, k] * shifts1[k]
        y1_parts.append(acc + b1_ref[f, 0])
    y1 = jnp.concatenate(y1_parts, axis=0)                       # (F1*B*CHANS, T), rows (f, b, c)

    # block2: grouped depthwise conv as ONE block-diagonal matmul over the whole batch
    # (BN2 folded), then ELU and AvgPool(1, PK1).
    y2 = jnp.dot(w2g_ref[...], y1, preferred_element_type=f32) + b2_ref[...]   # (B*F2, T)
    y2 = _elu(y2)
    y2 = jnp.mean(y2.reshape(BF2, T1, PK1), axis=-1)             # (B*F2, T1)

    # block3: depthwise (1, K3) 'same' conv (per-channel VPU taps) + pointwise 1x1 conv
    # as one batch-block-diagonal matmul (BN3 folded) + ELU + AvgPool(1, PK2).
    left3 = (K3 - 1) // 2
    pad3_ref[:, :left3] = jnp.zeros((BF2, left3), f32)
    pad3_ref[:, left3 + T1:] = jnp.zeros((BF2, K3 - 1 - left3), f32)
    pad3_ref[:, left3:left3 + T1] = y2

    w3dw = w3dw_ref[...]                                         # (B*F2, K3)
    acc3 = w3dw[:, 0:1] * pad3_ref[:, 0:T1]
    for k in range(1, K3):
        acc3 = acc3 + w3dw[:, k:k + 1] * pad3_ref[:, k:k + T1]
    y3 = jnp.dot(w3p_ref[...], acc3, preferred_element_type=f32) + b3_ref[...]  # (B*F2, T1)
    y3 = _elu(y3)
    y3 = jnp.mean(y3.reshape(BF2, T2, PK2), axis=-1)             # (B*F2, T2)

    # fc (flatten is channel-major, matching torch .view).  The per-batch logits are then
    # pushed straight through input_proj at the (B, OUT_DIM) level and only the projected
    # (B, D_MODEL) rows are repeated over the Mamba sequence length (all L rows identical).
    fcw = fcw_ref[...]                                           # (OUT_DIM, F2, T2)
    logit_rows = []
    for b in range(B):
        y3b = y3[b * F2:(b + 1) * F2, :]                         # (F2, T2)
        prod = fcw * y3b[None, :, :]                             # (OUT_DIM, F2, T2)
        logit_rows.append(jnp.sum(jnp.sum(prod, axis=2), axis=1)[None, :])   # (1, OUT_DIM)
    logits = jnp.concatenate(logit_rows, axis=0) + fcb_ref[...]  # (B, OUT_DIM)

    # ================= Mamba (batch*seq folded into the sublane axis) =================
    # input_proj (4 -> d_model) on the B logits rows, then broadcast over seq_len.
    h0 = jnp.dot(logits, win_ref[...], preferred_element_type=f32) + bin_ref[...]   # (B, D_MODEL)
    h = jnp.concatenate(
        [jnp.broadcast_to(h0[b:b + 1, :], (L, D_MODEL)) for b in range(B)],
        axis=0)                                                  # (B*L, D_MODEL)

    # Conv1d halo columns are zeroed once; the interior is rewritten every block.
    xpad_ref[:, 0:1] = jnp.zeros((BL, 1), f32)
    xpad_ref[:, D2 + 1:] = jnp.zeros((BL, 1), f32)

    for blk in range(3):
        # RMSNorm
        ms = jnp.mean(h * h, axis=-1, keepdims=True)
        xn = h * jax.lax.rsqrt(ms + EPS_RMS) * rms_ref[blk]      # (B*L, D_MODEL)

        # fused inp_proj | D projection: one matmul, then slice.
        nd = jnp.dot(xn, wnd_ref[blk], preferred_element_type=f32) + bnd_ref[blk]    # (B*L, 2*D2)
        xp = nd[:, :D2]                                          # inp_proj(x)
        xd = nd[:, D2:]                                          # D(x)

        # Conv1d(seq_len, seq_len, 3, padding=1): channels = sequence positions,
        # width = 2*d_model.  One matmul against the batch-block-diagonal weight with
        # the 3 shifted windows stacked on the contraction axis.
        xpad_ref[:, 1:1 + D2] = xp
        zstack = jnp.concatenate([xpad_ref[:, k:k + D2] for k in range(3)], axis=0)   # (3*B*L, D2)
        x_conv = (jnp.dot(wconv_ref[blk], zstack, preferred_element_type=f32)
                  + bconv_ref[blk])                              # (B*L, D2)
        x_conv_out = (jnp.dot(_silu(x_conv), wcl_ref[blk], preferred_element_type=f32)
                      + bcl_ref[blk])                            # (B*L, D2)

        # fused S6 projections: delta_pre | B | C in one matmul.
        fc = jnp.dot(x_conv_out, wfc_ref[blk], preferred_element_type=f32) + bfc_ref[blk]
        delta = _softplus(fc[:, :D2])
        Bm = fc[:, D2:D2 + STATE]
        Cm = fc[:, D2 + STATE:]
        # S6 with h0 = 0: y = x * delta * sum_n(C_n * B_n); exp(delta@A) multiplies a
        # zero hidden state and drops out exactly (A is therefore never materialized).
        y_ssm = x_conv_out * delta * jnp.sum(Cm * Bm, axis=-1, keepdims=True)

        x_comb = _silu(y_ssm) * _silu(xd)
        h = jnp.dot(x_comb, wout_ref[blk], preferred_element_type=f32) + bout_ref[blk]   # (B*L, D_MODEL)

    # ================= head: mean over seq + output projection =================
    means = []
    for b in range(B):
        means.append(jnp.mean(h[b * L:(b + 1) * L, :], axis=0, keepdims=True))
    m = jnp.concatenate(means, axis=0)                           # (B, D_MODEL)
    mamba_out_ref[...] = m
    final_out_ref[...] = (jnp.dot(m, wproj_ref[...], preferred_element_type=f32)
                          + bproj_ref[...])


# ---------------- wrapper: one pallas_call, no grid, everything resident in VMEM ----------------
def cnn_mamba_forward(x, p):
    vmem = pl.BlockSpec(memory_space=pltpu.MemorySpace.VMEM)
    smem = pl.BlockSpec(memory_space=pltpu.MemorySpace.SMEM)
    args = [
        x,
        p['w1e'], p['b1'],                                    # SMEM scalars (block1 weights)
        p['w2g'], p['b2'], p['w3dw'], p['w3p'], p['b3'], p['fcw'], p['fcb'],
        p['win_t'], p['bin'],
        p['rms'], p['wnd'], p['bnd'], p['wconv'], p['bconv'],
        p['wcl'], p['bcl'], p['wfc'], p['bfc'], p['wout'], p['bout'],
        p['wproj_t'], p['bproj'],
    ]
    in_specs = [vmem, smem, smem] + [vmem] * (len(args) - 3)
    fn = pl.pallas_call(
        cnn_mamba_kernel,
        out_shape=(jax.ShapeDtypeStruct((B, D_MODEL), jnp.float32),
                   jax.ShapeDtypeStruct((B, OUT_DIM), jnp.float32)),
        in_specs=in_specs,
        out_specs=(vmem, vmem),
        scratch_shapes=[
            pltpu.VMEM((B * CHANS, T + K1 - 1), jnp.float32),   # block1 'same' pad
            pltpu.VMEM((B * F2, T1 + K3 - 1), jnp.float32),     # block3 'same' pad
            pltpu.VMEM((B * L, D2 + 2), jnp.float32),           # mamba conv1d pad
        ],
    )
    mamba_out, final_out = fn(*args)
    return mamba_out, final_out


# ---------------- deterministic parameter init (BN folded, weights stacked) ----------------
def init_params(key):
    ks = jax.random.split(key, 80)
    it = iter(ks)

    def uni(shape, fan_in):
        bound = 1.0 / float(fan_in) ** 0.5
        return jax.random.uniform(next(it), shape, jnp.float32, -bound, bound)

    def renorm_dim0(w, maxnorm):
        # torch.renorm(p=2, dim=0, maxnorm)
        flat = w.reshape(w.shape[0], -1)
        norms = jnp.sqrt(jnp.sum(flat * flat, axis=1, keepdims=True))
        scale = jnp.where(norms > maxnorm, maxnorm / (norms + 1e-7), 1.0)
        return (flat * scale).reshape(w.shape)

    # Inference-mode BatchNorm with default-initialized stats (gamma=1, beta=0,
    # running_mean=0, running_var=1): scale = 1/sqrt(1+eps), bias = 0.  Trained BN
    # parameters would be folded into these same weight/bias slots.
    bn_scale = 1.0 / (1.0 + EPS_BN) ** 0.5
    eyeB = jnp.eye(B, dtype=jnp.float32)

    # ---- EEGNet ----
    w1e = uni((F1, K1), K1) * bn_scale                       # conv1 weight, BN1 scale folded
    b1 = jnp.zeros((F1, 1), jnp.float32)                     # BN1 bias

    w2 = renorm_dim0(uni((F2, CHANS), CHANS), 1.0) * bn_scale   # grouped conv (max_norm1=1), BN2 folded
    base2 = jax.scipy.linalg.block_diag(
        *[w2[g * D_MULT:(g + 1) * D_MULT, :] for g in range(F1)])        # (F2, F1*CHANS)
    # batch-folded block-diagonal weight: rows (b, j), cols (f, b, c)
    w2g = (eyeB.reshape(B, 1, 1, B, 1) *
           base2.reshape(1, F2, F1, 1, CHANS)).reshape(B * F2, F1 * B * CHANS)
    b2 = jnp.zeros((B * F2, 1), jnp.float32)                 # BN2 bias slab

    w3dw = jnp.tile(uni((F2, K3), K3), (B, 1))               # depthwise (1,16) taps, rows (b, j)
    w3pw = uni((F2, F2), F2) * bn_scale                      # pointwise 1x1, BN3 scale folded
    w3p = jnp.kron(eyeB, w3pw)                               # (B*F2, B*F2) batch block-diag
    b3 = jnp.zeros((B * F2, 1), jnp.float32)                 # BN3 bias slab

    fcw = renorm_dim0(uni((OUT_DIM, LINEAR_SIZE), LINEAR_SIZE), 0.25)    # max_norm2 = 0.25
    fcw = fcw.reshape(OUT_DIM, F2, T2)
    fcb = uni((1, OUT_DIM), LINEAR_SIZE)

    eeg = dict(w1e=w1e, b1=b1, w2g=w2g, b2=b2, w3dw=w3dw, w3p=w3p, b3=b3,
               fcw=fcw, fcb=fcb)

    # ---- Mamba ----
    def linear(in_dim, out_dim):
        w = uni((out_dim, in_dim), in_dim)
        b = uni((1, out_dim), in_dim)
        return jnp.transpose(w), b                           # pre-transposed (in, out), (1, out)

    win_t, bin_ = linear(OUT_DIM, D_MODEL)                   # input_proj
    wproj_t, bproj = linear(D_MODEL, OUT_DIM)                # output_proj

    rms_l, wnd_l, bnd_l, wconv_l, bconv_l = [], [], [], [], []
    wcl_l, bcl_l, wfc_l, bfc_l, wout_l, bout_l = [], [], [], [], [], []
    for _ in range(3):
        rms_l.append(jnp.ones((1, D_MODEL), jnp.float32))

        winp_t, binp = linear(D_MODEL, D2)                   # inp_proj
        wd_t, bd = linear(D_MODEL, D2)                       # D
        wnd_l.append(jnp.concatenate([winp_t, wd_t], axis=1))            # (D_MODEL, 2*D2)
        bnd_l.append(jnp.concatenate([binp, bd], axis=1))                # (1, 2*D2)

        convw = uni((L, L, 3), L * 3)                        # Conv1d(L, L, 3) weight (out, in, k)
        convb = uni((L, 1), L * 3)
        wconv_l.append(jnp.concatenate(
            [jnp.kron(eyeB, convw[:, :, k]) for k in range(3)], axis=1))  # (B*L, 3*B*L)
        bconv_l.append(jnp.tile(convb, (B, 1)))                           # (B*L, 1)

        wcl_t, bcl = linear(D2, D2)                          # conv_linear
        wcl_l.append(wcl_t); bcl_l.append(bcl)

        wfc1_t, bfc1 = linear(D2, D2)                        # S6.fc1 (delta)
        wfc2_t, bfc2 = linear(D2, STATE)                     # S6.fc2 (B)
        wfc3_t, bfc3 = linear(D2, STATE)                     # S6.fc3 (C)
        wfc_l.append(jnp.concatenate([wfc1_t, wfc2_t, wfc3_t], axis=1))  # (D2, D2+2*STATE)
        bfc_l.append(jnp.concatenate([bfc1, bfc2, bfc3], axis=1))

        wob_t, bob = linear(D2, D_MODEL)                     # out_proj
        wout_l.append(wob_t)
        bout_l.append(jnp.ones_like(bob))                    # out_proj bias constant-init to 1.0

    mamba = dict(win_t=win_t, bin=bin_, wproj_t=wproj_t, bproj=bproj,
                 rms=jnp.stack(rms_l), wnd=jnp.stack(wnd_l), bnd=jnp.stack(bnd_l),
                 wconv=jnp.stack(wconv_l), bconv=jnp.stack(bconv_l),
                 wcl=jnp.stack(wcl_l), bcl=jnp.stack(bcl_l),
                 wfc=jnp.stack(wfc_l), bfc=jnp.stack(bfc_l),
                 wout=jnp.stack(wout_l), bout=jnp.stack(bout_l))
    # TODO(synk): S6's A parameter is initialized in the reference but never affects the
    # output (h starts at zero each forward), so it is intentionally not materialized.
    return dict(**eeg, **mamba)


if __name__ == "__main__":
    key = jax.random.PRNGKey(0)
    kp, kx = jax.random.split(key)
    params = init_params(kp)
    # layout: (B, chans, time)  ==  PyTorch NCHW (B, 1, chans, time)
    x = jax.random.normal(kx, (B, CHANS, T), jnp.float32)

    fwd = jax.jit(cnn_mamba_forward)
    mamba_out, final_out = fwd(x, params)
    jax.block_until_ready((mamba_out, final_out))

    assert mamba_out.shape == (B, D_MODEL)
    assert final_out.shape == (B, OUT_DIM)
    assert jnp.all(jnp.isfinite(mamba_out)) and jnp.all(jnp.isfinite(final_out))
    print("KERNEL_OK")
</pallas_src>

<mosaic_0001>
module attributes {stable_mosaic.version = 11 : i64} {
  func.func @cnn_mamba_kernel(%arg0: memref<2x8x128xf32, #tpu.memory_space<vmem>>, %arg1: memref<4x8xf32, #tpu.memory_space<smem>>, %arg2: memref<4x1xf32, #tpu.memory_space<smem>>, %arg3: memref<16x64xf32, #tpu.memory_space<vmem>>, %arg4: memref<16x1xf32, #tpu.memory_space<vmem>>, %arg5: memref<16x16xf32, #tpu.memory_space<vmem>>, %arg6: memref<16x16xf32, #tpu.memory_space<vmem>>, %arg7: memref<16x1xf32, #tpu.memory_space<vmem>>, %arg8: memref<4x8x4xf32, #tpu.memory_space<vmem>>, %arg9: memref<1x4xf32, #tpu.memory_space<vmem>>, %arg10: memref<4x16xf32, #tpu.memory_space<vmem>>, %arg11: memref<1x16xf32, #tpu.memory_space<vmem>>, %arg12: memref<3x1x16xf32, #tpu.memory_space<vmem>>, %arg13: memref<3x16x64xf32, #tpu.memory_space<vmem>>, %arg14: memref<3x1x64xf32, #tpu.memory_space<vmem>>, %arg15: memref<3x32x96xf32, #tpu.memory_space<vmem>>, %arg16: memref<3x32x1xf32, #tpu.memory_space<vmem>>, %arg17: memref<3x32x32xf32, #tpu.memory_space<vmem>>, %arg18: memref<3x1x32xf32, #tpu.memory_space<vmem>>, %arg19: memref<3x32x48xf32, #tpu.memory_space<vmem>>, %arg20: memref<3x1x48xf32, #tpu.memory_space<vmem>>, %arg21: memref<3x32x16xf32, #tpu.memory_space<vmem>>, %arg22: memref<3x1x16xf32, #tpu.memory_space<vmem>>, %arg23: memref<16x4xf32, #tpu.memory_space<vmem>>, %arg24: memref<1x4xf32, #tpu.memory_space<vmem>>, %arg25: memref<2x16xf32, #tpu.memory_space<vmem>>, %arg26: memref<2x4xf32, #tpu.memory_space<vmem>>, %arg27: memref<16x135xf32, #tpu.memory_space<vmem>>, %arg28: memref<16x47xf32, #tpu.memory_space<vmem>>, %arg29: memref<32x34xf32, #tpu.memory_space<vmem>>) attributes {dimension_semantics = [], scalar_prefetch = 0 : i64, scratch_operands = 3 : i64, tpu.core_type = #tpu.core_type<tc>} {
    %cst = arith.constant 0.000000e+00 : f32
    %0 = vector.broadcast %cst : f32 to vector<16x3xf32>
    %c0 = arith.constant 0 : index
    %c0_0 = arith.constant 0 : index
    %1 = vector.load %arg27[%c0, %c0_0] : memref<16x135xf32, #tpu.memory_space<vmem>>, vector<16x3xf32>
    tpu.vector_store %arg27[%c0, %c0_0], %0 {strides = array<i32>} : memref<16x135xf32, #tpu.memory_space<vmem>>, vector<16x3xf32>,
    %cst_1 = arith.constant 0.000000e+00 : f32
    %2 = vector.broadcast %cst_1 : f32 to vector<16x4xf32>
    %c0_2 = arith.constant 0 : index
    %c131 = arith.constant 131 : index
    %3 = vector.load %arg27[%c0_2, %c131] : memref<16x135xf32, #tpu.memory_space<vmem>>, vector<16x4xf32>
    tpu.vector_store %arg27[%c0_2, %c131], %2 {strides = array<i32>} : memref<16x135xf32, #tpu.memory_space<vmem>>, vector<16x4xf32>,
    %c0_3 = arith.constant 0 : index
    %c0_4 = arith.constant 0 : index
    %c0_5 = arith.constant 0 : index
    %4 = vector.load %arg0[%c0_3, %c0_4, %c0_5] : memref<2x8x128xf32, #tpu.memory_space<vmem>>, vector<2x8x128xf32>
    %5 = vector.shape_cast %4 : vector<2x8x128xf32> to vector<16x128xf32>
    %c0_6 = arith.constant 0 : index
    %c3 = arith.constant 3 : index
    %6 = vector.load %arg27[%c0_6, %c3] : memref<16x135xf32, #tpu.memory_space<vmem>>, vector<16x128xf32>
    tpu.vector_store %arg27[%c0_6, %c3], %5 {strides = array<i32>} : memref<16x135xf32, #tpu.memory_space<vmem>>, vector<16x128xf32>,
    %c0_7 = arith.constant 0 : index
    %c0_8 = arith.constant 0 : index
    %7 = vector.load %arg27[%c0_7, %c0_8] : memref<16x135xf32, #tpu.memory_space<vmem>>, vector<16x128xf32>
    %c0_9 = arith.constant 0 : index
    %c1 = arith.constant 1 : index
    %8 = vector.load %arg27[%c0_9, %c1] : memref<16x135xf32, #tpu.memory_space<vmem>>, vector<16x128xf32>
    %c0_10 = arith.constant 0 : index
    %c2 = arith.constant 2 : index
    %9 = vector.load %arg27[%c0_10, %c2] : memref<16x135xf32, #tpu.memory_space<vmem>>, vector<16x128xf32>
    %c0_11 = arith.constant 0 : index
    %c3_12 = arith.constant 3 : index
    %10 = vector.load %arg27[%c0_11, %c3_12] : memref<16x135xf32, #tpu.memory_space<vmem>>, vector<16x128xf32>
    %c0_13 = arith.constant 0 : index
    %c4 = arith.constant 4 : index
    %11 = vector.load %arg27[%c0_13, %c4] : memref<16x135xf32, #tpu.memory_space<vmem>>, vector<16x128xf32>
    %c0_14 = arith.constant 0 : index
    %c5 = arith.constant 5 : index
    %12 = vector.load %arg27[%c0_14, %c5] : memref<16x135xf32, #tpu.memory_space<vmem>>, vector<16x128xf32>
    %c0_15 = arith.constant 0 : index
    %c6 = arith.constant 6 : index
    %13 = vector.load %arg27[%c0_15, %c6] : memref<16x135xf32, #tpu.memory_space<vmem>>, vector<16x128xf32>
    %c0_16 = arith.constant 0 : index
    %c7 = arith.constant 7 : index
    %14 = vector.load %arg27[%c0_16, %c7] : memref<16x135xf32, #tpu.memory_space<vmem>>, vector<16x128xf32>
    %c0_17 = arith.constant 0 : index
    %c0_18 = arith.constant 0 : index
    %15 = memref.load %arg1[%c0_17, %c0_18] : memref<4x8xf32, #tpu.memory_space<smem>>
    %16 = vector.broadcast %15 : f32 to vector<16x128xf32>
    %17 = arith.mulf %16, %7 : vector<16x128xf32>
    %c0_19 = arith.constant 0 : index
    %c1_20 = arith.constant 1 : index
    %18 = memref.load %arg1[%c0_19, %c1_20] : memref<4x8xf32, #tpu.memory_space<smem>>
    %19 = vector.broadcast %18 : f32 to vector<16x128xf32>
    %20 = arith.mulf %19, %8 : vector<16x128xf32>
    %21 = arith.addf %17, %20 : vector<16x128xf32>
    %c0_21 = arith.constant 0 : index
    %c2_22 = arith.constant 2 : index
    %22 = memref.load %arg1[%c0_21, %c2_22] : memref<4x8xf32, #tpu.memory_space<smem>>
    %23 = vector.broadcast %22 : f32 to vector<16x128xf32>
    %24 = arith.mulf %23, %9 : vector<16x128xf32>
    %25 = arith.addf %21, %24 : vector<16x128xf32>
    %c0_23 = arith.constant 0 : index
    %c3_24 = arith.constant 3 : index
    %26 = memref.load %arg1[%c0_23, %c3_24] : memref<4x8xf32, #tpu.memory_space<smem>>
    %27 = vector.broadcast %26 : f32 to vector<16x128xf32>
    %28 = arith.mulf %27, %10 : vector<16x128xf32>
    %29 = arith.addf %25, %28 : vector<16x128xf32>
    %c0_25 = arith.constant 0 : index
    %c4_26 = arith.constant 4 : index
    %30 = memref.load %arg1[%c0_25, %c4_26] : memref<4x8xf32, #tpu.memory_space<smem>>
    %31 = vector.broadcast %30 : f32 to vector<16x128xf32>
    %32 = arith.mulf %31, %11 : vector<16x128xf32>
    %33 = arith.addf %29, %32 : vector<16x128xf32>
    %c0_27 = arith.constant 0 : index
    %c5_28 = arith.constant 5 : index
    %34 = memref.load %arg1[%c0_27, %c5_28] : memref<4x8xf32, #tpu.memory_space<smem>>
    %35 = vector.broadcast %34 : f32 to vector<16x128xf32>
    %36 = arith.mulf %35, %12 : vector<16x128xf32>
    %37 = arith.addf %33, %36 : vector<16x128xf32>
    %c0_29 = arith.constant 0 : index
    %c6_30 = arith.constant 6 : index
    %38 = memref.load %arg1[%c0_29, %c6_30] : memref<4x8xf32, #tpu.memory_space<smem>>
    %39 = vector.broadcast %38 : f32 to vector<16x128xf32>
    %40 = arith.mulf %39, %13 : vector<16x128xf32>
    %41 = arith.addf %37, %40 : vector<16x128xf32>
    %c0_31 = arith.constant 0 : index
    %c7_32 = arith.constant 7 : index
    %42 = memref.load %arg1[%c0_31, %c7_32] : memref<4x8xf32, #tpu.memory_space<smem>>
    %43 = vector.broadcast %42 : f32 to vector<16x128xf32>
    %44 = arith.mulf %43, %14 : vector<16x128xf32>
    %45 = arith.addf %41, %44 : vector<16x128xf32>
    %c0_33 = arith.constant 0 : index
    %c0_34 = arith.constant 0 : index
    %46 = memref.load %arg2[%c0_33, %c0_34] : memref<4x1xf32, #tpu.memory_space<smem>>
    %47 = vector.broadcast %46 : f32 to vector<16x128xf32>
    %48 = arith.addf %45, %47 : vector<16x128xf32>
    %c1_35 = arith.constant 1 : index
    %c0_36 = arith.constant 0 : index
    %49 = memref.load %arg1[%c1_35, %c0_36] : memref<4x8xf32, #tpu.memory_space<smem>>
    %50 = vector.broadcast %49 : f32 to vector<16x128xf32>
    %51 = arith.mulf %50, %7 : vector<16x128xf32>
    %c1_37 = arith.constant 1 : index
    %c1_38 = arith.constant 1 : index
    %52 = memref.load %arg1[%c1_37, %c1_38] : memref<4x8xf32, #tpu.memory_space<smem>>
    %53 = vector.broadcast %52 : f32 to vector<16x128xf32>
    %54 = arith.mulf %53, %8 : vector<16x128xf32>
    %55 = arith.addf %51, %54 : vector<16x128xf32>
    %c1_39 = arith.constant 1 : index
    %c2_40 = arith.constant 2 : index
    %56 = memref.load %arg1[%c1_39, %c2_40] : memref<4x8xf32, #tpu.memory_space<smem>>
    %57 = vector.broadcast %56 : f32 to vector<16x128xf32>
    %58 = arith.mulf %57, %9 : vector<16x128xf32>
    %59 = arith.addf %55, %58 : vector<16x128xf32>
    %c1_41 = arith.constant 1 : index
    %c3_42 = arith.constant 3 : index
    %60 = memref.load %arg1[%c1_41, %c3_42] : memref<4x8xf32, #tpu.memory_space<smem>>
    %61 = vector.broadcast %60 : f32 to vector<16x128xf32>
    %62 = arith.mulf %61, %10 : vector<16x128xf32>
    %63 = arith.addf %59, %62 : vector<16x128xf32>
    %c1_43 = arith.constant 1 : index
    %c4_44 = arith.constant 4 : index
    %64 = memref.load %arg1[%c1_43, %c4_44] : memref<4x8xf32, #tpu.memory_space<smem>>
    %65 = vector.broadcast %64 : f32 to vector<16x128xf32>
    %66 = arith.mulf %65, %11 : vector<16x128xf32>
    %67 = arith.addf %63, %66 : vector<16x128xf32>
    %c1_45 = arith.constant 1 : index
    %c5_46 = arith.constant 5 : index
    %68 = memref.load %arg1[%c1_45, %c5_46] : memref<4x8xf32, #tpu.memory_space<smem>>
    %69 = vector.broadcast %68 : f32 to vector<16x128xf32>
    %70 = arith.mulf %69, %12 : vector<16x128xf32>
    %71 = arith.addf %67, %70 : vector<16x128xf32>
    %c1_47 = arith.constant 1 : index
    %c6_48 = arith.constant 6 : index
    %72 = memref.load %arg1[%c1_47, %c6_48] : memref<4x8xf32, #tpu.memory_space<smem>>
    %73 = vector.broadcast %72 : f32 to vector<16x128xf32>
    %74 = arith.mulf %73, %13 : vector<16x128xf32>
    %75 = arith.addf %71, %74 : vector<16x128xf32>
    %c1_49 = arith.constant 1 : index
    %c7_50 = arith.constant 7 : index
    %76 = memref.load %arg1[%c1_49, %c7_50] : memref<4x8xf32, #tpu.memory_space<smem>>
    %77 = vector.broadcast %76 : f32 to vector<16x128xf32>
    %78 = arith.mulf %77, %14 : vector<16x128xf32>
    %79 = arith.addf %75, %78 : vector<16x128xf32>
    %c1_51 = arith.constant 1 : index
    %c0_52 = arith.constant 0 : index
    %80 = memref.load %arg2[%c1_51, %c0_52] : memref<4x1xf32, #tpu.memory_space<smem>>
    %81 = vector.broadcast %80 : f32 to vector<16x128xf32>
    %82 = arith.addf %79, %81 : vector<16x128xf32>
    %c2_53 = arith.constant 2 : index
    %c0_54 = arith.constant 0 : index
    %83 = memref.load %arg1[%c2_53, %c0_54] : memref<4x8xf32, #tpu.memory_space<smem>>
    %84 = vector.broadcast %83 : f32 to vector<16x128xf32>
    %85 = arith.mulf %84, %7 : vector<16x128xf32>
    %c2_55 = arith.constant 2 : index
    %c1_56 = arith.constant 1 : index
    %86 = memref.load %arg1[%c2_55, %c1_56] : memref<4x8xf32, #tpu.memory_space<smem>>
    %87 = vector.broadcast %86 : f32 to vector<16x128xf32>
    %88 = arith.mulf %87, %8 : vector<16x128xf32>
    %89 = arith.addf %85, %88 : vector<16x128xf32>
    %c2_57 = arith.constant 2 : index
    %c2_58 = arith.constant 2 : index
    %90 = memref.load %arg1[%c2_57, %c2_58] : memref<4x8xf32, #tpu.memory_space<smem>>
    %91 = vector.broadcast %90 : f32 to vector<16x128xf32>
    %92 = arith.mulf %91, %9 : vector<16x128xf32>
    %93 = arith.addf %89, %92 : vector<16x128xf32>
    %c2_59 = arith.constant 2 : index
    %c3_60 = arith.constant 3 : index
    %94 = memref.load %arg1[%c2_59, %c3_60] : memref<4x8xf32, #tpu.memory_space<smem>>
    %95 = vector.broadcast %94 : f32 to vector<16x128xf32>
    %96 = arith.mulf %95, %10 : vector<16x128xf32>
    %97 = arith.addf %93, %96 : vector<16x128xf32>
    %c2_61 = arith.constant 2 : index
    %c4_62 = arith.constant 4 : index
    %98 = memref.load %arg1[%c2_61, %c4_62] : memref<4x8xf32, #tpu.memory_space<smem>>
    %99 = vector.broadcast %98 : f32 to vector<16x128xf32>
    %100 = arith.mulf %99, %11 : vector<16x128xf32>
    %101 = arith.addf %97, %100 : vector<16x128xf32>
    %c2_63 = arith.constant 2 : index
    %c5_64 = arith.constant 5 : index
    %102 = memref.load %arg1[%c2_63, %c5_64] : memref<4x8xf32, #tpu.memory_space<smem>>
    %103 = vector.broadcast %102 : f32 to vector<16x128xf32>
    %104 = arith.mulf %103, %12 : vector<16x128xf32>
    %105 = arith.addf %101, %104 : vector<16x128xf32>
    %c2_65 = arith.constant 2 : index
    %c6_66 = arith.constant 6 : index
    %106 = memref.load %arg1[%c2_65, %c6_66] : memref<4x8xf32, #tpu.memory_space<smem>>
    %107 = vector.broadcast %106 : f32 to vector<16x128xf32>
    %108 = arith.mulf %107, %13 : vector<16x128xf32>
    %109 = arith.addf %105, %108 : vector<16x128xf32>
    %c2_67 = arith.constant 2 : index
    %c7_68 = arith.constant 7 : index
    %110 = memref.load %arg1[%c2_67, %c7_68] : memref<4x8xf32, #tpu.memory_space<smem>>
    %111 = vector.broadcast %110 : f32 to vector<16x128xf32>
    %112 = arith.mulf %111, %14 : vector<16x128xf32>
    %113 = arith.addf %109, %112 : vector<16x128xf32>
    %c2_69 = arith.constant 2 : index
    %c0_70 = arith.constant 0 : index
    %114 = memref.load %arg2[%c2_69, %c0_70] : memref<4x1xf32, #tpu.memory_space<smem>>
    %115 = vector.broadcast %114 : f32 to vector<16x128xf32>
    %116 = arith.addf %113, %115 : vector<16x128xf32>
    %c3_71 = arith.constant 3 : index
    %c0_72 = arith.constant 0 : index
    %117 = memref.load %arg1[%c3_71, %c0_72] : memref<4x8xf32, #tpu.memory_space<smem>>
    %118 = vector.broadcast %117 : f32 to vector<16x128xf32>
    %119 = arith.mulf %118, %7 : vector<16x128xf32>
    %c3_73 = arith.constant 3 : index
    %c1_74 = arith.constant 1 : index
    %120 = memref.load %arg1[%c3_73, %c1_74] : memref<4x8xf32, #tpu.memory_space<smem>>
    %121 = vector.broadcast %120 : f32 to vector<16x128xf32>
    %122 = arith.mulf %121, %8 : vector<16x128xf32>
    %123 = arith.addf %119, %122 : vector<16x128xf32>
    %c3_75 = arith.constant 3 : index
    %c2_76 = arith.constant 2 : index
    %124 = memref.load %arg1[%c3_75, %c2_76] : memref<4x8xf32, #tpu.memory_space<smem>>
    %125 = vector.broadcast %124 : f32 to vector<16x128xf32>
    %126 = arith.mulf %125, %9 : vector<16x128xf32>
    %127 = arith.addf %123, %126 : vector<16x128xf32>
    %c3_77 = arith.constant 3 : index
    %c3_78 = arith.constant 3 : index
    %128 = memref.load %arg1[%c3_77, %c3_78] : memref<4x8xf32, #tpu.memory_space<smem>>
    %129 = vector.broadcast %128 : f32 to vector<16x128xf32>
    %130 = arith.mulf %129, %10 : vector<16x128xf32>
    %131 = arith.addf %127, %130 : vector<16x128xf32>
    %c3_79 = arith.constant 3 : index
    %c4_80 = arith.constant 4 : index
    %132 = memref.load %arg1[%c3_79, %c4_80] : memref<4x8xf32, #tpu.memory_space<smem>>
    %133 = vector.broadcast %132 : f32 to vector<16x128xf32>
    %134 = arith.mulf %133, %11 : vector<16x128xf32>
    %135 = arith.addf %131, %134 : vector<16x128xf32>
    %c3_81 = arith.constant 3 : index
    %c5_82 = arith.constant 5 : index
    %136 = memref.load %arg1[%c3_81, %c5_82] : memref<4x8xf32, #tpu.memory_space<smem>>
    %137 = vector.broadcast %136 : f32 to vector<16x128xf32>
    %138 = arith.mulf %137, %12 : vector<16x128xf32>
    %139 = arith.addf %135, %138 : vector<16x128xf32>
    %c3_83 = arith.constant 3 : index
    %c6_84 = arith.constant 6 : index
    %140 = memref.load %arg1[%c3_83, %c6_84] : memref<4x8xf32, #tpu.memory_space<smem>>
    %141 = vector.broadcast %140 : f32 to vector<16x128xf32>
    %142 = arith.mulf %141, %13 : vector<16x128xf32>
    %143 = arith.addf %139, %142 : vector<16x128xf32>
    %c3_85 = arith.constant 3 : index
    %c7_86 = arith.constant 7 : index
    %144 = memref.load %arg1[%c3_85, %c7_86] : memref<4x8xf32, #tpu.memory_space<smem>>
    %145 = vector.broadcast %144 : f32 to vector<16x128xf32>
    %146 = arith.mulf %145, %14 : vector<16x128xf32>
    %147 = arith.addf %143, %146 : vector<16x128xf32>
    %c3_87 = arith.constant 3 : index
    %c0_88 = arith.constant 0 : index
    %148 = memref.load %arg2[%c3_87, %c0_88] : memref<4x1xf32, #tpu.memory_space<smem>>
    %149 = vector.broadcast %148 : f32 to vector<16x128xf32>
    %150 = arith.addf %147, %149 : vector<16x128xf32>
    %151 = tpu.concatenate %48, %82, %116, %150 in 0 : vector<16x128xf32>, vector<16x128xf32>, vector<16x128xf32>, vector<16x128xf32> -> vector<64x128xf32>
    %c0_89 = arith.constant 0 : index
    %c0_90 = arith.constant 0 : index
    %152 = vector.load %arg3[%c0_89, %c0_90] : memref<16x64xf32, #tpu.memory_space<vmem>>, vector<16x64xf32>
    %cst_91 = arith.constant dense<0.000000e+00> : vector<16x128xf32>
    %153 = tpu.matmul %152, %151, %cst_91 {dimension_numbers = #tpu.dot_dimension_numbers<[1], [0], [0], [1], [0, 0, 1, 1], [], []>} : vector<16x64xf32>, vector<64x128xf32>, vector<16x128xf32> -> vector<16x128xf32>
    %c0_92 = arith.constant 0 : index
    %c0_93 = arith.constant 0 : index
    %154 = vector.load %arg4[%c0_92, %c0_93] : memref<16x1xf32, #tpu.memory_space<vmem>>, vector<16x1xf32>
    %155 = vector.broadcast %154 : vector<16x1xf32> to vector<16x128xf32>
    %156 = arith.addf %153, %155 : vector<16x128xf32>
    %cst_94 = arith.constant 0.000000e+00 : f32
    %157 = vector.broadcast %cst_94 : f32 to vector<16x128xf32>
    %158 = arith.cmpf ogt, %156, %157 : vector<16x128xf32>
    %159 = math.exp %156 : vector<16x128xf32>
    %cst_95 = arith.constant 1.000000e+00 : f32
    %160 = vector.broadcast %cst_95 : f32 to vector<16x128xf32>
    %161 = arith.subf %159, %160 : vector<16x128xf32>
    %162 = arith.select %158, %156, %161 : vector<16x128xi1>, vector<16x128xf32>
    %163 = vector.shape_cast %162 : vector<16x128xf32> to vector<16x32x4xf32>
    %cst_96 = arith.constant dense<0.000000e+00> : vector<16x32xf32>
    %164 = vector.multi_reduction <add>, %163, %cst_96 [2] : vector<16x32x4xf32> to vector<16x32xf32>
    %cst_97 = arith.constant 4.000000e+00 : f32
    %165 = vector.broadcast %cst_97 : f32 to vector<16x32xf32>
    %166 = arith.divf %164, %165 : vector<16x32xf32>
    %cst_98 = arith.constant 0.000000e+00 : f32
    %167 = vector.broadcast %cst_98 : f32 to vector<16x7xf32>
    %c0_99 = arith.constant 0 : index
    %c0_100 = arith.constant 0 : index
    %168 = vector.load %arg28[%c0_99, %c0_100] : memref<16x47xf32, #tpu.memory_space<vmem>>, vector<16x7xf32>
    tpu.vector_store %arg28[%c0_99, %c0_100], %167 {strides = array<i32>} : memref<16x47xf32, #tpu.memory_space<vmem>>, vector<16x7xf32>,
    %cst_101 = arith.constant 0.000000e+00 : f32
    %169 = vector.broadcast %cst_101 : f32 to vector<16x8xf32>
    %c0_102 = arith.constant 0 : index
    %c39 = arith.constant 39 : index
    %170 = vector.load %arg28[%c0_102, %c39] : memref<16x47xf32, #tpu.memory_space<vmem>>, vector<16x8xf32>
    tpu.vector_store %arg28[%c0_102, %c39], %169 {strides = array<i32>} : memref<16x47xf32, #tpu.memory_space<vmem>>, vector<16x8xf32>,
    %c0_103 = arith.constant 0 : index
    %c7_104 = arith.constant 7 : index
    %171 = vector.load %arg28[%c0_103, %c7_104] : memref<16x47xf32, #tpu.memory_space<vmem>>, vector<16x32xf32>
    tpu.vector_store %arg28[%c0_103, %c7_104], %166 {strides = array<i32>} : memref<16x47xf32, #tpu.memory_space<vmem>>, vector<16x32xf32>,
    %c0_105 = arith.constant 0 : index
    %c0_106 = arith.constant 0 : index
    %172 = vector.load %arg5[%c0_105, %c0_106] : memref<16x16xf32, #tpu.memory_space<vmem>>, vector<16x16xf32>
    %173 = vector.extract_strided_slice %172 {offsets = [0, 0], sizes = [16, 1], strides = [1, 1]} : vector<16x16xf32> to vector<16x1xf32>
    %c0_107 = arith.constant 0 : index
    %c0_108 = arith.constant 0 : index
    %174 = vector.load %arg28[%c0_107, %c0_108] : memref<16x47xf32, #tpu.memory_space<vmem>>, vector<16x32xf32>
    %175 = vector.broadcast %173 : vector<16x1xf32> to vector<16x32xf32>
    %176 = arith.mulf %175, %174 : vector<16x32xf32>
    %177 = vector.extract_strided_slice %172 {offsets = [0, 1], sizes = [16, 1], strides = [1, 1]} : vector<16x16xf32> to vector<16x1xf32>
    %c0_109 = arith.constant 0 : index
    %c1_110 = arith.constant 1 : index
    %178 = vector.load %arg28[%c0_109, %c1_110] : memref<16x47xf32, #tpu.memory_space<vmem>>, vector<16x32xf32>
    %179 = vector.broadcast %177 : vector<16x1xf32> to vector<16x32xf32>
    %180 = arith.mulf %179, %178 : vector<16x32xf32>
    %181 = arith.addf %176, %180 : vector<16x32xf32>
    %182 = vector.extract_strided_slice %172 {offsets = [0, 2], sizes = [16, 1], strides = [1, 1]} : vector<16x16xf32> to vector<16x1xf32>
    %c0_111 = arith.constant 0 : index
    %c2_112 = arith.constant 2 : index
    %183 = vector.load %arg28[%c0_111, %c2_112] : memref<16x47xf32, #tpu.memory_space<vmem>>, vector<16x32xf32>
    %184 = vector.broadcast %182 : vector<16x1xf32> to vector<16x32xf32>
    %185 = arith.mulf %184, %183 : vector<16x32xf32>
    %186 = arith.addf %181, %185 : vector<16x32xf32>
    %187 = vector.extract_strided_slice %172 {offsets = [0, 3], sizes = [16, 1], strides = [1, 1]} : vector<16x16xf32> to vector<16x1xf32>
    %c0_113 = arith.constant 0 : index
    %c3_114 = arith.constant 3 : index
    %188 = vector.load %arg28[%c0_113, %c3_114] : memref<16x47xf32, #tpu.memory_space<vmem>>, vector<16x32xf32>
    %189 = vector.broadcast %187 : vector<16x1xf32> to vector<16x32xf32>
    %190 = arith.mulf %189, %188 : vector<16x32xf32>
    %191 = arith.addf %186, %190 : vector<16x32xf32>
    %192 = vector.extract_strided_slice %172 {offsets = [0, 4], sizes = [16, 1], strides = [1, 1]} : vector<16x16xf32> to vector<16x1xf32>
    %c0_115 = arith.constant 0 : index
    %c4_116 = arith.constant 4 : index
    %193 = vector.load %arg28[%c0_115, %c4_116] : memref<16x47xf32, #tpu.memory_space<vmem>>, vector<16x32xf32>
    %194 = vector.broadcast %192 : vector<16x1xf32> to vector<16x32xf32>
    %195 = arith.mulf %194, %193 : vector<16x32xf32>
    %196 = arith.addf %191, %195 : vector<16x32xf32>
    %197 = vector.extract_strided_slice %172 {offsets = [0, 5], sizes = [16, 1], strides = [1, 1]} : vector<16x16xf32> to vector<16x1xf32>
    %c0_117 = arith.constant 0 : index
    %c5_118 = arith.constant 5 : index
    %198 = vector.load %arg28[%c0_117, %c5_118] : memref<16x47xf32, #tpu.memory_space<vmem>>, vector<16x32xf32>
    %199 = vector.broadcast %197 : vector<16x1xf32> to vector<16x32xf32>
    %200 = arith.mulf %199, %198 : vector<16x32xf32>
    %201 = arith.addf %196, %200 : vector<16x32xf32>
    %202 = vector.extract_strided_slice %172 {offsets = [0, 6], sizes = [16, 1], strides = [1, 1]} : vector<16x16xf32> to vector<16x1xf32>
    %c0_119 = arith.constant 0 : index
    %c6_120 = arith.constant 6 : index
    %203 = vector.load %arg28[%c0_119, %c6_120] : memref<16x47xf32, #tpu.memory_space<vmem>>, vector<16x32xf32>
    %204 = vector.broadcast %202 : vector<16x1xf32> to vector<16x32xf32>
    %205 = arith.mulf %204, %203 : vector<16x32xf32>
    %206 = arith.addf %201, %205 : vector<16x32xf32>
    %207 = vector.extract_strided_slice %172 {offsets = [0, 7], sizes = [16, 1], strides = [1, 1]} : vector<16x16xf32> to vector<16x1xf32>
    %c0_121 = arith.constant 0 : index
    %c7_122 = arith.constant 7 : index
    %208 = vector.load %arg28[%c0_121, %c7_122] : memref<16x47xf32, #tpu.memory_space<vmem>>, vector<16x32xf32>
    %209 = vector.broadcast %207 : vector<16x1xf32> to vector<16x32xf32>
    %210 = arith.mulf %209, %208 : vector<16x32xf32>
    %211 = arith.addf %206, %210 : vector<16x32xf32>
    %212 = vector.extract_strided_slice %172 {offsets = [0, 8], sizes = [16, 1], strides = [1, 1]} : vector<16x16xf32> to vector<16x1xf32>
    %c0_123 = arith.constant 0 : index
    %c8 = arith.constant 8 : index
    %213 = vector.load %arg28[%c0_123, %c8] : memref<16x47xf32, #tpu.memory_space<vmem>>, vector<16x32xf32>
    %214 = vector.broadcast %212 : vector<16x1xf32> to vector<16x32xf32>
    %215 = arith.mulf %214, %213 : vector<16x32xf32>
    %216 = arith.addf %211, %215 : vector<16x32xf32>
    %217 = vector.extract_strided_slice %172 {offsets = [0, 9], sizes = [16, 1], strides = [1, 1]} : vector<16x16xf32> to vector<16x1xf32>
    %c0_124 = arith.constant 0 : index
    %c9 = arith.constant 9 : index
    %218 = vector.load %arg28[%c0_124, %c9] : memref<16x47xf32, #tpu.memory_space<vmem>>, vector<16x32xf32>
    %219 = vector.broadcast %217 : vector<16x1xf32> to vector<16x32xf32>
    %220 = arith.mulf %219, %218 : vector<16x32xf32>
    %221 = arith.addf %216, %220 : vector<16x32xf32>
    %222 = vector.extract_strided_slice %172 {offsets = [0, 10], sizes = [16, 1], strides = [1, 1]} : vector<16x16xf32> to vector<16x1xf32>
    %c0_125 = arith.constant 0 : index
    %c10 = arith.constant 10 : index
    %223 = vector.load %arg28[%c0_125, %c10] : memref<16x47xf32, #tpu.memory_space<vmem>>, vector<16x32xf32>
    %224 = vector.broadcast %222 : vector<16x1xf32> to vector<16x32xf32>
    %225 = arith.mulf %224, %223 : vector<16x32xf32>
    %226 = arith.addf %221, %225 : vector<16x32xf32>
    %227 = vector.extract_strided_slice %172 {offsets = [0, 11], sizes = [16, 1], strides = [1, 1]} : vector<16x16xf32> to vector<16x1xf32>
    %c0_126 = arith.constant 0 : index
    %c11 = arith.constant 11 : index
    %228 = vector.load %arg28[%c0_126, %c11] : memref<16x47xf32, #tpu.memory_space<vmem>>, vector<16x32xf32>
    %229 = vector.broadcast %227 : vector<16x1xf32> to vector<16x32xf32>
    %230 = arith.mulf %229, %228 : vector<16x32xf32>
    %231 = arith.addf %226, %230 : vector<16x32xf32>
    %232 = vector.extract_strided_slice %172 {offsets = [0, 12], sizes = [16, 1], strides = [1, 1]} : vector<16x16xf32> to vector<16x1xf32>
    %c0_127 = arith.constant 0 : index
    %c12 = arith.constant 12 : index
    %233 = vector.load %arg28[%c0_127, %c12] : memref<16x47xf32, #tpu.memory_space<vmem>>, vector<16x32xf32>
    %234 = vector.broadcast %232 : vector<16x1xf32> to vector<16x32xf32>
    %235 = arith.mulf %234, %233 : vector<16x32xf32>
    %236 = arith.addf %231, %235 : vector<16x32xf32>
    %237 = vector.extract_strided_slice %172 {offsets = [0, 13], sizes = [16, 1], strides = [1, 1]} : vector<16x16xf32> to vector<16x1xf32>
    %c0_128 = arith.constant 0 : index
    %c13 = arith.constant 13 : index
    %238 = vector.load %arg28[%c0_128, %c13] : memref<16x47xf32, #tpu.memory_space<vmem>>, vector<16x32xf32>
    %239 = vector.broadcast %237 : vector<16x1xf32> to vector<16x32xf32>
    %240 = arith.mulf %239, %238 : vector<16x32xf32>
    %241 = arith.addf %236, %240 : vector<16x32xf32>
    %242 = vector.extract_strided_slice %172 {offsets = [0, 14], sizes = [16, 1], strides = [1, 1]} : vector<16x16xf32> to vector<16x1xf32>
    %c0_129 = arith.constant 0 : index
    %c14 = arith.constant 14 : index
    %243 = vector.load %arg28[%c0_129, %c14] : memref<16x47xf32, #tpu.memory_space<vmem>>, vector<16x32xf32>
    %244 = vector.broadcast %242 : vector<16x1xf32> to vector<16x32xf32>
    %245 = arith.mulf %244, %243 : vector<16x32xf32>
    %246 = arith.addf %241, %245 : vector<16x32xf32>
    %247 = vector.extract_strided_slice %172 {offsets = [0, 15], sizes = [16, 1], strides = [1, 1]} : vector<16x16xf32> to vector<16x1xf32>
    %c0_130 = arith.constant 0 : index
    %c15 = arith.constant 15 : index
    %248 = vector.load %arg28[%c0_130, %c15] : memref<16x47xf32, #tpu.memory_space<vmem>>, vector<16x32xf32>
    %249 = vector.broadcast %247 : vector<16x1xf32> to vector<16x32xf32>
    %250 = arith.mulf %249, %248 : vector<16x32xf32>
    %251 = arith.addf %246, %250 : vector<16x32xf32>
    %c0_131 = arith.constant 0 : index
    %c0_132 = arith.constant 0 : index
    %252 = vector.load %arg6[%c0_131, %c0_132] : memref<16x16xf32, #tpu.memory_space<vmem>>, vector<16x16xf32>
    %cst_133 = arith.constant dense<0.000000e+00> : vector<16x32xf32>
    %253 = tpu.matmul %252, %251, %cst_133 {dimension_numbers = #tpu.dot_dimension_numbers<[1], [0], [0], [1], [0, 0, 1, 1], [], []>} : vector<16x16xf32>, vector<16x32xf32>, vector<16x32xf32> -> vector<16x32xf32>
    %c0_134 = arith.constant 0 : index
    %c0_135 = arith.constant 0 : index
    %254 = vector.load %arg7[%c0_134, %c0_135] : memref<16x1xf32, #tpu.memory_space<vmem>>, vector<16x1xf32>
    %255 = vector.broadcast %254 : vector<16x1xf32> to vector<16x32xf32>
    %256 = arith.addf %253, %255 : vector<16x32xf32>
    %cst_136 = arith.constant 0.000000e+00 : f32
    %257 = vector.broadcast %cst_136 : f32 to vector<16x32xf32>
    %258 = arith.cmpf ogt, %256, %257 : vector<16x32xf32>
    %259 = math.exp %256 : vector<16x32xf32>
    %cst_137 = arith.constant 1.000000e+00 : f32
    %260 = vector.broadcast %cst_137 : f32 to vector<16x32xf32>
    %261 = arith.subf %259, %260 : vector<16x32xf32>
    %262 = arith.select %258, %256, %261 : vector<16x32xi1>, vector<16x32xf32>
    %263 = vector.shape_cast %262 : vector<16x32xf32> to vector<16x4x8xf32>
    %cst_138 = arith.constant dense<0.000000e+00> : vector<16x4xf32>
    %264 = vector.multi_reduction <add>, %263, %cst_138 [2] : vector<16x4x8xf32> to vector<16x4xf32>
    %cst_139 = arith.constant 8.000000e+00 : f32
    %265 = vector.broadcast %cst_139 : f32 to vector<16x4xf32>
    %266 = arith.divf %264, %265 : vector<16x4xf32>
    %c0_140 = arith.constant 0 : index
    %c0_141 = arith.constant 0 : index
    %c0_142 = arith.constant 0 : index
    %267 = vector.load %arg8[%c0_140, %c0_141, %c0_142] : memref<4x8x4xf32, #tpu.memory_space<vmem>>, vector<4x8x4xf32>
    %268 = vector.extract_strided_slice %266 {offsets = [0, 0], sizes = [8, 4], strides = [1, 1]} : vector<16x4xf32> to vector<8x4xf32>
    %269 = vector.shape_cast %268 : vector<8x4xf32> to vector<1x8x4xf32>
    %270 = vector.broadcast %269 : vector<1x8x4xf32> to vector<4x8x4xf32>
    %271 = arith.mulf %267, %270 : vector<4x8x4xf32>
    %cst_143 = arith.constant dense<0.000000e+00> : vector<4x8xf32>
    %272 = vector.multi_reduction <add>, %271, %cst_143 [2] : vector<4x8x4xf32> to vector<4x8xf32>
    %cst_144 = arith.constant dense<0.000000e+00> : vector<4xf32>
    %273 = vector.multi_reduction <add>, %272, %cst_144 [1] : vector<4x8xf32> to vector<4xf32>
    %274 = vector.shape_cast %273 : vector<4xf32> to vector<1x4xf32>
    %275 = vector.extract_strided_slice %266 {offsets = [8, 0], sizes = [8, 4], strides = [1, 1]} : vector<16x4xf32> to vector<8x4xf32>
    %276 = vector.shape_cast %275 : vector<8x4xf32> to vector<1x8x4xf32>
    %277 = vector.broadcast %276 : vector<1x8x4xf32> to vector<4x8x4xf32>
    %278 = arith.mulf %267, %277 : vector<4x8x4xf32>
    %cst_145 = arith.constant dense<0.000000e+00> : vector<4x8xf32>
    %279 = vector.multi_reduction <add>, %278, %cst_145 [2] : vector<4x8x4xf32> to vector<4x8xf32>
    %cst_146 = arith.constant dense<0.000000e+00> : vector<4xf32>
    %280 = vector.multi_reduction <add>, %279, %cst_146 [1] : vector<4x8xf32> to vector<4xf32>
    %281 = vector.shape_cast %280 : vector<4xf32> to vector<1x4xf32>
    %282 = tpu.concatenate %274, %281 in 0 : vector<1x4xf32>, vector<1x4xf32> -> vector<2x4xf32>
    %c0_147 = arith.constant 0 : index
    %c0_148 = arith.constant 0 : index
    %283 = vector.load %arg9[%c0_147, %c0_148] : memref<1x4xf32, #tpu.memory_space<vmem>>, vector<1x4xf32>
    %284 = vector.broadcast %283 : vector<1x4xf32> to vector<2x4xf32>
    %285 = arith.addf %282, %284 : vector<2x4xf32>
    %c0_149 = arith.constant 0 : index
    %c0_150 = arith.constant 0 : index
    %286 = vector.load %arg10[%c0_149, %c0_150] : memref<4x16xf32, #tpu.memory_space<vmem>>, vector<4x16xf32>
    %cst_151 = arith.constant dense<0.000000e+00> : vector<2x16xf32>
    %287 = tpu.matmul %285, %286, %cst_151 {dimension_numbers = #tpu.dot_dimension_numbers<[1], [0], [0], [1], [0, 0, 1, 1], [], []>} : vector<2x4xf32>, vector<4x16xf32>, vector<2x16xf32> -> vector<2x16xf32>
    %c0_152 = arith.constant 0 : index
    %c0_153 = arith.constant 0 : index
    %288 = vector.load %arg11[%c0_152, %c0_153] : memref<1x16xf32, #tpu.memory_space<vmem>>, vector<1x16xf32>
    %289 = vector.broadcast %288 : vector<1x16xf32> to vector<2x16xf32>
    %290 = arith.addf %287, %289 : vector<2x16xf32>
    %291 = vector.extract_strided_slice %290 {offsets = [0, 0], sizes = [1, 16], strides = [1, 1]} : vector<2x16xf32> to vector<1x16xf32>
    %292 = vector.shape_cast %291 : vector<1x16xf32> to vector<1x16xf32>
    %293 = vector.broadcast %292 : vector<1x16xf32> to vector<16x16xf32>
    %294 = vector.extract_strided_slice %290 {offsets = [1, 0], sizes = [1, 16], strides = [1, 1]} : vector<2x16xf32> to vector<1x16xf32>
    %295 = vector.shape_cast %294 : vector<1x16xf32> to vector<1x16xf32>
    %296 = vector.broadcast %295 : vector<1x16xf32> to vector<16x16xf32>
    %297 = tpu.concatenate %293, %296 in 0 : vector<16x16xf32>, vector<16x16xf32> -> vector<32x16xf32>
    %cst_154 = arith.constant 0.000000e+00 : f32
    %298 = vector.broadcast %cst_154 : f32 to vector<32x1xf32>
    %c0_155 = arith.constant 0 : index
    %c0_156 = arith.constant 0 : index
    %299 = vector.load %arg29[%c0_155, %c0_156] : memref<32x34xf32, #tpu.memory_space<vmem>>, vector<32x1xf32>
    tpu.vector_store %arg29[%c0_155, %c0_156], %298 {strides = array<i32>} : memref<32x34xf32, #tpu.memory_space<vmem>>, vector<32x1xf32>,
    %cst_157 = arith.constant 0.000000e+00 : f32
    %300 = vector.broadcast %cst_157 : f32 to vector<32x1xf32>
    %c0_158 = arith.constant 0 : index
    %c33 = arith.constant 33 : index
    %301 = vector.load %arg29[%c0_158, %c33] : memref<32x34xf32, #tpu.memory_space<vmem>>, vector<32x1xf32>
    tpu.vector_store %arg29[%c0_158, %c33], %300 {strides = array<i32>} : memref<32x34xf32, #tpu.memory_space<vmem>>, vector<32x1xf32>,
    %302 = arith.mulf %297, %297 : vector<32x16xf32>
    %cst_159 = arith.constant dense<0.000000e+00> : vector<32xf32>
    %303 = vector.multi_reduction <add>, %302, %cst_159 [1] : vector<32x16xf32> to vector<32xf32>
    %304 = vector.shape_cast %303 : vector<32xf32> to vector<32x1xf32>
    %cst_160 = arith.constant 1.600000e+01 : f32
    %305 = vector.broadcast %cst_160 : f32 to vector<32x1xf32>
    %306 = arith.divf %304, %305 : vector<32x1xf32>
    %cst_161 = arith.constant 9.99999974E-6 : f32
    %307 = vector.broadcast %cst_161 : f32 to vector<32x1xf32>
    %308 = arith.addf %306, %307 : vector<32x1xf32>
    %309 = math.rsqrt %308 : vector<32x1xf32>
    %310 = vector.broadcast %309 : vector<32x1xf32> to vector<32x16xf32>
    %311 = arith.mulf %297, %310 : vector<32x16xf32>
    %c0_162 = arith.constant 0 : index
    %c0_163 = arith.constant 0 : index
    %c0_164 = arith.constant 0 : index
    %312 = vector.load %arg12[%c0_162, %c0_163, %c0_164] : memref<3x1x16xf32, #tpu.memory_space<vmem>>, vector<1x1x16xf32>
    %313 = vector.shape_cast %312 : vector<1x1x16xf32> to vector<1x16xf32>
    %314 = vector.broadcast %313 : vector<1x16xf32> to vector<32x16xf32>
    %315 = arith.mulf %311, %314 : vector<32x16xf32>
    %c0_165 = arith.constant 0 : index
    %c0_166 = arith.constant 0 : index
    %c0_167 = arith.constant 0 : index
    %316 = vector.load %arg13[%c0_165, %c0_166, %c0_167] : memref<3x16x64xf32, #tpu.memory_space<vmem>>, vector<1x16x64xf32>
    %317 = vector.shape_cast %316 : vector<1x16x64xf32> to vector<16x64xf32>
    %cst_168 = arith.constant dense<0.000000e+00> : vector<32x64xf32>
    %318 = tpu.matmul %315, %317, %cst_168 {dimension_numbers = #tpu.dot_dimension_numbers<[1], [0], [0], [1], [0, 0, 1, 1], [], []>} : vector<32x16xf32>, vector<16x64xf32>, vector<32x64xf32> -> vector<32x64xf32>
    %c0_169 = arith.constant 0 : index
    %c0_170 = arith.constant 0 : index
    %c0_171 = arith.constant 0 : index
    %319 = vector.load %arg14[%c0_169, %c0_170, %c0_171] : memref<3x1x64xf32, #tpu.memory_space<vmem>>, vector<1x1x64xf32>
    %320 = vector.shape_cast %319 : vector<1x1x64xf32> to vector<1x64xf32>
    %321 = vector.broadcast %320 : vector<1x64xf32> to vector<32x64xf32>
    %322 = arith.addf %318, %321 : vector<32x64xf32>
    %323 = vector.extract_strided_slice %322 {offsets = [0, 0], sizes = [32, 32], strides = [1, 1]} : vector<32x64xf32> to vector<32x32xf32>
    %324 = vector.extract_strided_slice %322 {offsets = [0, 32], sizes = [32, 32], strides = [1, 1]} : vector<32x64xf32> to vector<32x32xf32>
    %c0_172 = arith.constant 0 : index
    %c1_173 = arith.constant 1 : index
    %325 = vector.load %arg29[%c0_172, %c1_173] : memref<32x34xf32, #tpu.memory_space<vmem>>, vector<32x32xf32>
    tpu.vector_store %arg29[%c0_172, %c1_173], %323 {strides = array<i32>} : memref<32x34xf32, #tpu.memory_space<vmem>>, vector<32x32xf32>,
    %c0_174 = arith.constant 0 : index
    %c0_175 = arith.constant 0 : index
    %326 = vector.load %arg29[%c0_174, %c0_175] : memref<32x34xf32, #tpu.memory_space<vmem>>, vector<32x32xf32>
    %c0_176 = arith.constant 0 : index
    %c1_177 = arith.constant 1 : index
    %327 = vector.load %arg29[%c0_176, %c1_177] : memref<32x34xf32, #tpu.memory_space<vmem>>, vector<32x32xf32>
    %c0_178 = arith.constant 0 : index
    %c2_179 = arith.constant 2 : index
    %328 = vector.load %arg29[%c0_178, %c2_179] : memref<32x34xf32, #tpu.memory_space<vmem>>, vector<32x32xf32>
    %329 = tpu.concatenate %326, %327, %328 in 0 : vector<32x32xf32>, vector<32x32xf32>, vector<32x32xf32> -> vector<96x32xf32>
    %c0_180 = arith.constant 0 : index
    %c0_181 = arith.constant 0 : index
    %c0_182 = arith.constant 0 : index
    %330 = vector.load %arg15[%c0_180, %c0_181, %c0_182] : memref<3x32x96xf32, #tpu.memory_space<vmem>>, vector<1x32x96xf32>
    %331 = vector.shape_cast %330 : vector<1x32x96xf32> to vector<32x96xf32>
    %cst_183 = arith.constant dense<0.000000e+00> : vector<32x32xf32>
    %332 = tpu.matmul %331, %329, %cst_183 {dimension_numbers = #tpu.dot_dimension_numbers<[1], [0], [0], [1], [0, 0, 1, 1], [], []>} : vector<32x96xf32>, vector<96x32xf32>, vector<32x32xf32> -> vector<32x32xf32>
    %c0_184 = arith.constant 0 : index
    %c0_185 = arith.constant 0 : index
    %c0_186 = arith.constant 0 : index
    %333 = vector.load %arg16[%c0_184, %c0_185, %c0_186] : memref<3x32x1xf32, #tpu.memory_space<vmem>>, vector<1x32x1xf32>
    %334 = vector.shape_cast %333 : vector<1x32x1xf32> to vector<32x1xf32>
    %335 = vector.broadcast %334 : vector<32x1xf32> to vector<32x32xf32>
    %336 = arith.addf %332, %335 : vector<32x32xf32>
    %cst_187 = arith.constant 0.000000e+00 : f32
    %337 = vector.broadcast %cst_187 : f32 to vector<32x32xf32>
    %338 = arith.subf %337, %336 : vector<32x32xf32>
    %339 = math.exp %338 : vector<32x32xf32>
    %cst_188 = arith.constant 1.000000e+00 : f32
    %340 = vector.broadcast %cst_188 : f32 to vector<32x32xf32>
    %341 = arith.addf %340, %339 : vector<32x32xf32>
    %cst_189 = arith.constant 1.000000e+00 : f32
    %342 = vector.broadcast %cst_189 : f32 to vector<32x32xf32>
    %343 = arith.divf %342, %341 : vector<32x32xf32>
    %344 = arith.mulf %336, %343 : vector<32x32xf32>
    %c0_190 = arith.constant 0 : index
    %c0_191 = arith.constant 0 : index
    %c0_192 = arith.constant 0 : index
    %345 = vector.load %arg17[%c0_190, %c0_191, %c0_192] : memref<3x32x32xf32, #tpu.memory_space<vmem>>, vector<1x32x32xf32>
    %346 = vector.shape_cast %345 : vector<1x32x32xf32> to vector<32x32xf32>
    %cst_193 = arith.constant dense<0.000000e+00> : vector<32x32xf32>
    %347 = tpu.matmul %344, %346, %cst_193 {dimension_numbers = #tpu.dot_dimension_numbers<[1], [0], [0], [1], [0, 0, 1, 1], [], []>} : vector<32x32xf32>, vector<32x32xf32>, vector<32x32xf32> -> vector<32x32xf32>
    %c0_194 = arith.constant 0 : index
    %c0_195 = arith.constant 0 : index
    %c0_196 = arith.constant 0 : index
    %348 = vector.load %arg18[%c0_194, %c0_195, %c0_196] : memref<3x1x32xf32, #tpu.memory_space<vmem>>, vector<1x1x32xf32>
    %349 = vector.shape_cast %348 : vector<1x1x32xf32> to vector<1x32xf32>
    %350 = vector.broadcast %349 : vector<1x32xf32> to vector<32x32xf32>
    %351 = arith.addf %347, %350 : vector<32x32xf32>
    %c0_197 = arith.constant 0 : index
    %c0_198 = arith.constant 0 : index
    %c0_199 = arith.constant 0 : index
    %352 = vector.load %arg19[%c0_197, %c0_198, %c0_199] : memref<3x32x48xf32, #tpu.memory_space<vmem>>, vector<1x32x48xf32>
    %353 = vector.shape_cast %352 : vector<1x32x48xf32> to vector<32x48xf32>
    %cst_200 = arith.constant dense<0.000000e+00> : vector<32x48xf32>
    %354 = tpu.matmul %351, %353, %cst_200 {dimension_numbers = #tpu.dot_dimension_numbers<[1], [0], [0], [1], [0, 0, 1, 1], [], []>} : vector<32x32xf32>, vector<32x48xf32>, vector<32x48xf32> -> vector<32x48xf32>
    %c0_201 = arith.constant 0 : index
    %c0_202 = arith.constant 0 : index
    %c0_203 = arith.constant 0 : index
    %355 = vector.load %arg20[%c0_201, %c0_202, %c0_203] : memref<3x1x48xf32, #tpu.memory_space<vmem>>, vector<1x1x48xf32>
    %356 = vector.shape_cast %355 : vector<1x1x48xf32> to vector<1x48xf32>
    %357 = vector.broadcast %356 : vector<1x48xf32> to vector<32x48xf32>
    %358 = arith.addf %354, %357 : vector<32x48xf32>
    %359 = vector.extract_strided_slice %358 {offsets = [0, 0], sizes = [32, 32], strides = [1, 1]} : vector<32x48xf32> to vector<32x32xf32>
    %cst_204 = arith.constant 2.000000e+01 : f32
    %360 = vector.broadcast %cst_204 : f32 to vector<32x32xf32>
    %361 = arith.cmpf ogt, %359, %360 : vector<32x32xf32>
    %362 = math.exp %359 : vector<32x32xf32>
    %cst_205 = arith.constant 1.000000e+00 : f32
    %363 = vector.broadcast %cst_205 : f32 to vector<32x32xf32>
    %364 = arith.addf %363, %362 : vector<32x32xf32>
    %365 = math.log %364 : vector<32x32xf32>
    %366 = arith.select %361, %359, %365 : vector<32x32xi1>, vector<32x32xf32>
    %367 = vector.extract_strided_slice %358 {offsets = [0, 32], sizes = [32, 8], strides = [1, 1]} : vector<32x48xf32> to vector<32x8xf32>
    %368 = vector.extract_strided_slice %358 {offsets = [0, 40], sizes = [32, 8], strides = [1, 1]} : vector<32x48xf32> to vector<32x8xf32>
    %369 = arith.mulf %351, %366 : vector<32x32xf32>
    %370 = arith.mulf %368, %367 : vector<32x8xf32>
    %cst_206 = arith.constant dense<0.000000e+00> : vector<32xf32>
    %371 = vector.multi_reduction <add>, %370, %cst_206 [1] : vector<32x8xf32> to vector<32xf32>
    %372 = vector.shape_cast %371 : vector<32xf32> to vector<32x1xf32>
    %373 = vector.broadcast %372 : vector<32x1xf32> to vector<32x32xf32>
    %374 = arith.mulf %369, %373 : vector<32x32xf32>
    %cst_207 = arith.constant 0.000000e+00 : f32
    %375 = vector.broadcast %cst_207 : f32 to vector<32x32xf32>
    %376 = arith.subf %375, %374 : vector<32x32xf32>
    %377 = math.exp %376 : vector<32x32xf32>
    %cst_208 = arith.constant 1.000000e+00 : f32
    %378 = vector.broadcast %cst_208 : f32 to vector<32x32xf32>
    %379 = arith.addf %378, %377 : vector<32x32xf32>
    %cst_209 = arith.constant 1.000000e+00 : f32
    %380 = vector.broadcast %cst_209 : f32 to vector<32x32xf32>
    %381 = arith.divf %380, %379 : vector<32x32xf32>
    %382 = arith.mulf %374, %381 : vector<32x32xf32>
    %cst_210 = arith.constant 0.000000e+00 : f32
    %383 = vector.broadcast %cst_210 : f32 to vector<32x32xf32>
    %384 = arith.subf %383, %324 : vector<32x32xf32>
    %385 = math.exp %384 : vector<32x32xf32>
    %cst_211 = arith.constant 1.000000e+00 : f32
    %386 = vector.broadcast %cst_211 : f32 to vector<32x32xf32>
    %387 = arith.addf %386, %385 : vector<32x32xf32>
    %cst_212 = arith.constant 1.000000e+00 : f32
    %388 = vector.broadcast %cst_212 : f32 to vector<32x32xf32>
    %389 = arith.divf %388, %387 : vector<32x32xf32>
    %390 = arith.mulf %324, %389 : vector<32x32xf32>
    %391 = arith.mulf %382, %390 : vector<32x32xf32>
    %c0_213 = arith.constant 0 : index
    %c0_214 = arith.constant 0 : index
    %c0_215 = arith.constant 0 : index
    %392 = vector.load %arg21[%c0_213, %c0_214, %c0_215] : memref<3x32x16xf32, #tpu.memory_space<vmem>>, vector<1x32x16xf32>
    %393 = vector.shape_cast %392 : vector<1x32x16xf32> to vector<32x16xf32>
    %cst_216 = arith.constant dense<0.000000e+00> : vector<32x16xf32>
    %394 = tpu.matmul %391, %393, %cst_216 {dimension_numbers = #tpu.dot_dimension_numbers<[1], [0], [0], [1], [0, 0, 1, 1], [], []>} : vector<32x32xf32>, vector<32x16xf32>, vector<32x16xf32> -> vector<32x16xf32>
    %c0_217 = arith.constant 0 : index
    %c0_218 = arith.constant 0 : index
    %c0_219 = arith.constant 0 : index
    %395 = vector.load %arg22[%c0_217, %c0_218, %c0_219] : memref<3x1x16xf32, #tpu.memory_space<vmem>>, vector<1x1x16xf32>
    %396 = vector.shape_cast %395 : vector<1x1x16xf32> to vector<1x16xf32>
    %397 = vector.broadcast %396 : vector<1x16xf32> to vector<32x16xf32>
    %398 = arith.addf %394, %397 : vector<32x16xf32>
    %399 = arith.mulf %398, %398 : vector<32x16xf32>
    %cst_220 = arith.constant dense<0.000000e+00> : vector<32xf32>
    %400 = vector.multi_reduction <add>, %399, %cst_220 [1] : vector<32x16xf32> to vector<32xf32>
    %401 = vector.shape_cast %400 : vector<32xf32> to vector<32x1xf32>
    %cst_221 = arith.constant 1.600000e+01 : f32
    %402 = vector.broadcast %cst_221 : f32 to vector<32x1xf32>
    %403 = arith.divf %401, %402 : vector<32x1xf32>
    %cst_222 = arith.constant 9.99999974E-6 : f32
    %404 = vector.broadcast %cst_222 : f32 to vector<32x1xf32>
    %405 = arith.addf %403, %404 : vector<32x1xf32>
    %406 = math.rsqrt %405 : vector<32x1xf32>
    %407 = vector.broadcast %406 : vector<32x1xf32> to vector<32x16xf32>
    %408 = arith.mulf %398, %407 : vector<32x16xf32>
    %c1_223 = arith.constant 1 : index
    %c0_224 = arith.constant 0 : index
    %c0_225 = arith.constant 0 : index
    %409 = vector.load %arg12[%c1_223, %c0_224, %c0_225] : memref<3x1x16xf32, #tpu.memory_space<vmem>>, vector<1x1x16xf32>
    %410 = vector.shape_cast %409 : vector<1x1x16xf32> to vector<1x16xf32>
    %411 = vector.broadcast %410 : vector<1x16xf32> to vector<32x16xf32>
    %412 = arith.mulf %408, %411 : vector<32x16xf32>
    %c1_226 = arith.constant 1 : index
    %c0_227 = arith.constant 0 : index
    %c0_228 = arith.constant 0 : index
    %413 = vector.load %arg13[%c1_226, %c0_227, %c0_228] : memref<3x16x64xf32, #tpu.memory_space<vmem>>, vector<1x16x64xf32>
    %414 = vector.shape_cast %413 : vector<1x16x64xf32> to vector<16x64xf32>
    %cst_229 = arith.constant dense<0.000000e+00> : vector<32x64xf32>
    %415 = tpu.matmul %412, %414, %cst_229 {dimension_numbers = #tpu.dot_dimension_numbers<[1], [0], [0], [1], [0, 0, 1, 1], [], []>} : vector<32x16xf32>, vector<16x64xf32>, vector<32x64xf32> -> vector<32x64xf32>
    %c1_230 = arith.constant 1 : index
    %c0_231 = arith.constant 0 : index
    %c0_232 = arith.constant 0 : index
    %416 = vector.load %arg14[%c1_230, %c0_231, %c0_232] : memref<3x1x64xf32, #tpu.memory_space<vmem>>, vector<1x1x64xf32>
    %417 = vector.shape_cast %416 : vector<1x1x64xf32> to vector<1x64xf32>
    %418 = vector.broadcast %417 : vector<1x64xf32> to vector<32x64xf32>
    %419 = arith.addf %415, %418 : vector<32x64xf32>
    %420 = vector.extract_strided_slice %419 {offsets = [0, 0], sizes = [32, 32], strides = [1, 1]} : vector<32x64xf32> to vector<32x32xf32>
    %421 = vector.extract_strided_slice %419 {offsets = [0, 32], sizes = [32, 32], strides = [1, 1]} : vector<32x64xf32> to vector<32x32xf32>
    %c0_233 = arith.constant 0 : index
    %c1_234 = arith.constant 1 : index
    %422 = vector.load %arg29[%c0_233, %c1_234] : memref<32x34xf32, #tpu.memory_space<vmem>>, vector<32x32xf32>
    tpu.vector_store %arg29[%c0_233, %c1_234], %420 {strides = array<i32>} : memref<32x34xf32, #tpu.memory_space<vmem>>, vector<32x32xf32>,
    %c0_235 = arith.constant 0 : index
    %c0_236 = arith.constant 0 : index
    %423 = vector.load %arg29[%c0_235, %c0_236] : memref<32x34xf32, #tpu.memory_space<vmem>>, vector<32x32xf32>
    %c0_237 = arith.constant 0 : index
    %c1_238 = arith.constant 1 : index
    %424 = vector.load %arg29[%c0_237, %c1_238] : memref<32x34xf32, #tpu.memory_space<vmem>>, vector<32x32xf32>
    %c0_239 = arith.constant 0 : index
    %c2_240 = arith.constant 2 : index
    %425 = vector.load %arg29[%c0_239, %c2_240] : memref<32x34xf32, #tpu.memory_space<vmem>>, vector<32x32xf32>
    %426 = tpu.concatenate %423, %424, %425 in 0 : vector<32x32xf32>, vector<32x32xf32>, vector<32x32xf32> -> vector<96x32xf32>
    %c1_241 = arith.constant 1 : index
    %c0_242 = arith.constant 0 : index
    %c0_243 = arith.constant 0 : index
    %427 = vector.load %arg15[%c1_241, %c0_242, %c0_243] : memref<3x32x96xf32, #tpu.memory_space<vmem>>, vector<1x32x96xf32>
    %428 = vector.shape_cast %427 : vector<1x32x96xf32> to vector<32x96xf32>
    %cst_244 = arith.constant dense<0.000000e+00> : vector<32x32xf32>
    %429 = tpu.matmul %428, %426, %cst_244 {dimension_numbers = #tpu.dot_dimension_numbers<[1], [0], [0], [1], [0, 0, 1, 1], [], []>} : vector<32x96xf32>, vector<96x32xf32>, vector<32x32xf32> -> vector<32x32xf32>
    %c1_245 = arith.constant 1 : index
    %c0_246 = arith.constant 0 : index
    %c0_247 = arith.constant 0 : index
    %430 = vector.load %arg16[%c1_245, %c0_246, %c0_247] : memref<3x32x1xf32, #tpu.memory_space<vmem>>, vector<1x32x1xf32>
    %431 = vector.shape_cast %430 : vector<1x32x1xf32> to vector<32x1xf32>
    %432 = vector.broadcast %431 : vector<32x1xf32> to vector<32x32xf32>
    %433 = arith.addf %429, %432 : vector<32x32xf32>
    %cst_248 = arith.constant 0.000000e+00 : f32
    %434 = vector.broadcast %cst_248 : f32 to vector<32x32xf32>
    %435 = arith.subf %434, %433 : vector<32x32xf32>
    %436 = math.exp %435 : vector<32x32xf32>
    %cst_249 = arith.constant 1.000000e+00 : f32
    %437 = vector.broadcast %cst_249 : f32 to vector<32x32xf32>
    %438 = arith.addf %437, %436 : vector<32x32xf32>
    %cst_250 = arith.constant 1.000000e+00 : f32
    %439 = vector.broadcast %cst_250 : f32 to vector<32x32xf32>
    %440 = arith.divf %439, %438 : vector<32x32xf32>
    %441 = arith.mulf %433, %440 : vector<32x32xf32>
    %c1_251 = arith.constant 1 : index
    %c0_252 = arith.constant 0 : index
    %c0_253 = arith.constant 0 : index
    %442 = vector.load %arg17[%c1_251, %c0_252, %c0_253] : memref<3x32x32xf32, #tpu.memory_space<vmem>>, vector<1x32x32xf32>
    %443 = vector.shape_cast %442 : vector<1x32x32xf32> to vector<32x32xf32>
    %cst_254 = arith.constant dense<0.000000e+00> : vector<32x32xf32>
    %444 = tpu.matmul %441, %443, %cst_254 {dimension_numbers = #tpu.dot_dimension_numbers<[1], [0], [0], [1], [0, 0, 1, 1], [], []>} : vector<32x32xf32>, vector<32x32xf32>, vector<32x32xf32> -> vector<32x32xf32>
    %c1_255 = arith.constant 1 : index
    %c0_256 = arith.constant 0 : index
    %c0_257 = arith.constant 0 : index
    %445 = vector.load %arg18[%c1_255, %c0_256, %c0_257] : memref<3x1x32xf32, #tpu.memory_space<vmem>>, vector<1x1x32xf32>
    %446 = vector.shape_cast %445 : vector<1x1x32xf32> to vector<1x32xf32>
    %447 = vector.broadcast %446 : vector<1x32xf32> to vector<32x32xf32>
    %448 = arith.addf %444, %447 : vector<32x32xf32>
    %c1_258 = arith.constant 1 : index
    %c0_259 = arith.constant 0 : index
    %c0_260 = arith.constant 0 : index
    %449 = vector.load %arg19[%c1_258, %c0_259, %c0_260] : memref<3x32x48xf32, #tpu.memory_space<vmem>>, vector<1x32x48xf32>
    %450 = vector.shape_cast %449 : vector<1x32x48xf32> to vector<32x48xf32>
    %cst_261 = arith.constant dense<0.000000e+00> : vector<32x48xf32>
    %451 = tpu.matmul %448, %450, %cst_261 {dimension_numbers = #tpu.dot_dimension_numbers<[1], [0], [0], [1], [0, 0, 1, 1], [], []>} : vector<32x32xf32>, vector<32x48xf32>, vector<32x48xf32> -> vector<32x48xf32>
    %c1_262 = arith.constant 1 : index
    %c0_263 = arith.constant 0 : index
    %c0_264 = arith.constant 0 : index
    %452 = vector.load %arg20[%c1_262, %c0_263, %c0_264] : memref<3x1x48xf32, #tpu.memory_space<vmem>>, vector<1x1x48xf32>
    %453 = vector.shape_cast %452 : vector<1x1x48xf32> to vector<1x48xf32>
    %454 = vector.broadcast %453 : vector<1x48xf32> to vector<32x48xf32>
    %455 = arith.addf %451, %454 : vector<32x48xf32>
    %456 = vector.extract_strided_slice %455 {offsets = [0, 0], sizes = [32, 32], strides = [1, 1]} : vector<32x48xf32> to vector<32x32xf32>
    %cst_265 = arith.constant 2.000000e+01 : f32
    %457 = vector.broadcast %cst_265 : f32 to vector<32x32xf32>
    %458 = arith.cmpf ogt, %456, %457 : vector<32x32xf32>
    %459 = math.exp %456 : vector<32x32xf32>
    %cst_266 = arith.constant 1.000000e+00 : f32
    %460 = vector.broadcast %cst_266 : f32 to vector<32x32xf32>
    %461 = arith.addf %460, %459 : vector<32x32xf32>
    %462 = math.log %461 : vector<32x32xf32>
    %463 = arith.select %458, %456, %462 : vector<32x32xi1>, vector<32x32xf32>
    %464 = vector.extract_strided_slice %455 {offsets = [0, 32], sizes = [32, 8], strides = [1, 1]} : vector<32x48xf32> to vector<32x8xf32>
    %465 = vector.extract_strided_slice %455 {offsets = [0, 40], sizes = [32, 8], strides = [1, 1]} : vector<32x48xf32> to vector<32x8xf32>
    %466 = arith.mulf %448, %463 : vector<32x32xf32>
    %467 = arith.mulf %465, %464 : vector<32x8xf32>
    %cst_267 = arith.constant dense<0.000000e+00> : vector<32xf32>
    %468 = vector.multi_reduction <add>, %467, %cst_267 [1] : vector<32x8xf32> to vector<32xf32>
    %469 = vector.shape_cast %468 : vector<32xf32> to vector<32x1xf32>
    %470 = vector.broadcast %469 : vector<32x1xf32> to vector<32x32xf32>
    %471 = arith.mulf %466, %470 : vector<32x32xf32>
    %cst_268 = arith.constant 0.000000e+00 : f32
    %472 = vector.broadcast %cst_268 : f32 to vector<32x32xf32>
    %473 = arith.subf %472, %471 : vector<32x32xf32>
    %474 = math.exp %473 : vector<32x32xf32>
    %cst_269 = arith.constant 1.000000e+00 : f32
    %475 = vector.broadcast %cst_269 : f32 to vector<32x32xf32>
    %476 = arith.addf %475, %474 : vector<32x32xf32>
    %cst_270 = arith.constant 1.000000e+00 : f32
    %477 = vector.broadcast %cst_270 : f32 to vector<32x32xf32>
    %478 = arith.divf %477, %476 : vector<32x32xf32>
    %479 = arith.mulf %471, %478 : vector<32x32xf32>
    %cst_271 = arith.constant 0.000000e+00 : f32
    %480 = vector.broadcast %cst_271 : f32 to vector<32x32xf32>
    %481 = arith.subf %480, %421 : vector<32x32xf32>
    %482 = math.exp %481 : vector<32x32xf32>
    %cst_272 = arith.constant 1.000000e+00 : f32
    %483 = vector.broadcast %cst_272 : f32 to vector<32x32xf32>
    %484 = arith.addf %483, %482 : vector<32x32xf32>
    %cst_273 = arith.constant 1.000000e+00 : f32
    %485 = vector.broadcast %cst_273 : f32 to vector<32x32xf32>
    %486 = arith.divf %485, %484 : vector<32x32xf32>
    %487 = arith.mulf %421, %486 : vector<32x32xf32>
    %488 = arith.mulf %479, %487 : vector<32x32xf32>
    %c1_274 = arith.constant 1 : index
    %c0_275 = arith.constant 0 : index
    %c0_276 = arith.constant 0 : index
    %489 = vector.load %arg21[%c1_274, %c0_275, %c0_276] : memref<3x32x16xf32, #tpu.memory_space<vmem>>, vector<1x32x16xf32>
    %490 = vector.shape_cast %489 : vector<1x32x16xf32> to vector<32x16xf32>
    %cst_277 = arith.constant dense<0.000000e+00> : vector<32x16xf32>
    %491 = tpu.matmul %488, %490, %cst_277 {dimension_numbers = #tpu.dot_dimension_numbers<[1], [0], [0], [1], [0, 0, 1, 1], [], []>} : vector<32x32xf32>, vector<32x16xf32>, vector<32x16xf32> -> vector<32x16xf32>
    %c1_278 = arith.constant 1 : index
    %c0_279 = arith.constant 0 : index
    %c0_280 = arith.constant 0 : index
    %492 = vector.load %arg22[%c1_278, %c0_279, %c0_280] : memref<3x1x16xf32, #tpu.memory_space<vmem>>, vector<1x1x16xf32>
    %493 = vector.shape_cast %492 : vector<1x1x16xf32> to vector<1x16xf32>
    %494 = vector.broadcast %493 : vector<1x16xf32> to vector<32x16xf32>
    %495 = arith.addf %491, %494 : vector<32x16xf32>
    %496 = arith.mulf %495, %495 : vector<32x16xf32>
    %cst_281 = arith.constant dense<0.000000e+00> : vector<32xf32>
    %497 = vector.multi_reduction <add>, %496, %cst_281 [1] : vector<32x16xf32> to vector<32xf32>
    %498 = vector.shape_cast %497 : vector<32xf32> to vector<32x1xf32>
    %cst_282 = arith.constant 1.600000e+01 : f32
    %499 = vector.broadcast %cst_282 : f32 to vector<32x1xf32>
    %500 = arith.divf %498, %499 : vector<32x1xf32>
    %cst_283 = arith.constant 9.99999974E-6 : f32
    %501 = vector.broadcast %cst_283 : f32 to vector<32x1xf32>
    %502 = arith.addf %500, %501 : vector<32x1xf32>
    %503 = math.rsqrt %502 : vector<32x1xf32>
    %504 = vector.broadcast %503 : vector<32x1xf32> to vector<32x16xf32>
    %505 = arith.mulf %495, %504 : vector<32x16xf32>
    %c2_284 = arith.constant 2 : index
    %c0_285 = arith.constant 0 : index
    %c0_286 = arith.constant 0 : index
    %506 = vector.load %arg12[%c2_284, %c0_285, %c0_286] : memref<3x1x16xf32, #tpu.memory_space<vmem>>, vector<1x1x16xf32>
    %507 = vector.shape_cast %506 : vector<1x1x16xf32> to vector<1x16xf32>
    %508 = vector.broadcast %507 : vector<1x16xf32> to vector<32x16xf32>
    %509 = arith.mulf %505, %508 : vector<32x16xf32>
    %c2_287 = arith.constant 2 : index
    %c0_288 = arith.constant 0 : index
    %c0_289 = arith.constant 0 : index
    %510 = vector.load %arg13[%c2_287, %c0_288, %c0_289] : memref<3x16x64xf32, #tpu.memory_space<vmem>>, vector<1x16x64xf32>
    %511 = vector.shape_cast %510 : vector<1x16x64xf32> to vector<16x64xf32>
    %cst_290 = arith.constant dense<0.000000e+00> : vector<32x64xf32>
    %512 = tpu.matmul %509, %511, %cst_290 {dimension_numbers = #tpu.dot_dimension_numbers<[1], [0], [0], [1], [0, 0, 1, 1], [], []>} : vector<32x16xf32>, vector<16x64xf32>, vector<32x64xf32> -> vector<32x64xf32>
    %c2_291 = arith.constant 2 : index
    %c0_292 = arith.constant 0 : index
    %c0_293 = arith.constant 0 : index
    %513 = vector.load %arg14[%c2_291, %c0_292, %c0_293] : memref<3x1x64xf32, #tpu.memory_space<vmem>>, vector<1x1x64xf32>
    %514 = vector.shape_cast %513 : vector<1x1x64xf32> to vector<1x64xf32>
    %515 = vector.broadcast %514 : vector<1x64xf32> to vector<32x64xf32>
    %516 = arith.addf %512, %515 : vector<32x64xf32>
    %517 = vector.extract_strided_slice %516 {offsets = [0, 0], sizes = [32, 32], strides = [1, 1]} : vector<32x64xf32> to vector<32x32xf32>
    %518 = vector.extract_strided_slice %516 {offsets = [0, 32], sizes = [32, 32], strides = [1, 1]} : vector<32x64xf32> to vector<32x32xf32>
    %c0_294 = arith.constant 0 : index
    %c1_295 = arith.constant 1 : index
    %519 = vector.load %arg29[%c0_294, %c1_295] : memref<32x34xf32, #tpu.memory_space<vmem>>, vector<32x32xf32>
    tpu.vector_store %arg29[%c0_294, %c1_295], %517 {strides = array<i32>} : memref<32x34xf32, #tpu.memory_space<vmem>>, vector<32x32xf32>,
    %c0_296 = arith.constant 0 : index
    %c0_297 = arith.constant 0 : index
    %520 = vector.load %arg29[%c0_296, %c0_297] : memref<32x34xf32, #tpu.memory_space<vmem>>, vector<32x32xf32>
    %c0_298 = arith.constant 0 : index
    %c1_299 = arith.constant 1 : index
    %521 = vector.load %arg29[%c0_298, %c1_299] : memref<32x34xf32, #tpu.memory_space<vmem>>, vector<32x32xf32>
    %c0_300 = arith.constant 0 : index
    %c2_301 = arith.constant 2 : index
    %522 = vector.load %arg29[%c0_300, %c2_301] : memref<32x34xf32, #tpu.memory_space<vmem>>, vector<32x32xf32>
    %523 = tpu.concatenate %520, %521, %522 in 0 : vector<32x32xf32>, vector<32x32xf32>, vector<32x32xf32> -> vector<96x32xf32>
    %c2_302 = arith.constant 2 : index
    %c0_303 = arith.constant 0 : index
    %c0_304 = arith.constant 0 : index
    %524 = vector.load %arg15[%c2_302, %c0_303, %c0_304] : memref<3x32x96xf32, #tpu.memory_space<vmem>>, vector<1x32x96xf32>
    %525 = vector.shape_cast %524 : vector<1x32x96xf32> to vector<32x96xf32>
    %cst_305 = arith.constant dense<0.000000e+00> : vector<32x32xf32>
    %526 = tpu.matmul %525, %523, %cst_305 {dimension_numbers = #tpu.dot_dimension_numbers<[1], [0], [0], [1], [0, 0, 1, 1], [], []>} : vector<32x96xf32>, vector<96x32xf32>, vector<32x32xf32> -> vector<32x32xf32>
    %c2_306 = arith.constant 2 : index
    %c0_307 = arith.constant 0 : index
    %c0_308 = arith.constant 0 : index
    %527 = vector.load %arg16[%c2_306, %c0_307, %c0_308] : memref<3x32x1xf32, #tpu.memory_space<vmem>>, vector<1x32x1xf32>
    %528 = vector.shape_cast %527 : vector<1x32x1xf32> to vector<32x1xf32>
    %529 = vector.broadcast %528 : vector<32x1xf32> to vector<32x32xf32>
    %530 = arith.addf %526, %529 : vector<32x32xf32>
    %cst_309 = arith.constant 0.000000e+00 : f32
    %531 = vector.broadcast %cst_309 : f32 to vector<32x32xf32>
    %532 = arith.subf %531, %530 : vector<32x32xf32>
    %533 = math.exp %532 : vector<32x32xf32>
    %cst_310 = arith.constant 1.000000e+00 : f32
    %534 = vector.broadcast %cst_310 : f32 to vector<32x32xf32>
    %535 = arith.addf %534, %533 : vector<32x32xf32>
    %cst_311 = arith.constant 1.000000e+00 : f32
    %536 = vector.broadcast %cst_311 : f32 to vector<32x32xf32>
    %537 = arith.divf %536, %535 : vector<32x32xf32>
    %538 = arith.mulf %530, %537 : vector<32x32xf32>
    %c2_312 = arith.constant 2 : index
    %c0_313 = arith.constant 0 : index
    %c0_314 = arith.constant 0 : index
    %539 = vector.load %arg17[%c2_312, %c0_313, %c0_314] : memref<3x32x32xf32, #tpu.memory_space<vmem>>, vector<1x32x32xf32>
    %540 = vector.shape_cast %539 : vector<1x32x32xf32> to vector<32x32xf32>
    %cst_315 = arith.constant dense<0.000000e+00> : vector<32x32xf32>
    %541 = tpu.matmul %538, %540, %cst_315 {dimension_numbers = #tpu.dot_dimension_numbers<[1], [0], [0], [1], [0, 0, 1, 1], [], []>} : vector<32x32xf32>, vector<32x32xf32>, vector<32x32xf32> -> vector<32x32xf32>
    %c2_316 = arith.constant 2 : index
    %c0_317 = arith.constant 0 : index
    %c0_318 = arith.constant 0 : index
    %542 = vector.load %arg18[%c2_316, %c0_317, %c0_318] : memref<3x1x32xf32, #tpu.memory_space<vmem>>, vector<1x1x32xf32>
    %543 = vector.shape_cast %542 : vector<1x1x32xf32> to vector<1x32xf32>
    %544 = vector.broadcast %543 : vector<1x32xf32> to vector<32x32xf32>
    %545 = arith.addf %541, %544 : vector<32x32xf32>
    %c2_319 = arith.constant 2 : index
    %c0_320 = arith.constant 0 : index
    %c0_321 = arith.constant 0 : index
    %546 = vector.load %arg19[%c2_319, %c0_320, %c0_321] : memref<3x32x48xf32, #tpu.memory_space<vmem>>, vector<1x32x48xf32>
    %547 = vector.shape_cast %546 : vector<1x32x48xf32> to vector<32x48xf32>
    %cst_322 = arith.constant dense<0.000000e+00> : vector<32x48xf32>
    %548 = tpu.matmul %545, %547, %cst_322 {dimension_numbers = #tpu.dot_dimension_numbers<[1], [0], [0], [1], [0, 0, 1, 1], [], []>} : vector<32x32xf32>, vector<32x48xf32>, vector<32x48xf32> -> vector<32x48xf32>
    %c2_323 = arith.constant 2 : index
    %c0_324 = arith.constant 0 : index
    %c0_325 = arith.constant 0 : index
    %549 = vector.load %arg20[%c2_323, %c0_324, %c0_325] : memref<3x1x48xf32, #tpu.memory_space<vmem>>, vector<1x1x48xf32>
    %550 = vector.shape_cast %549 : vector<1x1x48xf32> to vector<1x48xf32>
    %551 = vector.broadcast %550 : vector<1x48xf32> to vector<32x48xf32>
    %552 = arith.addf %548, %551 : vector<32x48xf32>
    %553 = vector.extract_strided_slice %552 {offsets = [0, 0], sizes = [32, 32], strides = [1, 1]} : vector<32x48xf32> to vector<32x32xf32>
    %cst_326 = arith.constant 2.000000e+01 : f32
    %554 = vector.broadcast %cst_326 : f32 to vector<32x32xf32>
    %555 = arith.cmpf ogt, %553, %554 : vector<32x32xf32>
    %556 = math.exp %553 : vector<32x32xf32>
    %cst_327 = arith.constant 1.000000e+00 : f32
    %557 = vector.broadcast %cst_327 : f32 to vector<32x32xf32>
    %558 = arith.addf %557, %556 : vector<32x32xf32>
    %559 = math.log %558 : vector<32x32xf32>
    %560 = arith.select %555, %553, %559 : vector<32x32xi1>, vector<32x32xf32>
    %561 = vector.extract_strided_slice %552 {offsets = [0, 32], sizes = [32, 8], strides = [1, 1]} : vector<32x48xf32> to vector<32x8xf32>
    %562 = vector.extract_strided_slice %552 {offsets = [0, 40], sizes = [32, 8], strides = [1, 1]} : vector<32x48xf32> to vector<32x8xf32>
    %563 = arith.mulf %545, %560 : vector<32x32xf32>
    %564 = arith.mulf %562, %561 : vector<32x8xf32>
    %cst_328 = arith.constant dense<0.000000e+00> : vector<32xf32>
    %565 = vector.multi_reduction <add>, %564, %cst_328 [1] : vector<32x8xf32> to vector<32xf32>
    %566 = vector.shape_cast %565 : vector<32xf32> to vector<32x1xf32>
    %567 = vector.broadcast %566 : vector<32x1xf32> to vector<32x32xf32>
    %568 = arith.mulf %563, %567 : vector<32x32xf32>
    %cst_329 = arith.constant 0.000000e+00 : f32
    %569 = vector.broadcast %cst_329 : f32 to vector<32x32xf32>
    %570 = arith.subf %569, %568 : vector<32x32xf32>
    %571 = math.exp %570 : vector<32x32xf32>
    %cst_330 = arith.constant 1.000000e+00 : f32
    %572 = vector.broadcast %cst_330 : f32 to vector<32x32xf32>
    %573 = arith.addf %572, %571 : vector<32x32xf32>
    %cst_331 = arith.constant 1.000000e+00 : f32
    %574 = vector.broadcast %cst_331 : f32 to vector<32x32xf32>
    %575 = arith.divf %574, %573 : vector<32x32xf32>
    %576 = arith.mulf %568, %575 : vector<32x32xf32>
    %cst_332 = arith.constant 0.000000e+00 : f32
    %577 = vector.broadcast %cst_332 : f32 to vector<32x32xf32>
    %578 = arith.subf %577, %518 : vector<32x32xf32>
    %579 = math.exp %578 : vector<32x32xf32>
    %cst_333 = arith.constant 1.000000e+00 : f32
    %580 = vector.broadcast %cst_333 : f32 to vector<32x32xf32>
    %581 = arith.addf %580, %579 : vector<32x32xf32>
    %cst_334 = arith.constant 1.000000e+00 : f32
    %582 = vector.broadcast %cst_334 : f32 to vector<32x32xf32>
    %583 = arith.divf %582, %581 : vector<32x32xf32>
    %584 = arith.mulf %518, %583 : vector<32x32xf32>
    %585 = arith.mulf %576, %584 : vector<32x32xf32>
    %c2_335 = arith.constant 2 : index
    %c0_336 = arith.constant 0 : index
    %c0_337 = arith.constant 0 : index
    %586 = vector.load %arg21[%c2_335, %c0_336, %c0_337] : memref<3x32x16xf32, #tpu.memory_space<vmem>>, vector<1x32x16xf32>
    %587 = vector.shape_cast %586 : vector<1x32x16xf32> to vector<32x16xf32>
    %cst_338 = arith.constant dense<0.000000e+00> : vector<32x16xf32>
    %588 = tpu.matmul %585, %587, %cst_338 {dimension_numbers = #tpu.dot_dimension_numbers<[1], [0], [0], [1], [0, 0, 1, 1], [], []>} : vector<32x32xf32>, vector<32x16xf32>, vector<32x16xf32> -> vector<32x16xf32>
    %c2_339 = arith.constant 2 : index
    %c0_340 = arith.constant 0 : index
    %c0_341 = arith.constant 0 : index
    %589 = vector.load %arg22[%c2_339, %c0_340, %c0_341] : memref<3x1x16xf32, #tpu.memory_space<vmem>>, vector<1x1x16xf32>
    %590 = vector.shape_cast %589 : vector<1x1x16xf32> to vector<1x16xf32>
    %591 = vector.broadcast %590 : vector<1x16xf32> to vector<32x16xf32>
    %592 = arith.addf %588, %591 : vector<32x16xf32>
    %593 = vector.extract_strided_slice %592 {offsets = [0, 0], sizes = [16, 16], strides = [1, 1]} : vector<32x16xf32> to vector<16x16xf32>
    %cst_342 = arith.constant dense<0.000000e+00> : vector<16xf32>
    %594 = vector.multi_reduction <add>, %593, %cst_342 [0] : vector<16x16xf32> to vector<16xf32>
    %595 = vector.shape_cast %594 : vector<16xf32> to vector<1x16xf32>
    %cst_343 = arith.constant 1.600000e+01 : f32
    %596 = vector.broadcast %cst_343 : f32 to vector<1x16xf32>
    %597 = arith.divf %595, %596 : vector<1x16xf32>
    %598 = vector.extract_strided_slice %592 {offsets = [16, 0], sizes = [16, 16], strides = [1, 1]} : vector<32x16xf32> to vector<16x16xf32>
    %cst_344 = arith.constant dense<0.000000e+00> : vector<16xf32>
    %599 = vector.multi_reduction <add>, %598, %cst_344 [0] : vector<16x16xf32> to vector<16xf32>
    %600 = vector.shape_cast %599 : vector<16xf32> to vector<1x16xf32>
    %cst_345 = arith.constant 1.600000e+01 : f32
    %601 = vector.broadcast %cst_345 : f32 to vector<1x16xf32>
    %602 = arith.divf %600, %601 : vector<1x16xf32>
    %603 = tpu.concatenate %597, %602 in 0 : vector<1x16xf32>, vector<1x16xf32> -> vector<2x16xf32>
    %c0_346 = arith.constant 0 : index
    %c0_347 = arith.constant 0 : index
    %604 = vector.load %arg25[%c0_346, %c0_347] : memref<2x16xf32, #tpu.memory_space<vmem>>, vector<2x16xf32>
    tpu.vector_store %arg25[%c0_346, %c0_347], %603 {strides = array<i32>} : memref<2x16xf32, #tpu.memory_space<vmem>>, vector<2x16xf32>,
    %c0_348 = arith.constant 0 : index
    %c0_349 = arith.constant 0 : index
    %605 = vector.load %arg23[%c0_348, %c0_349] : memref<16x4xf32, #tpu.memory_space<vmem>>, vector<16x4xf32>
    %cst_350 = arith.constant dense<0.000000e+00> : vector<2x4xf32>
    %606 = tpu.matmul %603, %605, %cst_350 {dimension_numbers = #tpu.dot_dimension_numbers<[1], [0], [0], [1], [0, 0, 1, 1], [], []>} : vector<2x16xf32>, vector<16x4xf32>, vector<2x4xf32> -> vector<2x4xf32>
    %c0_351 = arith.constant 0 : index
    %c0_352 = arith.constant 0 : index
    %607 = vector.load %arg24[%c0_351, %c0_352] : memref<1x4xf32, #tpu.memory_space<vmem>>, vector<1x4xf32>
    %608 = vector.broadcast %607 : vector<1x4xf32> to vector<2x4xf32>
    %609 = arith.addf %606, %608 : vector<2x4xf32>
    %c0_353 = arith.constant 0 : index
    %c0_354 = arith.constant 0 : index
    %610 = vector.load %arg26[%c0_353, %c0_354] : memref<2x4xf32, #tpu.memory_space<vmem>>, vector<2x4xf32>
    tpu.vector_store %arg26[%c0_353, %c0_354], %609 {strides = array<i32>} : memref<2x4xf32, #tpu.memory_space<vmem>>, vector<2x4xf32>,
    return
  }
}

</mosaic_0001>

<bundles_post_ra>
// kernel: cnn_mamba_forward.1
= control target key start
LH: loop header
LB: loop body
LE: loop exit
PB: predicated region body
PF: predicated region fallthrough
CT: control target
= control target key end

     0   :  { %s9955_s0 = inlined_call_operand.vmem [shape: f32[2,8,128], index: 0, kind: input, shape index: {}]   ;;  %s9956_s1 = inlined_call_operand.vmem [shape: f32[4,8], index: 1, kind: input, shape index: {}]   ;;  %s9957_s2 = inlined_call_operand.vmem [shape: f32[4,1], index: 2, kind: input, shape index: {}]   ;;  %s9958_s3 = inlined_call_operand.vmem [shape: f32[16,64], index: 3, kind: input, shape index: {}]   ;;  %s9959_s4 = inlined_call_operand.vmem [shape: f32[16,1], index: 4, kind: input, shape index: {}]   ;;  %s9960_s5 = inlined_call_operand.vmem [shape: f32[16,16], index: 5, kind: input, shape index: {}]   ;;  %s9961_s6 = inlined_call_operand.hbm [shape: f32[16,16], index: 6, kind: input, shape index: {}]   ;;  %s9962_s7 = inlined_call_operand.vmem [shape: f32[16,1], index: 7, kind: input, shape index: {}]   ;;  %s9963_s8 = inlined_call_operand.vmem [shape: f32[4,8,4], index: 8, kind: input, shape index: {}]   ;;  %s9964_s9 = inlined_call_operand.hbm [shape: f32[1,4], index: 9, kind: input, shape index: {}]   ;;  %s9965_s10 = inlined_call_operand.vmem [shape: f32[4,16], index: 10, kind: input, shape index: {}]   ;;  %s9966_s11 = inlined_call_operand.hbm [shape: f32[1,16], index: 11, kind: input, shape index: {}]   ;;  %s9967_s12 = inlined_call_operand.hbm [shape: f32[3,1,16], index: 12, kind: input, shape index: {}]   ;;  %s9968_s13 = inlined_call_operand.vmem [shape: f32[3,16,64], index: 13, kind: input, shape index: {}]   ;;  %s9969_s14 = inlined_call_operand.hbm [shape: f32[3,1,64], index: 14, kind: input, shape index: {}]   ;;  %s9970_s15 = inlined_call_operand.vmem [shape: f32[3,32,96], index: 15, kind: input, shape index: {}]   ;;  %s9971_s16 = inlined_call_operand.vmem [shape: f32[3,32,1], index: 16, kind: input, shape index: {}]   ;;  %s9972_s17 = inlined_call_operand.vmem [shape: f32[3,32,32], index: 17, kind: input, shape index: {}]   ;;  %s9973_s18 = inlined_call_operand.hbm [shape: f32[3,1,32], index: 18, kind: input, shape index: {}]   ;;  %s9974_s19 = inlined_call_operand.hbm [shape: f32[3,32,48], index: 19, kind: input, shape index: {}]   ;;  %s9975_s20 = inlined_call_operand.hbm [shape: f32[3,1,48], index: 20, kind: input, shape index: {}]   ;;  %s9976_s21 = inlined_call_operand.vmem [shape: f32[3,32,16], index: 21, kind: input, shape index: {}]   ;;  %s9977_s22 = inlined_call_operand.hbm [shape: f32[3,1,16], index: 22, kind: input, shape index: {}]   ;;  %s9978_s23 = inlined_call_operand.vmem [shape: f32[16,4], index: 23, kind: input, shape index: {}]   ;;  %s9979_s24 = inlined_call_operand.hbm [shape: f32[1,4], index: 24, kind: input, shape index: {}]   ;;  %s9980_s25 = inlined_call_operand.hbm [shape: f32[2,16], index: 25, kind: output, shape index: {0}]   ;;  %s9981_s26 = inlined_call_operand.hbm [shape: f32[2,4], index: 26, kind: output, shape index: {1}]  }
   0x1   :  { %10048 = sst [smem:[#allocation77_spill]] %s9955_s0 }
   0x2   :  { %10049 = sst [smem:[#allocation78_spill]] %s9956_s1 }
   0x3   :  { %10050 = sst [smem:[#allocation79_spill]] %s9957_s2 }
   0x4   :  { %10051 = sst [smem:[#allocation80_spill]] %s9958_s3 }
   0x5   :  { %10052 = sst [smem:[#allocation81_spill]] %s9959_s4 }
   0x6   :  { %10053 = sst [smem:[#allocation82_spill]] %s9960_s5 }
   0x7   :  { %10054 = sst [smem:[#allocation83_spill]] %s9961_s6 }
   0x8   :  { %10055 = sst [smem:[#allocation84_spill]] %s9962_s7 }
   0x9   :  { %10056 = sst [smem:[#allocation85_spill]] %s9963_s8 }
   0xa   :  { %10057 = sst [smem:[#allocation86_spill]] %s9964_s9 }
   0xb   :  { %10058 = sst [smem:[#allocation87_spill]] %s9965_s10 }
   0xc   :  { %10059 = sst [smem:[#allocation88_spill]] %s9981_s26 }
   0xd   :  { %32 = vsyncpa [#allocation8], 0 }
   0xe   :  { %33 = vsyncpa [#allocation10], 0 }
   0xf   :  { %34 = vsyncpa [#allocation6], 0 }
  0x10   :  { %35 = vsyncpa [#allocation13], 0 }
  0x11   :  { %36 = vsyncpa [#allocation16], 0 }
  0x12   :  { %37 = vsyncpa [#allocation19], 0 }
  0x13   :  { %38 = vsyncpa [#allocation22], 0 }
  0x14   :  { %39 = vsyncpa [#allocation25], 0 }
  0x15   :  { %40 = vsyncpa [#allocation7], 0  ;;  %s10060_s7 = sld [smem:[#allocation86_spill]] }
  0x1b   :  { %s90_s28 = sshll.u32 %s10060_s7, 4  ;;  %s91_s28 = int_to_ptr.hbm [resolvable:$true] %s90_s28 }
  0x1c   :  { %41 = vsyncpa [#allocation28], 0  ;;  %s6559_s8 = smov [#allocation12]   ;;  %s113_s9 = sshll.u32 %s9967_s12, 4  ;;  %s114_s9 = int_to_ptr.hbm [resolvable:$true] %s113_s9 }
  0x1d   :  { %s92_s4 = sshll.u32 %s6559_s8, 4  ;;  %s6560_s30 = smov [#allocation15]   ;;  %s93_s4 = int_to_ptr.vmem [resolvable:$true] %s92_s4 }
  0x1e   :  { %95 = dma.hbm_to_vmem [thread:$0]  %s91_s28, 16, %s93_s4, [#allocation13]  }
  0x1f   :  { %s115_s2 = sshll.u32 %s6560_s30, 4  ;;  %s6561_s5 = smov 16   ;;  %s116_s2 = int_to_ptr.vmem [resolvable:$true] %s115_s2 }
  0x20   :  { %s9994_s10 = smov 1   ;;  %s147_s27 = sshll.u32 %s9973_s18, 4  ;;  %s148_s27 = int_to_ptr.hbm [resolvable:$true] %s147_s27 }
  0x21   :  { %121 = dma.hbm_to_vmem [thread:$0]  %s114_s9, 48, %s116_s2, [#allocation16], %s6561_s5, %s6561_s5, %s9994_s10  }
  0x22   :  { %s6563_s3 = smov [#allocation18]   ;;  %s173_s8 = sshll.u32 %s9975_s20, 4  ;;  %s174_s8 = int_to_ptr.hbm [resolvable:$true] %s173_s8 }
  0x23   :  { %s149_s7 = sshll.u32 %s6563_s3, 4  ;;  %s6564_s4 = smov [#allocation21]   ;;  %s150_s7 = int_to_ptr.vmem [resolvable:$true] %s149_s7 }
  0x24   :  { %155 = dma.hbm_to_vmem [thread:$0]  %s148_s27, 48, %s150_s7, [#allocation19], %s6561_s5, %s6561_s5, %s9994_s10  }
  0x25   :  { %s175_s29 = sshll.u32 %s6564_s4, 4  ;;  %s10061_s30 = sld [smem:[#allocation78_spill]]  ;;  %s176_s29 = int_to_ptr.vmem [resolvable:$true] %s175_s29 }
  0x26   :  { %181 = dma.hbm_to_vmem [thread:$0]  %s174_s8, 48, %s176_s29, [#allocation22], %s6561_s5, %s6561_s5, %s9994_s10  }
  0x27   :  { %s10062_s20 = sld [smem:[#allocation79_spill]]  ;;  %s6565_s3 = smov [#allocation5]  }
  0x28   :  { %s6566_s27 = smov [#allocation9]   ;;  %s10063_s28 = sld [smem:[#allocation83_spill]] }
  0x29   :  { %s6567_s0 = smov [#allocation11]   ;;  %s103_s8 = sshll.u32 %s9966_s11, 4  ;;  %s104_s8 = int_to_ptr.hbm [resolvable:$true] %s103_s8 }
  0x2a   :  { %s74_s9 = sshll.u32 %s6567_s0, 4  ;;  %s6568_s29 = smov 128   ;;  %s75_s9 = int_to_ptr.vmem [resolvable:$true] %s74_s9 }
  0x2b   :  { %s49_s2 = sshll.u32 %s10061_s30, 4  ;;  %s6569_s18 = smov 8   ;;  %s50_s2 = int_to_ptr.vmem [resolvable:$true] %s49_s2 }
  0x2c   :  { %52 = dma.vmem_to_smem %s50_s2, 64, %s6565_s3, [#allocation8]  }
  0x2d   :  { %s58_s1 = sshll.u32 %s10062_s20, 4  ;;  %s6570_s2 = smov [#allocation14]   ;;  %s59_s1 = int_to_ptr.vmem [resolvable:$true] %s58_s1 }
  0x2e   :  { %61 = dma.vmem_to_smem %s59_s1, 64, %s6566_s27, [#allocation10]  }
  0x2f   :  { %s72_s4 = sshll.u32 %s10063_s28, 4  ;;  %s105_s6 = sshll.u32 %s6570_s2, 4  ;;  %s73_s4 = int_to_ptr.hbm [resolvable:$true] %s72_s4  ;;  %s106_s6 = int_to_ptr.vmem [resolvable:$true] %s105_s6 }
  0x30   :  { %80 = dma.hbm_to_vmem [thread:$0]  %s73_s4, 256, %s75_s9, [#allocation6], %s6568_s29, %s6568_s29, %s6569_s18  }
  0x31   :  { %s128_s3 = sshll.u32 %s9969_s14, 4  ;;  %s160_s12 = sshll.u32 %s9974_s19, 4  ;;  %s129_s3 = int_to_ptr.hbm [resolvable:$true] %s128_s3  ;;  %s161_s12 = int_to_ptr.hbm [resolvable:$true] %s160_s12 }
  0x32   :  { %108 = dma.hbm_to_vmem [thread:$0]  %s104_s8, 16, %s106_s6, [#allocation13]  }
  0x33   :  { %s6571_s26 = smov [#allocation17]   ;;  %s6572_s28 = smov [#allocation20]  }
  0x34   :  { %s130_s11 = sshll.u32 %s6571_s26, 4  ;;  %s162_s4 = sshll.u32 %s6572_s28, 4  ;;  %s131_s11 = int_to_ptr.vmem [resolvable:$true] %s130_s11  ;;  %s163_s4 = int_to_ptr.vmem [resolvable:$true] %s162_s4 }
  0x35   :  { %136 = dma.hbm_to_vmem [thread:$0]  %s129_s3, 48, %s131_s11, [#allocation16], %s6561_s5, %s6561_s5, %s9994_s10  }
  0x36   :  { %s188_s14 = sshll.u32 %s9977_s22, 4  ;;  %s204_s8 = sshll.u32 %s9979_s24, 4  ;;  %s189_s14 = int_to_ptr.hbm [resolvable:$true] %s188_s14  ;;  %s205_s8 = int_to_ptr.hbm [resolvable:$true] %s204_s8 }
  0x37   :  { %168 = dma.hbm_to_vmem [thread:$0]  %s161_s12, 1536, %s163_s4, [#allocation19], %s6568_s29, %s6568_s29, %s6569_s18  }
  0x38   :  { %s6573_s2 = smov [#allocation23]   ;;  %s6574_s20 = smov [#allocation24]  }
  0x39   :  { %s190_s6 = sshll.u32 %s6573_s2, 4  ;;  %s206_s1 = sshll.u32 %s6574_s20, 4  ;;  %s191_s6 = int_to_ptr.vmem [resolvable:$true] %s190_s6  ;;  %s207_s1 = int_to_ptr.vmem [resolvable:$true] %s206_s1 }
  0x3a   :  { %196 = dma.hbm_to_vmem [thread:$0]  %s189_s14, 48, %s191_s6, [#allocation22], %s6561_s5, %s6561_s5, %s9994_s10  }
  0x3b   :  { %209 = dma.hbm_to_vmem [thread:$0]  %s205_s8, 16, %s207_s1, [#allocation25]  }
  0x3c   :  { %6539 = dma.done.wait [#allocation8], 64  }
  0x3d   :  { %6540 = vsyncadd [#allocation8], 4294967232 }
  0x3e   :  { %6541 = dma.done.wait [#allocation10], 64  }
  0x3f   :  { %6542 = vsyncadd [#allocation10], 4294967232 }
  0x40   :  { %6543 = dma.done.wait [#allocation6], 256  }
  0x41   :  { %6544 = vsyncadd [#allocation6], 4294967040 }
  0x42   :  { %6545 = dma.done.wait [#allocation13], 32  }
  0x43   :  { %6546 = vsyncadd [#allocation13], 4294967264 }
  0x44   :  { %6547 = dma.done.wait [#allocation16], 96  }
  0x45   :  { %6548 = vsyncadd [#allocation16], 4294967200 }
  0x46   :  { %6549 = dma.done.wait [#allocation19], 1584  }
  0x47   :  { %6550 = vsyncadd [#allocation19], 4294965712 }
  0x48   :  { %6551 = dma.done.wait [#allocation22], 96  }
  0x49   :  { %6552 = vsyncadd [#allocation22], 4294967200 }
  0x4a   :  { %6553 = dma.done.wait [#allocation25], 16  }
  0x4b   :  { %6554 = vsyncadd [#allocation25], 4294967280 }
  0x4c   :  { %258 = sfence }
  0x4d   :  { %s10064_s29 = sld [smem:[#allocation77_spill]]  ;;  %s6575_s3 = smov 3   ;;  %vm259_vm0 = vcmask 23552   ;;  %vm262_vm1 = vcmask 56344   ;;  %v9988_v2 = vmov 0.0   ;;  %vm275_vm2 = vcmask 1047576  }
  0x4e   :  { %261 = vst.msk [vmem:[#allocation2 + $0x10] sm:$0xff] %vm259_vm0, %v9988_v2  ;;  %s5677_s12 = sld [smem:[#allocation5 + $0x182]]  ;;  %s6577_s28 = smov 126   ;;  %vm306_vm3 = vcmask 1039360   ;;  %vm331_vm4 = vcmask 1031168   ;;  %vm356_vm5 = vcmask 1022976  }
  0x4f   :  { %264 = vst.msk [vmem:[#allocation2 + $0x18] sm:$0xff] %vm262_vm1, %v9988_v2  ;;  %s5676_s26 = sld [smem:[#allocation5 + $0x181]]  ;;  %s6578_s4 = smov 127   ;;  %vm381_vm6 = vcmask 1014784   ;;  %vm406_vm7 = vcmask 1006592   ;;  %vm431_vm8 = vcmask 998400  }
  0x50   :  { %260 = vst.msk [vmem:[#allocation2] sm:$0xff] %vm259_vm0, %v9988_v2  ;;  %s5667_s11 = sld [smem:[#allocation5 + $0x101]]  ;;  %s6579_s9 = smov 125   ;;  %vm456_vm9 = vcmask 990208   ;;  %vm1009_vm10 = vcmask 523264   ;;  %vm1238_vm13 = vcmask 1047556  }
  0x51   :  { %263 = vst.msk [vmem:[#allocation2 + $0x8] sm:$0xff] %vm262_vm1, %v9988_v2  ;;  %s5678_s0 = sld [smem:[#allocation5 + $0x183]]  ;;  %s6580_s19 = smov 124   ;;  %vm2134_vm14 = vcmask 31744   ;;  %vm2478_vm1 = vcmask 253112  }
  0x52   :  { %s5679_s14 = sld [smem:[#allocation5 + $0x184]]  ;;  %s6581_s20 = smov 123  }
  0x53   :  { %v266_v0 = vld [vmem:[%s10064_s29 + $0x8] sm:$0xff]  ;;  %v265_v1 = vld [vmem:[%s10064_s29] sm:$0xff]  ;;  %s5668_s30 = sld [smem:[#allocation5 + $0x102]]  ;;  %s6610_s10 = smov 12  }
  0x54   :  { %271 = vrot.lane.b32.xlu0 %v266_v0, %s6575_s3  ;;  %v848_v4 = vstv %s5677_s12  ;;  %s5658_s8 = sld [smem:[#allocation5 + $0x81]] }
  0x55   :  { %v824_v5 = vstv %s5676_s26  ;;  %s5669_s2 = sld [smem:[#allocation5 + $0x103]] }
  0x56   :  { %v648_v11 = vstv %s5667_s11  ;;  %s5680_s6 = sld [smem:[#allocation5 + $0x185]]  ;;  %s6583_s11 = smov 121  }
  0x57   :  { %v872_v17 = vstv %s5678_s0  ;;  %s5659_s1 = sld [smem:[#allocation5 + $0x82]] }
  0x58   :  { %v896_v27 = vstv %s5679_s14  ;;  %s5670_s22 = sld [smem:[#allocation5 + $0x104]] }
  0x59   :  { %v672_v28 = vstv %s5668_s30  ;;  %s5681_s24 = sld [smem:[#allocation5 + $0x186]] }
  0x5a   :  { %v472_v35 = vstv %s5658_s8  ;;  %s5650_s29 = sld [smem:[#allocation5 + $0x1]] }
  0x5b   :  { %v696_v36 = vstv %s5669_s2  ;;  %s5660_s27 = sld [smem:[#allocation5 + $0x83]] }
  0x5c   :  { %269 = vrot.lane.b32.xlu0 %v265_v1, %s6575_s3  ;;  %v920_v40 = vstv %s5680_s6  ;;  %s6582_s3 = smov 122   ;;  %s5682_s7 = sld [smem:[#allocation5 + $0x187]] }
  0x5d   :  { %v496_v50 = vstv %s5659_s1  ;;  %s5671_s12 = sld [smem:[#allocation5 + $0x105]] }
  0x5e   :  { %v720_v51 = vstv %s5670_s22  ;;  %s5651_s26 = sld [smem:[#allocation5 + $0x2]] }
  0x5f   :  { %v6921_v55 = vstv %s5681_s24  ;;  %s5672_s0 = sld [smem:[#allocation5 + $0x106]] }
  0x60   :  { %v6932_v60 = vstv %s5650_s29  ;;  %s5661_s14 = sld [smem:[#allocation5 + $0x84]] }
  0x61   :  { %v6943_v1 = vstv %s5660_s27  ;;  %s5652_s30 = sld [smem:[#allocation5 + $0x3]] }
  0x62   :  { %s5662_s8 = sld [smem:[#allocation5 + $0x85]] }
  0x63   :  { %s5653_s2 = sld [smem:[#allocation5 + $0x4]] }
  0x64   :  { %s5673_s6 = sld [smem:[#allocation5 + $0x107]] }
  0x65   :  { %s5663_s1 = sld [smem:[#allocation5 + $0x86]] }
  0x66   :  { %s7161_s22 = sld [smem:[#allocation5 + $0x180]] }
  0x67   :  { %s5654_s24 = sld [smem:[#allocation5 + $0x5]] }
  0x68   :  { %s7213_s29 = sld [smem:[#allocation9 + $0x180]] }
  0x69   :  { %s5655_s27 = sld [smem:[#allocation5 + $0x6]] }
  0xc6   :  { %v272_v3 = vpop.permute.xlu0 %271 }
  0xc7   :  { %278 = vst.msk [vmem:[#allocation2 + $0x10] sm:$0xff] %vm275_vm2, %v272_v3 }
  0xc8   :  { %279 = vst.msk [vmem:[#allocation2 + $0x18] sm:$0xff] %vm259_vm0, %v272_v3 }
  0xce   :  { %v6842_v6 = vld [vmem:[#allocation2 + $0x10] sm:$0xff]  ;;  %v270_v7 = vpop.permute.xlu0 %269 }
  0xcf   :  { %276 = vst.msk [vmem:[#allocation2] sm:$0xff] %vm275_vm2, %v270_v7  ;;  %v851_v8 = vmul.f32 %v848_v4, %v6842_v6  ;;  %v827_v9 = vmul.f32 %v824_v5, %v6842_v6  ;;  %v6849_v10 = vld [vmem:[#allocation2 + $0x18] sm:$0xff]  ;;  %v875_v19 = vmul.f32 %v872_v17, %v6842_v6  ;;  %v651_v23 = vmul.f32 %v648_v11, %v6842_v6 }
  0xd0   :  { %277 = vst.msk [vmem:[#allocation2 + $0x8] sm:$0xff] %vm259_vm0, %v270_v7  ;;  %v652_v13 = vmul.f32 %v648_v11, %v6849_v10  ;;  %v828_v14 = vmul.f32 %v824_v5, %v6849_v10  ;;  %v852_v20 = vmul.f32 %v848_v4, %v6849_v10  ;;  %v876_v25 = vmul.f32 %v872_v17, %v6849_v10 }
  0xd1   :  { %861 = vrot.lane.b32.xlu0 %v851_v8, %s6577_s28  ;;  %837 = vrot.lane.b32.xlu1 %v827_v9, %s6578_s4  ;;  %v900_v29 = vmul.f32 %v896_v27, %v6849_v10  ;;  %v675_v30 = vmul.f32 %v672_v28, %v6842_v6  ;;  %v676_v34 = vmul.f32 %v672_v28, %v6849_v10  ;;  %vm2474_vm0 = vcmask 187512  }
  0xd2   :  { %v475_v37 = vmul.f32 %v472_v35, %v6842_v6  ;;  %v700_v38 = vmul.f32 %v696_v36, %v6849_v10  ;;  %v899_v39 = vmul.f32 %v896_v27, %v6842_v6  ;;  %v923_v42 = vmul.f32 %v920_v40, %v6842_v6 }
  0xd3   :  { %v476_v43 = vmul.f32 %v472_v35, %v6849_v10  ;;  %v699_v46 = vmul.f32 %v696_v36, %v6842_v6  ;;  %v924_v47 = vmul.f32 %v920_v40, %v6849_v10  ;;  %v499_v52 = vmul.f32 %v496_v50, %v6842_v6 }
  0xd4   :  { %v724_v53 = vmul.f32 %v720_v51, %v6849_v10  ;;  %v947_v57 = vmul.f32 %v6921_v55, %v6842_v6  ;;  %v500_v58 = vmul.f32 %v496_v50, %v6849_v10  ;;  %v293_v62 = vmul.f32 %v6932_v60, %v6849_v10 }
  0xd5   :  { %v723_v63 = vmul.f32 %v720_v51, %v6842_v6  ;;  %v948_v3 = vmul.f32 %v6921_v55, %v6849_v10  ;;  %vm2482_vm2 = vcmask 318712  }
  0xd6   :  { %v6851_v12 = vld [vmem:[#allocation2] sm:$0xff] }
  0xd7   :  { %v825_v15 = vmul.f32 %v824_v5, %v6851_v12  ;;  %v6859_v16 = vld [vmem:[#allocation2 + $0x8] sm:$0xff]  ;;  %v849_v22 = vmul.f32 %v848_v4, %v6851_v12  ;;  %v873_v24 = vmul.f32 %v872_v17, %v6851_v12  ;;  %v649_v31 = vmul.f32 %v648_v11, %v6851_v12 }
  0xd8   :  { %v826_v18 = vmul.f32 %v824_v5, %v6859_v16  ;;  %v650_v21 = vmul.f32 %v648_v11, %v6859_v16  ;;  %v850_v26 = vmul.f32 %v848_v4, %v6859_v16  ;;  %v874_v32 = vmul.f32 %v872_v17, %v6859_v16 }
  0xd9   :  { %663 = vrot.lane.b32.xlu0 %v652_v13, %s6578_s4  ;;  %839 = vrot.lane.b32.xlu1 %v828_v14, %s6578_s4  ;;  %v673_v33 = vmul.f32 %v672_v28, %v6851_v12  ;;  %v674_v41 = vmul.f32 %v672_v28, %v6859_v16  ;;  %v897_v44 = vmul.f32 %v896_v27, %v6851_v12 }
  0xda   :  { %833 = vrot.lane.b32.xlu2 %v825_v15, %s6578_s4  ;;  %v474_v45 = vmul.f32 %v472_v35, %v6859_v16  ;;  %v697_v48 = vmul.f32 %v696_v36, %v6851_v12  ;;  %v898_v49 = vmul.f32 %v896_v27, %v6859_v16  ;;  %v473_v54 = vmul.f32 %v472_v35, %v6851_v12 }
  0xdb   :  { %v698_v56 = vmul.f32 %v696_v36, %v6859_v16  ;;  %v921_v61 = vmul.f32 %v920_v40, %v6851_v12  ;;  %v523_v4 = vmul.f32 %v6943_v1, %v6842_v6  ;;  %v922_v5 = vmul.f32 %v920_v40, %v6859_v16 }
  0xdc   :  { %v722_v11 = vmul.f32 %v720_v51, %v6859_v16  ;;  %v497_v13 = vmul.f32 %v496_v50, %v6851_v12  ;;  %v292_v14 = vmul.f32 %v6932_v60, %v6842_v6  ;;  %v946_v35 = vmul.f32 %v6921_v55, %v6859_v16 }
  0xdd   :  { %v522_v40 = vmul.f32 %v6943_v1, %v6859_v16 }
  0xe1   :  { %885 = vrot.lane.b32.xlu0 %v875_v19, %s6579_s9  ;;  %863 = vrot.lane.b32.xlu1 %v852_v20, %s6577_s28  ;;  %v945_v19 = vmul.f32 %v6921_v55, %v6851_v12  ;;  %v524_v20 = vmul.f32 %v6943_v1, %v6849_v10 }
  0xe2   :  { %835 = vrot.lane.b32.xlu2 %v826_v18, %s6578_s4 }
  0xe9   :  { %659 = vrot.lane.b32.xlu0 %v650_v21, %s6578_s4  ;;  %857 = vrot.lane.b32.xlu1 %v849_v22, %s6577_s28  ;;  %v498_v21 = vmul.f32 %v496_v50, %v6859_v16 }
  0xea   :  { %661 = vrot.lane.b32.xlu2 %v651_v23, %s6578_s4 }
  0xf1   :  { %881 = vrot.lane.b32.xlu0 %v873_v24, %s6579_s9  ;;  %887 = vrot.lane.b32.xlu1 %v876_v25, %s6579_s9  ;;  %v6986_v25 = vstv %s5682_s7  ;;  %s5664_s7 = sld [smem:[#allocation5 + $0x87]] }
  0xf2   :  { %859 = vrot.lane.b32.xlu2 %v850_v26, %s6577_s28  ;;  %v744_v26 = vstv %s5671_s12  ;;  %v972_v27 = vmul.f32 %v6986_v25, %v6849_v10  ;;  %s5656_s12 = sld [smem:[#allocation5 + $0x7]] }
  0xf3   :  { %v747_v28 = vmul.f32 %v744_v26, %v6842_v6  ;;  %v748_v36 = vmul.f32 %v744_v26, %v6849_v10 }
  0xf9   :  { %911 = vrot.lane.b32.xlu0 %v900_v29, %s6580_s19  ;;  %685 = vrot.lane.b32.xlu1 %v675_v30, %s6577_s28  ;;  %v721_v29 = vmul.f32 %v720_v51, %v6851_v12 }
  0xfa   :  { %657 = vrot.lane.b32.xlu2 %v649_v31, %s6578_s4 }
 0x101   :  { %883 = vrot.lane.b32.xlu1 %v874_v32, %s6579_s9  ;;  %681 = vrot.lane.b32.xlu0 %v673_v33, %s6577_s28  ;;  %v7001_v33 = vstv %s5651_s26  ;;  %s5666_s26 = sld [smem:[#allocation5 + $0x100]] }
 0x102   :  { %687 = vrot.lane.b32.xlu2 %v676_v34, %s6577_s28  ;;  %v317_v34 = vmul.f32 %v7001_v33, %v6842_v6 }
 0x109   :  { %485 = vrot.lane.b32.xlu1 %v475_v37, %s6578_s4  ;;  %711 = vrot.lane.b32.xlu0 %v700_v38, %s6579_s9 }
 0x10a   :  { %909 = vrot.lane.b32.xlu2 %v899_v39, %s6580_s19 }
 0x111   :  { %683 = vrot.lane.b32.xlu1 %v674_v41, %s6577_s28  ;;  %933 = vrot.lane.b32.xlu0 %v923_v42, %s6581_s20  ;;  %v290_v41 = vmul.f32 %v6932_v60, %v6851_v12  ;;  %v971_v42 = vmul.f32 %v6986_v25, %v6842_v6 }
 0x112   :  { %487 = vrot.lane.b32.xlu2 %v476_v43, %s6578_s4 }
 0x119   :  { %905 = vrot.lane.b32.xlu1 %v897_v44, %s6580_s19  ;;  %483 = vrot.lane.b32.xlu0 %v474_v45, %s6578_s4 }
 0x11a   :  { %709 = vrot.lane.b32.xlu2 %v699_v46, %s6579_s9  ;;  %v745_v46 = vmul.f32 %v744_v26, %v6851_v12 }
 0x121   :  { %935 = vrot.lane.b32.xlu1 %v924_v47, %s6581_s20  ;;  %705 = vrot.lane.b32.xlu0 %v697_v48, %s6579_s9  ;;  %v318_v47 = vmul.f32 %v7001_v33, %v6849_v10  ;;  %v291_v48 = vmul.f32 %v6932_v60, %v6859_v16 }
 0x122   :  { %907 = vrot.lane.b32.xlu2 %v898_v49, %s6580_s19 }
 0x129   :  { %509 = vrot.lane.b32.xlu1 %v499_v52, %s6577_s28  ;;  %735 = vrot.lane.b32.xlu0 %v724_v53, %s6580_s19  ;;  %v7046_v52 = vstv %s5672_s0  ;;  %v544_v53 = vstv %s5661_s14  ;;  %s7350_s0 = sld [smem:[#allocation9 + $0x100]] }
 0x12a   :  { %481 = vrot.lane.b32.xlu2 %v473_v54, %s6578_s4  ;;  %v772_v54 = vmul.f32 %v7046_v52, %v6849_v10  ;;  %v547_v55 = vmul.f32 %v544_v53, %v6842_v6  ;;  %s7387_s14 = sld [smem:[#allocation5 + $0x80]] }
 0x131   :  { %707 = vrot.lane.b32.xlu1 %v698_v56, %s6579_s9  ;;  %957 = vrot.lane.b32.xlu0 %v947_v57, %s6582_s3  ;;  %v521_v56 = vmul.f32 %v6943_v1, %v6851_v12 }
 0x132   :  { %511 = vrot.lane.b32.xlu2 %v500_v58, %s6577_s28 }
 0x134   :  { %v6930_v59 = vpop.permute.xlu2 %833 }
 0x139   :  { %929 = vrot.lane.b32.xlu1 %v921_v61, %s6581_s20  ;;  %304 = vrot.lane.b32.xlu0 %v293_v62, %s6578_s4  ;;  %v315_v61 = vmul.f32 %v7001_v33, %v6851_v12  ;;  %v746_v62 = vmul.f32 %v744_v26, %v6859_v16  ;;  %v7089_v26 = vstv %s5662_s8  ;;  %s7409_s8 = sld [smem:[#allocation9 + $0x80]] }
 0x13a   :  { %733 = vrot.lane.b32.xlu2 %v723_v63, %s6580_s19  ;;  %v548_v63 = vmul.f32 %v544_v53, %v6849_v10 }
 0x13c   :  { %v6941_v0 = vpop.permute.xlu2 %835 }
 0x141   :  { %959 = vrot.lane.b32.xlu1 %v948_v3, %s6582_s3  ;;  %533 = vrot.lane.b32.xlu0 %v523_v4, %s6579_s9 }
 0x142   :  { %931 = vrot.lane.b32.xlu2 %v922_v5, %s6581_s20  ;;  %v339_v5 = vstv %s5652_s30  ;;  %s7404_s30 = sld [smem:[#allocation5]] }
 0x143   :  { %v6953_v7 = vpop.permute.xlu0 %861  ;;  %v6955_v8 = vpop.permute.xlu1 %837 }
 0x144   :  { %v6957_v9 = vpop.permute.xlu2 %661 }
 0x149   :  { %731 = vrot.lane.b32.xlu0 %v722_v11, %s6580_s19  ;;  %505 = vrot.lane.b32.xlu1 %v497_v13, %s6577_s28  ;;  %v343_v11 = vmul.f32 %v339_v5, %v6849_v10  ;;  %v969_v13 = vmul.f32 %v6986_v25, %v6851_v12 }
 0x14a   :  { %302 = vrot.lane.b32.xlu2 %v292_v14, %s6578_s4  ;;  %v771_v14 = vmul.f32 %v7046_v52, %v6842_v6 }
 0x14b   :  { %v6966_v15 = vpop.permute.xlu0 %663  ;;  %v6968_v17 = vpop.permute.xlu1 %839 }
 0x14c   :  { %v6970_v18 = vpop.permute.xlu2 %859  ;;  %v842_v2 = vsel %vm306_vm3, %v6955_v8, %v6968_v17 }
 0x151   :  { %953 = vrot.lane.b32.xlu0 %v945_v19, %s6582_s3  ;;  %535 = vrot.lane.b32.xlu1 %v524_v20, %s6579_s9 }
 0x152   :  { %507 = vrot.lane.b32.xlu2 %v498_v21, %s6577_s28 }
 0x153   :  { %v6980_v22 = vpop.permute.xlu0 %885  ;;  %v6982_v23 = vpop.permute.xlu1 %863 }
 0x154   :  { %v6984_v24 = vpop.permute.xlu2 %657 }
 0x159   :  { %983 = vrot.lane.b32.xlu0 %v972_v27, %s6583_s11  ;;  %757 = vrot.lane.b32.xlu1 %v747_v28, %s6581_s20  ;;  %v571_v27 = vmul.f32 %v7089_v26, %v6842_v6  ;;  %v316_v28 = vmul.f32 %v7001_v33, %v6859_v16  ;;  %v545_v33 = vmul.f32 %v544_v53, %v6851_v12 }
 0x15a   :  { %729 = vrot.lane.b32.xlu2 %v721_v29, %s6580_s19  ;;  %v970_v29 = vmul.f32 %v6986_v25, %v6859_v16 }
 0x15b   :  { %v6995_v30 = vpop.permute.xlu0 %659  ;;  %v6997_v31 = vpop.permute.xlu1 %857 }
 0x15c   :  { %v6999_v32 = vpop.permute.xlu2 %687 }
 0x161   :  { %327 = vrot.lane.b32.xlu0 %v317_v34, %s6577_s28  ;;  %955 = vrot.lane.b32.xlu1 %v946_v35, %s6582_s3 }
 0x162   :  { %759 = vrot.lane.b32.xlu2 %v748_v36, %s6581_s20 }
 0x163   :  { %v7011_v37 = vpop.permute.xlu0 %881  ;;  %v7013_v38 = vpop.permute.xlu1 %887 }
 0x164   :  { %v7015_v39 = vpop.permute.xlu2 %909  ;;  %v890_v8 = vsel %vm356_vm5, %v6980_v22, %v7013_v38 }
 0x169   :  { %531 = vrot.lane.b32.xlu0 %v522_v40, %s6579_s9  ;;  %298 = vrot.lane.b32.xlu1 %v290_v41, %s6578_s4  ;;  %v770_v40 = vmul.f32 %v7046_v52, %v6859_v16  ;;  %v342_v41 = vmul.f32 %v339_v5, %v6842_v6 }
 0x16a   :  { %981 = vrot.lane.b32.xlu2 %v971_v42, %s6583_s11 }
 0x16b   :  { %v7026_v43 = vpop.permute.xlu0 %911  ;;  %v7028_v44 = vpop.permute.xlu1 %685 }
 0x16c   :  { %v7030_v45 = vpop.permute.xlu2 %487 }
 0x171   :  { %753 = vrot.lane.b32.xlu0 %v745_v46, %s6581_s20  ;;  %329 = vrot.lane.b32.xlu1 %v318_v47, %s6577_s28  ;;  %v340_v47 = vmul.f32 %v339_v5, %v6851_v12 }
 0x172   :  { %300 = vrot.lane.b32.xlu2 %v291_v48, %s6578_s4  ;;  %v572_v48 = vmul.f32 %v7089_v26, %v6849_v10 }
 0x173   :  { %v7040_v49 = vpop.permute.xlu1 %883  ;;  %v7042_v50 = vpop.permute.xlu0 %681 }
 0x174   :  { %v7044_v51 = vpop.permute.xlu2 %709 }
 0x179   :  { %783 = vrot.lane.b32.xlu0 %v772_v54, %s6582_s3  ;;  %557 = vrot.lane.b32.xlu1 %v547_v55, %s6580_s19  ;;  %v546_v54 = vmul.f32 %v544_v53, %v6859_v16 }
 0x17a   :  { %529 = vrot.lane.b32.xlu2 %v521_v56, %s6579_s9 }
 0x17b   :  { %v7056_v57 = vpop.permute.xlu1 %485  ;;  %v7058_v58 = vpop.permute.xlu0 %711 }
 0x17c   :  { %v7060_v60 = vpop.permute.xlu2 %907 }
 0x181   :  { %323 = vrot.lane.b32.xlu0 %v315_v61, %s6577_s28  ;;  %755 = vrot.lane.b32.xlu1 %v746_v62, %s6581_s20  ;;  %v7132_v62 = vstv %s5653_s2  ;;  %s6588_s2 = smov 36  }
 0x182   :  { %559 = vrot.lane.b32.xlu2 %v548_v63, %s6580_s19  ;;  %v7134_v63 = vstv %s5673_s6  ;;  %v368_v53 = vmul.f32 %v7132_v62, %v6849_v10  ;;  %s6589_s6 = smov 84  }
 0x183   :  { %v7069_v1 = vpop.permute.xlu1 %683  ;;  %v7071_v3 = vpop.permute.xlu0 %933 }
 0x184   :  { %v7073_v4 = vpop.permute.xlu2 %481 }
 0x189   :  { %354 = vrot.lane.b32.xlu0 %v343_v11, %s6579_s9  ;;  %977 = vrot.lane.b32.xlu1 %v969_v13, %s6583_s11  ;;  %v795_v11 = vmul.f32 %v7134_v63, %v6842_v6  ;;  %v769_v13 = vmul.f32 %v7046_v52, %v6851_v12  ;;  %v796_v52 = vmul.f32 %v7134_v63, %v6849_v10 }
 0x18a   :  { %781 = vrot.lane.b32.xlu2 %v771_v14, %s6582_s3 }
 0x18b   :  { %v7083_v19 = vpop.permute.xlu1 %905  ;;  %v7085_v20 = vpop.permute.xlu0 %483 }
 0x18c   :  { %v7087_v21 = vpop.permute.xlu2 %511 }
 0x191   :  { %581 = vrot.lane.b32.xlu0 %v571_v27, %s6581_s20  ;;  %325 = vrot.lane.b32.xlu1 %v316_v28, %s6577_s28 }
 0x192   :  { %979 = vrot.lane.b32.xlu2 %v970_v29, %s6583_s11  ;;  %v7151_v29 = vstv %s5663_s1  ;;  %s10074_s1 = sld [smem:[#allocation81_spill]] }
 0x193   :  { %v7100_v34 = vpop.permute.xlu1 %935  ;;  %v7102_v35 = vpop.permute.xlu0 %705 }
 0x194   :  { %v7104_v36 = vpop.permute.xlu2 %733  ;;  %v938_v22 = vsel %vm406_vm7, %v7071_v3, %v7100_v34 }
 0x199   :  { %779 = vrot.lane.b32.xlu0 %v770_v40, %s6582_s3  ;;  %553 = vrot.lane.b32.xlu1 %v545_v33, %s6580_s19  ;;  %v595_v40 = vmul.f32 %v7151_v29, %v6842_v6  ;;  %v341_v33 = vmul.f32 %v339_v5, %v6859_v16  ;;  %v794_v5 = vmul.f32 %v7134_v63, %v6859_v16 }
 0x19a   :  { %352 = vrot.lane.b32.xlu2 %v342_v41, %s6579_s9 }
 0x19b   :  { %v7113_v25 = vpop.permute.xlu1 %509  ;;  %v7115_v42 = vpop.permute.xlu0 %735 }
 0x19c   :  { %v7117_v46 = vpop.permute.xlu2 %931 }
 0x1a1   :  { %348 = vrot.lane.b32.xlu0 %v340_v47, %s6579_s9  ;;  %583 = vrot.lane.b32.xlu1 %v572_v48, %s6581_s20 }
 0x1a2   :  { %555 = vrot.lane.b32.xlu2 %v546_v54, %s6580_s19  ;;  %v569_v54 = vmul.f32 %v7089_v26, %v6851_v12 }
 0x1a3   :  { %v7126_v55 = vpop.permute.xlu1 %707  ;;  %v7128_v56 = vpop.permute.xlu0 %957 }
 0x1a4   :  { %v7130_v61 = vpop.permute.xlu2 %302 }
 0x1a5   :  { %10065 = vst [vmem:[#allocation39_spill] sm:$0xff] %v7130_v61 }
 0x1a9   :  { %379 = vrot.lane.b32.xlu0 %v368_v53, %s6580_s19  ;;  %805 = vrot.lane.b32.xlu1 %v795_v11, %s6583_s11  ;;  %v367_v53 = vmul.f32 %v7132_v62, %v6842_v6 }
 0x1aa   :  { %777 = vrot.lane.b32.xlu2 %v769_v13, %s6582_s3 }
 0x1ab   :  { %v7145_v14 = vpop.permute.xlu1 %929  ;;  %v7147_v27 = vpop.permute.xlu0 %304 }
 0x1ac   :  { %v7149_v28 = vpop.permute.xlu2 %507 }
 0x1ad   :  { %10066 = vst [vmem:[#allocation40_spill] sm:$0xff] %v7149_v28  ;;  %v570_v28 = vmul.f32 %v7089_v26, %v6859_v16 }
 0x1b1   :  { %605 = vrot.lane.b32.xlu0 %v595_v40, %s6582_s3  ;;  %350 = vrot.lane.b32.xlu1 %v341_v33, %s6579_s9  ;;  %v9990_v40 = vstv %s7161_s22 }
 0x1b2   :  { %807 = vrot.lane.b32.xlu2 %v796_v52, %s6583_s11  ;;  %v7183_v52 = vstv %s5654_s24  ;;  %s6592_s24 = smov 72  }
 0x1b3   :  { %v960_v41 = vpop.permute.xlu1 %959  ;;  %v7163_v47 = vpop.permute.xlu0 %533 }
 0x1b4   :  { %v7165_v48 = vpop.permute.xlu2 %729 }
 0x1b9   :  { %803 = vrot.lane.b32.xlu0 %v794_v5, %s6583_s11  ;;  %577 = vrot.lane.b32.xlu1 %v569_v54, %s6581_s20  ;;  %v822_v5 = vmul.f32 %v9990_v40, %v6842_v6  ;;  %v392_v54 = vmul.f32 %v7183_v52, %v6842_v6 }
 0x1ba   :  { %377 = vrot.lane.b32.xlu2 %v367_v53, %s6580_s19  ;;  %v596_v53 = vmul.f32 %v7151_v29, %v6849_v10 }
 0x1bb   :  { %v7176_v11 = vpop.permute.xlu0 %731  ;;  %v7178_v13 = vpop.permute.xlu1 %505  ;;  %v846_v61 = vadd.f32 %v842_v2, %v822_v5  ;;  %v914_v2 = vsel %vm381_vm6, %v7015_v39, %v7026_v43  ;;  %v962_v39 = vsel %vm431_vm8, %v7128_v56, %v960_v41  ;;  %v793_v43 = vmul.f32 %v7134_v63, %v6851_v12 }
 0x1bc   :  { %10067 = vst [vmem:[#allocation41_spill] sm:$0xff] %v7178_v13  ;;  %v7181_v33 = vpop.permute.xlu2 %759  ;;  %v866_v13 = vsel %vm331_vm4, %v6953_v7, %v6982_v23  ;;  %v9991_v56 = vstv %s7213_s29 }
 0x1bd   :  { %v870_v17 = vadd.f32 %v866_v13, %v846_v61  ;;  %v594_v61 = vmul.f32 %v7151_v29, %v6859_v16 }
 0x1bf   :  { %v894_v26 = vadd.f32 %v890_v8, %v870_v17  ;;  %v390_v8 = vmul.f32 %v7183_v52, %v6851_v12  ;;  %v366_v17 = vmul.f32 %v7132_v62, %v6859_v16 }
 0x1c1   :  { %402 = vrot.lane.b32.xlu0 %v392_v54, %s6581_s20  ;;  %607 = vrot.lane.b32.xlu1 %v596_v53, %s6582_s3  ;;  %v918_v38 = vadd.f32 %v914_v2, %v894_v26  ;;  %v393_v2 = vmul.f32 %v7183_v52, %v6849_v10 }
 0x1c2   :  { %579 = vrot.lane.b32.xlu2 %v570_v28, %s6581_s20  ;;  %v365_v28 = vmul.f32 %v7132_v62, %v6851_v12  ;;  %v593_v62 = vmul.f32 %v7151_v29, %v6851_v12  ;;  %v391_v29 = vmul.f32 %v7183_v52, %v6859_v16 }
 0x1c3   :  { %v7206_v40 = vpop.permute.xlu0 %953  ;;  %v7208_v7 = vpop.permute.xlu1 %535  ;;  %v942_v13 = vadd.f32 %v938_v22, %v918_v38  ;;  %v414_v38 = vstv %s5655_s27  ;;  %s6594_s27 = smov 52  }
 0x1c4   :  { %v982_v23 = vpop.permute.xlu2 %981 }
 0x1c5   :  { %v966_v3 = vadd.f32 %v962_v39, %v942_v13 }
 0x1c9   :  { %603 = vrot.lane.b32.xlu0 %v594_v61, %s6582_s3  ;;  %373 = vrot.lane.b32.xlu1 %v365_v28, %s6580_s19  ;;  %v616_v61 = vstv %s5664_s7  ;;  %v418_v28 = vmul.f32 %v414_v38, %v6849_v10  ;;  %s6595_s7 = smov 76  }
 0x1ca   :  { %801 = vrot.lane.b32.xlu2 %v793_v43, %s6583_s11  ;;  %v619_v39 = vmul.f32 %v616_v61, %v6842_v6  ;;  %v617_v52 = vmul.f32 %v616_v61, %v6851_v12 }
 0x1cb   :  { %v984_v34 = vpop.permute.xlu0 %983  ;;  %v7229_v5 = vpop.permute.xlu1 %757 }
 0x1cc   :  { %v986_v54 = vsel %vm456_vm9, %v982_v23, %v984_v34  ;;  %v7232_v53 = vpop.permute.xlu2 %300  ;;  %v415_v34 = vmul.f32 %v414_v38, %v6851_v12 }
 0x1cd   :  { %v990_v41 = vadd.f32 %v986_v54, %v966_v3  ;;  %v620_v54 = vmul.f32 %v616_v61, %v6849_v10 }
 0x1cf   :  { %v994_v63 = vadd.f32 %v9991_v56, %v990_v41  ;;  %v865_v56 = vsel %vm331_vm4, %v6997_v31, %v6970_v18  ;;  %v913_v18 = vsel %vm381_vm6, %v7083_v19, %v7060_v60 }
 0x1d1   :  { %1024 = vmatpush.msra.mxu0 %v994_v63  ;;  %398 = vrot.lane.b32.xlu0 %v390_v8, %s6581_s20 }
 0x1d2   :  { %375 = vrot.lane.b32.xlu2 %v366_v17, %s6580_s19  ;;  %404 = vrot.lane.b32.xlu1 %v393_v2, %s6581_s20  ;;  %v439_v17 = vstv %s5656_s12  ;;  %s10076_s12 = sld [smem:[#allocation80_spill]] }
 0x1d3   :  { %v7246_v23 = vpop.permute.xlu0 %327  ;;  %v956_v26 = vpop.permute.xlu1 %955  ;;  %v443_v2 = vmul.f32 %v439_v17, %v6849_v10  ;;  %v10069_v10 = vstv %s7161_s22  ;;  %s7452_s22 = sld [smem:[#allocation9]] }
 0x1d4   :  { %v7248_v22 = vpop.permute.xlu2 %529 }
 0x1d9   :  { %429 = vrot.lane.b32.xlu0 %v418_v28, %s6582_s3  ;;  %v417_v28 = vmul.f32 %v414_v38, %v6842_v6 }
 0x1da   :  { %601 = vrot.lane.b32.xlu2 %v593_v62, %s6582_s3  ;;  %629 = vrot.lane.b32.xlu1 %v619_v39, %s6583_s11 }
 0x1db   :  { %v7257_v43 = vpop.permute.xlu0 %531  ;;  %v7259_v13 = vpop.permute.xlu1 %298 }
 0x1dc   :  { %10068 = vst [vmem:[#allocation42_spill] sm:$0xff] %v7259_v13  ;;  %v7261_v3 = vpop.permute.xlu2 %559  ;;  %v889_v13 = vsel %vm356_vm5, %v7011_v37, %v7040_v49  ;;  %v937_v37 = vsel %vm406_vm7, %v7145_v14, %v7117_v46 }
 0x1e1   :  { %423 = vrot.lane.b32.xlu0 %v415_v34, %s6582_s3 }
 0x1e2   :  { %631 = vrot.lane.b32.xlu2 %v620_v54, %s6583_s11  ;;  %400 = vrot.lane.b32.xlu1 %v391_v29, %s6581_s20  ;;  %v841_v54 = vsel %vm306_vm3, %v6930_v59, %v6941_v0  ;;  %v821_v29 = vmul.f32 %v10069_v10, %v6851_v12 }
 0x1e3   :  { %v7270_v41 = vpop.permute.xlu0 %753  ;;  %v7272_v63 = vpop.permute.xlu1 %329 }
 0x1e4   :  { %v7274_v8 = vpop.permute.xlu2 %781 }
 0x1e9   :  { %454 = vrot.lane.b32.xlu0 %v443_v2, %s6583_s11  ;;  %v618_v2 = vmul.f32 %v616_v61, %v6859_v16  ;;  %v442_v61 = vmul.f32 %v439_v17, %v6842_v6 }
 0x1ea   :  { %427 = vrot.lane.b32.xlu2 %v417_v28, %s6582_s3  ;;  %625 = vrot.lane.b32.xlu1 %v617_v52, %s6583_s11  ;;  %v416_v28 = vmul.f32 %v414_v38, %v6859_v16  ;;  %v845_v52 = vadd.f32 %v841_v54, %v821_v29  ;;  %v440_v54 = vmul.f32 %v439_v17, %v6851_v12 }
 0x1eb   :  { %v784_v62 = vpop.permute.xlu0 %783  ;;  %v7282_v39 = vpop.permute.xlu1 %557 }
 0x1ec   :  { %v980_v34 = vpop.permute.xlu2 %979  ;;  %v869_v59 = vadd.f32 %v865_v56, %v845_v52  ;;  %v961_v56 = vsel %vm431_vm8, %v7206_v40, %v956_v26  ;;  %v441_v26 = vmul.f32 %v439_v17, %v6859_v16  ;;  %v690_v17 = vsel %vm331_vm4, %v7028_v44, %v6999_v32 }
 0x1ed   :  { %v762_v32 = vsel %vm406_vm7, %v7229_v5, %v7181_v33 }
 0x1ee   :  { %v893_v38 = vadd.f32 %v889_v13, %v869_v59 }
 0x1f0   :  { %v917_v49 = vadd.f32 %v913_v18, %v893_v38 }
 0x1f2   :  { %627 = vrot.lane.b32.xlu2 %v618_v2, %s6583_s11  ;;  %425 = vrot.lane.b32.xlu1 %v416_v28, %s6582_s3  ;;  %v941_v29 = vadd.f32 %v937_v37, %v917_v49  ;;  %v10070_v28 = vstv %s7213_s29  ;;  %v644_v49 = vstv %s5666_s26  ;;  %s6593_s29 = smov 92   ;;  %s9992_s26 = smov 88  }
 0x1f3   :  { %v7300_v0 = vpop.permute.xlu0 %323  ;;  %v7302_v10 = vpop.permute.xlu1 %755  ;;  %v646_v16 = vmul.f32 %v644_v49, %v6842_v6  ;;  %v645_v33 = vmul.f32 %v644_v49, %v6851_v12 }
 0x1f4   :  { %v7307_v31 = vpop.permute.xlu2 %352  ;;  %v965_v60 = vadd.f32 %v961_v56, %v941_v29 }
 0x1fa   :  { %452 = vrot.lane.b32.xlu2 %v442_v61, %s6583_s11  ;;  %448 = vrot.lane.b32.xlu1 %v440_v54, %s6583_s11  ;;  %v714_v54 = vsel %vm356_vm5, %v7044_v51, %v7058_v58  ;;  %v786_v51 = vsel %vm431_vm8, %v7274_v8, %v784_v62  ;;  %v689_v8 = vsel %vm331_vm4, %v7042_v50, %v7069_v1 }
 0x1fb   :  { %v7318_v19 = vpop.permute.xlu0 %354  ;;  %v978_v13 = vpop.permute.xlu1 %977  ;;  %v761_v50 = vsel %vm406_vm7, %v7270_v41, %v7302_v10 }
 0x1fc   :  { %v7320_v2 = vpop.permute.xlu2 %555  ;;  %v985_v46 = vsel %vm456_vm9, %v978_v13, %v980_v34  ;;  %v666_v34 = vsel %vm306_vm3, %v6957_v9, %v6966_v15 }
 0x1fd   :  { %v989_v14 = vadd.f32 %v985_v46, %v965_v60  ;;  %v670_v61 = vadd.f32 %v666_v34, %v646_v16  ;;  %v738_v46 = vsel %vm381_vm6, %v7104_v36, %v7115_v42  ;;  %v665_v16 = vsel %vm306_vm3, %v6984_v24, %v6995_v30 }
 0x1fe   :  { %v669_v62 = vadd.f32 %v665_v16, %v645_v33  ;;  %v737_v24 = vsel %vm381_vm6, %v7165_v48, %v7176_v11  ;;  %v538_v16 = vsel %vm356_vm5, %v7163_v47, %v7208_v7 }
 0x1ff   :  { %v993_v40 = vadd.f32 %v10070_v28, %v989_v14  ;;  %v694_v29 = vadd.f32 %v690_v17, %v670_v61  ;;  %v713_v17 = vsel %vm356_vm5, %v7102_v35, %v7126_v55 }
 0x201   :  { %1025 = vmatpush.msra.mxu0 %v993_v40  ;;  %v718_v15 = vadd.f32 %v714_v54, %v694_v29 }
 0x202   :  { %450 = vrot.lane.b32.xlu2 %v441_v26, %s6583_s11  ;;  %v816_v26 = vstv %s7350_s0  ;;  %s6598_s0 = smov 40  }
 0x203   :  { %v7327_v52 = vpop.permute.xlu0 %581  ;;  %v7329_v59 = vpop.permute.xlu1 %325  ;;  %v742_v44 = vadd.f32 %v738_v46, %v718_v15 }
 0x204   :  { %v778_v18 = vpop.permute.xlu2 %777 }
 0x205   :  { %v766_v58 = vadd.f32 %v762_v32, %v742_v44 }
 0x207   :  { %v790_v14 = vadd.f32 %v786_v51, %v766_v58 }
 0x20b   :  { %v780_v38 = vpop.permute.xlu0 %779  ;;  %v7331_v37 = vpop.permute.xlu1 %553 }
 0x20c   :  { %v808_v56 = vpop.permute.xlu2 %807  ;;  %v785_v29 = vsel %vm431_vm8, %v778_v18, %v780_v38  ;;  %v468_v18 = vstv %s7387_s14  ;;  %s6585_s14 = smov 68  }
 0x213   :  { %v7343_v60 = vpop.permute.xlu0 %348  ;;  %v584_v13 = vpop.permute.xlu1 %583 }
 0x214   :  { %v7348_v9 = vpop.permute.xlu2 %377 }
 0x21b   :  { %v7357_v28 = vpop.permute.xlu0 %379  ;;  %v806_v40 = vpop.permute.xlu1 %805 }
 0x21c   :  { %v7359_v36 = vpop.permute.xlu2 %579  ;;  %v810_v42 = vsel %vm456_vm9, %v806_v40, %v808_v56  ;;  %v693_v56 = vadd.f32 %v689_v8, %v669_v62  ;;  %v490_v40 = vsel %vm306_vm3, %v7056_v57, %v7030_v45  ;;  %v562_v45 = vsel %vm381_vm6, %v7282_v39, %v7261_v3 }
 0x21d   :  { %v814_v34 = vadd.f32 %v810_v42, %v790_v14  ;;  %v470_v42 = vmul.f32 %v468_v18, %v6842_v6  ;;  %v489_v39 = vsel %vm306_vm3, %v7073_v4, %v7085_v20  ;;  %v537_v20 = vsel %vm356_vm5, %v7248_v22, %v7257_v43 }
 0x21e   :  { %v717_v49 = vadd.f32 %v713_v17, %v693_v56  ;;  %v561_v22 = vsel %vm381_vm6, %v7331_v37, %v7320_v2  ;;  %v383_v43 = vsel %vm381_vm6, %v7348_v9, %v7357_v28 }
 0x21f   :  { %v818_v5 = vadd.f32 %v816_v26, %v814_v34  ;;  %v494_v34 = vadd.f32 %v490_v40, %v470_v42 }
 0x220   :  { %v741_v1 = vadd.f32 %v737_v24, %v717_v49 }
 0x221   :  { %1026 = vmatpush.msra.mxu0 %v818_v5 }
 0x222   :  { %v765_v46 = vadd.f32 %v761_v50, %v741_v1  ;;  %v640_v50 = vstv %s7409_s8  ;;  %v10071_v1 = vld [vmem:[#allocation39_spill] sm:$0xff]  ;;  %s6587_s8 = smov 116  }
 0x223   :  { %v606_v61 = vpop.permute.xlu0 %605  ;;  %v7373_v54 = vpop.permute.xlu1 %350 }
 0x224   :  { %v802_v30 = vpop.permute.xlu2 %801  ;;  %v789_v15 = vadd.f32 %v785_v29, %v765_v46  ;;  %v10072_v46 = vld [vmem:[#allocation40_spill] sm:$0xff] }
 0x22b   :  { %v804_v35 = vpop.permute.xlu0 %803  ;;  %v7382_v55 = vpop.permute.xlu1 %577 }
 0x22c   :  { %v7384_v32 = vpop.permute.xlu2 %375  ;;  %v809_v44 = vsel %vm456_vm9, %v802_v30, %v804_v35  ;;  %v285_v30 = vstv %s7404_s30  ;;  %s6586_s30 = smov 100  }
 0x22d   :  { %v813_v51 = vadd.f32 %v809_v44, %v789_v15  ;;  %v10073_v15 = vld [vmem:[#allocation41_spill] sm:$0xff]  ;;  %v333_v44 = vsel %vm331_vm4, %v7246_v23, %v7272_v63  ;;  %v9996_v63 = vmov 0  }
 0x22e   :  { %v513_v35 = vsel %vm331_vm4, %v10073_v15, %v10072_v46  ;;  %5888 = vset.pattern.permute.xlu1 %v9996_v63  ;;  %5887 = vset.pattern.permute.xlu0 %v9996_v63  ;;  %v995_v46 = vld [vmem:[%s10076_s12] sm:$0xff] }
 0x22f   :  { %v817_v48 = vadd.f32 %v816_v26, %v813_v51  ;;  %v514_v26 = vsel %vm331_vm4, %v7113_v25, %v7087_v21  ;;  %v586_v21 = vsel %vm406_vm7, %v7327_v52, %v584_v13  ;;  %v308_v52 = vsel %vm306_vm3, %v10071_v1, %v7147_v27  ;;  %v997_v27 = vld [vmem:[%s10074_s1] sm:$0xff] }
 0x230   :  { %v518_v5 = vadd.f32 %v514_v26, %v494_v34  ;;  %v469_v13 = vmul.f32 %v468_v18, %v6851_v12  ;;  %1001 = vperm.xlu1 %5888, %v997_v27  }
 0x231   :  { %1027 = vmatpush.msra.mxu0 %v817_v48 }
 0x232   :  { %v542_v57 = vadd.f32 %v538_v16, %v518_v5  ;;  %v493_v48 = vadd.f32 %v489_v39, %v469_v13  ;;  %v998_v5 = vld [vmem:[%s10074_s1 + $0x8] sm:$0xff]  ;;  %s6590_s1 = smov 104  }
 0x233   :  { %v403_v11 = vpop.permute.xlu0 %402  ;;  %v608_v58 = vpop.permute.xlu1 %607  ;;  %1006 = vperm.xlu0 %5887, %v998_v5  }
 0x234   :  { %v602_v14 = vpop.permute.xlu2 %601  ;;  %v566_v47 = vadd.f32 %v562_v45, %v542_v57  ;;  %v610_v7 = vsel %vm431_vm8, %v606_v61, %v608_v58  ;;  %v287_v61 = vmul.f32 %v285_v30, %v6842_v6  ;;  %v358_v6 = vsel %vm356_vm5, %v7307_v31, %v7318_v19  ;;  %v10075_v57 = vld [vmem:[#allocation42_spill] sm:$0xff] }
 0x235   :  { %v517_v58 = vadd.f32 %v513_v35, %v493_v48 }
 0x236   :  { %v590_v62 = vadd.f32 %v586_v21, %v566_v47  ;;  %v312_v4 = vadd.f32 %v308_v52, %v287_v61  ;;  %v307_v21 = vsel %vm306_vm3, %v10075_v57, %v7232_v53  ;;  %v6226_v47 = vld [vmem:[#allocation2] sm:$0xff]  ;;  %vm2589_vm3 = vcmask 1041409  }
 0x237   :  { %v541_v31 = vadd.f32 %v537_v20, %v517_v58 }
 0x238   :  { %v614_v56 = vadd.f32 %v610_v7, %v590_v62  ;;  %v337_v18 = vadd.f32 %v333_v44, %v312_v4  ;;  %v286_v7 = vmul.f32 %v6226_v47, %v285_v30 }
 0x239   :  { %v565_v42 = vadd.f32 %v561_v22, %v541_v31 }
 0x23a   :  { %v362_v19 = vadd.f32 %v358_v6, %v337_v18 }
 0x23b   :  { %v604_v41 = vpop.permute.xlu0 %603  ;;  %v7389_v10 = vpop.permute.xlu1 %373 }
 0x23c   :  { %v632_v38 = vpop.permute.xlu2 %631  ;;  %v387_v26 = vadd.f32 %v383_v43, %v362_v19  ;;  %v609_v34 = vsel %vm431_vm8, %v602_v14, %v604_v41  ;;  %v382_v53 = vsel %vm381_vm6, %v7389_v10, %v7384_v32  ;;  %v996_v32 = vld [vmem:[%s10076_s12 + $0x8] sm:$0xff]  ;;  %s6596_s12 = smov 108   ;;  %vm2591_vm6 = vcmask 1042434  }
 0x243   :  { %v7402_v33 = vpop.permute.xlu0 %398 }
 0x244   :  { %v405_v8 = vpop.permute.xlu1 %404  ;;  %v428_v25 = vpop.permute.xlu2 %427 }
 0x245   :  { %v408_v40 = vsel %vm406_vm7, %v403_v11, %v405_v8 }
 0x246   :  { %v412_v9 = vadd.f32 %v408_v40, %v387_v26 }
 0x24b   :  { %v430_v17 = vpop.permute.xlu0 %429 }
 0x24c   :  { %v630_v24 = vpop.permute.xlu1 %629  ;;  %v628_v51 = vpop.permute.xlu2 %627  ;;  %v433_v2 = vsel %vm431_vm8, %v428_v25, %v430_v17  ;;  %v464_v25 = vstv %s7452_s22  ;;  %v332_v17 = vsel %vm331_vm4, %v7300_v0, %v7329_v59  ;;  %s6591_s22 = smov 120   ;;  %vm2398_vm4 = vcmask 56320  }
 0x24d   :  { %v634_v49 = vsel %vm456_vm9, %v630_v24, %v632_v38  ;;  %v585_v38 = vsel %vm406_vm7, %v7382_v55, %v7359_v36  ;;  %v437_v55 = vadd.f32 %v433_v2, %v412_v9 }
 0x24e   :  { %v638_v3 = vadd.f32 %v634_v49, %v614_v56  ;;  %v589_v37 = vadd.f32 %v585_v38, %v565_v42  ;;  %v311_v56 = vadd.f32 %v307_v21, %v286_v7  ;;  %v357_v49 = vsel %vm356_vm5, %v7343_v60, %v7373_v54 }
 0x24f   :  { %vm2401_vm5 = vcmask 384312  }
 0x250   :  { %v642_v29 = vadd.f32 %v640_v50, %v638_v3  ;;  %v613_v36 = vadd.f32 %v609_v34, %v589_v37  ;;  %v336_v3 = vadd.f32 %v332_v17, %v311_v56 }
 0x252   :  { %1028 = vmatpush.msra.mxu0 %v642_v29  ;;  %v361_v30 = vadd.f32 %v357_v49, %v336_v3 }
 0x253   :  { %v424_v12 = vpop.permute.xlu0 %423 }
 0x254   :  { %v401_v23 = vpop.permute.xlu1 %400  ;;  %v453_v28 = vpop.permute.xlu2 %452  ;;  %v386_v1 = vadd.f32 %v382_v53, %v361_v30 }
 0x25b   :  { %v455_v16 = vpop.permute.xlu0 %454 }
 0x25c   :  { %v458_v11 = vsel %vm456_vm9, %v453_v28, %v455_v16  ;;  %v626_v8 = vpop.permute.xlu1 %625  ;;  %v451_v52 = vpop.permute.xlu2 %450 }
 0x25d   :  { %v633_v45 = vsel %vm456_vm9, %v626_v8, %v628_v51  ;;  %v462_v14 = vadd.f32 %v458_v11, %v437_v55 }
 0x25e   :  { %v637_v41 = vadd.f32 %v633_v45, %v613_v36 }
 0x25f   :  { %v466_v24 = vadd.f32 %v464_v25, %v462_v14 }
 0x260   :  { %v641_v62 = vadd.f32 %v640_v50, %v637_v41  ;;  %v407_v50 = vsel %vm406_vm7, %v7402_v33, %v401_v23  ;;  %vm2593_vm7 = vcmask 1043459  }
 0x261   :  { %v411_v59 = vadd.f32 %v407_v50, %v386_v1 }
 0x262   :  { %1029 = vmatpush.msra.mxu0 %v641_v62 }
 0x264   :  { %1030 = vmatpush.msra.mxu0 %v466_v24  ;;  %v426_v39 = vpop.permute.xlu1 %425 }
 0x265   :  { %v432_v0 = vsel %vm431_vm8, %v424_v12, %v426_v39  ;;  %vm2595_vm8 = vcmask 1044484  }
 0x266   :  { %v436_v13 = vadd.f32 %v432_v0, %v411_v59 }
 0x26c   :  { %v449_v61 = vpop.permute.xlu1 %448 }
 0x26d   :  { %v457_v60 = vsel %vm456_vm9, %v449_v61, %v451_v52  ;;  %v6613_v52 = vmov 1983009808   ;;  %vm2597_vm9 = vcmask 1045509  }
 0x26e   :  { %v461_v54 = vadd.f32 %v457_v60, %v436_v13  ;;  %v1243_v13 = vunpack.c.l.s4 %v6613_v52 }
 0x270   :  { %v465_v29 = vadd.f32 %v464_v25, %v461_v54 }
 0x272   :  { %1031 = vmatpush.msra.mxu0 %v465_v29  ;;  %v7671_v29 = vunpack.c.0.s8 %v1243_v13 }
 0x273   :  { %5684 = vmatmul.msk.f32.vlgmr.msra.gmra.mxu0 %vm1009_vm10, %v995_v46 }
 0x274   :  { %10104 = vst [vmem:[#allocation66_spill] sm:$0xff] %v7671_v29 }
 0x27b   :  { %5685 = vmatmul.msk.f32.gmra.mxu0 %vm1009_vm10, %v996_v32  ;;  %vm2599_vm10 = vcmask 1046534  }
 0x2a2   :  { %v1002_v10 = vpop.permute.xlu1 %1001 }
 0x2a5   :  { %v1007_v4 = vpop.permute.xlu0 %1006 }
 0x2f0   :  { %v1033_v33 = vpop.f32.mrf.mxu0 }
 0x2f1   :  { %v1034_v15 = vadd.f32 %v1033_v33, %v1002_v10 }
 0x2f3   :  { %v1041_v35 = vmul.f32 1.442695, %v1034_v15  ;;  %vm1039_vm11 = vcmp.gt.f32.partialorder %v1034_v15, 0.0 }
 0x2f5   :  { %6000 = vpow2.f32 %v1041_v35 }
 0x2f8   :  { %v1036_v20 = vpop.f32.mrf.mxu0 }
 0x2f9   :  { %v1037_v6 = vadd.f32 %v1036_v20, %v1007_v4 }
 0x2fb   :  { %v6001_v44 = vpop.eup %6000  ;;  %v1043_v12 = vmul.f32 1.442695, %v1037_v6  ;;  %vm1040_vm12 = vcmp.gt.f32.partialorder %v1037_v6, 0.0 }
 0x2fc   :  { %v5686_v51 = vadd.f32 -1.0, %v6001_v44 }
 0x2fd   :  { %6002 = vpow2.f32 %v1043_v12 }
 0x2fe   :  { %v7484_v48 = vsel %vm1039_vm11, %v1034_v15, %v5686_v51  ;;  %vm2601_vm11 = vcmask 1047559  }
 0x2ff   :  { %10077 = vst [vmem:[#allocation39_spill] sm:$0xff] %v7484_v48  ;;  %1135 = vrot.lane.b32.xlu2 %v7484_v48, %s6585_s14  ;;  %1087 = vrot.lane.b32.xlu0 %v7484_v48, %s6586_s30 }
 0x300   :  { %1063 = vrot.lane.b32.xlu1 %v7484_v48, %s6587_s8 }
 0x303   :  { %v6003_v27 = vpop.eup %6002 }
 0x304   :  { %v5687_v58 = vadd.f32 -1.0, %v6003_v27 }
 0x306   :  { %v7505_v18 = vsel %vm1040_vm12, %v1037_v6, %v5687_v58  ;;  %v6614_v58 = vmov 1934713408   ;;  %vm2612_vm12 = vcmask 318520  }
 0x307   :  { %1183 = vrot.lane.b32.xlu2 %v7484_v48, %s6588_s2  ;;  %1111 = vrot.lane.b32.xlu0 %v7484_v48, %s6589_s6  ;;  %v1291_v52 = vunpack.c.l.s4 %v6614_v58 }
 0x308   :  { %1081 = vrot.lane.b32.xlu1 %v7484_v48, %s6590_s1 }
 0x30f   :  { %1057 = vrot.lane.b32.xlu2 %v7484_v48, %s6591_s22  ;;  %1129 = vrot.lane.b32.xlu0 %v7484_v48, %s6592_s24 }
 0x310   :  { %1051 = vrot.lane.b32.xlu1 %v7484_v48, %s6580_s19 }
 0x317   :  { %1099 = vrot.lane.b32.xlu2 %v7484_v48, %s6593_s29  ;;  %1159 = vrot.lane.b32.xlu0 %v7484_v48, %s6594_s27 }
 0x318   :  { %1123 = vrot.lane.b32.xlu1 %v7484_v48, %s6595_s7 }
 0x31f   :  { %1065 = vrot.lane.b32.xlu2 %v7505_v18, %s6587_s8  ;;  %1075 = vrot.lane.b32.xlu0 %v7484_v48, %s6596_s12 }
 0x320   :  { %1089 = vrot.lane.b32.xlu1 %v7505_v18, %s6586_s30  ;;  %s6599_s30 = smov 20  }
 0x327   :  { %1113 = vrot.lane.b32.xlu2 %v7505_v18, %s6589_s6  ;;  %1105 = vrot.lane.b32.xlu0 %v7484_v48, %s9992_s26  ;;  %s6602_s6 = smov 80  }
 0x328   :  { %1083 = vrot.lane.b32.xlu1 %v7505_v18, %s6590_s1 }
 0x32f   :  { %1131 = vrot.lane.b32.xlu2 %v7505_v18, %s6592_s24  ;;  %1177 = vrot.lane.b32.xlu0 %v7484_v48, %s6598_s0  ;;  %s6603_s24 = smov 112  }
 0x330   :  { %1185 = vrot.lane.b32.xlu1 %v7505_v18, %s6588_s2  ;;  %s6600_s2 = smov 4  }
 0x337   :  { %1053 = vrot.lane.b32.xlu2 %v7505_v18, %s6580_s19  ;;  %1137 = vrot.lane.b32.xlu0 %v7505_v18, %s6585_s14  ;;  %s6601_s14 = smov 60  }
 0x338   :  { %1101 = vrot.lane.b32.xlu1 %v7505_v18, %s6593_s29  ;;  %s6604_s29 = smov 44  }
 0x33f   :  { %1077 = vrot.lane.b32.xlu2 %v7505_v18, %s6596_s12  ;;  %1161 = vrot.lane.b32.xlu0 %v7505_v18, %s6594_s27  ;;  %s6605_s27 = smov 56   ;;  %s6607_s12 = smov 48  }
 0x340   :  { %1125 = vrot.lane.b32.xlu1 %v7505_v18, %s6595_s7  ;;  %s6606_s7 = smov 96  }
 0x347   :  { %1107 = vrot.lane.b32.xlu2 %v7505_v18, %s9992_s26  ;;  %1059 = vrot.lane.b32.xlu0 %v7505_v18, %s6591_s22  ;;  %s6609_s26 = smov 24  }
 0x348   :  { %1209 = vrot.lane.b32.xlu1 %v7505_v18, %s6599_s30 }
 0x34f   :  { %1233 = vrot.lane.b32.xlu2 %v7505_v18, %s6600_s2  ;;  %1179 = vrot.lane.b32.xlu0 %v7505_v18, %s6598_s0  ;;  %s6608_s0 = smov 28  }
 0x350   :  { %1149 = vrot.lane.b32.xlu1 %v7505_v18, %s6601_s14 }
 0x357   :  { %1119 = vrot.lane.b32.xlu2 %v7505_v18, %s6602_s6  ;;  %1071 = vrot.lane.b32.xlu0 %v7505_v18, %s6603_s24 }
 0x358   :  { %1173 = vrot.lane.b32.xlu1 %v7505_v18, %s6604_s29 }
 0x359   :  { %v7544_v23 = vpop.permute.xlu2 %1135 }
 0x35a   :  { %10078 = vst [vmem:[#allocation40_spill] sm:$0xff] %v7544_v23 }
 0x35f   :  { %1155 = vrot.lane.b32.xlu2 %v7505_v18, %s6605_s27  ;;  %1227 = vrot.lane.b32.xlu0 %v7505_v18, %s6569_s18 }
 0x360   :  { %1095 = vrot.lane.b32.xlu1 %v7505_v18, %s6606_s7 }
 0x361   :  { %v7551_v22 = vpop.permute.xlu2 %1183 }
 0x362   :  { %10079 = vst [vmem:[#allocation41_spill] sm:$0xff] %v7551_v22 }
 0x367   :  { %1167 = vrot.lane.b32.xlu2 %v7505_v18, %s6607_s12  ;;  %1207 = vrot.lane.b32.xlu0 %v7484_v48, %s6599_s30  ;;  %s6611_s30 = smov 64  }
 0x368   :  { %1197 = vrot.lane.b32.xlu1 %v7505_v18, %s6608_s0 }
 0x369   :  { %v7557_v43 = vpop.permute.xlu2 %1057 }
 0x36a   :  { %10080 = vst [vmem:[#allocation42_spill] sm:$0xff] %v7557_v43  ;;  %v1237_v46 = vrot.slane %v7557_v43, 4 }
 0x36c   :  { %v1239_v35 = vsel %vm1238_vm13, %v1237_v46, %v7484_v48 }
 0x36d   :  { %v7695_v13 = vperm.slane %v1239_v35, %v7671_v29 }
 0x36f   :  { %1203 = vrot.lane.b32.xlu2 %v7505_v18, %s6609_s26  ;;  %1069 = vrot.lane.b32.xlu0 %v7484_v48, %s6603_s24 }
 0x370   :  { %1221 = vrot.lane.b32.xlu1 %v7505_v18, %s6610_s10 }
 0x371   :  { %v7564_v31 = vpop.permute.xlu2 %1099  ;;  %v7566_v19 = vpop.permute.xlu0 %1087 }
 0x372   :  { %10081 = vst [vmem:[#allocation43_spill] sm:$0xff] %v7564_v31  ;;  %v7568_v38 = vpop.permute.xlu1 %1063  ;;  %v1274_v44 = vrot.slane %v7566_v19, 4 }
 0x373   :  { %10082 = vst [vmem:[#allocation44_spill] sm:$0xff] %v7566_v19  ;;  %v1250_v60 = vrot.slane %v7568_v38, 4 }
 0x374   :  { %10083 = vst [vmem:[#allocation45_spill] sm:$0xff] %v7568_v38 }
 0x377   :  { %1231 = vrot.lane.b32.xlu2 %v7484_v48, %s6600_s2  ;;  %1147 = vrot.lane.b32.xlu0 %v7484_v48, %s6601_s14  ;;  %s6612_s2 = smov 32   ;;  %s10181_s14 = sld [smem:[#allocation88_spill]] }
 0x378   :  { %1117 = vrot.lane.b32.xlu1 %v7484_v48, %s6602_s6 }
 0x379   :  { %v7575_v40 = vpop.permute.xlu2 %1065  ;;  %v7577_v42 = vpop.permute.xlu0 %1111 }
 0x37a   :  { %10084 = vst [vmem:[#allocation46_spill] sm:$0xff] %v7577_v42  ;;  %v7579_v26 = vpop.permute.xlu1 %1081  ;;  %v1362_v51 = vrot.slane %v7577_v42, 4 }
 0x37b   :  { %10085 = vst [vmem:[#allocation47_spill] sm:$0xff] %v7579_v26  ;;  %v1262_v63 = vrot.slane %v7579_v26, 4 }
 0x37c   :  { %v1363_v46 = vsel %vm1238_vm13, %v1362_v51, %v7564_v31 }
 0x37d   :  { %s5628_s6 = sshll.u32 %s10181_s14, 4  ;;  %s5629_s6 = int_to_ptr.hbm [resolvable:$true] %s5628_s6 }
 0x37f   :  { %1143 = vrot.lane.b32.xlu2 %v7505_v18, %s6611_s30  ;;  %1215 = vrot.lane.b32.xlu0 %v7505_v18, %s6561_s5 }
 0x380   :  { %1153 = vrot.lane.b32.xlu1 %v7484_v48, %s6605_s27  ;;  %s10179_s27 = smov 1  }
 0x381   :  { %v7585_v34 = vpop.permute.xlu2 %1113  ;;  %v7587_v2 = vpop.permute.xlu0 %1129 }
 0x382   :  { %10086 = vst [vmem:[#allocation48_spill] sm:$0xff] %v7587_v2  ;;  %v7589_v37 = vpop.permute.xlu1 %1051 }
 0x383   :  { %10087 = vst [vmem:[#allocation49_spill] sm:$0xff] %v7589_v37  ;;  %v1251_v54 = vsel %vm1238_vm13, %v1250_v60, %v7589_v37  ;;  %v1386_v60 = vrot.slane %v7544_v23, 4 }
 0x384   :  { %v7675_v32 = vperm.slane %v1251_v54, %v7671_v29  ;;  %v1698_v54 = vrot.slane %v7575_v40, 4 }
 0x386   :  { %v1286_v20 = vrot.slane %v7675_v32, 4 }
 0x387   :  { %1171 = vrot.lane.b32.xlu2 %v7484_v48, %s6604_s29  ;;  %1165 = vrot.lane.b32.xlu0 %v7484_v48, %s6607_s12  ;;  %s10173_s12 = sld [smem:[#allocation84_spill]] }
 0x388   :  { %1225 = vrot.lane.b32.xlu1 %v7484_v48, %s6569_s18  ;;  %v1287_v35 = vsel %vm1238_vm13, %v1286_v20, %v7695_v13 }
 0x389   :  { %v7596_v9 = vpop.permute.xlu2 %1131  ;;  %v7598_v28 = vpop.permute.xlu0 %1159 }
 0x38a   :  { %10088 = vst [vmem:[#allocation50_spill] sm:$0xff] %v7596_v9  ;;  %v7600_v16 = vpop.permute.xlu1 %1123 }
 0x38b   :  { %10089 = vst [vmem:[#allocation51_spill] sm:$0xff] %v7600_v16  ;;  %v1387_v42 = vsel %vm1238_vm13, %v1386_v60, %v7600_v16 }
 0x38f   :  { %1093 = vrot.lane.b32.xlu2 %v7484_v48, %s6606_s7  ;;  %1201 = vrot.lane.b32.xlu0 %v7484_v48, %s6609_s26  ;;  %s10165_s26 = sld [smem:[#allocation82_spill]] }
 0x390   :  { %1191 = vrot.lane.b32.xlu1 %v7505_v18, %s6612_s2 }
 0x391   :  { %v7606_v5 = vpop.permute.xlu2 %1053  ;;  %v7608_v36 = vpop.permute.xlu0 %1075 }
 0x392   :  { %10090 = vst [vmem:[#allocation52_spill] sm:$0xff] %v7608_v36  ;;  %v7610_v55 = vpop.permute.xlu1 %1089  ;;  %v1275_v6 = vsel %vm1238_vm13, %v1274_v44, %v7608_v36  ;;  %v1699_v51 = vsel %vm1238_vm13, %v1698_v54, %v7606_v5  ;;  %v1810_v54 = vrot.slane %v7585_v34, 4  ;;  %v1374_v36 = vrot.slane %v7587_v2, 4 }
 0x393   :  { %v1722_v4 = vrot.slane %v7610_v55, 4 }
 0x397   :  { %1195 = vrot.lane.b32.xlu2 %v7484_v48, %s6608_s0  ;;  %1213 = vrot.lane.b32.xlu0 %v7484_v48, %s6561_s5 }
 0x398   :  { %1219 = vrot.lane.b32.xlu1 %v7484_v48, %s6610_s10 }
 0x399   :  { %v7618_v11 = vpop.permute.xlu2 %1077  ;;  %v7620_v8 = vpop.permute.xlu0 %1105 }
 0x39a   :  { %10091 = vst [vmem:[#allocation53_spill] sm:$0xff] %v7620_v8  ;;  %v7622_v45 = vpop.permute.xlu1 %1083  ;;  %v1723_v12 = vsel %vm1238_vm13, %v1722_v4, %v7618_v11  ;;  %v7705_v4 = vperm.slane %v1275_v6, %v7671_v29  ;;  %v7721_v6 = vunpack.c.0.s8 %v1291_v52  ;;  %v7739_v52 = vperm.slane %v1387_v42, %v7671_v29 }
 0x39b   :  { %v1710_v27 = vrot.slane %v7622_v45, 4  ;;  %v7708_v58 = vperm.slane %v1723_v12, %v7671_v29  ;;  %v7724_v12 = vperm.slane %v1363_v46, %v7671_v29  ;;  %v7742_v46 = vperm.slane %v1699_v51, %v7671_v29 }
 0x39c   :  { %10107 = vst [vmem:[#allocation69_spill] sm:$0xff] %v7705_v4  ;;  %v1293_v38 = vperm.slane %v1287_v35, %v7721_v6 }
 0x39d   :  { %10109 = vst [vmem:[#allocation71_spill] sm:$0xff] %v7721_v6  ;;  %v1758_v31 = vrot.slane %v7708_v58, 4  ;;  %v1398_v42 = vrot.slane %v7724_v12, 4 }
 0x39e   :  { %10110 = vst [vmem:[#allocation72_spill] sm:$0xff] %v7724_v12 }
 0x39f   :  { %1141 = vrot.lane.b32.xlu2 %v7484_v48, %s6611_s30 }
 0x3a0   :  { %1189 = vrot.lane.b32.xlu1 %v7484_v48, %s6612_s2  ;;  %s6640_s2 = smov [#allocation27]  }
 0x3a1   :  { %v7626_v14 = vpop.permute.xlu2 %1107  ;;  %v7628_v41 = vpop.permute.xlu0 %1177  ;;  %s5626_s5 = sshll.u32 %s6640_s2, 4  ;;  %s5627_s5 = int_to_ptr.vmem [resolvable:$true] %s5626_s5 }
 0x3a2   :  { %10092 = vst [vmem:[#allocation54_spill] sm:$0xff] %v7626_v14  ;;  %v7630_v57 = vpop.permute.xlu1 %1185 }
 0x3a3   :  { %10093 = vst [vmem:[#allocation55_spill] sm:$0xff] %v7630_v57 }
 0x3a9   :  { %v7632_v21 = vpop.permute.xlu2 %1233  ;;  %v7634_v25 = vpop.permute.xlu0 %1137 }
 0x3aa   :  { %v7636_v47 = vpop.permute.xlu1 %1101 }
 0x3b1   :  { %v7638_v7 = vpop.permute.xlu2 %1119  ;;  %v7640_v62 = vpop.permute.xlu0 %1161 }
 0x3b2   :  { %10094 = vst [vmem:[#allocation56_spill] sm:$0xff] %v7638_v7  ;;  %v7642_v17 = vpop.permute.xlu1 %1125 }
 0x3b3   :  { %10095 = vst [vmem:[#allocation57_spill] sm:$0xff] %v7640_v62 }
 0x3b9   :  { %v7644_v56 = vpop.permute.xlu2 %1155  ;;  %v7646_v24 = vpop.permute.xlu0 %1059 }
 0x3ba   :  { %10096 = vst [vmem:[#allocation58_spill] sm:$0xff] %v7644_v56  ;;  %v7648_v49 = vpop.permute.xlu1 %1209  ;;  %v1686_v23 = vrot.slane %v7646_v24, 4 }
 0x3bb   :  { %10097 = vst [vmem:[#allocation59_spill] sm:$0xff] %v7646_v24 }
 0x3bc   :  { %v1687_v35 = vsel %vm1238_vm13, %v1686_v23, %v7505_v18  ;;  %v1822_v23 = vrot.slane %v7596_v9, 4 }
 0x3c1   :  { %v7650_v3 = vpop.permute.xlu2 %1167  ;;  %v7652_v39 = vpop.permute.xlu0 %1179 }
 0x3c2   :  { %10098 = vst [vmem:[#allocation60_spill] sm:$0xff] %v7650_v3  ;;  %v7654_v53 = vpop.permute.xlu1 %1149  ;;  %v1934_v24 = vrot.slane %v7652_v39, 4 }
 0x3c3   :  { %10099 = vst [vmem:[#allocation61_spill] sm:$0xff] %v7652_v39 }
 0x3c4   :  { %10100 = vst [vmem:[#allocation62_spill] sm:$0xff] %v7654_v53 }
 0x3c9   :  { %v7656_v30 = vpop.permute.xlu2 %1203  ;;  %v7658_v50 = vpop.permute.xlu0 %1071 }
 0x3ca   :  { %v7660_v1 = vpop.permute.xlu1 %1173  ;;  %v1711_v44 = vsel %vm1238_vm13, %v1710_v27, %v7658_v50 }
 0x3cb   :  { %10101 = vst [vmem:[#allocation63_spill] sm:$0xff] %v7660_v1  ;;  %v7727_v19 = vperm.slane %v1711_v44, %v7671_v29  ;;  %v1310_v44 = vrot.slane %v7705_v4, 4  ;;  %v1946_v4 = vrot.slane %v7630_v57, 4 }
 0x3cd   :  { %v1759_v51 = vsel %vm1238_vm13, %v1758_v31, %v7727_v19  ;;  %v7769_v31 = vperm.slane %v1687_v35, %v7671_v29 }
 0x3d1   :  { %v7662_v0 = vpop.permute.xlu2 %1231  ;;  %v7664_v59 = vpop.permute.xlu0 %1227 }
 0x3d2   :  { %10102 = vst [vmem:[#allocation64_spill] sm:$0xff] %v7662_v0  ;;  %v7666_v61 = vpop.permute.xlu1 %1095  ;;  %v1350_v0 = vrot.slane %v7620_v8, 4 }
 0x3d3   :  { %10103 = vst [vmem:[#allocation65_spill] sm:$0xff] %v7666_v61 }
 0x3d9   :  { %v7677_v10 = vpop.permute.xlu2 %1143  ;;  %v7679_v33 = vpop.permute.xlu0 %1207 }
 0x3da   :  { %10105 = vst [vmem:[#allocation67_spill] sm:$0xff] %v7677_v10  ;;  %v7681_v15 = vpop.permute.xlu1 %1197 }
 0x3db   :  { %10106 = vst [vmem:[#allocation68_spill] sm:$0xff] %v7679_v33 }
 0x3e1   :  { %v7717_v27 = vpop.permute.xlu2 %1171  ;;  %v7719_v26 = vpop.permute.xlu0 %1069 }
 0x3e2   :  { %10108 = vst [vmem:[#allocation70_spill] sm:$0xff] %v7719_v26  ;;  %v1263_v20 = vsel %vm1238_vm13, %v1262_v63, %v7719_v26  ;;  %v7731_v60 = vpop.permute.xlu1 %1221  ;;  %v1798_v63 = vrot.slane %v7626_v14, 4  ;;  %v1834_v26 = vrot.slane %v7634_v25, 4  ;;  %v1336_v14 = vrot.slane %v1293_v38, 4 }
 0x3e3   :  { %v7735_v16 = vperm.slane %v1263_v20, %v7671_v29  ;;  %v1811_v20 = vsel %vm1238_vm13, %v1810_v54, %v7636_v47 }
 0x3e4   :  { %v1835_v43 = vsel %vm1238_vm13, %v1834_v26, %v7642_v17  ;;  %v1799_v48 = vsel %vm1238_vm13, %v1798_v63, %v7666_v61  ;;  %v7766_v2 = vperm.slane %v1811_v20, %v7671_v29  ;;  %v1734_v26 = vrot.slane %v7742_v46, 4 }
 0x3e5   :  { %v1311_v37 = vsel %vm1238_vm13, %v1310_v44, %v7735_v16  ;;  %v1422_v44 = vrot.slane %v7739_v52, 4  ;;  %v7780_v9 = vperm.slane %v1835_v43, %v7671_v29  ;;  %v7783_v20 = vperm.slane %v1799_v48, %v7671_v29 }
 0x3e6   :  { %v1317_v54 = vperm.slane %v1311_v37, %v7721_v6  ;;  %v7777_v37 = vperm.slane %v1759_v51, %v7721_v6  ;;  %v1846_v48 = vrot.slane %v7766_v2, 4 }
 0x3e7   :  { %v1870_v57 = vrot.slane %v7780_v9, 4 }
 0x3e8   :  { %v1337_v63 = vsel %vm1238_vm13, %v1317_v54, %v1336_v14  ;;  %v1334_v61 = vrot.slane %v1317_v54, 4  ;;  %v1735_v54 = vsel %vm1238_vm13, %v1734_v26, %v7769_v31 }
 0x3e9   :  { %v7773_v12 = vpop.permute.xlu2 %1093  ;;  %v7793_v14 = vpop.permute.xlu0 %1147 }
 0x3ea   :  { %10111 = vst [vmem:[#allocation73_spill] sm:$0xff] %v7773_v12  ;;  %v1351_v35 = vsel %vm1238_vm13, %v1350_v0, %v7773_v12  ;;  %v7787_v8 = vpop.permute.xlu1 %1117  ;;  %v2147_v0 = vsel %vm2134_vm14, %v1337_v63, 0.0  ;;  %v1947_v12 = vsel %vm1238_vm13, %v1946_v4, %v7660_v1  ;;  %v1847_v63 = vsel %vm1238_vm13, %v1846_v48, %v7783_v20 }
 0x3eb   :  { %10112 = vst [vmem:[#allocation74_spill] sm:$0xff] %v7787_v8  ;;  %v7791_v33 = vperm.slane %v1351_v35, %v7671_v29  ;;  %v1375_v43 = vsel %vm1238_vm13, %v1374_v36, %v7787_v8  ;;  %v1823_v35 = vsel %vm1238_vm13, %v1822_v23, %v7638_v7  ;;  %2148 = vadd.xlane.f32.xlu2 %v2147_v0  ;;  %v1782_v8 = vrot.slane %v7777_v37, 4 }
 0x3ec   :  { %v7799_v51 = vperm.slane %v1375_v43, %v7671_v29  ;;  %v1922_v43 = vrot.slane %v7640_v62, 4  ;;  %v1335_v26 = vsel %vm1238_vm13, %v1334_v61, %v1293_v38  ;;  %v1910_v23 = vrot.slane %v7644_v56, 4 }
 0x3ed   :  { %v1399_v36 = vsel %vm1238_vm13, %v1398_v42, %v7791_v33  ;;  %v2135_v4 = vsel %vm2134_vm14, %v1335_v26, 0.0  ;;  %v1741_v42 = vperm.slane %v1735_v54, %v7721_v6  ;;  %v7823_v62 = vperm.slane %v1947_v12, %v7671_v29 }
 0x3ee   :  { %v1923_v0 = vsel %vm1238_vm13, %v1922_v43, %v7654_v53  ;;  %2136 = vadd.xlane.f32.xlu0 %v2135_v4  ;;  %v1405_v1 = vperm.slane %v1399_v36, %v7721_v6  ;;  %v1423_v38 = vsel %vm1238_vm13, %v1422_v44, %v7799_v51  ;;  %v1829_v61 = vperm.slane %v1823_v35, %v7671_v29 }
 0x3ef   :  { %v1783_v48 = vsel %vm1238_vm13, %v1782_v8, %v1741_v42  ;;  %v1429_v26 = vperm.slane %v1423_v38, %v7721_v6  ;;  %v1853_v54 = vperm.slane %v1847_v63, %v7721_v6  ;;  %v1911_v43 = vsel %vm1238_vm13, %v1910_v23, %v7677_v10 }
 0x3f0   :  { %v1935_v12 = vsel %vm1238_vm13, %v1934_v24, %v7650_v3  ;;  %v7839_v36 = vperm.slane %v1923_v0, %v7671_v29  ;;  %v1448_v44 = vrot.slane %v1405_v1, 4  ;;  %v1871_v35 = vsel %vm1238_vm13, %v1870_v57, %v1829_v61 }
 0x3f1   :  { %v1760_v8 = vrot.slane %v7727_v19, 4  ;;  %v1982_v4 = vrot.slane %v7823_v62, 4  ;;  %v2231_v63 = vsel %vm2134_vm14, %v1783_v48, 0.0  ;;  %v1446_v38 = vrot.slane %v1429_v26, 4  ;;  %v7850_v24 = vpop.permute.xlu0 %1215 }
 0x3f2   :  { %v7834_v56 = vpop.permute.xlu1 %1153  ;;  %v1498_v23 = vrot.slane %v7551_v22, 4  ;;  %v7848_v10 = vperm.slane %v1911_v43, %v7671_v29  ;;  %v1896_v0 = vrot.slane %v1853_v54, 4  ;;  %v1941_v57 = vperm.slane %v1935_v12, %v7671_v29 }
 0x3f3   :  { %10113 = vst [vmem:[#allocation75_spill] sm:$0xff] %v7834_v56  ;;  %2232 = vadd.xlane.f32.xlu2 %v2231_v63  ;;  %v1449_v19 = vsel %vm1238_vm13, %v1429_v26, %v1448_v44  ;;  %v1447_v3 = vsel %vm1238_vm13, %v1446_v38, %v1405_v1  ;;  %v1877_v48 = vperm.slane %v1871_v35, %v7721_v6  ;;  %v1736_v53 = vrot.slane %v7769_v31, 4 }
 0x3f4   :  { %v1958_v22 = vrot.slane %v7839_v36, 4  ;;  %v2150_v39 = vsel %vm2134_vm14, %v1449_v19, 0.0  ;;  %v2138_v43 = vsel %vm2134_vm14, %v1447_v3, 0.0  ;;  %v2058_v63 = vrot.slane %v7632_v21, 4 }
 0x3f5   :  { %2139 = vadd.xlane.f32.xlu1 %v2138_v43  ;;  %v1983_v26 = vsel %vm1238_vm13, %v1982_v4, %v1941_v57  ;;  %v1761_v1 = vsel %vm1238_vm13, %v7708_v58, %v1760_v8  ;;  %v1872_v12 = vrot.slane %v1829_v61, 4  ;;  %v1897_v31 = vsel %vm1238_vm13, %v1877_v48, %v1896_v0  ;;  %v7874_v43 = vpop.permute.xlu2 %1195 }
 0x3f6   :  { %2151 = vadd.xlane.f32.xlu0 %v2150_v39  ;;  %v1784_v44 = vrot.slane %v1741_v42, 4  ;;  %v1959_v35 = vsel %vm1238_vm13, %v1958_v22, %v7848_v10  ;;  %v2034_v3 = vrot.slane %v7648_v49, 4  ;;  %v2046_v38 = vrot.slane %v7664_v59, 4 }
 0x3f7   :  { %v2059_v39 = vsel %vm1238_vm13, %v2058_v63, %v7731_v60  ;;  %v1894_v4 = vrot.slane %v1877_v48, 4  ;;  %v1989_v42 = vperm.slane %v1983_v26, %v7721_v6  ;;  %v1737_v22 = vsel %vm1238_vm13, %v7742_v46, %v1736_v53 }
 0x3f8   :  { %v1785_v58 = vsel %vm1238_vm13, %v7777_v37, %v1784_v44  ;;  %v7882_v61 = vperm.slane %v1761_v1, %v7721_v6  ;;  %v2047_v8 = vsel %vm1238_vm13, %v2046_v38, %v7850_v24  ;;  %v2246_v0 = vsel %vm2134_vm14, %v1897_v31, 0.0 }
 0x3f9   :  { %v1895_v48 = vsel %vm1238_vm13, %v1894_v4, %v1853_v54  ;;  %v1965_v63 = vperm.slane %v1959_v35, %v7721_v6  ;;  %v1486_v37 = vrot.slane %v7628_v41, 4  ;;  %v2035_v26 = vsel %vm1238_vm13, %v2034_v3, %v7681_v15  ;;  %v7906_v35 = vpop.permute.xlu0 %1165 }
 0x3fa   :  { %v7872_v19 = vpop.permute.xlu1 %1225  ;;  %v7894_v53 = vperm.slane %v2059_v39, %v7671_v29  ;;  %v1873_v46 = vsel %vm1238_vm13, %v7780_v9, %v1872_v12  ;;  %v1848_v1 = vrot.slane %v7783_v20, 4  ;;  %v2243_v54 = vsel %vm2134_vm14, %v1785_v58, 0.0 }
 0x3fb   :  { %10114 = vst [vmem:[#allocation76_spill] sm:$0xff] %v7872_v19  ;;  %2247 = vadd.xlane.f32.xlu2 %v2246_v0  ;;  %v7901_v31 = vperm.slane %v1737_v22, %v7721_v6  ;;  %v7904_v44 = vperm.slane %v2047_v8, %v7671_v29  ;;  %v2234_v3 = vsel %vm2134_vm14, %v1895_v48, 0.0  ;;  %v2006_v38 = vrot.slane %v1989_v42, 4 }
 0x3fc   :  { %v1786_v39 = vrot.slane %v7882_v61, 4  ;;  %v1984_v4 = vrot.slane %v1941_v57, 4  ;;  %v7911_v9 = vperm.slane %v2035_v26, %v7671_v29  ;;  %v1499_v20 = vsel %vm1238_vm13, %v1498_v23, %v7717_v27 }
 0x3fd   :  { %2244 = vadd.xlane.f32.xlu1 %v2243_v54  ;;  %v2008_v12 = vrot.slane %v1965_v63, 4  ;;  %v2022_v58 = vrot.slane %v7656_v30, 4  ;;  %v1960_v22 = vrot.slane %v7848_v10, 4  ;;  %v2094_v8 = vrot.slane %v7894_v53, 4 }
 0x3fe   :  { %2235 = vadd.xlane.f32.xlu0 %v2234_v3  ;;  %v2007_v0 = vsel %vm1238_vm13, %v2006_v38, %v1965_v63  ;;  %v1985_v57 = vsel %vm1238_vm13, %v7823_v62, %v1984_v4  ;;  %v1487_v48 = vsel %vm1238_vm13, %v1486_v37, %v7906_v35  ;;  %v1849_v23 = vsel %vm1238_vm13, %v7766_v2, %v1848_v1  ;;  %v7945_v1 = vpop.permute.xlu2 %1141 }
 0x3ff   :  { %v7928_v54 = vperm.slane %v1873_v46, %v7721_v6  ;;  %v7931_v10 = vperm.slane %v1499_v20, %v7671_v29  ;;  %v2095_v63 = vsel %vm1238_vm13, %v2094_v8, %v7904_v44  ;;  %v1787_v37 = vsel %vm1238_vm13, %v1786_v39, %v7901_v31 }
 0x400   :  { %v2070_v3 = vrot.slane %v7911_v9, 4  ;;  %v2237_v2 = vsel %vm2134_vm14, %v2007_v0, 0.0  ;;  %v2009_v46 = vsel %vm1238_vm13, %v1989_v42, %v2008_v12  ;;  %v7948_v4 = vperm.slane %v1487_v48, %v7671_v29 }
 0x401   :  { %v7951_v20 = vperm.slane %v1849_v23, %v7721_v6  ;;  %v1961_v39 = vsel %vm1238_vm13, %v7839_v36, %v1960_v22  ;;  %v10115_v8 = vrot.slane %v7598_v28, 4  ;;  %v1462_v12 = vrot.slane %v7834_v56, 4 }
 0x402   :  { %v7923_v26 = vpop.permute.xlu1 %1191  ;;  %v2101_v48 = vperm.slane %v2095_v63, %v7721_v6  ;;  %v1534_v23 = vrot.slane %v7931_v10, 4  ;;  %v2255_v36 = vsel %vm2134_vm14, %v1787_v37, 0.0  ;;  %v1898_v22 = vrot.slane %v7928_v54, 4 }
 0x403   :  { %v2023_v62 = vsel %vm1238_vm13, %v2022_v58, %v7923_v26  ;;  %2238 = vadd.xlane.f32.xlu2 %v2237_v2  ;;  %v7956_v58 = vperm.slane %v1985_v57, %v7721_v6  ;;  %v1475_v42 = vsel %vm1238_vm13, %v10115_v8, %v7793_v14  ;;  %v1463_v57 = vsel %vm1238_vm13, %v1462_v12, %v7945_v1 }
 0x404   :  { %v7941_v38 = vperm.slane %v2023_v62, %v7671_v29  ;;  %v2249_v62 = vsel %vm2134_vm14, %v2009_v46, 0.0  ;;  %v7973_v2 = vperm.slane %v1961_v39, %v7721_v6  ;;  %v7977_v63 = vperm.slane %v1475_v42, %v7671_v29 }
 0x405   :  { %2256 = vadd.xlane.f32.xlu1 %v2255_v36  ;;  %v1535_v46 = vsel %vm1238_vm13, %v1534_v23, %v7948_v4  ;;  %v1899_v37 = vsel %vm1238_vm13, %v1898_v22, %v7951_v20  ;;  %v2010_v8 = vrot.slane %v7956_v58, 4  ;;  %v2118_v7 = vrot.slane %v2101_v48, 4 }
 0x406   :  { %v2071_v0 = vsel %vm1238_vm13, %v2070_v3, %v7941_v38  ;;  %2250 = vadd.xlane.f32.xlu0 %v2249_v62  ;;  %v10116_v12 = vrot.slane %v7606_v5, 4  ;;  %v10117_v62 = vrot.slane %v7618_v11, 4  ;;  %v7994_v23 = vperm.slane %v1463_v57, %v7671_v29 }
 0x407   :  { %v2077_v3 = vperm.slane %v2071_v0, %v7721_v6  ;;  %v1712_v0 = vrot.slane %v7658_v50, 4  ;;  %v2258_v36 = vsel %vm2134_vm14, %v1899_v37, 0.0  ;;  %v2011_v22 = vsel %vm1238_vm13, %v2010_v8, %v7973_v2 }
 0x408   :  { %v1701_v39 = vsel %vm1238_vm13, %v7575_v40, %v10116_v12  ;;  %v1725_v42 = vsel %vm1238_vm13, %v7610_v55, %v10117_v62  ;;  %v8001_v56 = vperm.slane %v1535_v46, %v7721_v6  ;;  %v1836_v40 = vrot.slane %v7642_v17, 4 }
 0x409   :  { %v2119_v5 = vsel %vm1238_vm13, %v2118_v7, %v2077_v3  ;;  %v1510_v11 = vrot.slane %v7977_v63, 4  ;;  %v1424_v55 = vrot.slane %v7799_v51, 4  ;;  %v2120_v57 = vrot.slane %v2077_v3, 4 }
 0x40a   :  { %v8006_v50 = vpop.permute.xlu1 %1219  ;;  %v1288_v37 = vrot.slane %v7695_v13, 4  ;;  %v8010_v12 = vperm.slane %v1701_v39, %v7671_v29  ;;  %v8013_v7 = vperm.slane %v1725_v42, %v7671_v29  ;;  %v1713_v46 = vsel %vm1238_vm13, %v7622_v45, %v1712_v0 }
 0x40b   :  { %2259 = vadd.xlane.f32.xlu2 %v2258_v36  ;;  %v2261_v17 = vsel %vm2134_vm14, %v2011_v22, 0.0  ;;  %v2240_v8 = vsel %vm2134_vm14, %v2119_v5, 0.0  ;;  %v1511_v51 = vsel %vm1238_vm13, %v1510_v11, %v7994_v23  ;;  %v1688_v3 = vrot.slane %v7505_v18, 4 }
 0x40c   :  { %v1558_v13 = vrot.slane %v8001_v56, 4  ;;  %v1289_v39 = vsel %vm1238_vm13, %v7675_v32, %v1288_v37  ;;  %v1812_v62 = vrot.slane %v7636_v47, 4  ;;  %v1837_v45 = vsel %vm1238_vm13, %v7634_v25, %v1836_v40  ;;  %v8056_v37 = vpop.permute.xlu0 %1201 }
 0x40d   :  { %2241 = vadd.xlane.f32.xlu1 %v2240_v8  ;;  %v2121_v42 = vsel %vm1238_vm13, %v2101_v48, %v2120_v57  ;;  %v1425_v0 = vsel %vm1238_vm13, %v7739_v52, %v1424_v55  ;;  %v8032_v36 = vperm.slane %v1713_v46, %v7671_v29  ;;  %v1312_v18 = vrot.slane %v7735_v16, 4  ;;  %v10118_v55 = vld [vmem:[#allocation56_spill] sm:$0xff] }
 0x40e   :  { %2262 = vadd.xlane.f32.xlu0 %v2261_v17  ;;  %v1517_v22 = vperm.slane %v1511_v51, %v7721_v6  ;;  %v1788_v5 = vrot.slane %v7901_v31, 4  ;;  %v1746_v32 = vrot.slane %v8010_v12, 4  ;;  %v1770_v47 = vrot.slane %v8013_v7, 4  ;;  %10119 = vst [vmem:[#allocation56_spill] sm:$0xff] %v8056_v37  ;;  %v10120_v17 = vld [vmem:[#allocation59_spill] sm:$0xff] }
 0x40f   :  { %v1400_v25 = vrot.slane %v7791_v33, 4  ;;  %v8041_v48 = vperm.slane %v1289_v39, %v7721_v6  ;;  %v2252_v52 = vsel %vm2134_vm14, %v2121_v42, 0.0  ;;  %v8048_v11 = vperm.slane %v1425_v0, %v7721_v6 }
 0x410   :  { %v1559_v40 = vsel %vm1238_vm13, %v1558_v13, %v1517_v22  ;;  %v1789_v16 = vsel %vm1238_vm13, %v7882_v61, %v1788_v5  ;;  %v1813_v31 = vsel %vm1238_vm13, %v7585_v34, %v1812_v62  ;;  %v1824_v57 = vrot.slane %v10118_v55, 4  ;;  %v10121_v61 = vld [vmem:[#allocation68_spill] sm:$0xff]  ;;  %v10122_v13 = vld [vmem:[#allocation69_spill] sm:$0xff] }
 0x411   :  { %v8054_v33 = vperm.slane %v1837_v45, %v7671_v29  ;;  %v1900_v46 = vrot.slane %v7951_v20, 4  ;;  %v1689_v8 = vsel %vm1238_vm13, %v10120_v17, %v1688_v3  ;;  %v1586_v51 = vrot.slane %v10121_v61, 4  ;;  %v10124_v20 = vld [vmem:[#allocation72_spill] sm:$0xff]  ;;  %v10132_v61 = vld [vmem:[#allocation62_spill] sm:$0xff] }
 0x412   :  { %v1313_v39 = vsel %vm1238_vm13, %v10122_v13, %v1312_v18  ;;  %v1771_v34 = vsel %vm1238_vm13, %v1770_v47, %v8032_v36  ;;  %v2096_v62 = vrot.slane %v7904_v44, 4  ;;  %v8067_v45 = vpop.permute.xlu1 %1189  ;;  %v2141_v42 = vsel %vm2134_vm14, %v1559_v40, 0.0  ;;  %v10125_v55 = vld [vmem:[#allocation64_spill] sm:$0xff] }
 0x413   :  { %2253 = vadd.xlane.f32.xlu2 %v2252_v52  ;;  %10123 = vst [vmem:[#allocation59_spill] sm:$0xff] %v8067_v45  ;;  %v2267_v0 = vsel %vm2134_vm14, %v1789_v16, 0.0  ;;  %v1401_v5 = vsel %vm1238_vm13, %v10124_v20, %v1400_v25  ;;  %v1587_v3 = vsel %vm1238_vm13, %v1586_v51, %v7874_v43  ;;  %v1574_v52 = vrot.slane %v8056_v37, 4  ;;  %v10126_v51 = vld [vmem:[#allocation65_spill] sm:$0xff] }
 0x414   :  { %v1450_v18 = vrot.slane %v8048_v11, 4  ;;  %v1560_v47 = vrot.slane %v1517_v22, 4  ;;  %v8078_v44 = vperm.slane %v1689_v8, %v7671_v29  ;;  %v2072_v40 = vrot.slane %v7941_v38, 4 }
 0x415   :  { %2268 = vadd.xlane.f32.xlu1 %v2267_v0  ;;  %v1901_v16 = vsel %vm1238_vm13, %v7928_v54, %v1900_v46  ;;  %v8084_v25 = vperm.slane %v1313_v39, %v7721_v6  ;;  %v1610_v17 = vrot.slane %v10125_v55, 4  ;;  %v1800_v13 = vrot.slane %v10126_v51, 4 }
 0x416   :  { %2142 = vadd.xlane.f32.xlu0 %v2141_v42  ;;  %v1575_v42 = vsel %vm1238_vm13, %v1574_v52, %v8067_v45  ;;  %v8091_v22 = vperm.slane %v1401_v5, %v7721_v6  ;;  %v8094_v8 = vperm.slane %v1813_v31, %v7671_v29  ;;  %v8097_v38 = vperm.slane %v1587_v3, %v7671_v29  ;;  %v10127_v5 = vld [vmem:[#allocation50_spill] sm:$0xff] }
 0x417   :  { %v8100_v54 = vperm.slane %v1771_v34, %v7721_v6  ;;  %v2097_v46 = vsel %vm1238_vm13, %v7894_v53, %v2096_v62  ;;  %v1611_v39 = vsel %vm1238_vm13, %v1610_v17, %v8006_v50  ;;  %v2270_v0 = vsel %vm2134_vm14, %v1901_v16, 0.0  ;;  %v10128_v16 = vld [vmem:[#allocation54_spill] sm:$0xff]  ;;  %v8128_v17 = vpop.permute.xlu0 %1213 }
 0x418   :  { %v1451_v20 = vsel %vm1238_vm13, %v1450_v18, %v8091_v22  ;;  %v1561_v31 = vsel %vm1238_vm13, %v8001_v56, %v1560_v47  ;;  %v1825_v3 = vsel %vm1238_vm13, %v10127_v5, %v1824_v57  ;;  %v8114_v34 = vperm.slane %v1575_v42, %v7671_v29  ;;  %10129 = vst [vmem:[#allocation69_spill] sm:$0xff] %v8128_v17 }
 0x419   :  { %v1338_v53 = vrot.slane %v8084_v25, 4  ;;  %v2073_v62 = vsel %vm1238_vm13, %v7911_v9, %v2072_v40  ;;  %v1882_v52 = vrot.slane %v8054_v33, 4  ;;  %v1801_v18 = vsel %vm1238_vm13, %v10128_v16, %v1800_v13 }
 0x41a   :  { %v1747_v56 = vsel %vm1238_vm13, %v1746_v32, %v8078_v44  ;;  %v8125_v47 = vperm.slane %v2097_v46, %v7721_v6  ;;  %v1622_v57 = vrot.slane %v8097_v38, 4  ;;  %v8131_v51 = vperm.slane %v1611_v39, %v7671_v29 }
 0x41b   :  { %2271 = vadd.xlane.f32.xlu2 %v2270_v0  ;;  %v2162_v9 = vsel %vm2134_vm14, %v1451_v20, 0.0  ;;  %v2153_v40 = vsel %vm2134_vm14, %v1561_v31, 0.0  ;;  %v1598_v42 = vrot.slane %v7872_v19, 4  ;;  %v1790_v32 = vrot.slane %v8100_v54, 4 }
 0x41c   :  { %v8138_v13 = vperm.slane %v2073_v62, %v7721_v6  ;;  %v8141_v46 = vperm.slane %v1825_v3, %v7671_v29  ;;  %v8144_v0 = vperm.slane %v1801_v18, %v7671_v29  ;;  %v1623_v39 = vsel %vm1238_vm13, %v1622_v57, %v8114_v34 }
 0x41d   :  { %2154 = vadd.xlane.f32.xlu1 %v2153_v40  ;;  %v1339_v20 = vsel %vm1238_vm13, %v1338_v53, %v8041_v48  ;;  %v1599_v31 = vsel %vm1238_vm13, %v1598_v42, %v8128_v17  ;;  %v8153_v5 = vperm.slane %v1747_v56, %v7721_v6  ;;  %v2122_v62 = vrot.slane %v8125_v47, 4 }
 0x41e   :  { %2163 = vadd.xlane.f32.xlu0 %v2162_v9  ;;  %v1858_v3 = vrot.slane %v8094_v8, 4  ;;  %v1646_v16 = vrot.slane %v8131_v51, 4  ;;  %v1883_v18 = vsel %vm1238_vm13, %v1882_v52, %v8141_v46  ;;  %v2159_v57 = vsel %vm2134_vm14, %v1339_v20, 0.0 }
 0x41f   :  { %v1791_v53 = vsel %vm1238_vm13, %v1790_v32, %v8153_v5  ;;  %v2123_v9 = vsel %vm1238_vm13, %v2122_v62, %v8138_v13  ;;  %v1629_v56 = vperm.slane %v1623_v39, %v7721_v6  ;;  %v1536_v40 = vrot.slane %v7948_v4, 4  ;;  %v10130_v32 = vld [vmem:[#allocation63_spill] sm:$0xff] }
 0x420   :  { %v8168_v42 = vperm.slane %v1599_v31, %v7671_v29  ;;  %v2012_v37 = vrot.slane %v7973_v2, 4  ;;  %v1859_v52 = vsel %vm1238_vm13, %v1858_v3, %v8144_v0  ;;  %v8174_v20 = vperm.slane %v1883_v18, %v7721_v6 }
 0x421   :  { %v1948_v19 = vrot.slane %v10130_v32, 4  ;;  %v2279_v62 = vsel %vm2134_vm14, %v1791_v53, 0.0  ;;  %v2264_v39 = vsel %vm2134_vm14, %v2123_v9, 0.0  ;;  %v8182_v31 = vperm.slane %v1859_v52, %v7721_v6  ;;  %v10131_v9 = vld [vmem:[#allocation39_spill] sm:$0xff] }
 0x422   :  { %v1647_v4 = vsel %vm1238_vm13, %v1646_v16, %v8168_v42  ;;  %v1672_v2 = vrot.slane %v1629_v56, 4  ;;  %v2013_v3 = vsel %vm1238_vm13, %v7956_v58, %v2012_v37  ;;  %v1537_v18 = vsel %vm1238_vm13, %v7931_v10, %v1536_v40  ;;  %v10134_v40 = vld [vmem:[#allocation42_spill] sm:$0xff] }
 0x423   :  { %2160 = vadd.xlane.f32.xlu2 %v2159_v57  ;;  %v1902_v57 = vrot.slane %v8174_v20, 4  ;;  %v1653_v53 = vperm.slane %v1647_v4, %v7721_v6  ;;  %v1240_v32 = vrot.slane %v10131_v9, 4  ;;  %v1924_v16 = vrot.slane %v10132_v61, 4  ;;  %v10135_v61 = vld [vmem:[#allocation60_spill] sm:$0xff] }
 0x424   :  { %v1512_v52 = vrot.slane %v7994_v23, 4  ;;  %v2273_v45 = vsel %vm2134_vm14, %v2013_v3, 0.0  ;;  %v8200_v37 = vperm.slane %v1537_v18, %v7721_v6  ;;  %v1936_v9 = vrot.slane %v10135_v61, 4  ;;  %v10137_v23 = vld [vmem:[#allocation67_spill] sm:$0xff]  ;;  %v10138_v18 = vld [vmem:[#allocation57_spill] sm:$0xff] }
 0x425   :  { %2265 = vadd.xlane.f32.xlu1 %v2264_v39  ;;  %v1903_v58 = vsel %vm1238_vm13, %v1902_v57, %v8182_v31  ;;  %v1673_v10 = vsel %vm1238_vm13, %v1653_v53, %v1672_v2  ;;  %v1241_v4 = vsel %vm1238_vm13, %v10134_v40, %v1240_v32  ;;  %v1670_v17 = vrot.slane %v1653_v53, 4  ;;  %v10139_v40 = vld [vmem:[#allocation49_spill] sm:$0xff] }
 0x426   :  { %2280 = vadd.xlane.f32.xlu0 %v2279_v62  ;;  %v10133_v62 = vld [vmem:[#allocation55_spill] sm:$0xff]  ;;  %v2282_v3 = vsel %vm2134_vm14, %v1903_v58, 0.0  ;;  %v2156_v57 = vsel %vm2134_vm14, %v1673_v10, 0.0  ;;  %v1513_v2 = vsel %vm1238_vm13, %v7977_v63, %v1512_v52  ;;  %v1562_v32 = vrot.slane %v8200_v37, 4  ;;  %v10146_v63 = vld [vmem:[#allocation44_spill] sm:$0xff] }
 0x427   :  { %v1949_v39 = vsel %vm1238_vm13, %v10133_v62, %v1948_v19  ;;  %v1912_v62 = vrot.slane %v10137_v23, 4  ;;  %v1252_v61 = vrot.slane %v10139_v40, 4  ;;  %v10140_v23 = vld [vmem:[#allocation52_spill] sm:$0xff]  ;;  %v1671_v58 = vsel %vm1238_vm13, %v1670_v17, %v1629_v56  ;;  %v10141_v10 = vld [vmem:[#allocation43_spill] sm:$0xff] }
 0x428   :  { %v8206_v19 = vperm.slane %v1949_v39, %v7671_v29  ;;  %v1452_v39 = vrot.slane %v8091_v22, 4  ;;  %v1276_v55 = vrot.slane %v10140_v23, 4  ;;  %v8221_v53 = vperm.slane %v1241_v4, %v7671_v29  ;;  %v10144_v23 = vld [vmem:[#allocation45_spill] sm:$0xff] }
 0x429   :  { %v8225_v52 = vperm.slane %v1513_v2, %v7721_v6  ;;  %v2060_v17 = vrot.slane %v7731_v60, 4  ;;  %v2144_v56 = vsel %vm2134_vm14, %v1671_v58, 0.0 }
 0x42a   :  { %10136 = vst [vmem:[#allocation72_spill] sm:$0xff] %v8206_v19  ;;  %v1994_v22 = vrot.slane %v8206_v19, 4  ;;  %v1453_v2 = vsel %vm1238_vm13, %v8048_v11, %v1452_v39  ;;  %v1277_v19 = vsel %vm1238_vm13, %v10146_v63, %v1276_v55  ;;  %v1792_v11 = vrot.slane %v8153_v5, 4 }
 0x42b   :  { %2274 = vadd.xlane.f32.xlu2 %v2273_v45  ;;  %v1925_v45 = vsel %vm1238_vm13, %v10138_v18, %v1924_v16  ;;  %v10142_v16 = vld [vmem:[#allocation61_spill] sm:$0xff]  ;;  %v10143_v18 = vld [vmem:[#allocation58_spill] sm:$0xff]  ;;  %v1563_v4 = vsel %vm1238_vm13, %v1562_v32, %v8225_v52  ;;  %v2174_v55 = vsel %vm2134_vm14, %v1453_v2, 0.0  ;;  %v2048_v63 = vrot.slane %v7850_v24, 4  ;;  %v10149_v24 = vld [vmem:[#allocation47_spill] sm:$0xff] }
 0x42c   :  { %v1913_v40 = vsel %vm1238_vm13, %v10143_v18, %v1912_v62  ;;  %v1340_v62 = vrot.slane %v8041_v48, 4  ;;  %v10147_v32 = vld [vmem:[#allocation70_spill] sm:$0xff]  ;;  %v2061_v48 = vsel %vm1238_vm13, %v7632_v21, %v2060_v17 }
 0x42d   :  { %2283 = vadd.xlane.f32.xlu1 %v2282_v3  ;;  %v1937_v3 = vsel %vm1238_vm13, %v10142_v16, %v1936_v9  ;;  %v1253_v9 = vsel %vm1238_vm13, %v10144_v23, %v1252_v61  ;;  %v8251_v58 = vperm.slane %v1913_v40, %v7671_v29  ;;  %v1264_v18 = vrot.slane %v10147_v32, 4 }
 0x42e   :  { %2157 = vadd.xlane.f32.xlu0 %v2156_v57  ;;  %v8230_v57 = vperm.slane %v1925_v45, %v7671_v29  ;;  %v10145_v45 = vld [vmem:[#allocation51_spill] sm:$0xff]  ;;  %v8248_v60 = vperm.slane %v1937_v3, %v7671_v29  ;;  %v2036_v61 = vrot.slane %v7681_v15, 4  ;;  %v2165_v23 = vsel %vm2134_vm14, %v1563_v4, 0.0  ;;  %v10148_v15 = vld [vmem:[#allocation40_spill] sm:$0xff] }
 0x42f   :  { %v1388_v16 = vrot.slane %v10145_v45, 4  ;;  %v2124_v3 = vrot.slane %v8138_v13, 4  ;;  %v8266_v40 = vperm.slane %v1253_v9, %v7671_v29  ;;  %v8271_v4 = vperm.slane %v1277_v19, %v7671_v29  ;;  %v10150_v45 = vld [vmem:[#allocation74_spill] sm:$0xff] }
 0x430   :  { %v1970_v39 = vrot.slane %v8230_v57, 4  ;;  %v1995_v5 = vsel %vm1238_vm13, %v1994_v22, %v8248_v60  ;;  %v1341_v21 = vsel %vm1238_vm13, %v8084_v25, %v1340_v62  ;;  %v1265_v17 = vsel %vm1238_vm13, %v10149_v24, %v1264_v18 }
 0x431   :  { %v2024_v13 = vrot.slane %v7923_v26, 4  ;;  %v1793_v22 = vsel %vm1238_vm13, %v8100_v54, %v1792_v11  ;;  %v2037_v9 = vsel %vm1238_vm13, %v7648_v49, %v2036_v61  ;;  %v8285_v19 = vperm.slane %v2061_v48, %v7671_v29 }
 0x432   :  { %v1971_v2 = vsel %vm1238_vm13, %v1970_v39, %v8251_v58  ;;  %v8289_v25 = vperm.slane %v1995_v5, %v7721_v6  ;;  %v2049_v26 = vsel %vm1238_vm13, %v7664_v59, %v2048_v63  ;;  %v1648_v62 = vrot.slane %v8168_v42, 4 }
 0x433   :  { %2145 = vadd.xlane.f32.xlu2 %v2144_v56  ;;  %v1389_v56 = vsel %vm1238_vm13, %v10148_v15, %v1388_v16  ;;  %v1376_v16 = vrot.slane %v10150_v45, 4  ;;  %v2171_v54 = vsel %vm2134_vm14, %v1341_v21, 0.0  ;;  %v2125_v32 = vsel %vm1238_vm13, %v8125_v47, %v2124_v3 }
 0x434   :  { %v8298_v49 = vperm.slane %v1389_v56, %v7671_v29  ;;  %v1322_v18 = vrot.slane %v8271_v4, 4  ;;  %v8302_v11 = vperm.slane %v1265_v17, %v7671_v29  ;;  %v8305_v39 = vperm.slane %v1971_v2, %v7721_v6  ;;  %v10152_v56 = vld [vmem:[#allocation73_spill] sm:$0xff] }
 0x435   :  { %2166 = vadd.xlane.f32.xlu1 %v2165_v23  ;;  %v8308_v59 = vperm.slane %v2037_v9, %v7671_v29  ;;  %v2025_v42 = vsel %vm1238_vm13, %v7656_v30, %v2024_v13  ;;  %v1624_v47 = vrot.slane %v8114_v34, 4  ;;  %v2291_v61 = vsel %vm2134_vm14, %v1793_v22, 0.0  ;;  %v10151_v23 = vld [vmem:[#allocation48_spill] sm:$0xff] }
 0x436   :  { %2175 = vadd.xlane.f32.xlu0 %v2174_v55  ;;  %v1377_v55 = vsel %vm1238_vm13, %v10151_v23, %v1376_v16  ;;  %v8317_v48 = vperm.slane %v2049_v26, %v7671_v29  ;;  %v2276_v63 = vsel %vm2134_vm14, %v2125_v32, 0.0  ;;  %v2014_v3 = vrot.slane %v8289_v25, 4 }
 0x437   :  { %v2106_v5 = vrot.slane %v8285_v19, 4  ;;  %v1649_v15 = vsel %vm1238_vm13, %v8131_v51, %v1648_v62  ;;  %v1904_v30 = vrot.slane %v8182_v31, 4  ;;  %v1564_v34 = vrot.slane %v8225_v52, 4  ;;  %v10154_v51 = vld [vmem:[#allocation46_spill] sm:$0xff] }
 0x438   :  { %v1352_v21 = vrot.slane %v10152_v56, 4  ;;  %v8328_v24 = vperm.slane %v2025_v42, %v7671_v29  ;;  %v2015_v17 = vsel %vm1238_vm13, %v2014_v3, %v8305_v39  ;;  %v1323_v13 = vsel %vm1238_vm13, %v1322_v18, %v8302_v11  ;;  %v10155_v42 = vld [vmem:[#allocation53_spill] sm:$0xff] }
 0x439   :  { %v10153_v22 = vrot.slane %v10141_v10, 4  ;;  %v1298_v31 = vrot.slane %v8266_v40, 4  ;;  %v8340_v52 = vperm.slane %v1377_v55, %v7671_v29  ;;  %v1625_v9 = vsel %vm1238_vm13, %v8097_v38, %v1624_v47 }
 0x43a   :  { %v1434_v45 = vrot.slane %v8298_v49, 4  ;;  %v2082_v16 = vrot.slane %v8308_v59, 4  ;;  %v8347_v26 = vperm.slane %v1649_v15, %v7721_v6  ;;  %v2107_v10 = vsel %vm1238_vm13, %v2106_v5, %v8317_v48 }
 0x43b   :  { %2172 = vadd.xlane.f32.xlu2 %v2171_v54  ;;  %v1365_v2 = vsel %vm1238_vm13, %v10154_v51, %v10153_v22  ;;  %v2285_v62 = vsel %vm2134_vm14, %v2015_v17, 0.0  ;;  %v1905_v54 = vsel %vm1238_vm13, %v8174_v20, %v1904_v30  ;;  %v1565_v32 = vsel %vm1238_vm13, %v8200_v37, %v1564_v34 }
 0x43c   :  { %v8357_v38 = vperm.slane %v1323_v13, %v7721_v6  ;;  %v8360_v18 = vperm.slane %v1365_v2, %v7671_v29  ;;  %v1353_v47 = vsel %vm1238_vm13, %v10155_v42, %v1352_v21  ;;  %v2083_v23 = vsel %vm1238_vm13, %v2082_v16, %v8328_v24 }
 0x43d   :  { %2277 = vadd.xlane.f32.xlu1 %v2276_v63  ;;  %v1884_v20 = vrot.slane %v8141_v46, 4  ;;  %v8371_v37 = vperm.slane %v2107_v10, %v7721_v6  ;;  %v1299_v55 = vsel %vm1238_vm13, %v1298_v31, %v8221_v53  ;;  %v1435_v63 = vsel %vm1238_vm13, %v1434_v45, %v8340_v52  ;;  %v10156_v31 = vld [vmem:[#allocation41_spill] sm:$0xff] }
 0x43e   :  { %2292 = vadd.xlane.f32.xlu0 %v2291_v61  ;;  %v8365_v61 = vperm.slane %v1625_v9, %v7721_v6  ;;  %v1500_v3 = vrot.slane %v7717_v27, 4  ;;  %v2294_v5 = vsel %vm2134_vm14, %v1905_v54, 0.0  ;;  %v2177_v15 = vsel %vm2134_vm14, %v1565_v32, 0.0 }
 0x43f   :  { %v1674_v30 = vrot.slane %v8347_v26, 4  ;;  %v8382_v34 = vperm.slane %v1353_v47, %v7671_v29  ;;  %v8385_v46 = vperm.slane %v2083_v23, %v7721_v6  ;;  %v1342_v56 = vrot.slane %v8357_v38, 4 }
 0x440   :  { %v1860_v21 = vrot.slane %v8144_v0, 4  ;;  %v8392_v17 = vperm.slane %v1435_v63, %v7721_v6  ;;  %v1410_v13 = vrot.slane %v8360_v18, 4  ;;  %v1772_v22 = vrot.slane %v8032_v36, 4 }
 0x441   :  { %v1675_v27 = vsel %vm1238_vm13, %v1674_v30, %v8365_v61  ;;  %v2126_v51 = vrot.slane %v8371_v37, 4  ;;  %v8398_v2 = vperm.slane %v1299_v55, %v7721_v6  ;;  %v1501_v9 = vsel %vm1238_vm13, %v10156_v31, %v1500_v3 }
 0x442   :  { %v1488_v0 = vrot.slane %v7906_v35, 4  ;;  %v1885_v45 = vsel %vm1238_vm13, %v8054_v33, %v1884_v20  ;;  %v2168_v16 = vsel %vm2134_vm14, %v1675_v27, 0.0  ;;  %v1454_v54 = vrot.slane %v8392_v17, 4 }
 0x443   :  { %2286 = vadd.xlane.f32.xlu2 %v2285_v62  ;;  %v2127_v10 = vsel %vm1238_vm13, %v2126_v51, %v8385_v46  ;;  %v1343_v36 = vsel %vm1238_vm13, %v1342_v56, %v8398_v2  ;;  %v1411_v62 = vsel %vm1238_vm13, %v1410_v13, %v8382_v34  ;;  %v1861_v35 = vsel %vm1238_vm13, %v8094_v8, %v1860_v21 }
 0x444   :  { %v8416_v32 = vperm.slane %v1501_v9, %v7671_v29  ;;  %v1476_v33 = vrot.slane %v7793_v14, 4  ;;  %v8420_v42 = vperm.slane %v1885_v45, %v7721_v6  ;;  %v1773_v47 = vsel %vm1238_vm13, %v8013_v7, %v1772_v22  ;;  %v10157_v22 = vld [vmem:[#allocation75_spill] sm:$0xff] }
 0x445   :  { %2295 = vadd.xlane.f32.xlu1 %v2294_v5  ;;  %v1489_v23 = vsel %vm1238_vm13, %v7628_v41, %v1488_v0  ;;  %v2288_v20 = vsel %vm2134_vm14, %v2127_v10, 0.0  ;;  %v2183_v55 = vsel %vm2134_vm14, %v1343_v36, 0.0  ;;  %v8429_v8 = vperm.slane %v1411_v62, %v7721_v6 }
 0x446   :  { %2178 = vadd.xlane.f32.xlu0 %v2177_v15  ;;  %v1748_v63 = vrot.slane %v8078_v44, 4  ;;  %v8433_v14 = vperm.slane %v1861_v35, %v7721_v6  ;;  %v2016_v3 = vrot.slane %v8305_v39, 4  ;;  %v1464_v7 = vrot.slane %v7945_v1, 4 }
 0x447   :  { %v1455_v41 = vsel %vm1238_vm13, %v1454_v54, %v8429_v8  ;;  %v8440_v5 = vperm.slane %v1773_v47, %v7721_v6  ;;  %v8443_v15 = vperm.slane %v1489_v23, %v7671_v29  ;;  %v1906_v44 = vrot.slane %v8420_v42, 4  ;;  %v10159_v47 = vld [vmem:[#allocation69_spill] sm:$0xff] }
 0x448   :  { %v1546_v30 = vrot.slane %v8416_v32, 4  ;;  %v1477_v56 = vsel %vm1238_vm13, %v7598_v28, %v1476_v33  ;;  %v1612_v39 = vrot.slane %v8006_v50, 4  ;;  %v2186_v1 = vsel %vm2134_vm14, %v1455_v41, 0.0 }
 0x449   :  { %v1907_v21 = vsel %vm1238_vm13, %v1906_v44, %v8433_v14  ;;  %v2017_v27 = vsel %vm1238_vm13, %v8289_v25, %v2016_v3  ;;  %v1749_v13 = vsel %vm1238_vm13, %v8010_v12, %v1748_v63  ;;  %v1465_v51 = vsel %vm1238_vm13, %v10157_v22, %v1464_v7  ;;  %v10161_v3 = vld [vmem:[#allocation68_spill] sm:$0xff] }
 0x44a   :  { %v1794_v31 = vrot.slane %v8440_v5, 4  ;;  %v8461_v28 = vperm.slane %v1477_v56, %v7671_v29  ;;  %v1547_v50 = vsel %vm1238_vm13, %v1546_v30, %v8443_v15  ;;  %v1588_v9 = vrot.slane %v7874_v43, 4 }
 0x44b   :  { %2169 = vadd.xlane.f32.xlu2 %v2168_v16  ;;  %v2306_v0 = vsel %vm2134_vm14, %v1907_v21, 0.0  ;;  %v2297_v25 = vsel %vm2134_vm14, %v2017_v27, 0.0  ;;  %v8469_v12 = vperm.slane %v1749_v13, %v7721_v6  ;;  %v8472_v45 = vperm.slane %v1465_v51, %v7671_v29  ;;  %v10158_v16 = vld [vmem:[#allocation64_spill] sm:$0xff] }
 0x44c   :  { %v1613_v10 = vsel %vm1238_vm13, %v10158_v16, %v1612_v39  ;;  %v1676_v36 = vrot.slane %v8365_v61, 4  ;;  %v1996_v62 = vrot.slane %v8248_v60, 4  ;;  %v1972_v43 = vrot.slane %v8251_v58, 4  ;;  %v10162_v58 = vld [vmem:[#allocation72_spill] sm:$0xff] }
 0x44d   :  { %2184 = vadd.xlane.f32.xlu1 %v2183_v55  ;;  %v1795_v54 = vsel %vm1238_vm13, %v1794_v31, %v8469_v12  ;;  %v8482_v35 = vperm.slane %v1547_v50, %v7721_v6  ;;  %v1522_v33 = vrot.slane %v8461_v28, 4  ;;  %v1600_v23 = vrot.slane %v10159_v47, 4  ;;  %v10163_v21 = vld [vmem:[#allocation76_spill] sm:$0xff] }
 0x44e   :  { %2289 = vadd.xlane.f32.xlu0 %v2288_v20  ;;  %v10160_v20 = vld [vmem:[#allocation59_spill] sm:$0xff]  ;;  %v1344_v63 = vrot.slane %v8398_v2, 4  ;;  %v1589_v61 = vsel %vm1238_vm13, %v10161_v3, %v1588_v9  ;;  %v8491_v60 = vperm.slane %v1613_v10, %v7671_v29  ;;  %v1997_v7 = vsel %vm1238_vm13, %v10162_v58, %v1996_v62  ;;  %v10164_v13 = vld [vmem:[#allocation56_spill] sm:$0xff] }
 0x44f   :  { %v1576_v55 = vrot.slane %v10160_v20, 4  ;;  %v2303_v41 = vsel %vm2134_vm14, %v1795_v54, 0.0  ;;  %v1677_v30 = vsel %vm1238_vm13, %v8347_v26, %v1676_v36  ;;  %v1523_v2 = vsel %vm1238_vm13, %v1522_v33, %v8472_v45 }
 0x450   :  { %v1345_v44 = vsel %vm1238_vm13, %v8357_v38, %v1344_v63  ;;  %v1566_v56 = vrot.slane %v8482_v35, 4  ;;  %v1973_v39 = vsel %vm1238_vm13, %v8230_v57, %v1972_v43  ;;  %v1601_v27 = vsel %vm1238_vm13, %v10163_v21, %v1600_v23 }
 0x451   :  { %v1577_v38 = vsel %vm1238_vm13, %v10164_v13, %v1576_v55  ;;  %v8513_v26 = vperm.slane %v1997_v7, %v7721_v6  ;;  %v1658_v22 = vrot.slane %v8491_v60, 4  ;;  %v2195_v51 = vsel %vm2134_vm14, %v1345_v44, 0.0 }
 0x452   :  { %v2180_v31 = vsel %vm2134_vm14, %v1677_v30, 0.0  ;;  %v8519_v57 = vperm.slane %v1523_v2, %v7721_v6  ;;  %v8524_v9 = vperm.slane %v1973_v39, %v7721_v6  ;;  %v8531_v16 = vperm.slane %v1577_v38, %v7671_v29 }
 0x453   :  { %2187 = vadd.xlane.f32.xlu2 %v2186_v1  ;;  %v8506_v1 = vperm.slane %v1589_v61, %v7671_v29  ;;  %v2018_v36 = vrot.slane %v8513_v26, 4  ;;  %v1436_v23 = vrot.slane %v8340_v52, 4  ;;  %v2128_v20 = vrot.slane %v8385_v46, 4 }
 0x454   :  { %v1567_v10 = vsel %vm1238_vm13, %v1566_v56, %v8519_v57  ;;  %v1324_v7 = vrot.slane %v8302_v11, 4  ;;  %v1796_v44 = vrot.slane %v8469_v12, 4  ;;  %v1412_v30 = vrot.slane %v8382_v34, 4 }
 0x455   :  { %2298 = vadd.xlane.f32.xlu1 %v2297_v25  ;;  %v8528_v25 = vperm.slane %v1601_v27, %v7671_v29  ;;  %v1634_v62 = vrot.slane %v8506_v1, 4  ;;  %v2019_v33 = vsel %vm1238_vm13, %v2018_v36, %v8524_v9  ;;  %v2129_v52 = vsel %vm1238_vm13, %v8371_v37, %v2128_v20 }
 0x456   :  { %2307 = vadd.xlane.f32.xlu0 %v2306_v0  ;;  %v1456_v0 = vrot.slane %v8429_v8, 4  ;;  %v2189_v8 = vsel %vm2134_vm14, %v1567_v10, 0.0  ;;  %v2309_v3 = vsel %vm2134_vm14, %v2019_v33, 0.0  ;;  %v1437_v46 = vsel %vm1238_vm13, %v8298_v49, %v1436_v23 }
 0x457   :  { %v1659_v54 = vsel %vm1238_vm13, %v1658_v22, %v8528_v25  ;;  %v1635_v55 = vsel %vm1238_vm13, %v1634_v62, %v8531_v16  ;;  %v2300_v39 = vsel %vm2134_vm14, %v2129_v52, 0.0  ;;  %v1797_v37 = vsel %vm1238_vm13, %v8440_v5, %v1796_v44 }
 0x458   :  { %v1457_v47 = vsel %vm1238_vm13, %v8392_v17, %v1456_v0  ;;  %v8551_v63 = vperm.slane %v1659_v54, %v7721_v6  ;;  %v1641_v17 = vperm.slane %v1635_v55, %v7721_v6  ;;  %v8575_v49 = vperm.slane %v1437_v46, %v7721_v6 }
 0x459   :  { %v2198_v61 = vsel %vm2134_vm14, %v1457_v47, 0.0  ;;  %v1908_v11 = vrot.slane %v8433_v14, 4  ;;  %v1325_v34 = vsel %vm1238_vm13, %v8271_v4, %v1324_v7  ;;  %v2108_v12 = vrot.slane %v8317_v48, 4 }
 0x45a   :  { %v2315_v13 = vsel %vm2134_vm14, %v1797_v37, 0.0  ;;  %v1413_v38 = vsel %vm1238_vm13, %v8360_v18, %v1412_v30  ;;  %v1458_v22 = vrot.slane %v8575_v49, 4  ;;  %v1568_v14 = vrot.slane %v8519_v57, 4 }
 0x45b   :  { %2304 = vadd.xlane.f32.xlu2 %v2303_v41  ;;  %v1678_v41 = vrot.slane %v8551_v63, 4  ;;  %v1909_v4 = vsel %vm1238_vm13, %v8420_v42, %v1908_v11  ;;  %v8593_v48 = vperm.slane %v1325_v34, %v7721_v6  ;;  %v1421_v18 = vperm.slane %v1413_v38, %v7721_v6 }
 0x45c   :  { %v2109_v36 = vsel %vm1238_vm13, %v8285_v19, %v2108_v12  ;;  %v2318_v57 = vsel %vm2134_vm14, %v1909_v4, 0.0  ;;  %v1569_v42 = vsel %vm1238_vm13, %v8482_v35, %v1568_v14  ;;  %v2020_v44 = vrot.slane %v8524_v9, 4 }
 0x45d   :  { %2181 = vadd.xlane.f32.xlu1 %v2180_v31  ;;  %v1679_v21 = vsel %vm1238_vm13, %v1678_v41, %v1641_v17  ;;  %v1300_v31 = vrot.slane %v8221_v53, 4  ;;  %v1548_v53 = vrot.slane %v8443_v15, 4  ;;  %v1346_v54 = vrot.slane %v8593_v48, 4 }
 0x45e   :  { %2196 = vadd.xlane.f32.xlu0 %v2195_v51  ;;  %v8521_v50 = vpop.xlane.xlu2 %2148  ;;  %v2192_v27 = vsel %vm2134_vm14, %v1679_v21, 0.0  ;;  %v2084_v51 = vrot.slane %v8328_v24, 4  ;;  %v1459_v24 = vsel %vm1238_vm13, %v1458_v22, %v1421_v18  ;;  %v2117_v19 = vperm.slane %v2109_v36, %v7721_v6 }
 0x45f   :  { %v1301_v62 = vsel %vm1238_vm13, %v8266_v40, %v1300_v31  ;;  %v2210_v33 = vsel %vm2134_vm14, %v1459_v24, 0.0  ;;  %v2201_v47 = vsel %vm2134_vm14, %v1569_v42, 0.0  ;;  %v1680_v40 = vrot.slane %v1641_v17, 4 }
 0x460   :  { %v1309_v23 = vperm.slane %v1301_v62, %v7721_v6  ;;  %v2130_v55 = vrot.slane %v2117_v19, 4  ;;  %v1460_v21 = vrot.slane %v1421_v18, 4  ;;  %v2021_v37 = vsel %vm1238_vm13, %v8513_v26, %v2020_v44 }
 0x461   :  { %v8537_v43 = vpop.xlane.xlu0 %2136  ;;  %v1681_v7 = vsel %vm1238_vm13, %v8551_v63, %v1680_v40  ;;  %v1660_v12 = vrot.slane %v8528_v25, 4  ;;  %v1636_v38 = vrot.slane %v8531_v16, 4  ;;  %v6615_v22 = vmov 1  }
 0x462   :  { %v1347_v20 = vsel %vm1238_vm13, %v1346_v54, %v1309_v23  ;;  %5890 = vset.pattern.permute.xlu0 %v6615_v22  ;;  %5889 = vset.pattern.permute.xlu2 %v6615_v22 }
 0x463   :  { %2190 = vadd.xlane.f32.xlu2 %v2189_v8  ;;  %v2085_v8 = vsel %vm1238_vm13, %v8308_v59, %v2084_v51  ;;  %v1549_v59 = vsel %vm1238_vm13, %v8416_v32, %v1548_v53  ;;  %v2207_v46 = vsel %vm2134_vm14, %v1347_v20, 0.0  ;;  %v2204_v32 = vsel %vm2134_vm14, %v1681_v7, 0.0 }
 0x464   :  { %v2093_v15 = vperm.slane %v2085_v8, %v7721_v6  ;;  %v1557_v41 = vperm.slane %v1549_v59, %v7721_v6  ;;  %v1348_v51 = vrot.slane %v1309_v23, 4  ;;  %v1637_v18 = vsel %vm1238_vm13, %v8506_v1, %v1636_v38 }
 0x465   :  { %2199 = vadd.xlane.f32.xlu1 %v2198_v61  ;;  %v6616_v23 = vmov 2  }
 0x466   :  { %2310 = vadd.xlane.f32.xlu0 %v2309_v3  ;;  %v8555_v58 = vpop.xlane.xlu2 %2232  ;;  %v1524_v3 = vrot.slane %v8472_v45, 4  ;;  %v2131_v17 = vsel %vm1238_vm13, %v2130_v55, %v2093_v15  ;;  %v1570_v63 = vrot.slane %v1557_v41, 4  ;;  %v2132_v31 = vrot.slane %v2093_v15, 4  ;;  %5891 = vset.pattern.permute.xlu1 %v6616_v23 }
 0x467   :  { %v2312_v45 = vsel %vm2134_vm14, %v2131_v17, 0.0  ;;  %v1349_v16 = vsel %vm1238_vm13, %v8593_v48, %v1348_v51  ;;  %v8695_v17 = vld [vmem:[%s10165_s26] sm:$0xff] }
 0x468   :  { %v8568_v56 = vpop.xlane.xlu1 %2139  ;;  %v1525_v30 = vsel %vm1238_vm13, %v8461_v28, %v1524_v3  ;;  %v1461_v28 = vsel %vm1238_vm13, %v8575_v49, %v1460_v21  ;;  %v1661_v49 = vsel %vm1238_vm13, %v8491_v60, %v1660_v12  ;;  %v2219_v42 = vsel %vm2134_vm14, %v1349_v16, 0.0 }
 0x469   :  { %v8566_v2 = vpop.xlane.xlu0 %2151  ;;  %v1533_v11 = vperm.slane %v1525_v30, %v7721_v6  ;;  %v2222_v26 = vsel %vm2134_vm14, %v1461_v28, 0.0  ;;  %v1669_v24 = vperm.slane %v1661_v49, %v7721_v6  ;;  %v2133_v53 = vsel %vm1238_vm13, %v2117_v19, %v2132_v31 }
 0x46a   :  { %v1645_v60 = vperm.slane %v1637_v18, %v7721_v6  ;;  %v2324_v54 = vsel %vm2134_vm14, %v2133_v53, 0.0  ;;  %v6622_v31 = vmov 4  }
 0x46b   :  { %2301 = vadd.xlane.f32.xlu2 %v2300_v39  ;;  %v1572_v4 = vrot.slane %v1533_v11, 4  ;;  %v1682_v1 = vrot.slane %v1669_v24, 4 }
 0x46d   :  { %2316 = vadd.xlane.f32.xlu1 %v2315_v13  ;;  %v1571_v13 = vsel %vm1238_vm13, %v1570_v63, %v1533_v11  ;;  %v1573_v62 = vsel %vm1238_vm13, %v1557_v41, %v1572_v4  ;;  %v6617_v63 = vmov 5  }
 0x46e   :  { %2193 = vadd.xlane.f32.xlu0 %v2192_v27  ;;  %v8585_v5 = vpop.xlane.xlu2 %2247  ;;  %v2321_v27 = vsel %vm2134_vm14, %v2021_v37, 0.0  ;;  %v2213_v14 = vsel %vm2134_vm14, %v1571_v13, 0.0  ;;  %v2225_v48 = vsel %vm2134_vm14, %v1573_v62, 0.0  ;;  %v6619_v13 = vmov 3  }
 0x470   :  { %v8599_v10 = vpop.xlane.xlu1 %2244 }
 0x471   :  { %v8597_v0 = vpop.xlane.xlu0 %2235 }
 0x473   :  { %2319 = vadd.xlane.f32.xlu2 %v2318_v57 }
 0x475   :  { %2202 = vadd.xlane.f32.xlu1 %v2201_v47  ;;  %v1683_v47 = vsel %vm1238_vm13, %v1682_v1, %v1645_v60  ;;  %v10039_v1 = vmov 15  }
 0x476   :  { %2211 = vadd.xlane.f32.xlu0 %v2210_v33  ;;  %v8617_v35 = vpop.xlane.xlu2 %2238  ;;  %v1684_v33 = vrot.slane %v1645_v60, 4  ;;  %v2216_v15 = vsel %vm2134_vm14, %v1683_v47, 0.0  ;;  %v6625_v47 = vmov 6  }
 0x478   :  { %v8626_v52 = vpop.xlane.xlu1 %2256  ;;  %v1685_v20 = vsel %vm1238_vm13, %v1669_v24, %v1684_v33  ;;  %v10040_v24 = vmov 12  }
 0x479   :  { %v8624_v61 = vpop.xlane.xlu0 %2250  ;;  %v2228_v59 = vsel %vm2134_vm14, %v1685_v20, 0.0 }
 0x47b   :  { %2208 = vadd.xlane.f32.xlu2 %v2207_v46 }
 0x47d   :  { %2313 = vadd.xlane.f32.xlu1 %v2312_v45  ;;  %v8707_v45 = vld [vmem:[%s10165_s26 + $0x8] sm:$0xff] }
 0x47e   :  { %2205 = vadd.xlane.f32.xlu0 %v2204_v32  ;;  %v8638_v39 = vpop.xlane.xlu2 %2259 }
 0x480   :  { %v8645_v9 = vpop.xlane.xlu1 %2241 }
 0x481   :  { %v8643_v34 = vpop.xlane.xlu0 %2262 }
 0x483   :  { %2322 = vadd.xlane.f32.xlu2 %v2321_v27  ;;  %v6618_v27 = vmov 7  }
 0x485   :  { %2214 = vadd.xlane.f32.xlu1 %v2213_v14  ;;  %v10041_v14 = vmov 10  }
 0x486   :  { %2223 = vadd.xlane.f32.xlu0 %v2222_v26  ;;  %v8655_v25 = vpop.xlane.xlu2 %2253  ;;  %v6620_v26 = vmov 4.0  }
 0x487   :  { %6004 = vrcp.f32 %v6620_v26 }
 0x488   :  { %v8665_v57 = vpop.xlane.xlu1 %2268 }
 0x489   :  { %v8663_v36 = vpop.xlane.xlu0 %2142 }
 0x48b   :  { %2220 = vadd.xlane.f32.xlu2 %v2219_v42 }
 0x48d   :  { %2325 = vadd.xlane.f32.xlu1 %v2324_v54  ;;  %v6005_v4 = vpop.eup %6004  ;;  %v2468_v54 = vlaneseq }
 0x48e   :  { %2226 = vadd.xlane.f32.xlu0 %v2225_v48  ;;  %v8674_v8 = vpop.xlane.xlu2 %2271  ;;  %v2328_v18 = vmul.f32 4.0, %v6005_v4  ;;  %vm2332_vm15 = vweird.f32 %v6005_v4 }
 0x490   :  { %v8679_v19 = vpop.xlane.xlu1 %2154  ;;  %v2329_v62 = vsub.f32 1.0, %v2328_v18 }
 0x491   :  { %v8677_v40 = vpop.xlane.xlu0 %2163 }
 0x492   :  { %v2330_v48 = vmul.f32 %v6005_v4, %v2329_v62 }
 0x493   :  { %2217 = vadd.xlane.f32.xlu2 %v2216_v15 }
 0x495   :  { %2229 = vadd.xlane.f32.xlu1 %v2228_v59  ;;  %v8760_v59 = vand.u32 127, %v2468_v54 }
 0x496   :  { %v8684_v55 = vpop.xlane.xlu2 %2160 }
 0x497   :  { %10166 = vst [vmem:[#allocation65_spill] sm:$0xff] %v8760_v59  ;;  %v8777_v62 = vadd.s32 4294967281, %v8760_v59  ;;  %v8807_v6 = vadd.s32 4294967265, %v8760_v59 }
 0x498   :  { %v8688_v46 = vpop.xlane.xlu1 %2265 }
 0x499   :  { %v8686_v3 = vpop.xlane.xlu0 %2280 }
 0x49e   :  { %v8690_v7 = vpop.xlane.xlu2 %2274 }
 0x4a0   :  { %v8699_v44 = vpop.xlane.xlu1 %2283 }
 0x4a1   :  { %v8697_v41 = vpop.xlane.xlu0 %2157 }
 0x4a2   :  { %2632 = vperm.xlu0 %5890, %v8695_v17  }
 0x4a6   :  { %v8702_v32 = vpop.xlane.xlu2 %2145 }
 0x4a8   :  { %v8711_v21 = vpop.xlane.xlu1 %2166 }
 0x4a9   :  { %v8709_v30 = vpop.xlane.xlu0 %2175 }
 0x4aa   :  { %5897 = vset.pattern.permute.xlu0 %v6617_v63 }
 0x4ab   :  { %2716 = vperm.xlu0 %5897, %v8707_v45   ;;  %2636 = vperm.xlu2 %5889, %v8707_v45  }
 0x4ae   :  { %v8715_v37 = vpop.xlane.xlu2 %2172  ;;  %2656 = vperm.xlu1 %5891, %v8707_v45  }
 0x4b0   :  { %v8720_v12 = vpop.xlane.xlu1 %2277 }
 0x4b1   :  { %v8718_v11 = vpop.xlane.xlu0 %2292 }
 0x4b3   :  { %5902 = vset.pattern.permute.xlu0 %v6618_v27  ;;  %5892 = vset.pattern.permute.xlu2 %v6616_v23  ;;  %v2331_v23 = vadd.f32 %v6005_v4, %v2330_v48  ;;  %v10167_v48 = vmov 0  }
 0x4b4   :  { %2752 = vperm.xlu0 %5902, %v8695_v17   ;;  %2652 = vperm.xlu2 %5892, %v8695_v17  }
 0x4b6   :  { %v8724_v28 = vpop.xlane.xlu2 %2286  ;;  %5893 = vset.pattern.permute.xlu1 %v6619_v13 }
 0x4b7   :  { %2676 = vperm.xlu1 %5893, %v8707_v45  }
 0x4b8   :  { %v8729_v22 = vpop.xlane.xlu1 %2295 }
 0x4b9   :  { %v8727_v38 = vpop.xlane.xlu0 %2178 }
 0x4bc   :  { %5907 = vset.pattern.permute.xlu0 %v10041_v14  ;;  %5894 = vset.pattern.permute.xlu2 %v6619_v13  ;;  %v8766_v13 = vadd.s32 4294967289, %v8760_v59 }
 0x4bd   :  { %2816 = vperm.xlu0 %5907, %v8707_v45   ;;  %2672 = vperm.xlu2 %5894, %v8695_v17  }
 0x4be   :  { %v8734_v51 = vpop.xlane.xlu2 %2169 }
 0x4bf   :  { %5895 = vset.pattern.permute.xlu1 %v6622_v31 }
 0x4c0   :  { %2696 = vperm.xlu1 %5895, %v8707_v45   ;;  %v8739_v16 = vpop.xlane.xlu1 %2184 }
 0x4c1   :  { %v8736_v49 = vpop.xlane.xlu0 %2289 }
 0x4c5   :  { %5912 = vset.pattern.permute.xlu0 %v10040_v24  ;;  %5896 = vset.pattern.permute.xlu2 %v6622_v31 }
 0x4c6   :  { %2852 = vperm.xlu0 %5912, %v8695_v17   ;;  %v8743_v42 = vpop.xlane.xlu2 %2187  ;;  %2692 = vperm.xlu2 %5896, %v8695_v17  }
 0x4c8   :  { %5898 = vset.pattern.permute.xlu1 %v6617_v63  ;;  %v8748_v60 = vpop.xlane.xlu1 %2298  ;;  %v8762_v63 = vsel %vm2332_vm15, %v6005_v4, %v2331_v23  ;;  %vm2945_vm15 = vcmask 130048  }
 0x4c9   :  { %v8746_v53 = vpop.xlane.xlu0 %2307  ;;  %2712 = vperm.xlu1 %5898, %v8695_v17   ;;  %v2338_v26 = vmul.f32 %v8762_v63, %v8521_v50  ;;  %v8774_v18 = vmul.f32 %v8762_v63, %v8537_v43  ;;  %v2339_v4 = vmul.f32 %v8762_v63, %v8566_v2  ;;  %v2366_v50 = vmul.f32 %v8762_v63, %v8555_v58 }
 0x4ca   :  { %v2367_v54 = vmul.f32 %v8762_v63, %v8597_v0  ;;  %v8788_v43 = vadd.s32 4294967273, %v8760_v59  ;;  %v2368_v58 = vmul.f32 %v8762_v63, %v8617_v35  ;;  %v2372_v14 = vmul.f32 %v8762_v63, %v8624_v61 }
 0x4cb   :  { %v2484_v2 = vperm.slane %v2338_v26, %v8766_v13  ;;  %v2471_v0 = vperm.slane %v8774_v18, %v8766_v13  ;;  %v2485_v24 = vperm.slane %v2339_v4, %v8777_v62  ;;  %v6626_v26 = vmov 8  }
 0x4cc   :  { %v2373_v35 = vmul.f32 %v8762_v63, %v8655_v25  ;;  %v2533_v18 = vperm.slane %v2366_v50, %v8766_v13  ;;  %v2534_v61 = vperm.slane %v2367_v54, %v8777_v62  ;;  %v2369_v4 = vmul.f32 %v8762_v63, %v8645_v9 }
 0x4cd   :  { %v2374_v29 = vmul.f32 %v8762_v63, %v8626_v52  ;;  %v2543_v50 = vperm.slane %v2372_v14, %v8788_v43  ;;  %v2376_v9 = vmul.f32 %v8762_v63, %v8643_v34  ;;  %v2336_v54 = vmul.f32 %v8762_v63, %v8663_v36 }
 0x4ce   :  { %5917 = vset.pattern.permute.xlu0 %v10039_v1  ;;  %v8752_v33 = vpop.xlane.xlu2 %2304  ;;  %5899 = vset.pattern.permute.xlu2 %v6625_v47  ;;  %v2370_v1 = vmul.f32 %v8762_v63, %v8599_v10  ;;  %v2375_v10 = vmul.f32 %v8762_v63, %v8638_v39  ;;  %v2536_v39 = vperm.slane %v2368_v58, %v8788_v43 }
 0x4cf   :  { %2916 = vperm.xlu0 %5917, %v8707_v45   ;;  %2736 = vperm.xlu2 %5899, %v8707_v45   ;;  %v2545_v58 = vperm.slane %v2373_v35, %v8807_v6  ;;  %v2379_v52 = vmul.f32 %v8762_v63, %v8674_v8  ;;  %v2538_v14 = vperm.slane %v2369_v4, %v8807_v6 }
 0x4d0   :  { %v8758_v20 = vpop.xlane.xlu1 %2181  ;;  %v2377_v34 = vmul.f32 %v8762_v63, %v8688_v46  ;;  %v2547_v8 = vperm.slane %v2374_v29, %v8766_v13  ;;  %v2477_v46 = vperm.slane %v2336_v54, %v8788_v43  ;;  %v2342_v29 = vmul.f32 %v8762_v63, %v8684_v55 }
 0x4d1   :  { %v8756_v15 = vpop.xlane.xlu0 %2196  ;;  %5900 = vset.pattern.permute.xlu1 %v6625_v47 }
 0x4d2   :  { %2732 = vperm.xlu1 %5900, %v8695_v17  }
 0x4d6   :  { %v8770_v31 = vpop.xlane.xlu2 %2190 }
 0x4d7   :  { %5901 = vset.pattern.permute.xlu2 %v6618_v27  ;;  %5921 = vset.pattern.permute.xlu0 %v10167_v48  ;;  %v2335_v27 = vmul.f32 %v8762_v63, %v8568_v56  ;;  %v2371_v56 = vmul.f32 %v8762_v63, %v8585_v5  ;;  %v2540_v5 = vperm.slane %v2370_v1, %v8766_v13 }
 0x4d8   :  { %2756 = vperm.xlu2 %5901, %v8707_v45   ;;  %v8792_v23 = vpop.xlane.xlu1 %2199  ;;  %v8828_v48 = vsel %vm2474_vm0, %v2485_v24, %v2484_v2  ;;  %v2535_v24 = vsel %vm2474_vm0, %v2534_v61, %v2533_v18  ;;  %v2550_v18 = vperm.slane %v2376_v9, %v8788_v43  ;;  %v2340_v61 = vmul.f32 %v8762_v63, %v8679_v19 }
 0x4d9   :  { %v8790_v47 = vpop.xlane.xlu0 %2310  ;;  %v2473_v59 = vperm.slane %v2335_v27, %v8777_v62  ;;  %v2541_v1 = vperm.slane %v2371_v56, %v8777_v62  ;;  %v2548_v27 = vperm.slane %v2375_v10, %v8777_v62  ;;  %v2537_v10 = vsel %vm2478_vm1, %v2536_v39, %v2535_v24 }
 0x4da   :  { %5903 = vset.pattern.permute.xlu1 %v6626_v26  ;;  %v2555_v39 = vperm.slane %v2379_v52, %v8777_v62  ;;  %v2343_v9 = vmul.f32 %v8762_v63, %v8677_v40  ;;  %v2552_v19 = vperm.slane %v2377_v34, %v8807_v6  ;;  %v2487_v40 = vperm.slane %v2340_v61, %v8788_v43 }
 0x4db   :  { %2776 = vperm.xlu1 %5903, %v8707_v45   ;;  %v2542_v56 = vsel %vm2474_vm0, %v2541_v1, %v2540_v5  ;;  %v2549_v4 = vsel %vm2474_vm0, %v2548_v27, %v2547_v8  ;;  %v6627_v1 = vmov 9   ;;  %v2380_v27 = vmul.f32 %v8762_v63, %v8690_v7 }
 0x4dc   :  { %v2544_v35 = vsel %vm2478_vm1, %v2543_v50, %v2542_v56  ;;  %v2539_v50 = vsel %vm2482_vm2, %v2538_v14, %v2537_v10  ;;  %v2551_v55 = vsel %vm2478_vm1, %v2550_v18, %v2549_v4  ;;  %v10168_v52 = vmov 0.0  }
 0x4dd   :  { %v2546_v5 = vsel %vm2482_vm2, %v2545_v58, %v2544_v35  ;;  %2400 = vst.msk [vmem:[#allocation3 + $0x8] sm:$0xff] %vm2398_vm4, %v10168_v52  ;;  %v2491_v14 = vperm.slane %v2342_v29, %v8766_v13  ;;  %v2382_v7 = vmul.f32 %v8762_v63, %v8686_v3  ;;  %v2337_v34 = vmul.f32 %v8762_v63, %v8702_v32 }
 0x4de   :  { %v8825_v25 = vpop.xlane.xlu2 %2301  ;;  %2403 = vst.msk [vmem:[#allocation3 + $0x8] sm:$0xff] %vm2401_vm5, %v10168_v52  ;;  %v2492_v56 = vperm.slane %v2343_v9, %v8777_v62  ;;  %v2553_v10 = vsel %vm2482_vm2, %v2552_v19, %v2551_v55  ;;  %v2381_v8 = vmul.f32 %v8762_v63, %v8720_v12  ;;  %v2557_v3 = vperm.slane %v2380_v27, %v8788_v43 }
 0x4df   :  { %2399 = vst.msk [vmem:[#allocation3] sm:$0xff] %vm2398_vm4, %v10168_v52  ;;  %v2341_v32 = vmul.f32 %v8762_v63, %v8697_v41  ;;  %v2383_v18 = vmul.f32 %v8762_v63, %v8699_v44  ;;  %v2488_v12 = vsel %vm2478_vm1, %v2487_v40, %v8828_v48  ;;  %v2346_v61 = vmul.f32 %v8762_v63, %v8715_v37 }
 0x4e0   :  { %5904 = vset.pattern.permute.xlu2 %v6626_v26  ;;  %v8846_v36 = vpop.xlane.xlu1 %2316  ;;  %v2378_v26 = vmul.f32 %v8762_v63, %v8665_v57  ;;  %v2475_v57 = vsel %vm2474_vm0, %v2473_v59, %v2471_v0  ;;  %v2603_v59 = vsel %vm2589_vm3, %v2546_v5, %v2539_v50  ;;  %2402 = vst.msk [vmem:[#allocation3] sm:$0xff] %vm2401_vm5, %v10168_v52  ;;  %v10169_v29 = vmov 10  }
 0x4e1   :  { %v8844_v2 = vpop.xlane.xlu0 %2193  ;;  %2772 = vperm.xlu2 %5904, %v8695_v17   ;;  %v2479_v0 = vsel %vm2478_vm1, %v2477_v46, %v2475_v57  ;;  %v2344_v46 = vmul.f32 %v8762_v63, %v8711_v21  ;;  %v2493_v41 = vsel %vm2474_vm0, %v2492_v56, %v2491_v14  ;;  %v2561_v4 = vperm.slane %v2382_v7, %v8766_v13 }
 0x4e2   :  { %v2554_v54 = vperm.slane %v2378_v26, %v8766_v13  ;;  %v2481_v44 = vperm.slane %v2337_v34, %v8807_v6  ;;  %v2347_v5 = vmul.f32 %v8762_v63, %v8709_v30  ;;  %v2559_v48 = vperm.slane %v2381_v8, %v8807_v6 }
 0x4e3   :  { %5905 = vset.pattern.permute.xlu1 %v6627_v1  ;;  %v2384_v21 = vmul.f32 %v8762_v63, %v8724_v28  ;;  %v2348_v37 = vmul.f32 %v8762_v63, %v8727_v38  ;;  %v2489_v57 = vperm.slane %v2341_v32, %v8807_v6  ;;  %v2562_v50 = vperm.slane %v2383_v18, %v8777_v62 }
 0x4e4   :  { %2796 = vperm.xlu1 %5905, %v8707_v45   ;;  %v2556_v24 = vsel %vm2474_vm0, %v2555_v39, %v2554_v54  ;;  %v2604_v39 = vsel %vm2591_vm6, %v2553_v10, %v2603_v59  ;;  %v2385_v30 = vmul.f32 %v8762_v63, %v8736_v49  ;;  %v2494_v28 = vperm.slane %v2344_v46, %v8788_v43 }
 0x4e5   :  { %v2498_v19 = vperm.slane %v2346_v61, %v8766_v13  ;;  %v2387_v38 = vmul.f32 %v8762_v63, %v8729_v22  ;;  %v2483_v54 = vsel %vm2482_vm2, %v2481_v44, %v2479_v0  ;;  %v2499_v27 = vperm.slane %v2347_v5, %v8777_v62 }
 0x4e6   :  { %v8873_v58 = vpop.xlane.xlu2 %2319  ;;  %v2386_v55 = vmul.f32 %v8762_v63, %v8718_v11  ;;  %v2564_v59 = vperm.slane %v2384_v21, %v8788_v43  ;;  %v2501_v40 = vperm.slane %v2348_v37, %v8788_v43  ;;  %v2490_v0 = vsel %vm2482_vm2, %v2489_v57, %v2488_v12 }
 0x4e7   :  { %v2563_v7 = vsel %vm2474_vm0, %v2562_v50, %v2561_v4  ;;  %v2566_v34 = vperm.slane %v2385_v30, %v8807_v6  ;;  %v2351_v11 = vmul.f32 %v8762_v63, %v8743_v42  ;;  %v6628_v56 = vmov 11  }
 0x4e8   :  { %v8895_v35 = vpop.xlane.xlu1 %2202  ;;  %v8954_v10 = vsel %vm2589_vm3, %v2490_v0, %v2483_v54  ;;  %v2495_v8 = vsel %vm2478_vm1, %v2494_v28, %v2493_v41  ;;  %v2568_v32 = vperm.slane %v2386_v55, %v8766_v13  ;;  %v2350_v42 = vmul.f32 %v8762_v63, %v8739_v16 }
 0x4e9   :  { %v8893_v26 = vpop.xlane.xlu0 %2211  ;;  %5906 = vset.pattern.permute.xlu2 %v6627_v1  ;;  %v2558_v1 = vsel %vm2478_vm1, %v2557_v3, %v2556_v24  ;;  %v2345_v24 = vmul.f32 %v8762_v63, %v8734_v51  ;;  %v2500_v51 = vsel %vm2474_vm0, %v2499_v27, %v2498_v19  ;;  %v2569_v3 = vperm.slane %v2387_v38, %v8777_v62 }
 0x4ea   :  { %2792 = vperm.xlu2 %5906, %v8695_v17   ;;  %v2560_v49 = vsel %vm2482_vm2, %v2559_v48, %v2558_v1  ;;  %v2388_v12 = vmul.f32 %v8762_v63, %v8748_v60  ;;  %v2565_v46 = vsel %vm2478_vm1, %v2564_v59, %v2563_v7  ;;  %v2502_v61 = vsel %vm2478_vm1, %v2501_v40, %v2500_v51 }
 0x4eb   :  { %v2605_v18 = vsel %vm2593_vm7, %v2560_v49, %v2604_v39  ;;  %v2496_v41 = vperm.slane %v2345_v24, %v8807_v6  ;;  %v2389_v4 = vmul.f32 %v8762_v63, %v8825_v25  ;;  %v2567_v44 = vsel %vm2482_vm2, %v2566_v34, %v2565_v46 }
 0x4ec   :  { %5908 = vset.pattern.permute.xlu1 %v10169_v29  ;;  %v2506_v5 = vperm.slane %v2351_v11, %v8777_v62  ;;  %v2390_v39 = vmul.f32 %v8762_v63, %v8752_v33  ;;  %v2349_v16 = vmul.f32 %v8762_v63, %v8758_v20  ;;  %v2570_v48 = vsel %vm2474_vm0, %v2569_v3, %v2568_v32 }
 0x4ed   :  { %2812 = vperm.xlu1 %5908, %v8695_v17   ;;  %v2391_v21 = vmul.f32 %v8762_v63, %v8746_v53  ;;  %v2352_v25 = vmul.f32 %v8762_v63, %v8770_v31  ;;  %v2392_v37 = vmul.f32 %v8762_v63, %v8790_v47  ;;  %v2505_v33 = vperm.slane %v2350_v42, %v8766_v13 }
 0x4ee   :  { %v8931_v9 = vpop.xlane.xlu2 %2208  ;;  %v2571_v29 = vperm.slane %v2388_v12, %v8788_v43  ;;  %v2355_v20 = vmul.f32 %v8762_v63, %v8792_v23  ;;  %v8990_v1 = vsel %vm2482_vm2, %v2496_v41, %v2495_v8  ;;  %v2606_v53 = vsel %vm2595_vm8, %v2567_v44, %v2605_v18 }
 0x4ef   :  { %v2573_v31 = vperm.slane %v2389_v4, %v8807_v6  ;;  %v2353_v47 = vmul.f32 %v8762_v63, %v8844_v2  ;;  %v2507_v30 = vsel %vm2474_vm0, %v2506_v5, %v2505_v33  ;;  %v2575_v28 = vperm.slane %v2390_v39, %v8766_v13 }
 0x4f0   :  { %v2314_v22 = vpop.xlane.xlu1 %2313  ;;  %v2354_v23 = vmul.f32 %v8762_v63, %v8756_v15  ;;  %v2503_v19 = vperm.slane %v2349_v16, %v8807_v6  ;;  %v2576_v38 = vperm.slane %v2391_v21, %v8777_v62  ;;  %v2508_v54 = vperm.slane %v2352_v25, %v8788_v43 }
 0x4f1   :  { %v8946_v14 = vpop.xlane.xlu0 %2205  ;;  %v2578_v27 = vperm.slane %v2392_v37, %v8788_v43  ;;  %v2393_v55 = vmul.f32 %v8762_v63, %v2314_v22  ;;  %v10170_v2 = vmov 12   ;;  %v2572_v49 = vsel %vm2478_vm1, %v2571_v29, %v2570_v48 }
 0x4f2   :  { %5909 = vset.pattern.permute.xlu2 %v6628_v56  ;;  %v2513_v59 = vperm.slane %v2355_v20, %v8777_v62  ;;  %v2395_v40 = vmul.f32 %v8762_v63, %v8873_v58  ;;  %v2574_v15 = vsel %vm2482_vm2, %v2573_v31, %v2572_v49  ;;  %v2510_v24 = vperm.slane %v2353_v47, %v8807_v6 }
 0x4f3   :  { %2836 = vperm.xlu2 %5909, %v8707_v45   ;;  %v2394_v0 = vmul.f32 %v8762_v63, %v8846_v36  ;;  %v2577_v7 = vsel %vm2474_vm0, %v2576_v38, %v2575_v28  ;;  %v2512_v34 = vperm.slane %v2354_v23, %v8766_v13  ;;  %v2504_v11 = vsel %vm2482_vm2, %v2503_v19, %v2502_v61 }
 0x4f4   :  { %v2509_v58 = vsel %vm2478_vm1, %v2508_v54, %v2507_v30  ;;  %v2579_v8 = vsel %vm2478_vm1, %v2578_v27, %v2577_v7  ;;  %v2356_v51 = vmul.f32 %v8762_v63, %v8895_v35  ;;  %v2580_v3 = vperm.slane %v2393_v55, %v8807_v6 }
 0x4f5   :  { %5910 = vset.pattern.permute.xlu1 %v6628_v56  ;;  %v6629_v36 = vmov 13   ;;  %v2514_v32 = vsel %vm2474_vm0, %v2513_v59, %v2512_v34  ;;  %v2607_v18 = vsel %vm2597_vm9, %v2574_v15, %v2606_v53  ;;  %v2583_v42 = vperm.slane %v2395_v40, %v8777_v62 }
 0x4f6   :  { %v2323_v60 = vpop.xlane.xlu2 %2322  ;;  %2832 = vperm.xlu1 %5910, %v8695_v17   ;;  %v2357_v12 = vmul.f32 %v8762_v63, %v8946_v14  ;;  %v2511_v46 = vsel %vm2482_vm2, %v2510_v24, %v2509_v58  ;;  %v2582_v61 = vperm.slane %v2394_v0, %v8766_v13  ;;  %v2358_v35 = vmul.f32 %v8762_v63, %v8931_v9 }
 0x4f7   :  { %v2396_v22 = vmul.f32 %v8762_v63, %v2323_v60  ;;  %v2359_v16 = vmul.f32 %v8762_v63, %v8893_v26  ;;  %v2515_v60 = vperm.slane %v2356_v51, %v8788_v43  ;;  %v2581_v48 = vsel %vm2482_vm2, %v2580_v3, %v2579_v8 }
 0x4f8   :  { %v2215_v50 = vpop.xlane.xlu1 %2214  ;;  %v2584_v9 = vsel %vm2474_vm0, %v2583_v42, %v2582_v61  ;;  %v2517_v21 = vperm.slane %v2357_v12, %v8807_v6  ;;  %v2519_v33 = vperm.slane %v2358_v35, %v8766_v13  ;;  %v2608_v20 = vsel %vm2599_vm10, %v2581_v48, %v2607_v18 }
 0x4f9   :  { %v2224_v57 = vpop.xlane.xlu0 %2223  ;;  %v2585_v41 = vperm.slane %v2396_v22, %v8788_v43  ;;  %v2360_v44 = vmul.f32 %v8762_v63, %v2215_v50  ;;  %v2520_v50 = vperm.slane %v2359_v16, %v8777_v62  ;;  %v2516_v30 = vsel %vm2478_vm1, %v2515_v60, %v2514_v32 }
 0x4fa   :  { %v2363_v25 = vmul.f32 %v8762_v63, %v2224_v57  ;;  %v2592_v19 = vsel %vm2591_vm6, %v8990_v1, %v8954_v10  ;;  %v2518_v38 = vsel %vm2482_vm2, %v2517_v21, %v2516_v30  ;;  %vm3309_vm4 = vcmask 1040384  }
 0x4fb   :  { %5911 = vset.pattern.permute.xlu2 %v10170_v2  ;;  %v2586_v29 = vsel %vm2478_vm1, %v2585_v41, %v2584_v9  ;;  %v2522_v53 = vperm.slane %v2360_v44, %v8788_v43  ;;  %v2594_v27 = vsel %vm2593_vm7, %v2504_v11, %v2592_v19  ;;  %v2521_v55 = vsel %vm2474_vm0, %v2520_v50, %v2519_v33 }
 0x4fc   :  { %2856 = vperm.xlu2 %5911, %v8707_v45   ;;  %v2527_v54 = vperm.slane %v2363_v25, %v8777_v62  ;;  %v2596_v10 = vsel %vm2595_vm8, %v2511_v46, %v2594_v27 }
 0x4fd   :  { %v2523_v1 = vsel %vm2478_vm1, %v2522_v53, %v2521_v55  ;;  %v2598_v15 = vsel %vm2597_vm9, %v2518_v38, %v2596_v10 }
 0x4fe   :  { %v2221_v56 = vpop.xlane.xlu2 %2220  ;;  %5913 = vset.pattern.permute.xlu1 %v6629_v36 }
 0x4ff   :  { %2876 = vperm.xlu1 %5913, %v8707_v45   ;;  %v2362_v5 = vmul.f32 %v8762_v63, %v2221_v56  ;;  %v10172_v56 = vmov 0  }
 0x500   :  { %v2326_v4 = vpop.xlane.xlu1 %2325 }
 0x501   :  { %v2227_v39 = vpop.xlane.xlu0 %2226  ;;  %v2397_v14 = vmul.f32 %v8762_v63, %v2326_v4  ;;  %v2526_v31 = vperm.slane %v2362_v5, %v8766_v13  ;;  %v6630_v13 = vmov 14  }
 0x502   :  { %v2364_v26 = vmul.f32 %v8762_v63, %v2227_v39 }
 0x503   :  { %v2587_v37 = vperm.slane %v2397_v14, %v8807_v6  ;;  %v2528_v62 = vsel %vm2474_vm0, %v2527_v54, %v2526_v31 }
 0x504   :  { %5914 = vset.pattern.permute.xlu2 %v6629_v36  ;;  %v2529_v2 = vperm.slane %v2364_v26, %v8788_v43 }
 0x505   :  { %2872 = vperm.xlu2 %5914, %v8695_v17   ;;  %v2588_v47 = vsel %vm2482_vm2, %v2587_v37, %v2586_v29 }
 0x506   :  { %v2218_v57 = vpop.xlane.xlu2 %2217  ;;  %v2609_v28 = vsel %vm2601_vm11, %v2588_v47, %v2608_v20  ;;  %v2530_v22 = vsel %vm2478_vm1, %v2529_v2, %v2528_v62 }
 0x507   :  { %v2361_v23 = vmul.f32 %v8762_v63, %v2218_v57  ;;  %2614 = vst.msk [vmem:[#allocation3 + $0x8] sm:$0xff] %vm2612_vm12, %v2609_v28  ;;  %5915 = vset.pattern.permute.xlu1 %v6630_v13 }
 0x508   :  { %2896 = vperm.xlu1 %5915, %v8707_v45   ;;  %v2230_v59 = vpop.xlane.xlu1 %2229 }
 0x509   :  { %v2524_v49 = vperm.slane %v2361_v23, %v8807_v6  ;;  %v2365_v40 = vmul.f32 %v8762_v63, %v2230_v59  ;;  %v10171_v63 = vmov 15  }
 0x50b   :  { %v2525_v24 = vsel %vm2482_vm2, %v2524_v49, %v2523_v1  ;;  %v2531_v43 = vperm.slane %v2365_v40, %v8807_v6 }
 0x50c   :  { %v2600_v0 = vsel %vm2599_vm10, %v2525_v24, %v2598_v15 }
 0x50d   :  { %5916 = vset.pattern.permute.xlu2 %v6630_v13  ;;  %v2532_v7 = vsel %vm2482_vm2, %v2531_v43, %v2530_v22  ;;  %vm3117_vm2 = vcmask 60416  }
 0x50e   :  { %2892 = vperm.xlu2 %5916, %v8695_v17   ;;  %v2637_v34 = vpop.permute.xlu2 %2636  ;;  %v2602_v11 = vsel %vm2601_vm11, %v2532_v7, %v2600_v0  ;;  %v9089_v3 = vld [vmem:[#allocation3 + $0x8] sm:$0xff] }
 0x50f   :  { %2613 = vst.msk [vmem:[#allocation3] sm:$0xff] %vm2612_vm12, %v2602_v11  ;;  %v2640_v36 = vmul.f32 %v2637_v34, %v9089_v3  ;;  %v2933_v34 = vld [vmem:[%s10173_s12] sm:$0xff]  ;;  %vm3355_vm12 = vcmask 277768  }
 0x510   :  { %5918 = vset.pattern.permute.xlu1 %v10171_v63 }
 0x511   :  { %2912 = vperm.xlu1 %5918, %v8695_v17  }
 0x514   :  { %v2633_v8 = vpop.permute.xlu0 %2632 }
 0x516   :  { %5919 = vset.pattern.permute.xlu2 %v10172_v56  ;;  %v2653_v58 = vpop.permute.xlu2 %2652  ;;  %v9085_v6 = vld [vmem:[#allocation3] sm:$0xff] }
 0x517   :  { %2626 = vperm.xlu2 %5919, %v8707_v45   ;;  %v2639_v51 = vmul.f32 %v2633_v8, %v9085_v6  ;;  %v2659_v45 = vmul.f32 %v2653_v58, %v9085_v6 }
 0x519   :  { %5920 = vset.pattern.permute.xlu1 %v10172_v56  ;;  %2643 = vrot.lane.b32.xlu0 %v2639_v51, %s6578_s4 }
 0x51a   :  { %2621 = vperm.xlu1 %5920, %v8695_v17  }
 0x51d   :  { %v2717_v35 = vpop.permute.xlu0 %2716 }
 0x51e   :  { %v2673_v32 = vpop.permute.xlu2 %2672  ;;  %v2720_v41 = vmul.f32 %v2717_v35, %v9089_v3 }
 0x51f   :  { %2645 = vrot.lane.b32.xlu2 %v2640_v36, %s6578_s4  ;;  %v2679_v46 = vmul.f32 %v2673_v32, %v9085_v6 }
 0x520   :  { %v2657_v18 = vpop.permute.xlu1 %2656 }
 0x521   :  { %v2660_v42 = vmul.f32 %v2657_v18, %v9089_v3 }
 0x523   :  { %2665 = vrot.lane.b32.xlu1 %v2660_v42, %s6577_s28 }
 0x526   :  { %v2693_v12 = vpop.permute.xlu2 %2692  ;;  %v2753_v9 = vpop.permute.xlu0 %2752 }
 0x527   :  { %2663 = vrot.lane.b32.xlu2 %v2659_v45, %s6577_s28  ;;  %v2699_v44 = vmul.f32 %v2693_v12, %v9085_v6  ;;  %v2759_v21 = vmul.f32 %v2753_v9, %v9085_v6 }
 0x529   :  { %v2677_v61 = vpop.permute.xlu1 %2676 }
 0x52a   :  { %v2680_v17 = vmul.f32 %v2677_v61, %v9089_v3 }
 0x52b   :  { %2683 = vrot.lane.b32.xlu1 %v2679_v46, %s6579_s9 }
 0x52c   :  { %2685 = vrot.lane.b32.xlu0 %v2680_v17, %s6579_s9  ;;  %s6631_s9 = smov 118  }
 0x52e   :  { %v2737_v4 = vpop.permute.xlu2 %2736 }
 0x52f   :  { %v2740_v14 = vmul.f32 %v2737_v4, %v9089_v3  ;;  %v2817_v47 = vpop.permute.xlu0 %2816 }
 0x530   :  { %v2820_v57 = vmul.f32 %v2817_v47, %v9089_v3 }
 0x532   :  { %v2697_v5 = vpop.permute.xlu1 %2696 }
 0x533   :  { %v2700_v39 = vmul.f32 %v2697_v5, %v9089_v3  ;;  %2725 = vrot.lane.b32.xlu1 %v2720_v41, %s6581_s20 }
 0x534   :  { %2703 = vrot.lane.b32.xlu0 %v2699_v44, %s6580_s19 }
 0x535   :  { %2705 = vrot.lane.b32.xlu2 %v2700_v39, %s6580_s19  ;;  %s6632_s19 = smov 119  }
 0x536   :  { %v2757_v16 = vpop.permute.xlu2 %2756 }
 0x537   :  { %v2760_v25 = vmul.f32 %v2757_v16, %v9089_v3 }
 0x538   :  { %v2853_v13 = vpop.permute.xlu0 %2852 }
 0x539   :  { %v2859_v55 = vmul.f32 %v2853_v13, %v9085_v6 }
 0x53b   :  { %v2713_v60 = vpop.permute.xlu1 %2712 }
 0x53c   :  { %v2719_v48 = vmul.f32 %v2713_v60, %v9085_v6  ;;  %2745 = vrot.lane.b32.xlu0 %v2740_v14, %s6582_s3 }
 0x53e   :  { %2723 = vrot.lane.b32.xlu2 %v2719_v48, %s6581_s20  ;;  %v2773_v33 = vpop.permute.xlu2 %2772  ;;  %s6633_s20 = smov 117  }
 0x53f   :  { %v2779_v26 = vmul.f32 %v2773_v33, %v9085_v6 }
 0x541   :  { %v2917_v15 = vpop.permute.xlu0 %2916 }
 0x542   :  { %v2920_v0 = vmul.f32 %v2917_v15, %v9089_v3 }
 0x544   :  { %2763 = vrot.lane.b32.xlu0 %v2759_v21, %s6583_s11  ;;  %v2733_v37 = vpop.permute.xlu1 %2732 }
 0x545   :  { %v2739_v29 = vmul.f32 %v2733_v37, %v9085_v6 }
 0x546   :  { %2765 = vrot.lane.b32.xlu2 %v2760_v25, %s6583_s11  ;;  %v2793_v31 = vpop.permute.xlu2 %2792  ;;  %s6635_s11 = smov 113  }
 0x547   :  { %2743 = vrot.lane.b32.xlu1 %v2739_v29, %s6582_s3  ;;  %v2799_v50 = vmul.f32 %v2793_v31, %v9085_v6  ;;  %s6634_s3 = smov 115  }
 0x54d   :  { %v2777_v20 = vpop.permute.xlu1 %2776 }
 0x54e   :  { %v2780_v53 = vmul.f32 %v2777_v20, %v9089_v3  ;;  %2783 = vrot.lane.b32.xlu2 %v2779_v26, %s6591_s22  ;;  %v2837_v23 = vpop.permute.xlu2 %2836 }
 0x54f   :  { %v2840_v19 = vmul.f32 %v2837_v23, %v9089_v3 }
 0x550   :  { %2785 = vrot.lane.b32.xlu1 %v2780_v53, %s6591_s22 }
 0x556   :  { %2825 = vrot.lane.b32.xlu2 %v2820_v57, %s6631_s9  ;;  %v2797_v30 = vpop.permute.xlu1 %2796  ;;  %v2857_v27 = vpop.permute.xlu2 %2856 }
 0x557   :  { %v2800_v28 = vmul.f32 %v2797_v30, %v9089_v3  ;;  %v2860_v2 = vmul.f32 %v2857_v27, %v9089_v3 }
 0x558   :  { %2803 = vrot.lane.b32.xlu1 %v2799_v50, %s6632_s19 }
 0x559   :  { %2805 = vrot.lane.b32.xlu0 %v2800_v28, %s6632_s19 }
 0x55f   :  { %v2813_v38 = vpop.permute.xlu1 %2812  ;;  %v2873_v10 = vpop.permute.xlu2 %2872 }
 0x560   :  { %v2819_v54 = vmul.f32 %v2813_v38, %v9085_v6  ;;  %2845 = vrot.lane.b32.xlu1 %v2840_v19, %s6633_s20  ;;  %v2879_v1 = vmul.f32 %v2873_v10, %v9085_v6 }
 0x562   :  { %2823 = vrot.lane.b32.xlu0 %v2819_v54, %s6631_s9 }
 0x568   :  { %2863 = vrot.lane.b32.xlu1 %v2859_v55, %s6587_s8  ;;  %v2833_v49 = vpop.permute.xlu1 %2832  ;;  %v2893_v24 = vpop.permute.xlu2 %2892 }
 0x569   :  { %v2839_v59 = vmul.f32 %v2833_v49, %v9085_v6  ;;  %v2899_v43 = vmul.f32 %v2893_v24, %v9085_v6 }
 0x56a   :  { %2865 = vrot.lane.b32.xlu0 %v2860_v2, %s6587_s8  ;;  %s6636_s8 = smov 114  }
 0x56b   :  { %2843 = vrot.lane.b32.xlu2 %v2839_v59, %s6633_s20  ;;  %s10178_s20 = sld [smem:[#allocation87_spill]] }
 0x571   :  { %v2877_v62 = vpop.permute.xlu1 %2876  ;;  %v2627_v56 = vpop.permute.xlu2 %2626 }
 0x572   :  { %v2880_v40 = vmul.f32 %v2877_v62, %v9089_v3  ;;  %2883 = vrot.lane.b32.xlu0 %v2879_v1, %s6634_s3  ;;  %v2630_v39 = vmul.f32 %v2627_v56, %v9089_v3 }
 0x574   :  { %2885 = vrot.lane.b32.xlu2 %v2880_v40, %s6634_s3 }
 0x579   :  { %v2646_v51 = vpop.permute.xlu2 %2645 }
 0x57a   :  { %2925 = vrot.lane.b32.xlu0 %v2920_v0, %s6635_s11  ;;  %v2897_v22 = vpop.permute.xlu1 %2896  ;;  %v2650_v16 = vadd.f32 %v2646_v51, %v2630_v39  ;;  %v2932_v51 = vld [vmem:[#allocation11 + $0x8] sm:$0xff] }
 0x57b   :  { %v2900_v7 = vmul.f32 %v2897_v22, %v9089_v3  ;;  %v2934_v3 = vld [vmem:[%s10173_s12 + $0x8] sm:$0xff] }
 0x57c   :  { %2903 = vrot.lane.b32.xlu2 %v2899_v43, %s6636_s8 }
 0x57d   :  { %2905 = vrot.lane.b32.xlu1 %v2900_v7, %s6636_s8 }
 0x581   :  { %v2664_v18 = vpop.permute.xlu2 %2663 }
 0x582   :  { %2942 = vperm.xlu0 %5921, %v2934_v3  }
 0x583   :  { %v2913_v11 = vpop.permute.xlu1 %2912 }
 0x584   :  { %v2919_v63 = vmul.f32 %v2913_v11, %v9085_v6  ;;  %2937 = vperm.xlu2 %5919, %v2933_v34  }
 0x586   :  { %2923 = vrot.lane.b32.xlu1 %v2919_v63, %s6635_s11 }
 0x58b   :  { %v2644_v8 = vpop.permute.xlu0 %2643 }
 0x58c   :  { %v2622_v58 = vpop.permute.xlu1 %2621 }
 0x58d   :  { %v2629_v14 = vmul.f32 %v2622_v58, %v9085_v6 }
 0x58f   :  { %v2706_v12 = vpop.permute.xlu2 %2705  ;;  %v2649_v9 = vadd.f32 %v2644_v8, %v2629_v14  ;;  %v2931_v8 = vld [vmem:[#allocation11] sm:$0xff] }
 0x591   :  { %v2669_v33 = vadd.f32 %v2664_v18, %v2649_v9 }
 0x595   :  { %v2666_v36 = vpop.permute.xlu1 %2665 }
 0x596   :  { %v2670_v60 = vadd.f32 %v2666_v36, %v2650_v16 }
 0x598   :  { %v2724_v17 = vpop.permute.xlu2 %2723 }
 0x59d   :  { %v2684_v42 = vpop.permute.xlu1 %2683 }
 0x59e   :  { %v2686_v32 = vpop.permute.xlu0 %2685  ;;  %v2689_v26 = vadd.f32 %v2684_v42, %v2669_v33 }
 0x59f   :  { %v2690_v21 = vadd.f32 %v2686_v32, %v2670_v60 }
 0x5a0   :  { %v2766_v4 = vpop.permute.xlu2 %2765 }
 0x5a1   :  { %v2710_v29 = vadd.f32 %v2706_v12, %v2690_v21 }
 0x5a5   :  { %v2726_v46 = vpop.permute.xlu1 %2725 }
 0x5a6   :  { %v2704_v45 = vpop.permute.xlu0 %2703  ;;  %v2730_v20 = vadd.f32 %v2726_v46, %v2710_v29 }
 0x5a7   :  { %v2709_v53 = vadd.f32 %v2704_v45, %v2689_v26 }
 0x5a8   :  { %v2784_v48 = vpop.permute.xlu2 %2783 }
 0x5a9   :  { %v2729_v57 = vadd.f32 %v2724_v17, %v2709_v53 }
 0x5ae   :  { %v2746_v61 = vpop.permute.xlu0 %2745 }
 0x5af   :  { %v2750_v31 = vadd.f32 %v2746_v61, %v2730_v20 }
 0x5b0   :  { %v2826_v47 = vpop.permute.xlu2 %2825 }
 0x5b1   :  { %v2770_v30 = vadd.f32 %v2766_v4, %v2750_v31 }
 0x5b6   :  { %v2764_v41 = vpop.permute.xlu0 %2763 }
 0x5b9   :  { %v2744_v35 = vpop.permute.xlu1 %2743 }
 0x5ba   :  { %v2749_v28 = vadd.f32 %v2744_v35, %v2729_v57 }
 0x5bc   :  { %v2769_v54 = vadd.f32 %v2764_v41, %v2749_v28 }
 0x5be   :  { %v2789_v27 = vadd.f32 %v2784_v48, %v2769_v54  ;;  %v10175_v54 = vld [vmem:[#allocation71_spill] sm:$0xff] }
 0x5c2   :  { %v2786_v44 = vpop.permute.xlu1 %2785 }
 0x5c3   :  { %v2790_v23 = vadd.f32 %v2786_v44, %v2770_v30 }
 0x5c5   :  { %v2844_v19 = vpop.permute.xlu2 %2843 }
 0x5ca   :  { %v2804_v25 = vpop.permute.xlu1 %2803 }
 0x5cb   :  { %v2806_v5 = vpop.permute.xlu0 %2805  ;;  %v2809_v59 = vadd.f32 %v2804_v25, %v2789_v27  ;;  %v10174_v25 = vld [vmem:[#allocation66_spill] sm:$0xff] }
 0x5cc   :  { %v2810_v38 = vadd.f32 %v2806_v5, %v2790_v23 }
 0x5ce   :  { %v2830_v13 = vadd.f32 %v2826_v47, %v2810_v38  ;;  %v2886_v62 = vpop.permute.xlu2 %2885 }
 0x5d2   :  { %v2846_v6 = vpop.permute.xlu1 %2845 }
 0x5d3   :  { %v2850_v49 = vadd.f32 %v2846_v6, %v2830_v13 }
 0x5d4   :  { %v2824_v37 = vpop.permute.xlu0 %2823 }
 0x5d5   :  { %v2829_v1 = vadd.f32 %v2824_v37, %v2809_v59 }
 0x5d6   :  { %v2904_v11 = vpop.permute.xlu2 %2903 }
 0x5d7   :  { %v2849_v15 = vadd.f32 %v2844_v19, %v2829_v1 }
 0x5da   :  { %v2864_v55 = vpop.permute.xlu1 %2863 }
 0x5db   :  { %v2869_v43 = vadd.f32 %v2864_v55, %v2849_v15 }
 0x5dc   :  { %v2866_v50 = vpop.permute.xlu0 %2865 }
 0x5dd   :  { %v2870_v10 = vadd.f32 %v2866_v50, %v2850_v49 }
 0x5de   :  { %v2938_v32 = vpop.permute.xlu2 %2937 }
 0x5df   :  { %v2890_v40 = vadd.f32 %v2886_v62, %v2870_v10 }
 0x5e4   :  { %v2884_v2 = vpop.permute.xlu0 %2883 }
 0x5e5   :  { %v2889_v34 = vadd.f32 %v2884_v2, %v2869_v43 }
 0x5e7   :  { %v2909_v63 = vadd.f32 %v2904_v11, %v2889_v34 }
 0x5ec   :  { %v2926_v22 = vpop.permute.xlu0 %2925 }
 0x5ef   :  { %v2906_v24 = vpop.permute.xlu1 %2905 }
 0x5f0   :  { %v2910_v0 = vadd.f32 %v2906_v24, %v2890_v40 }
 0x5f2   :  { %v2930_v7 = vadd.f32 %v2926_v22, %v2910_v0 }
 0x5f4   :  { %2966 = vmatpush.msrb.mxu0 %v2930_v7  ;;  %5791 = vmatpush.msra.mxu1 %v2930_v7  ;;  %v2943_v36 = vpop.permute.xlu0 %2942 }
 0x5f8   :  { %v2924_v56 = vpop.permute.xlu1 %2923 }
 0x5f9   :  { %v2929_v58 = vadd.f32 %v2924_v56, %v2909_v63 }
 0x5fb   :  { %2967 = vmatpush.msrb.mxu0 %v2929_v58  ;;  %5792 = vmatpush.msra.mxu1 %v2929_v58 }
 0x5fc   :  { %5688 = vmatmul.msk.f32.vlgmr.msrb.gmra.mxu0 %vm2945_vm15, %v2931_v8  ;;  %5689 = vmatmul.msk.f32.vlgmr.msra.gmra.mxu1 %vm2945_vm15, %v2932_v51 }
 0x679   :  { %v2969_v18 = vpop.f32.mrf.mxu0  ;;  %v2972_v42 = vpop.f32.mrf.mxu1 }
 0x67a   :  { %v2970_v45 = vadd.f32 %v2969_v18, %v2938_v32  ;;  %v2973_v12 = vadd.f32 %v2972_v42, %v2943_v36 }
 0x67c   :  { %v2977_v46 = vmul.f32 1.442695, %v2970_v45  ;;  %v2979_v61 = vmul.f32 1.442695, %v2973_v12  ;;  %vm2976_vm0 = vcmp.gt.f32.partialorder %v2973_v12, 0.0  ;;  %vm2975_vm1 = vcmp.gt.f32.partialorder %v2970_v45, 0.0 }
 0x67e   :  { %6006 = vpow2.f32 %v2977_v46 }
 0x67f   :  { %6008 = vpow2.f32 %v2979_v61 }
 0x684   :  { %v6007_v17 = vpop.eup %6006 }
 0x685   :  { %v6009_v35 = vpop.eup %6008  ;;  %v5690_v41 = vadd.f32 -1.0, %v6007_v17 }
 0x686   :  { %v5691_v4 = vadd.f32 -1.0, %v6009_v35 }
 0x687   :  { %v2983_v44 = vsel %vm2975_vm1, %v2970_v45, %v5690_v41  ;;  %vm3529_vm1 = vcmask 785408  }
 0x688   :  { %v2984_v5 = vsel %vm2976_vm0, %v2973_v12, %v5691_v4  ;;  %2993 = vrot.lane.b32.xlu0 %v2983_v44, %s6603_s24  ;;  %2999 = vrot.lane.b32.xlu1 %v2983_v44, %s6590_s1  ;;  %v3007_v9 = vrot.slane %v2983_v44, 4  ;;  %vm3464_vm0 = vcmask 269320  }
 0x689   :  { %3001 = vrot.lane.b32.xlu2 %v2984_v5, %s6590_s1  ;;  %v3063_v1 = vrot.slane %v2984_v5, 4 }
 0x690   :  { %2987 = vrot.lane.b32.xlu1 %v2983_v44, %s6591_s22 }
 0x691   :  { %2989 = vrot.lane.b32.xlu2 %v2984_v5, %s6591_s22 }
 0x698   :  { %2995 = vrot.lane.b32.xlu1 %v2984_v5, %s6603_s24  ;;  %s10177_s24 = sld [smem:[#allocation85_spill]] }
 0x6e3   :  { %v3002_v39 = vpop.permute.xlu2 %3001 }
 0x6e4   :  { %v3073_v20 = vrot.slane %v3002_v39, 4 }
 0x6eb   :  { %v2990_v47 = vpop.permute.xlu2 %2989 }
 0x6ec   :  { %v3074_v19 = vsel %vm1238_vm13, %v3073_v20, %v2990_v47  ;;  %v3075_v38 = vrot.slane %v2990_v47, 4 }
 0x6ed   :  { %v3080_v10 = vperm.slane %v3074_v19, %v10174_v25 }
 0x6ee   :  { %v3076_v40 = vsel %vm1238_vm13, %v3002_v39, %v3075_v38 }
 0x6ef   :  { %v3084_v7 = vperm.slane %v3076_v40, %v10174_v25  ;;  %v3085_v34 = vrot.slane %v3080_v10, 4 }
 0x6f1   :  { %v3097_v42 = vrot.slane %v3084_v7, 4 }
 0x6fa   :  { %v2994_v14 = vpop.permute.xlu0 %2993  ;;  %v3000_v16 = vpop.permute.xlu1 %2999 }
 0x6fb   :  { %v3005_v60 = vrot.slane %v2994_v14, 4  ;;  %v3008_v21 = vsel %vm1238_vm13, %v2994_v14, %v3007_v9  ;;  %v3017_v33 = vrot.slane %v3000_v16, 4 }
 0x6fc   :  { %v3016_v29 = vperm.slane %v3008_v21, %v10174_v25 }
 0x6fd   :  { %v3006_v48 = vsel %vm1238_vm13, %v3005_v60, %v2983_v44 }
 0x6fe   :  { %v3012_v37 = vperm.slane %v3006_v48, %v10174_v25  ;;  %v3043_v50 = vrot.slane %v3016_v29, 4 }
 0x700   :  { %v3031_v57 = vrot.slane %v3012_v37, 4 }
 0x702   :  { %v2988_v26 = vpop.permute.xlu1 %2987 }
 0x703   :  { %v3018_v53 = vsel %vm1238_vm13, %v3017_v33, %v2988_v26  ;;  %v3019_v31 = vrot.slane %v2988_v26, 4 }
 0x704   :  { %v3024_v3 = vperm.slane %v3018_v53, %v10174_v25 }
 0x705   :  { %v3020_v6 = vsel %vm1238_vm13, %v3000_v16, %v3019_v31 }
 0x706   :  { %v3028_v30 = vperm.slane %v3020_v6, %v10174_v25  ;;  %v3029_v28 = vrot.slane %v3024_v3, 4  ;;  %v3032_v23 = vsel %vm1238_vm13, %v3024_v3, %v3031_v57 }
 0x707   :  { %v9167_v13 = vperm.slane %v3032_v23, %v10175_v54 }
 0x708   :  { %v3044_v27 = vsel %vm1238_vm13, %v3028_v30, %v3043_v50  ;;  %v3030_v55 = vsel %vm1238_vm13, %v3029_v28, %v3012_v37  ;;  %v3041_v56 = vrot.slane %v3028_v30, 4 }
 0x709   :  { %v3124_v2 = vsel %vm3117_vm2, %v9167_v13, 0.0  ;;  %v9174_v49 = vperm.slane %v3044_v27, %v10175_v54  ;;  %v3036_v59 = vperm.slane %v3030_v55, %v10175_v54  ;;  %v3055_v26 = vrot.slane %v9167_v13, 4 }
 0x70a   :  { %3125 = vadd.xlane.f32.xlu0 %v3124_v2  ;;  %v2996_v62 = vpop.permute.xlu1 %2995  ;;  %v3042_v61 = vsel %vm1238_vm13, %v3041_v56, %v3016_v29  ;;  %v6637_v13 = vmov 8.0  }
 0x70b   :  { %v3061_v15 = vrot.slane %v2996_v62, 4  ;;  %v3136_v24 = vsel %vm3117_vm2, %v9174_v49, 0.0  ;;  %v3053_v0 = vrot.slane %v3036_v59, 4  ;;  %v3064_v22 = vsel %vm1238_vm13, %v2996_v62, %v3063_v1 }
 0x70c   :  { %3137 = vadd.xlane.f32.xlu2 %v3136_v24  ;;  %v3072_v58 = vperm.slane %v3064_v22, %v10174_v25  ;;  %v3118_v12 = vsel %vm3117_vm2, %v3036_v59, 0.0  ;;  %v3048_v41 = vperm.slane %v3042_v61, %v10175_v54  ;;  %v3056_v31 = vsel %vm1238_vm13, 0.0, %v3055_v26 }
 0x70d   :  { %v3062_v43 = vsel %vm1238_vm13, %v3061_v15, %v2984_v5  ;;  %v3054_v63 = vsel %vm1238_vm13, 0.0, %v3053_v0  ;;  %v3127_v57 = vsel %vm3117_vm2, %v3056_v31, 0.0  ;;  %v3059_v30 = vrot.slane %v9174_v49, 4 }
 0x70e   :  { %v3068_v11 = vperm.slane %v3062_v43, %v10174_v25  ;;  %v3121_v36 = vsel %vm3117_vm2, %v3054_v63, 0.0  ;;  %v3098_v17 = vsel %vm1238_vm13, %v3097_v42, %v3072_v58  ;;  %v3057_v39 = vrot.slane %v3048_v41, 4 }
 0x70f   :  { %v3104_v44 = vperm.slane %v3098_v17, %v10175_v54  ;;  %v3099_v48 = vrot.slane %v3072_v58, 4  ;;  %v3130_v29 = vsel %vm3117_vm2, %v3048_v41, 0.0  ;;  %v3060_v23 = vsel %vm1238_vm13, 0.0, %v3059_v30 }
 0x710   :  { %v3087_v8 = vrot.slane %v3068_v11, 4  ;;  %v3086_v51 = vsel %vm1238_vm13, %v3085_v34, %v3068_v11  ;;  %v3058_v9 = vsel %vm1238_vm13, 0.0, %v3057_v39  ;;  %v3139_v38 = vsel %vm3117_vm2, %v3060_v23, 0.0 }
 0x711   :  { %v3092_v32 = vperm.slane %v3086_v51, %v10175_v54  ;;  %v3154_v16 = vsel %vm3117_vm2, %v3104_v44, 0.0  ;;  %v3133_v25 = vsel %vm3117_vm2, %v3058_v9, 0.0  ;;  %v3100_v37 = vsel %vm1238_vm13, %v3084_v7, %v3099_v48 }
 0x712   :  { %3122 = vadd.xlane.f32.xlu0 %v3121_v36  ;;  %v3088_v18 = vsel %vm1238_vm13, %v3080_v10, %v3087_v8  ;;  %v3113_v20 = vrot.slane %v3104_v44, 4  ;;  %v3108_v53 = vperm.slane %v3100_v37, %v10175_v54  ;;  %6010 = vrcp.f32 %v6637_v13  ;;  %v10176_v8 = vld [vmem:[#allocation65_spill] sm:$0xff] }
 0x713   :  { %v3142_v45 = vsel %vm3117_vm2, %v3092_v32, 0.0  ;;  %v3096_v46 = vperm.slane %v3088_v18, %v10175_v54  ;;  %v3109_v60 = vrot.slane %v3092_v32, 4 }
 0x714   :  { %3143 = vadd.xlane.f32.xlu1 %v3142_v45  ;;  %3119 = vadd.xlane.f32.xlu2 %v3118_v12  ;;  %v3114_v47 = vsel %vm1238_vm13, 0.0, %v3113_v20  ;;  %v3160_v3 = vsel %vm3117_vm2, %v3108_v53, 0.0  ;;  %v3115_v50 = vrot.slane %v3108_v53, 4 }
 0x715   :  { %v3111_v35 = vrot.slane %v3096_v46, 4  ;;  %v3148_v14 = vsel %vm3117_vm2, %v3096_v46, 0.0  ;;  %v3110_v21 = vsel %vm1238_vm13, 0.0, %v3109_v60  ;;  %v3157_v6 = vsel %vm3117_vm2, %v3114_v47, 0.0 }
 0x716   :  { %v3145_v33 = vsel %vm3117_vm2, %v3110_v21, 0.0  ;;  %v3116_v28 = vsel %vm1238_vm13, 0.0, %v3115_v50 }
 0x717   :  { %v3112_v4 = vsel %vm1238_vm13, 0.0, %v3111_v35  ;;  %v3163_v19 = vsel %vm3117_vm2, %v3116_v28, 0.0 }
 0x718   :  { %v3151_v5 = vsel %vm3117_vm2, %v3112_v4, 0.0  ;;  %v6011_v55 = vpop.eup %6010 }
 0x719   :  { %v3167_v59 = vmul.f32 8.0, %v6011_v55  ;;  %vm3171_vm13 = vweird.f32 %v6011_v55 }
 0x71a   :  { %3152 = vadd.xlane.f32.xlu0 %v3151_v5 }
 0x71b   :  { %v3168_v49 = vsub.f32 1.0, %v3167_v59 }
 0x71c   :  { %3149 = vadd.xlane.f32.xlu1 %v3148_v14  ;;  %3155 = vadd.xlane.f32.xlu2 %v3154_v16 }
 0x71d   :  { %v3169_v40 = vmul.f32 %v6011_v55, %v3168_v49 }
 0x71f   :  { %v3170_v0 = vadd.f32 %v6011_v55, %v3169_v40 }
 0x721   :  { %v3172_v43 = vsel %vm3171_vm13, %v6011_v55, %v3170_v0  ;;  %v3190_v55 = vld [vmem:[%s10177_s24 + $0x8] sm:$0xff] }
 0x722   :  { %3134 = vadd.xlane.f32.xlu0 %v3133_v25 }
 0x724   :  { %3146 = vadd.xlane.f32.xlu2 %v3145_v33  ;;  %3131 = vadd.xlane.f32.xlu1 %v3130_v29 }
 0x72a   :  { %3161 = vadd.xlane.f32.xlu0 %v3160_v3 }
 0x72c   :  { %3128 = vadd.xlane.f32.xlu2 %v3127_v57  ;;  %3158 = vadd.xlane.f32.xlu1 %v3157_v6 }
 0x734   :  { %3164 = vadd.xlane.f32.xlu2 %v3163_v19  ;;  %3140 = vadd.xlane.f32.xlu1 %v3139_v38 }
 0x77d   :  { %v3126_v54 = vpop.xlane.xlu0 %3125 }
 0x77e   :  { %v3175_v42 = vmul.f32 %v3172_v43, %v3126_v54 }
 0x77f   :  { %v3138_v27 = vpop.xlane.xlu2 %3137 }
 0x780   :  { %v3203_v39 = vperm.slane %v3175_v42, %v10176_v8  ;;  %v3179_v20 = vmul.f32 %v3172_v43, %v3138_v27 }
 0x782   :  { %v3207_v38 = vperm.slane %v3179_v20, %v10176_v8 }
 0x785   :  { %v3123_v2 = vpop.xlane.xlu0 %3122 }
 0x786   :  { %v3174_v58 = vmul.f32 %v3172_v43, %v3123_v2  ;;  %v3189_v2 = vld [vmem:[%s10177_s24] sm:$0xff] }
 0x787   :  { %v3144_v10 = vpop.xlane.xlu1 %3143  ;;  %v3120_v1 = vpop.xlane.xlu2 %3119 }
 0x788   :  { %v3181_v34 = vmul.f32 %v3172_v43, %v3144_v10  ;;  %v3173_v11 = vmul.f32 %v3172_v43, %v3120_v1  ;;  %v3202_v45 = vperm.slane %v3174_v58, %v10176_v8 }
 0x78a   :  { %v3256_v32 = vperm.slane %v3181_v34, %v10176_v8  ;;  %v3201_v18 = vperm.slane %v3173_v11, %v10176_v8 }
 0x78c   :  { %v3209_v4 = vsel %vm2589_vm3, %v3202_v45, %v3201_v18 }
 0x78d   :  { %v3153_v62 = vpop.xlane.xlu0 %3152  ;;  %v3210_v37 = vsel %vm2591_vm6, %v3203_v39, %v3209_v4 }
 0x78e   :  { %v3184_v12 = vmul.f32 %v3172_v43, %v3153_v62 }
 0x78f   :  { %v3150_v15 = vpop.xlane.xlu1 %3149  ;;  %v3156_v24 = vpop.xlane.xlu2 %3155 }
 0x790   :  { %v3183_v36 = vmul.f32 %v3172_v43, %v3150_v15  ;;  %v3185_v14 = vmul.f32 %v3172_v43, %v3156_v24  ;;  %v3259_v60 = vperm.slane %v3184_v12, %v10176_v8 }
 0x792   :  { %v3258_v61 = vperm.slane %v3183_v36, %v10176_v8  ;;  %v3260_v53 = vperm.slane %v3185_v14, %v10176_v8 }
 0x795   :  { %v3135_v63 = vpop.xlane.xlu0 %3134 }
 0x796   :  { %v3178_v48 = vmul.f32 %v3172_v43, %v3135_v63 }
 0x797   :  { %v3147_v22 = vpop.xlane.xlu2 %3146  ;;  %v3132_v7 = vpop.xlane.xlu1 %3131 }
 0x798   :  { %v3182_v56 = vmul.f32 %v3172_v43, %v3147_v22  ;;  %v3177_v17 = vmul.f32 %v3172_v43, %v3132_v7  ;;  %v3206_v3 = vperm.slane %v3178_v48, %v10176_v8  ;;  %v3191_v22 = vld [vmem:[%s10177_s24 + $0x10] sm:$0xff] }
 0x79a   :  { %v3257_v51 = vperm.slane %v3182_v56, %v10176_v8  ;;  %v3205_v25 = vperm.slane %v3177_v17, %v10176_v8 }
 0x79c   :  { %v3264_v46 = vsel %vm2589_vm3, %v3257_v51, %v3256_v32  ;;  %v3192_v51 = vld [vmem:[%s10177_s24 + $0x18] sm:$0xff]  ;;  %s10180_s24 = smov 88  }
 0x79d   :  { %v3265_v16 = vsel %vm2591_vm6, %v3258_v61, %v3264_v46  ;;  %v3162_v9 = vpop.xlane.xlu0 %3161 }
 0x79e   :  { %v3266_v29 = vsel %vm2593_vm7, %v3259_v60, %v3265_v16  ;;  %v3187_v31 = vmul.f32 %v3172_v43, %v3162_v9 }
 0x79f   :  { %v3129_v35 = vpop.xlane.xlu2 %3128  ;;  %v3159_v41 = vpop.xlane.xlu1 %3158  ;;  %v3267_v57 = vsel %vm2595_vm8, %v3260_v53, %v3266_v29 }
 0x7a0   :  { %v3176_v44 = vmul.f32 %v3172_v43, %v3129_v35  ;;  %v3186_v5 = vmul.f32 %v3172_v43, %v3159_v41  ;;  %v3262_v54 = vperm.slane %v3187_v31, %v10176_v8  ;;  %v3316_v31 = vld [vmem:[%s10178_s20] sm:$0xf] }
 0x7a2   :  { %v3204_v21 = vperm.slane %v3176_v44, %v10176_v8  ;;  %v3261_v26 = vperm.slane %v3186_v5, %v10176_v8 }
 0x7a4   :  { %v3211_v33 = vsel %vm2593_vm7, %v3204_v21, %v3210_v37  ;;  %v3268_v30 = vsel %vm2597_vm9, %v3261_v26, %v3267_v57  ;;  %v5982_v57 = vld [vmem:[#allocation12] ss:$0 sm:$0xff] }
 0x7a5   :  { %v3212_v47 = vsel %vm2595_vm8, %v3205_v25, %v3211_v33  ;;  %v3269_v59 = vsel %vm2599_vm10, %v3262_v54, %v3268_v30 }
 0x7a6   :  { %v3213_v19 = vsel %vm2597_vm9, %v3206_v3, %v3212_v47 }
 0x7a7   :  { %v3165_v6 = vpop.xlane.xlu2 %3164  ;;  %v3141_v50 = vpop.xlane.xlu1 %3140  ;;  %v3214_v10 = vsel %vm2599_vm10, %v3207_v38, %v3213_v19 }
 0x7a8   :  { %v3188_v28 = vmul.f32 %v3172_v43, %v3165_v6  ;;  %v3180_v23 = vmul.f32 %v3172_v43, %v3141_v50 }
 0x7aa   :  { %v3263_v13 = vperm.slane %v3188_v28, %v10176_v8  ;;  %v3208_v27 = vperm.slane %v3180_v23, %v10176_v8  ;;  %v5983_v23 = vld [vmem:[#allocation14] ss:$0 sm:$0xff] }
 0x7ac   :  { %v3270_v1 = vsel %vm2601_vm11, %v3263_v13, %v3269_v59  ;;  %v3215_v49 = vsel %vm2601_vm11, %v3208_v27, %v3214_v10  ;;  %v6638_v10 = vmov 16.0   ;;  %vm3350_vm11 = vcmask 7168  }
 0x7ad   :  { %v3218_v62 = vmul.f32 %v3215_v49, %v3190_v55  ;;  %v3217_v40 = vmul.f32 %v3215_v49, %v3189_v2  ;;  %v3272_v15 = vmul.f32 %v3270_v1, %v3189_v2  ;;  %v3219_v7 = vmul.f32 %v3215_v49, %v3191_v22  ;;  %3352 = vst.msk [vmem:[#allocation4 + $0x8] sm:$0xff] %vm3350_vm11, %v10168_v52 }
 0x7ae   :  { %v3273_v34 = vmul.f32 %v3270_v1, %v3190_v55  ;;  %v3274_v11 = vmul.f32 %v3270_v1, %v3191_v22  ;;  %v3275_v36 = vmul.f32 %v3270_v1, %v3192_v51  ;;  %v3220_v32 = vmul.f32 %v3215_v49, %v3192_v51  ;;  %3357 = vst.msk [vmem:[#allocation4 + $0x8] sm:$0xff] %vm3355_vm12, %v10168_v52 }
 0x7af   :  { %v3224_v24 = vsel %vm2134_vm14, %v3218_v62, 0.0  ;;  %v3221_v0 = vsel %vm2134_vm14, %v3217_v40, 0.0  ;;  %v3276_v43 = vsel %vm2134_vm14, %v3272_v15, 0.0  ;;  %v3227_v63 = vsel %vm2134_vm14, %v3219_v7, 0.0  ;;  %v3408_v62 = vld [vmem:[%s9968_s13 + $0x8] sm:$0xff]  ;;  %v3407_v40 = vld [vmem:[%s9968_s13] sm:$0xff] }
 0x7b0   :  { %3225 = vadd.xlane.f32.xlu1 %v3224_v24  ;;  %3222 = vadd.xlane.f32.xlu0 %v3221_v0  ;;  %v3279_v56 = vsel %vm2134_vm14, %v3273_v34, 0.0  ;;  %v3282_v58 = vsel %vm2134_vm14, %v3274_v11, 0.0  ;;  %v3285_v18 = vsel %vm2134_vm14, %v3275_v36, 0.0  ;;  %v3230_v42 = vsel %vm2134_vm14, %v3220_v32, 0.0  ;;  %3351 = vst.msk [vmem:[#allocation4] sm:$0xff] %vm3350_vm11, %v10168_v52 }
 0x7b1   :  { %3277 = vadd.xlane.f32.xlu2 %v3276_v43  ;;  %6012 = vrcp.f32 %v6638_v10  ;;  %3433 = vmatpush.msra.mxu3 %v3408_v62  ;;  %3353 = vst.msk [vmem:[#allocation4 + $0x10] sm:$0xff] %vm3350_vm11, %v10168_v52 }
 0x7b2   :  { %3354 = vst.msk [vmem:[#allocation4 + $0x18] sm:$0xff] %vm3350_vm11, %v10168_v52 }
 0x7b3   :  { %3434 = vmatpush.msra.mxu3 %v3407_v40  ;;  %3358 = vst.msk [vmem:[#allocation4 + $0x10] sm:$0xff] %vm3355_vm12, %v10168_v52  ;;  %v3501_v40 = vld [vmem:[%s9970_s15] sm:$0xff] }
 0x7b4   :  { %3356 = vst.msk [vmem:[#allocation4] sm:$0xff] %vm3355_vm12, %v10168_v52 }
 0x7b5   :  { %3359 = vst.msk [vmem:[#allocation4 + $0x18] sm:$0xff] %vm3355_vm12, %v10168_v52  ;;  %v3506_v52 = vld [vmem:[%s9971_s16 + $0x8] sm:$0xff] }
 0x7b8   :  { %3228 = vadd.xlane.f32.xlu1 %v3227_v63  ;;  %3280 = vadd.xlane.f32.xlu0 %v3279_v56 }
 0x7b9   :  { %3283 = vadd.xlane.f32.xlu2 %v3282_v58 }
 0x7c0   :  { %3286 = vadd.xlane.f32.xlu1 %v3285_v18  ;;  %3231 = vadd.xlane.f32.xlu0 %v3230_v42 }
 0x823   :  { %v3226_v45 = vpop.xlane.xlu1 %3225  ;;  %v3223_v12 = vpop.xlane.xlu0 %3222 }
 0x824   :  { %v3278_v46 = vpop.xlane.xlu2 %3277  ;;  %v3238_v4 = vperm.slane %v3226_v45, %v10176_v8  ;;  %v3237_v5 = vperm.slane %v3223_v12, %v10176_v8 }
 0x825   :  { %v3292_v44 = vperm.slane %v3278_v46, %v10176_v8  ;;  %v5984_v46 = vld [vmem:[#allocation15] ss:$0 sm:$0xff] }
 0x826   :  { %v3241_v9 = vsel %vm2589_vm3, %v3238_v4, %v3237_v5 }
 0x82b   :  { %v3229_v61 = vpop.xlane.xlu1 %3228  ;;  %v3281_v17 = vpop.xlane.xlu0 %3280 }
 0x82c   :  { %v3284_v35 = vpop.xlane.xlu2 %3283  ;;  %v3293_v41 = vperm.slane %v3281_v17, %v10176_v8  ;;  %v3239_v39 = vperm.slane %v3229_v61, %v10176_v8 }
 0x82d   :  { %v3294_v14 = vperm.slane %v3284_v35, %v10176_v8 }
 0x82e   :  { %v3296_v16 = vsel %vm2589_vm3, %v3293_v41, %v3292_v44  ;;  %v3242_v33 = vsel %vm2591_vm6, %v3239_v39, %v3241_v9  ;;  %vm3324_vm3 = vcmask 1043456  }
 0x82f   :  { %v3297_v37 = vsel %vm2591_vm6, %v3294_v14, %v3296_v16  ;;  %5692 = vmatpush.msk.msra.mxu2 %vm3324_vm3, %v3316_v31 }
 0x833   :  { %v3287_v60 = vpop.xlane.xlu1 %3286  ;;  %v3232_v48 = vpop.xlane.xlu0 %3231 }
 0x834   :  { %v3295_v21 = vperm.slane %v3287_v60, %v10176_v8  ;;  %v3240_v25 = vperm.slane %v3232_v48, %v10176_v8  ;;  %v5985_v60 = vld [vmem:[#allocation17] ss:$0 sm:$0xff] }
 0x836   :  { %v3298_v29 = vsel %vm2593_vm7, %v3295_v21, %v3297_v37  ;;  %v3243_v26 = vsel %vm2593_vm7, %v3240_v25, %v3242_v33 }
 0x837   :  { %v3300_v20 = vsel %vm3117_vm2, %v3298_v29, 0.0  ;;  %v3245_v53 = vsel %vm3117_vm2, %v3243_v26, 0.0 }
 0x838   :  { %3301 = vadd.xlane.f32.xlu0 %v3300_v20  ;;  %3246 = vadd.xlane.f32.xlu2 %v3245_v53 }
 0x8ab   :  { %v3247_v47 = vpop.xlane.xlu2 %3246  ;;  %v3302_v3 = vpop.xlane.xlu0 %3301 }
 0x8ac   :  { %v3304_v6 = vperm.slane %v3247_v47, %v10176_v8  ;;  %v3307_v50 = vperm.slane %v3302_v3, %v10176_v8  ;;  %v6013_v8 = vpop.eup %6012 }
 0x8ad   :  { %v3369_v1 = vmul.f32 16.0, %v6013_v8 }
 0x8ae   :  { %v3310_v30 = vsel %vm3309_vm4, %v3304_v6, %v3307_v50 }
 0x8af   :  { %v3315_v28 = vadd.f32 %v5982_v57, %v3310_v30  ;;  %v3370_v49 = vsub.f32 1.0, %v3369_v1 }
 0x8b1   :  { %5693 = vmatmul.msk.f32.vlgmr.msra.gmra.mxu2 %vm2134_vm14, %v3315_v28  ;;  %v3371_v15 = vmul.f32 %v6013_v8, %v3370_v49  ;;  %vm3373_vm14 = vweird.f32 %v6013_v8  ;;  %v3507_v28 = vld [vmem:[%s9971_s16 + $0x10] sm:$0xff] }
 0x8b3   :  { %v3372_v24 = vadd.f32 %v6013_v8, %v3371_v15  ;;  %v3504_v15 = vld [vmem:[%s9970_s15 + $0x18] sm:$0xff] }
 0x8b5   :  { %v9301_v0 = vsel %vm3373_vm14, %v6013_v8, %v3372_v24  ;;  %v3502_v24 = vld [vmem:[%s9970_s15 + $0x8] sm:$0xff] }
 0x934   :  { %v3345_v19 = vpop.f32.mrf.mxu2 }
 0x935   :  { %v3346_v38 = vadd.f32 %v5983_v23, %v3345_v19  ;;  %v3505_v23 = vld [vmem:[%s9971_s16] sm:$0xff]  ;;  %v3508_v19 = vld [vmem:[%s9971_s16 + $0x18] sm:$0xff] }
 0x937   :  { %v3348_v54 = vperm.slane %v3346_v38, 0  ;;  %v3349_v13 = vperm.slane %v3346_v38, 1 }
 0x939   :  { %v3361_v27 = vmul.f32 %v3349_v13, %v3349_v13  ;;  %v3360_v55 = vmul.f32 %v3348_v54, %v3348_v54 }
 0x93b   :  { %v3365_v2 = vsel %vm2945_vm15, %v3361_v27, 0.0  ;;  %v3362_v59 = vsel %vm2945_vm15, %v3360_v55, 0.0 }
 0x93c   :  { %3366 = vadd.xlane.f32.xlu2 %v3365_v2  ;;  %3363 = vadd.xlane.f32.xlu1 %v3362_v59 }
 0x9af   :  { %v3367_v43 = vpop.xlane.xlu2 %3366  ;;  %v3364_v22 = vpop.xlane.xlu1 %3363 }
 0x9b0   :  { %v3376_v7 = vmul.f32 %v9301_v0, %v3367_v43  ;;  %v3375_v34 = vmul.f32 %v9301_v0, %v3364_v22  ;;  %v3503_v43 = vld [vmem:[%s9970_s15 + $0x10] sm:$0xff] }
 0x9b2   :  { %v3378_v11 = vadd.f32 1e-05, %v3376_v7  ;;  %v3377_v63 = vadd.f32 1e-05, %v3375_v34 }
 0x9b4   :  { %6014 = vrsqrt.f32 %v3378_v11  ;;  %vm3385_vm6 = vweird.f32 %v3377_v63  ;;  %vm3395_vm9 = vweird.f32 %v3378_v11 }
 0x9b5   :  { %6016 = vrsqrt.f32 %v3377_v63 }
 0x9ba   :  { %v6015_v56 = vpop.eup %6014 }
 0x9bb   :  { %v6017_v58 = vpop.eup %6016  ;;  %v3390_v36 = vmul.f32 %v6015_v56, %v3378_v11  ;;  %vm3396_vm8 = vweird.f32 %v6015_v56 }
 0x9bc   :  { %v3380_v51 = vmul.f32 %v6017_v58, %v3377_v63  ;;  %vm3386_vm5 = vweird.f32 %v6017_v58  ;;  %vm3397_vm10 = vmor %vm3395_vm9, %vm3396_vm8 }
 0x9bd   :  { %v3391_v42 = vmul.f32 %v6015_v56, %v3390_v36  ;;  %vm3387_vm7 = vmor %vm3385_vm6, %vm3386_vm5  ;;  %vm3659_vm5 = vcmask 261120  }
 0x9be   :  { %v3381_v32 = vmul.f32 %v6017_v58, %v3380_v51 }
 0x9bf   :  { %v3392_v61 = vmul.f32 0.5, %v3391_v42 }
 0x9c0   :  { %v3382_v18 = vmul.f32 0.5, %v3381_v32 }
 0x9c1   :  { %v3393_v4 = vsub.f32 1.5, %v3392_v61 }
 0x9c2   :  { %v3383_v45 = vsub.f32 1.5, %v3382_v18 }
 0x9c3   :  { %v3394_v44 = vmul.f32 %v6015_v56, %v3393_v4 }
 0x9c4   :  { %v3384_v12 = vmul.f32 %v6017_v58, %v3383_v45 }
 0x9c5   :  { %v3398_v5 = vsel %vm3397_vm10, %v6015_v56, %v3394_v44  ;;  %v3654_v44 = vld [vmem:[%s9972_s17 + $0x18] sm:$0xff] }
 0x9c6   :  { %v3388_v17 = vsel %vm3387_vm7, %v6017_v58, %v3384_v12  ;;  %v3400_v39 = vmul.f32 %v3398_v5, %v3349_v13  ;;  %v3653_v5 = vld [vmem:[%s9972_s17 + $0x10] sm:$0xff]  ;;  %3684 = vmatpush.msrb.mxu1 %v3654_v44 }
 0x9c7   :  { %v3399_v35 = vmul.f32 %v3388_v17, %v3348_v54 }
 0x9c8   :  { %v3406_v14 = vmul.f32 %v5984_v46, %v3400_v39  ;;  %3685 = vmatpush.msrb.mxu1 %v3653_v5  ;;  %v3702_v5 = vld [vmem:[#allocation20 + $0x8] sm:$0xff] }
 0x9c9   :  { %v3405_v41 = vmul.f32 %v5984_v46, %v3399_v35 }
 0x9cb   :  { %5694 = vmatmul.msk.f32.vlgmr.msra.gmra.mxu3 %vm2945_vm15, %v3405_v41 }
 0x9d3   :  { %5695 = vmatmul.msk.f32.gmra.mxu3 %vm2945_vm15, %v3405_v41 }
 0x9db   :  { %5696 = vmatmul.msk.f32.gmra.mxu3 %vm2945_vm15, %v3406_v14 }
 0x9e3   :  { %5697 = vmatmul.msk.f32.gmra.mxu3 %vm2945_vm15, %v3406_v14 }
 0xa4e   :  { %v3436_v16 = vpop.f32.mrf.mxu3 }
 0xa4f   :  { %v9328_v29 = vadd.f32 %v5985_v60, %v3436_v16 }
 0xa56   :  { %v3439_v48 = vpop.f32.mrf.mxu3 }
 0xa57   :  { %v9309_v9 = vadd.f32 %v5985_v60, %v3439_v48 }
 0xa59   :  { %3454 = vrot.lane.b32.xlu2 %v9309_v9, %s10179_s27 }
 0xa5e   :  { %v3442_v21 = vpop.f32.mrf.mxu3 }
 0xa5f   :  { %v9313_v25 = vadd.f32 %v5985_v60, %v3442_v21 }
 0xa61   :  { %3456 = vrot.lane.b32.xlu1 %v9313_v25, %s10179_s27 }
 0xa66   :  { %v3445_v37 = vpop.f32.mrf.mxu3 }
 0xa67   :  { %v9317_v33 = vadd.f32 %v5985_v60, %v3445_v37  ;;  %v3652_v60 = vld [vmem:[%s9972_s17 + $0x8] sm:$0xff] }
 0xa68   :  { %3686 = vmatpush.msrb.mxu1 %v3652_v60 }
 0xa69   :  { %3458 = vrot.lane.b32.xlu0 %v9317_v33, %s10179_s27 }
 0xa71   :  { %3452 = vrot.lane.b32.xlu0 %v9328_v29, %s10179_s27 }
 0xab3   :  { %v3455_v26 = vpop.permute.xlu2 %3454 }
 0xab4   :  { %3466 = vst.msk [vmem:[#allocation4 + $0x8] sm:$0xff] %vm3464_vm0, %v3455_v26 }
 0xabb   :  { %v3470_v50 = vld [vmem:[#allocation4 + $0x8] sm:$0xff] }
 0xad3   :  { %v3457_v20 = vpop.permute.xlu1 %3456 }
 0xad4   :  { %3467 = vst.msk [vmem:[#allocation4 + $0x10] sm:$0xff] %vm3464_vm0, %v3457_v20  ;;  %v3651_v20 = vld [vmem:[%s9972_s17] sm:$0xff] }
 0xad5   :  { %3687 = vmatpush.msrb.mxu1 %v3651_v20  ;;  %v5987_v20 = vld [vmem:[#allocation21] ss:$0 sm:$0xff] }
 0xadb   :  { %v3459_v53 = vpop.permute.xlu0 %3458  ;;  %v3471_v47 = vld [vmem:[#allocation4 + $0x10] sm:$0xff] }
 0xadc   :  { %3468 = vst.msk [vmem:[#allocation4 + $0x18] sm:$0xff] %vm3464_vm0, %v3459_v53 }
 0xae3   :  { %v3453_v31 = vpop.permute.xlu0 %3452  ;;  %v3472_v3 = vld [vmem:[#allocation4 + $0x18] sm:$0xff] }
 0xae4   :  { %3465 = vst.msk [vmem:[#allocation4] sm:$0xff] %vm3464_vm0, %v3453_v31  ;;  %v5922_v57 = vpack.i.bf16 %v3471_v47, %v3472_v3 }
 0xae6   :  { %5923 = vrot.lane.b32.xlu1 %v5922_v57, %s6577_s28  ;;  %5933 = vrot.lane.b32.xlu2 %v5922_v57, %s6578_s4 }
 0xaeb   :  { %v3469_v6 = vld [vmem:[#allocation4] sm:$0xff] }
 0xaec   :  { %v5937_v30 = vpack.i.bf16 %v3469_v6, %v3470_v50 }
 0xaee   :  { %3516 = vperm.xlu2 %5919, %v3506_v52   ;;  %5938 = vrot.lane.b32.xlu1 %v5937_v30, %s6578_s4 }
 0xaef   :  { %5928 = vrot.lane.b32.xlu0 %v5937_v30, %s6577_s28 }
 0xaf6   :  { %3521 = vperm.xlu1 %5920, %v3507_v28  }
 0xaf7   :  { %3511 = vperm.xlu0 %5921, %v3505_v23  }
 0xaff   :  { %3526 = vperm.xlu0 %5921, %v3508_v19  }
 0xb40   :  { %v5934_v2 = vpop.permute.xlu2 %5933 }
 0xb41   :  { %v5935_v10 = vunpack.i.l.bf16 %v5934_v2  ;;  %v5936_v1 = vunpack.i.h.bf16 %v5934_v2 }
 0xb48   :  { %v3517_v32 = vpop.permute.xlu2 %3516 }
 0xb58   :  { %v5924_v38 = vpop.permute.xlu1 %5923 }
 0xb59   :  { %v5925_v54 = vunpack.i.l.bf16 %v5924_v38  ;;  %v5926_v13 = vunpack.i.h.bf16 %v5924_v38 }
 0xb5b   :  { %3546 = vmatpush.msrb.mxu2 %v5925_v54  ;;  %5793 = vmatpush.msrb.mxu3 %v5925_v54 }
 0xb5d   :  { %3547 = vmatpush.msrb.mxu2 %v5926_v13  ;;  %5794 = vmatpush.msrb.mxu3 %v5926_v13 }
 0xb60   :  { %v5939_v8 = vpop.permute.xlu1 %5938 }
 0xb61   :  { %v5929_v27 = vpop.permute.xlu0 %5928  ;;  %v5940_v49 = vunpack.i.l.bf16 %v5939_v8  ;;  %v5941_v62 = vunpack.i.h.bf16 %v5939_v8 }
 0xb62   :  { %v5930_v55 = vunpack.i.l.bf16 %v5929_v27  ;;  %v5931_v59 = vunpack.i.h.bf16 %v5929_v27 }
 0xb64   :  { %3548 = vmatpush.msrb.mxu2 %v5930_v55  ;;  %5795 = vmatpush.msrb.mxu3 %v5930_v55 }
 0xb66   :  { %3549 = vmatpush.msrb.mxu2 %v5931_v59  ;;  %5796 = vmatpush.msrb.mxu3 %v5931_v59 }
 0xb68   :  { %3550 = vmatpush.msrb.mxu2 %v5935_v10  ;;  %5797 = vmatpush.msrb.mxu3 %v5935_v10  ;;  %v3522_v41 = vpop.permute.xlu1 %3521 }
 0xb69   :  { %v3512_v22 = vpop.permute.xlu0 %3511 }
 0xb6a   :  { %3551 = vmatpush.msrb.mxu2 %v5936_v1  ;;  %5798 = vmatpush.msrb.mxu3 %v5936_v1 }
 0xb6c   :  { %3552 = vmatpush.msrb.mxu2 %v5940_v49  ;;  %5799 = vmatpush.msrb.mxu3 %v5940_v49 }
 0xb6e   :  { %3553 = vmatpush.msrb.mxu2 %v5941_v62  ;;  %5800 = vmatpush.msrb.mxu3 %v5941_v62 }
 0xb70   :  { %3554 = vmatpush.msrb.mxu2 %v3472_v3  ;;  %5801 = vmatpush.msrb.mxu3 %v3472_v3 }
 0xb71   :  { %v3527_v34 = vpop.permute.xlu0 %3526 }
 0xb72   :  { %3555 = vmatpush.msrb.mxu2 %v3471_v47  ;;  %5802 = vmatpush.msrb.mxu3 %v3471_v47 }
 0xb74   :  { %3556 = vmatpush.msrb.mxu2 %v3470_v50  ;;  %5803 = vmatpush.msrb.mxu3 %v3470_v50  ;;  %v3703_v50 = vld [vmem:[#allocation20 + $0x10] sm:$0xff] }
 0xb76   :  { %3557 = vmatpush.msrb.mxu2 %v3469_v6  ;;  %5804 = vmatpush.msrb.mxu3 %v3469_v6  ;;  %v3704_v6 = vld [vmem:[#allocation20 + $0x18] sm:$0xff] }
 0xb77   :  { %5698 = vmatmul.msk.f32.vlgmr.msrb.gmra.mxu2 %vm3529_vm1, %v3501_v40  ;;  %5701 = vmatmul.msk.f32.vlgmr.msrb.gmra.mxu3 %vm3529_vm1, %v3504_v15 }
 0xb78   :  { %3733 = vmatpush.msra.mxu0 %v3704_v6 }
 0xb7a   :  { %3734 = vmatpush.msra.mxu0 %v3703_v50 }
 0xb7c   :  { %3735 = vmatpush.msra.mxu0 %v3702_v5 }
 0xb7f   :  { %5699 = vmatmul.msk.f32.gmra.mxu2 %vm3529_vm1, %v3502_v24 }
 0xb87   :  { %5700 = vmatmul.msk.f32.gmra.mxu2 %vm3529_vm1, %v3503_v43 }
 0xbfa   :  { %v3559_v7 = vpop.f32.mrf.mxu2  ;;  %v3568_v63 = vpop.f32.mrf.mxu3 }
 0xbfb   :  { %v3560_v11 = vadd.f32 %v3559_v7, %v3512_v22  ;;  %v9369_v56 = vadd.f32 %v3568_v63, %v3527_v34 }
 0xbfd   :  { %v3571_v58 = vsub.f32 0.0, %v3560_v11  ;;  %v3574_v36 = vsub.f32 0.0, %v9369_v56 }
 0xbff   :  { %v3575_v51 = vmul.f32 1.442695, %v3571_v58  ;;  %v3581_v45 = vmul.f32 1.442695, %v3574_v36 }
 0xc01   :  { %6018 = vpow2.f32 %v3575_v51 }
 0xc02   :  { %v3562_v18 = vpop.f32.mrf.mxu2  ;;  %6020 = vpow2.f32 %v3581_v45 }
 0xc03   :  { %v9372_v42 = vadd.f32 %v3562_v18, %v3517_v32 }
 0xc05   :  { %v3572_v12 = vsub.f32 0.0, %v9372_v42 }
 0xc07   :  { %v6019_v46 = vpop.eup %6018  ;;  %v3577_v61 = vmul.f32 1.442695, %v3572_v12 }
 0xc08   :  { %v3583_v17 = vadd.f32 1.0, %v6019_v46  ;;  %v6021_v39 = vpop.eup %6020 }
 0xc09   :  { %6022 = vpow2.f32 %v3577_v61  ;;  %v9390_v53 = vadd.f32 1.0, %v6021_v39  ;;  %v3701_v39 = vld [vmem:[#allocation20] sm:$0xff] }
 0xc0a   :  { %6024 = vrcp.f32 %v3583_v17  ;;  %v3565_v35 = vpop.f32.mrf.mxu2  ;;  %v3598_v47 = vand.u32 2147483648, %v3583_v17  ;;  %v3596_v57 = vand.u32 2147483647, %v3583_v17  ;;  %vm3592_vm13 = vweird.f32 %v3583_v17  ;;  %3736 = vmatpush.msra.mxu0 %v3701_v39 }
 0xc0b   :  { %v9375_v4 = vadd.f32 %v3565_v35, %v3522_v41  ;;  %v3643_v12 = vand.u32 2147483648, %v9390_v53  ;;  %v3641_v46 = vand.u32 2147483647, %v9390_v53 }
 0xc0c   :  { %v3599_v28 = vor.u32 1.1754944e-38, %v3598_v47  ;;  %vm3597_vm14 = vcmp.eq.f32.partialorder %v3596_v57, 8.507059e+37 }
 0xc0d   :  { %v3573_v14 = vsub.f32 0.0, %v9375_v4  ;;  %v3644_v35 = vor.u32 1.1754944e-38, %v3643_v12 }
 0xc0f   :  { %v6023_v16 = vpop.eup %6022  ;;  %v3579_v37 = vmul.f32 1.442695, %v3573_v14  ;;  %v5986_v14 = vld [vmem:[#allocation18] ss:$0 sm:$0xff] }
 0xc10   :  { %v6025_v48 = vpop.eup %6024  ;;  %v3584_v21 = vadd.f32 1.0, %v6023_v16 }
 0xc11   :  { %v3588_v26 = vmul.f32 %v6025_v48, %v3583_v17  ;;  %vm3593_vm2 = vweird.f32 %v6025_v48 }
 0xc12   :  { %6026 = vrcp.f32 %v3584_v21  ;;  %vm3594_vm3 = vmor %vm3592_vm13, %vm3593_vm2  ;;  %v3613_v59 = vand.u32 2147483648, %v3584_v21  ;;  %v3611_v8 = vand.u32 2147483647, %v3584_v21  ;;  %vm3607_vm7 = vweird.f32 %v3584_v21 }
 0xc13   :  { %v3589_v31 = vsub.f32 1.0, %v3588_v26  ;;  %6028 = vpow2.f32 %v3579_v37 }
 0xc14   :  { %6030 = vrcp.f32 %v9390_v53  ;;  %v3614_v62 = vor.u32 1.1754944e-38, %v3613_v59  ;;  %vm3612_vm9 = vcmp.eq.f32.partialorder %v3611_v8, 8.507059e+37 }
 0xc15   :  { %v3590_v3 = vmul.f32 %v6025_v48, %v3589_v31 }
 0xc17   :  { %v3591_v52 = vadd.f32 %v6025_v48, %v3590_v3 }
 0xc18   :  { %v6027_v30 = vpop.eup %6026 }
 0xc19   :  { %v6029_v23 = vpop.eup %6028  ;;  %v3595_v19 = vsel %vm3594_vm3, %v6025_v48, %v3591_v52  ;;  %v3603_v38 = vmul.f32 %v6027_v30, %v3584_v21  ;;  %vm3608_vm6 = vweird.f32 %v6027_v30  ;;  %vm3637_vm3 = vweird.f32 %v9390_v53 }
 0xc1a   :  { %v3600_v54 = vsel %vm3597_vm14, %v3599_v28, %v3595_v19  ;;  %v3585_v13 = vadd.f32 1.0, %v6029_v23  ;;  %v6031_v2 = vpop.eup %6030  ;;  %vm3609_vm8 = vmor %vm3607_vm7, %vm3608_vm6  ;;  %vm3642_vm6 = vcmp.eq.f32.partialorder %v3641_v46, 8.507059e+37  ;;  %vm3818_vm7 = vcmask 64512  }
 0xc1b   :  { %v3647_v27 = vmul.f32 %v3600_v54, %v3560_v11  ;;  %v3604_v55 = vsub.f32 1.0, %v3603_v38  ;;  %v3633_v1 = vmul.f32 %v6031_v2, %v9390_v53  ;;  %vm3638_vm2 = vweird.f32 %v6031_v2 }
 0xc1c   :  { %6032 = vrcp.f32 %v3585_v13  ;;  %v3628_v11 = vand.u32 2147483648, %v3585_v13  ;;  %v3626_v51 = vand.u32 2147483647, %v3585_v13  ;;  %vm3622_vm11 = vweird.f32 %v3585_v13  ;;  %vm3639_vm14 = vmor %vm3637_vm3, %vm3638_vm2 }
 0xc1d   :  { %v3605_v10 = vmul.f32 %v6027_v30, %v3604_v55  ;;  %5702 = vmatmul.msk.f32.vlgmr.msrb.gmra.mxu1 %vm3659_vm5, %v3647_v27  ;;  %v3634_v43 = vsub.f32 1.0, %v3633_v1  ;;  %v3916_v55 = vsub.f32 0.0, %v9309_v9 }
 0xc1e   :  { %v3629_v32 = vor.u32 1.1754944e-38, %v3628_v11  ;;  %vm3627_vm13 = vcmp.eq.f32.partialorder %v3626_v51, 8.507059e+37 }
 0xc1f   :  { %v3606_v49 = vadd.f32 %v6027_v30, %v3605_v10  ;;  %v3635_v63 = vmul.f32 %v6031_v2, %v3634_v43  ;;  %v3921_v59 = vmul.f32 1.442695, %v3916_v55 }
 0xc21   :  { %v3610_v40 = vsel %vm3609_vm8, %v6027_v30, %v3606_v49  ;;  %v3636_v18 = vadd.f32 %v6031_v2, %v3635_v63  ;;  %6034 = vpow2.f32 %v3921_v59  ;;  %v3915_v49 = vsub.f32 0.0, %v9328_v29 }
 0xc22   :  { %v6033_v15 = vpop.eup %6032  ;;  %v3615_v24 = vsel %vm3612_vm9, %v3614_v62, %v3610_v40 }
 0xc23   :  { %v3648_v22 = vmul.f32 %v3615_v24, %v9372_v42  ;;  %v3618_v7 = vmul.f32 %v6033_v15, %v3585_v13  ;;  %vm3623_vm10 = vweird.f32 %v6033_v15  ;;  %v3640_v17 = vsel %vm3639_vm14, %v6031_v2, %v3636_v18 }
 0xc24   :  { %vm3624_vm12 = vmor %vm3622_vm11, %vm3623_vm10  ;;  %v3645_v41 = vsel %vm3642_vm6, %v3644_v35, %v3640_v17  ;;  %v3917_v2 = vsub.f32 0.0, %v9313_v25  ;;  %v3919_v40 = vmul.f32 1.442695, %v3915_v49 }
 0xc25   :  { %v3619_v34 = vsub.f32 1.0, %v3618_v7  ;;  %5703 = vmatmul.msk.f32.gmra.mxu1 %vm3659_vm5, %v3648_v22  ;;  %v3650_v44 = vmul.f32 %v3645_v41, %v9369_v56  ;;  %v3918_v22 = vsub.f32 0.0, %v9317_v33 }
 0xc26   :  { %v3923_v10 = vmul.f32 1.442695, %v3917_v2 }
 0xc27   :  { %v3620_v58 = vmul.f32 %v6033_v15, %v3619_v34  ;;  %v6035_v62 = vpop.eup %6034  ;;  %v3925_v7 = vmul.f32 1.442695, %v3918_v22 }
 0xc28   :  { %6036 = vpow2.f32 %v3923_v10  ;;  %v3928_v24 = vadd.f32 1.0, %v6035_v62 }
 0xc29   :  { %v3621_v36 = vadd.f32 %v6033_v15, %v3620_v58  ;;  %6038 = vpow2.f32 %v3919_v40 }
 0xc2a   :  { %6040 = vrcp.f32 %v3928_v24  ;;  %vm3951_vm9 = vweird.f32 %v3928_v24 }
 0xc2b   :  { %v3625_v45 = vsel %vm3624_vm12, %v6033_v15, %v3621_v36 }
 0xc2c   :  { %v3630_v42 = vsel %vm3627_vm13, %v3629_v32, %v3625_v45 }
 0xc2d   :  { %v3649_v61 = vmul.f32 %v3630_v42, %v9375_v4 }
 0xc2e   :  { %v6037_v15 = vpop.eup %6036 }
 0xc2f   :  { %5704 = vmatmul.msk.f32.gmra.mxu1 %vm3659_vm5, %v3649_v61  ;;  %v3929_v43 = vadd.f32 1.0, %v6037_v15  ;;  %v6039_v34 = vpop.eup %6038 }
 0xc30   :  { %v6041_v11 = vpop.eup %6040  ;;  %v3927_v36 = vadd.f32 1.0, %v6039_v34 }
 0xc31   :  { %6042 = vrcp.f32 %v3929_v43  ;;  %v3947_v32 = vmul.f32 %v6041_v11, %v3928_v24  ;;  %vm3952_vm8 = vweird.f32 %v6041_v11  ;;  %vm3966_vm12 = vweird.f32 %v3929_v43 }
 0xc32   :  { %6044 = vpow2.f32 %v3925_v7  ;;  %vm3953_vm10 = vmor %vm3951_vm9, %vm3952_vm8  ;;  %v3942_v10 = vand.u32 2147483648, %v3927_v36  ;;  %vm3936_vm6 = vweird.f32 %v3927_v36 }
 0xc33   :  { %6046 = vrcp.f32 %v3927_v36  ;;  %v3948_v45 = vsub.f32 1.0, %v3947_v32 }
 0xc34   :  { %v3943_v62 = vor.u32 1.1754944e-38, %v3942_v10 }
 0xc35   :  { %v3949_v17 = vmul.f32 %v6041_v11, %v3948_v45 }
 0xc37   :  { %5705 = vmatmul.msk.f32.gmra.mxu1 %vm3659_vm5, %v3650_v44  ;;  %v6043_v51 = vpop.eup %6042  ;;  %v3950_v39 = vadd.f32 %v6041_v11, %v3949_v17 }
 0xc38   :  { %v3962_v18 = vmul.f32 %v6043_v51, %v3929_v43  ;;  %v6045_v12 = vpop.eup %6044  ;;  %vm3967_vm11 = vweird.f32 %v6043_v51 }
 0xc39   :  { %v3930_v35 = vadd.f32 1.0, %v6045_v12  ;;  %v6047_v41 = vpop.eup %6046  ;;  %vm3968_vm13 = vmor %vm3966_vm12, %vm3967_vm11 }
 0xc3a   :  { %v3963_v61 = vsub.f32 1.0, %v3962_v18  ;;  %vm3937_vm14 = vweird.f32 %v6047_v41 }
 0xc3b   :  { %6048 = vrcp.f32 %v3930_v35  ;;  %vm3938_vm8 = vmor %vm3936_vm6, %vm3937_vm14  ;;  %v3987_v15 = vand.u32 2147483648, %v3930_v35  ;;  %vm3981_vm11 = vweird.f32 %v3930_v35 }
 0xc3c   :  { %v3964_v44 = vmul.f32 %v6043_v51, %v3963_v61 }
 0xc3d   :  { %v3988_v22 = vor.u32 1.1754944e-38, %v3987_v15 }
 0xc9a   :  { %v3689_v16 = vpop.f32.mrf.mxu1 }
 0xc9b   :  { %v9404_v60 = vadd.f32 %v5986_v14, %v3689_v16  ;;  %v3932_v16 = vmul.f32 %v6047_v41, %v3927_v36 }
 0xc9d   :  { %5706 = vmatmul.msk.f32.vlgmr.msra.gmra.mxu0 %vm3659_vm5, %v9404_v60 }
 0xca2   :  { %v3692_v4 = vpop.f32.mrf.mxu1 }
 0xca3   :  { %v9408_v48 = vadd.f32 %v5986_v14, %v3692_v4  ;;  %v3957_v4 = vand.u32 2147483648, %v3928_v24 }
 0xca5   :  { %5707 = vmatmul.msk.f32.gmra.mxu0 %vm3659_vm5, %v9408_v48 }
 0xcac   :  { %v3695_v56 = vpop.f32.mrf.mxu1 }
 0xcad   :  { %v9412_v21 = vadd.f32 %v5986_v14, %v3695_v56  ;;  %v3955_v56 = vand.u32 2147483647, %v3928_v24 }
 0xcaf   :  { %5708 = vmatmul.msk.f32.gmra.mxu0 %vm3659_vm5, %v9412_v21  ;;  %vm3956_vm2 = vcmp.eq.f32.partialorder %v3955_v56, 8.507059e+37  ;;  %v4017_v56 = vld [vmem:[%s9976_s21 + $0x10] sm:$0xff] }
 0xcb4   :  { %v3698_v37 = vpop.f32.mrf.mxu1 }
 0xcb5   :  { %v9416_v26 = vadd.f32 %v5986_v14, %v3698_v37  ;;  %v3965_v37 = vadd.f32 %v6043_v51, %v3964_v44 }
 0xcb7   :  { %5709 = vmatmul.msk.f32.gmra.mxu0 %vm3659_vm5, %v9416_v26 }
 0xd1a   :  { %v3738_v53 = vpop.f32.mrf.mxu0 }
 0xd1b   :  { %v9420_v31 = vadd.f32 %v5987_v20, %v3738_v53  ;;  %v3972_v53 = vand.u32 2147483648, %v3929_v43 }
 0xd1d   :  { %3786 = vrot.lane.b32.xlu2 %v9420_v31, %s6569_s18 }
 0xd22   :  { %v3741_v47 = vpop.f32.mrf.mxu0 }
 0xd23   :  { %v9424_v3 = vadd.f32 %v5987_v20, %v3741_v47  ;;  %v3933_v47 = vsub.f32 1.0, %v3932_v16 }
 0xd25   :  { %3788 = vrot.lane.b32.xlu1 %v9424_v3, %s6569_s18  ;;  %v3756_v12 = vmul.f32 1.442695, %v9424_v3  ;;  %vm3751_vm6 = vcmp.gt.f32.partialorder %v9424_v3, 20.0 }
 0xd2c   :  { %v3744_v57 = vpop.f32.mrf.mxu0 }
 0xd2d   :  { %v9428_v52 = vadd.f32 %v5987_v20, %v3744_v57  ;;  %v3958_v57 = vor.u32 1.1754944e-38, %v3957_v4  ;;  %v4018_v4 = vld [vmem:[%s9976_s21 + $0x18] sm:$0xff] }
 0xd2e   :  { %4047 = vmatpush.msra.mxu3 %v4018_v4 }
 0xd2f   :  { %3790 = vrot.lane.b32.xlu0 %v9428_v52, %s6569_s18 }
 0xd30   :  { %4048 = vmatpush.msra.mxu3 %v4017_v56 }
 0xd34   :  { %v3747_v6 = vpop.f32.mrf.mxu0 }
 0xd35   :  { %v9432_v50 = vadd.f32 %v5987_v20, %v3747_v6  ;;  %v3954_v20 = vsel %vm3953_vm10, %v6041_v11, %v3950_v39  ;;  %v3970_v6 = vand.u32 2147483647, %v3929_v43  ;;  %v3985_v43 = vand.u32 2147483647, %v3930_v35 }
 0xd36   :  { %v3754_v11 = vmul.f32 1.442695, %v9420_v31 }
 0xd37   :  { %3792 = vrot.lane.b32.xlu2 %v9432_v50, %s6569_s18  ;;  %vm3971_vm3 = vcmp.eq.f32.partialorder %v3970_v6, 8.507059e+37  ;;  %v3760_v32 = vmul.f32 1.442695, %v9432_v50  ;;  %vm3753_vm14 = vcmp.gt.f32.partialorder %v9432_v50, 20.0 }
 0xd38   :  { %6050 = vpow2.f32 %v3754_v11 }
 0xd77   :  { %v3787_v30 = vpop.permute.xlu2 %3786 }
 0xd78   :  { %v3798_v28 = vmul.f32 %v3787_v30, %v9420_v31  ;;  %v6049_v30 = vpop.eup %6048 }
 0xd79   :  { %vm3982_vm10 = vweird.f32 %v6049_v30 }
 0xd7a   :  { %3806 = vrot.lane.b32.xlu1 %v3798_v28, %s10180_s24  ;;  %v3959_v28 = vsel %vm3956_vm2, %v3958_v57, %v3954_v20  ;;  %vm3983_vm12 = vmor %vm3981_vm11, %vm3982_vm10  ;;  %vm3986_vm2 = vcmp.eq.f32.partialorder %v3985_v43, 8.507059e+37 }
 0xd91   :  { %v3793_v23 = vpop.permute.xlu2 %3792 }
 0xd92   :  { %v3801_v19 = vmul.f32 %v3793_v23, %v9432_v50  ;;  %v3969_v23 = vsel %vm3968_vm13, %v6043_v51, %v3965_v37  ;;  %vm3750_vm13 = vcmp.gt.f32.partialorder %v9420_v31, 20.0 }
 0xd94   :  { %3812 = vrot.lane.b32.xlu1 %v3801_v19, %s10180_s24  ;;  %v3973_v19 = vor.u32 1.1754944e-38, %v3972_v53 }
 0xd97   :  { %v3789_v38 = vpop.permute.xlu1 %3788 }
 0xd98   :  { %v3799_v54 = vmul.f32 %v3789_v38, %v9424_v3  ;;  %v3934_v38 = vmul.f32 %v6047_v41, %v3933_v47  ;;  %v4016_v47 = vld [vmem:[%s9976_s21 + $0x8] sm:$0xff] }
 0xd99   :  { %4049 = vmatpush.msra.mxu3 %v4016_v47 }
 0xd9a   :  { %3808 = vrot.lane.b32.xlu0 %v3799_v54, %s10180_s24  ;;  %v3977_v54 = vmul.f32 %v6049_v30, %v3930_v35  ;;  %v3935_v55 = vadd.f32 %v6047_v41, %v3934_v38 }
 0xd9c   :  { %v3978_v59 = vsub.f32 1.0, %v3977_v54 }
 0xd9e   :  { %v3979_v49 = vmul.f32 %v6049_v30, %v3978_v59 }
 0xda1   :  { %v3791_v13 = vpop.permute.xlu0 %3790 }
 0xda2   :  { %v3800_v27 = vmul.f32 %v3791_v13, %v9428_v52  ;;  %v3992_v13 = vmul.f32 %v3959_v28, %v9309_v9  ;;  %v3980_v9 = vadd.f32 %v6049_v30, %v3979_v49 }
 0xda4   :  { %3810 = vrot.lane.b32.xlu2 %v3800_v27, %s10180_s24  ;;  %v3974_v27 = vsel %vm3971_vm3, %v3973_v19, %v3969_v23  ;;  %vm3752_vm3 = vcmp.gt.f32.partialorder %v9428_v52, 20.0 }
 0xda5   :  { %v3993_v2 = vmul.f32 %v3974_v27, %v9313_v25  ;;  %v3984_v25 = vsel %vm3983_vm12, %v6049_v30, %v3980_v9 }
 0xda6   :  { %v3989_v7 = vsel %vm3986_vm2, %v3988_v22, %v3984_v25 }
 0xda7   :  { %v3994_v34 = vmul.f32 %v3989_v7, %v9317_v33 }
 0xdec   :  { %v3807_v8 = vpop.permute.xlu1 %3806 }
 0xded   :  { %v3819_v1 = vsel %vm3818_vm7, %v3807_v8, 0.0  ;;  %v3940_v8 = vand.u32 2147483647, %v3927_v36 }
 0xdee   :  { %3820 = vadd.xlane.f32.xlu0 %v3819_v1  ;;  %v3939_v1 = vsel %vm3938_vm8, %v6047_v41, %v3935_v55 }
 0xdef   :  { %vm3941_vm9 = vcmp.eq.f32.partialorder %v3940_v8, 8.507059e+37 }
 0xdf0   :  { %v3944_v40 = vsel %vm3941_vm9, %v3943_v62, %v3939_v1  ;;  %v4015_v62 = vld [vmem:[%s9976_s21] sm:$0xff] }
 0xdf1   :  { %v3991_v24 = vmul.f32 %v3944_v40, %v9328_v29  ;;  %v3758_v29 = vmul.f32 1.442695, %v9428_v52  ;;  %4050 = vmatpush.msra.mxu3 %v4015_v62 }
 0xdfe   :  { %v3811_v63 = vpop.permute.xlu2 %3810 }
 0xdff   :  { %v3825_v58 = vsel %vm3818_vm7, %v3811_v63, 0.0  ;;  %v6051_v63 = vpop.eup %6050 }
 0xe00   :  { %3826 = vadd.xlane.f32.xlu1 %v3825_v58  ;;  %v3762_v58 = vadd.f32 1.0, %v6051_v63 }
 0xe02   :  { %6052 = vlog2.f32 %v3762_v58 }
 0xe03   :  { %6054 = vpow2.f32 %v3758_v29 }
 0xe04   :  { %6056 = vpow2.f32 %v3760_v32 }
 0xe06   :  { %v3813_v42 = vpop.permute.xlu1 %3812 }
 0xe07   :  { %v3828_v46 = vsel %vm3818_vm7, %v3813_v42, 0.0 }
 0xe08   :  { %3829 = vadd.xlane.f32.xlu0 %v3828_v46  ;;  %v6053_v51 = vpop.eup %6052 }
 0xe09   :  { %v3767_v36 = vmul.f32 0.6931472, %v6053_v51  ;;  %v6055_v18 = vpop.eup %6054 }
 0xe0a   :  { %v3764_v45 = vadd.f32 1.0, %v6055_v18  ;;  %v6057_v17 = vpop.eup %6056 }
 0xe0b   :  { %v3774_v33 = vsel %vm3750_vm13, %v9420_v31, %v3767_v36  ;;  %v3765_v41 = vadd.f32 1.0, %v6057_v17 }
 0xe0c   :  { %v3809_v5 = vpop.permute.xlu0 %3808  ;;  %v3778_v42 = vmul.f32 %v3774_v33, %v9404_v60  ;;  %6058 = vlog2.f32 %v3764_v45 }
 0xe0d   :  { %v3822_v14 = vsel %vm3818_vm7, %v3809_v5, 0.0  ;;  %6060 = vpow2.f32 %v3756_v12 }
 0xe0e   :  { %3823 = vadd.xlane.f32.xlu2 %v3822_v14  ;;  %6062 = vlog2.f32 %v3765_v41 }
 0xe12   :  { %v6059_v44 = vpop.eup %6058 }
 0xe13   :  { %v6061_v5 = vpop.eup %6060  ;;  %v3771_v31 = vmul.f32 0.6931472, %v6059_v44 }
 0xe14   :  { %v3763_v14 = vadd.f32 1.0, %v6061_v5  ;;  %v6063_v16 = vpop.eup %6062 }
 0xe15   :  { %v3776_v60 = vsel %vm3752_vm3, %v9428_v52, %v3771_v31  ;;  %v3773_v53 = vmul.f32 0.6931472, %v6063_v16 }
 0xe16   :  { %v3780_v37 = vmul.f32 %v3776_v60, %v9412_v21 }
 0xe17   :  { %v3777_v21 = vsel %vm3753_vm14, %v9432_v50, %v3773_v53 }
 0xe18   :  { %v3781_v38 = vmul.f32 %v3777_v21, %v9416_v26 }
 0xe19   :  { %4001 = vrot.lane.b32.xlu1 %v3992_v13, %s6606_s7 }
 0xe1c   :  { %4003 = vrot.lane.b32.xlu0 %v3993_v2, %s6606_s7 }
 0xe26   :  { %3999 = vrot.lane.b32.xlu2 %v3991_v24, %s6606_s7 }
 0xe2e   :  { %4005 = vrot.lane.b32.xlu2 %v3994_v34, %s6606_s7 }
 0xe61   :  { %v3821_v46 = vpop.xlane.xlu0 %3820 }
 0xe62   :  { %v9467_v61 = vmul.f32 %v3821_v46, %v3778_v42 }
 0xe64   :  { %v3835_v35 = vsub.f32 0.0, %v9467_v61 }
 0xe66   :  { %v3839_v39 = vmul.f32 1.442695, %v3835_v35 }
 0xe68   :  { %6064 = vpow2.f32 %v3839_v39 }
 0xe69   :  { %6066 = vlog2.f32 %v3763_v14 }
 0xe6e   :  { %v6065_v52 = vpop.eup %6064 }
 0xe6f   :  { %v6067_v6 = vpop.eup %6066  ;;  %v3847_v28 = vadd.f32 1.0, %v6065_v52 }
 0xe70   :  { %v3769_v19 = vmul.f32 0.6931472, %v6067_v6 }
 0xe71   :  { %6068 = vrcp.f32 %v3847_v28  ;;  %v3862_v15 = vand.u32 2147483648, %v3847_v28  ;;  %vm3856_vm9 = vweird.f32 %v3847_v28 }
 0xe72   :  { %v3775_v27 = vsel %vm3751_vm6, %v9424_v3, %v3769_v19 }
 0xe73   :  { %v3827_v20 = vpop.xlane.xlu1 %3826  ;;  %v3779_v59 = vmul.f32 %v3775_v27, %v9408_v48  ;;  %v3860_v48 = vand.u32 2147483647, %v3847_v28  ;;  %v3863_v22 = vor.u32 1.1754944e-38, %v3862_v15 }
 0xe74   :  { %v9482_v57 = vmul.f32 %v3827_v20, %v3780_v37 }
 0xe75   :  { %vm3861_vm11 = vcmp.eq.f32.partialorder %v3860_v48, 8.507059e+37 }
 0xe76   :  { %v3837_v30 = vsub.f32 0.0, %v9482_v57 }
 0xe77   :  { %v6069_v10 = vpop.eup %6068 }
 0xe78   :  { %v3843_v23 = vmul.f32 1.442695, %v3837_v30  ;;  %v3852_v49 = vmul.f32 %v6069_v10, %v3847_v28  ;;  %vm3857_vm8 = vweird.f32 %v6069_v10 }
 0xe79   :  { %vm3858_vm10 = vmor %vm3856_vm9, %vm3857_vm8 }
 0xe7a   :  { %6070 = vpow2.f32 %v3843_v23  ;;  %v3853_v3 = vsub.f32 1.0, %v3852_v49 }
 0xe7b   :  { %v3830_v54 = vpop.xlane.xlu0 %3829 }
 0xe7c   :  { %v9488_v13 = vmul.f32 %v3830_v54, %v3781_v38  ;;  %v3854_v24 = vmul.f32 %v6069_v10, %v3853_v3 }
 0xe7e   :  { %v3838_v55 = vsub.f32 0.0, %v9488_v13  ;;  %v3855_v25 = vadd.f32 %v6069_v10, %v3854_v24 }
 0xe80   :  { %v3845_v2 = vmul.f32 1.442695, %v3838_v55  ;;  %v6071_v8 = vpop.eup %6070  ;;  %v3859_v34 = vsel %vm3858_vm10, %v6069_v10, %v3855_v25 }
 0xe81   :  { %v3824_v50 = vpop.xlane.xlu2 %3823  ;;  %v3849_v40 = vadd.f32 1.0, %v6071_v8  ;;  %v3864_v11 = vsel %vm3861_vm11, %v3863_v22, %v3859_v34  ;;  %v5988_v8 = vld [vmem:[#allocation23] ss:$0 sm:$0xff]  ;;  %v5715_v34 = vld [vmem:[%s9968_s13 + $0x18] sm:$0xff] }
 0xe82   :  { %v3832_v1 = vmul.f32 %v3824_v50, %v3779_v59  ;;  %6072 = vpow2.f32 %v3845_v2  ;;  %v3911_v29 = vmul.f32 %v3864_v11, %v9467_v61  ;;  %v5714_v11 = vld [vmem:[%s9968_s13 + $0x10] sm:$0xff]  ;;  %4175 = vmatpush.msra.mxu1 %v5715_v34 }
 0xe83   :  { %v3892_v60 = vand.u32 2147483648, %v3849_v40  ;;  %vm3886_vm6 = vweird.f32 %v3849_v40  ;;  %v3890_v4 = vand.u32 2147483647, %v3849_v40 }
 0xe84   :  { %v3836_v26 = vsub.f32 0.0, %v3832_v1  ;;  %4176 = vmatpush.msra.mxu1 %v5714_v11 }
 0xe85   :  { %v3893_v52 = vor.u32 1.1754944e-38, %v3892_v60  ;;  %vm3891_vm9 = vcmp.eq.f32.partialorder %v3890_v4, 8.507059e+37 }
 0xe86   :  { %v3841_v9 = vmul.f32 1.442695, %v3836_v26 }
 0xe88   :  { %6074 = vpow2.f32 %v3841_v9  ;;  %v6073_v43 = vpop.eup %6072 }
 0xe89   :  { %6076 = vrcp.f32 %v3849_v40  ;;  %v3850_v7 = vadd.f32 1.0, %v6073_v43  ;;  %v4000_v63 = vpop.permute.xlu2 %3999 }
 0xe8a   :  { %v4011_v32 = vmul.f32 %v4000_v63, %v3911_v29 }
 0xe8b   :  { %6078 = vrcp.f32 %v3850_v7  ;;  %v4002_v47 = vpop.permute.xlu1 %4001  ;;  %v3907_v21 = vand.u32 2147483648, %v3850_v7  ;;  %vm3901_vm11 = vweird.f32 %v3850_v7  ;;  %v3905_v19 = vand.u32 2147483647, %v3850_v7 }
 0xe8c   :  { %5710 = vmatmul.msk.f32.vlgmr.msra.gmra.mxu3 %vm3659_vm5, %v4011_v32 }
 0xe8d   :  { %v3908_v27 = vor.u32 1.1754944e-38, %v3907_v21 }
 0xe8e   :  { %v6075_v58 = vpop.eup %6074  ;;  %v4004_v54 = vpop.permute.xlu0 %4003 }
 0xe8f   :  { %v6077_v51 = vpop.eup %6076  ;;  %v3848_v36 = vadd.f32 1.0, %v6075_v58 }
 0xe90   :  { %v3882_v18 = vmul.f32 %v6077_v51, %v3849_v40  ;;  %vm3887_vm2 = vweird.f32 %v6077_v51 }
 0xe91   :  { %6080 = vrcp.f32 %v3848_v36  ;;  %v6079_v33 = vpop.eup %6078  ;;  %v3877_v41 = vand.u32 2147483648, %v3848_v36  ;;  %v3875_v5 = vand.u32 2147483647, %v3848_v36  ;;  %vm3871_vm13 = vweird.f32 %v3848_v36  ;;  %vm3888_vm8 = vmor %vm3886_vm6, %vm3887_vm2  ;;  %v4006_v10 = vpop.permute.xlu2 %4005 }
 0xe92   :  { %v3883_v45 = vsub.f32 1.0, %v3882_v18  ;;  %v3897_v35 = vmul.f32 %v6079_v33, %v3850_v7  ;;  %vm3902_vm10 = vweird.f32 %v6079_v33  ;;  %vm3906_vm2 = vcmp.eq.f32.partialorder %v3905_v19, 8.507059e+37 }
 0xe93   :  { %v3878_v14 = vor.u32 1.1754944e-38, %v3877_v41  ;;  %vm3876_vm14 = vcmp.eq.f32.partialorder %v3875_v5, 8.507059e+37 }
 0xe94   :  { %v3884_v17 = vmul.f32 %v6077_v51, %v3883_v45  ;;  %v3898_v31 = vsub.f32 1.0, %v3897_v35 }
 0xe96   :  { %v3885_v39 = vadd.f32 %v6077_v51, %v3884_v17  ;;  %v3899_v53 = vmul.f32 %v6079_v33, %v3898_v31 }
 0xe97   :  { %v6081_v12 = vpop.eup %6080 }
 0xe98   :  { %v3867_v42 = vmul.f32 %v6081_v12, %v3848_v36  ;;  %vm3872_vm12 = vweird.f32 %v6081_v12  ;;  %v3889_v20 = vsel %vm3888_vm8, %v6077_v51, %v3885_v39  ;;  %v3900_v28 = vadd.f32 %v6079_v33, %v3899_v53 }
 0xe99   :  { %vm3873_vm3 = vmor %vm3871_vm13, %vm3872_vm12  ;;  %v3894_v30 = vsel %vm3891_vm9, %v3893_v52, %v3889_v20 }
 0xe9a   :  { %v3868_v46 = vsub.f32 1.0, %v3867_v42  ;;  %v3913_v23 = vmul.f32 %v3894_v30, %v9482_v57  ;;  %vm3903_vm12 = vmor %vm3901_vm11, %vm3902_vm10  ;;  %v5989_v42 = vld [vmem:[#allocation15 + $0x1] ss:$0 sm:$0xff] }
 0xe9b   :  { %v3904_v38 = vsel %vm3903_vm12, %v6079_v33, %v3900_v28 }
 0xe9c   :  { %v3869_v44 = vmul.f32 %v6081_v12, %v3868_v46  ;;  %v4013_v55 = vmul.f32 %v4004_v54, %v3913_v23  ;;  %v3909_v2 = vsel %vm3906_vm2, %v3908_v27, %v3904_v38 }
 0xe9d   :  { %v3914_v59 = vmul.f32 %v3909_v2, %v9488_v13 }
 0xe9e   :  { %v3870_v61 = vadd.f32 %v6081_v12, %v3869_v44 }
 0xe9f   :  { %v4014_v50 = vmul.f32 %v4006_v10, %v3914_v59 }
 0xea0   :  { %v3874_v16 = vsel %vm3873_vm3, %v6081_v12, %v3870_v61 }
 0xea1   :  { %v3879_v56 = vsel %vm3876_vm14, %v3878_v14, %v3874_v16 }
 0xea2   :  { %v3912_v37 = vmul.f32 %v3879_v56, %v3832_v1 }
 0xea4   :  { %v4012_v6 = vmul.f32 %v4002_v47, %v3912_v37 }
 0xea6   :  { %5711 = vmatmul.msk.f32.gmra.mxu3 %vm3659_vm5, %v4012_v6 }
 0xeae   :  { %5712 = vmatmul.msk.f32.gmra.mxu3 %vm3659_vm5, %v4013_v55 }
 0xeb6   :  { %5713 = vmatmul.msk.f32.gmra.mxu3 %vm3659_vm5, %v4014_v50 }
 0xf0f   :  { %v4052_v1 = vpop.f32.mrf.mxu3 }
 0xf10   :  { %v4053_v57 = vadd.f32 %v5988_v8, %v4052_v1 }
 0xf12   :  { %v4064_v26 = vmul.f32 %v4053_v57, %v4053_v57 }
 0xf14   :  { %v4068_v49 = vsel %vm2945_vm15, %v4064_v26, 0.0 }
 0xf15   :  { %4069 = vadd.xlane.f32.xlu0 %v4068_v49 }
 0xf29   :  { %v4055_v62 = vpop.f32.mrf.mxu3 }
 0xf2a   :  { %v4056_v40 = vadd.f32 %v5988_v8, %v4055_v62 }
 0xf2c   :  { %v4065_v9 = vmul.f32 %v4056_v40, %v4056_v40 }
 0xf2e   :  { %v4071_v3 = vsel %vm2945_vm15, %v4065_v9, 0.0 }
 0xf2f   :  { %4072 = vadd.xlane.f32.xlu1 %v4071_v3 }
 0xf31   :  { %v4058_v15 = vpop.f32.mrf.mxu3 }
 0xf32   :  { %v9506_v24 = vadd.f32 %v5988_v8, %v4058_v15 }
 0xf34   :  { %v4066_v13 = vmul.f32 %v9506_v24, %v9506_v24 }
 0xf36   :  { %v4074_v48 = vsel %vm2945_vm15, %v4066_v13, 0.0 }
 0xf37   :  { %4075 = vadd.xlane.f32.xlu2 %v4074_v48 }
 0xf39   :  { %v4061_v43 = vpop.f32.mrf.mxu3 }
 0xf3a   :  { %v9511_v25 = vadd.f32 %v5988_v8, %v4061_v43 }
 0xf3c   :  { %v4067_v22 = vmul.f32 %v9511_v25, %v9511_v25 }
 0xf3e   :  { %v4077_v7 = vsel %vm2945_vm15, %v4067_v22, 0.0 }
 0xf3f   :  { %4078 = vadd.xlane.f32.xlu0 %v4077_v7 }
 0xf88   :  { %v4070_v63 = vpop.xlane.xlu0 %4069 }
 0xf89   :  { %v4080_v58 = vmul.f32 %v4070_v63, %v9301_v0 }
 0xf8b   :  { %v4084_v29 = vadd.f32 1e-05, %v4080_v58 }
 0xf8d   :  { %6082 = vrsqrt.f32 %v4084_v29  ;;  %vm4094_vm3 = vweird.f32 %v4084_v29 }
 0xf93   :  { %v6083_v51 = vpop.eup %6082 }
 0xf94   :  { %v4089_v36 = vmul.f32 %v6083_v51, %v4084_v29  ;;  %vm4095_vm13 = vweird.f32 %v6083_v51  ;;  %v5724_v29 = vld [vmem:[%s9971_s16 + $0x20] sm:$0xff] }
 0xf95   :  { %vm4096_vm14 = vmor %vm4094_vm3, %vm4095_vm13 }
 0xf96   :  { %v4090_v32 = vmul.f32 %v6083_v51, %v4089_v36 }
 0xf98   :  { %v4091_v18 = vmul.f32 0.5, %v4090_v32 }
 0xf9a   :  { %v4092_v33 = vsub.f32 1.5, %v4091_v18  ;;  %v5727_v18 = vld [vmem:[%s9971_s16 + $0x38] sm:$0xff] }
 0xf9c   :  { %v4093_v45 = vmul.f32 %v6083_v51, %v4092_v33  ;;  %v5725_v33 = vld [vmem:[%s9971_s16 + $0x28] sm:$0xff] }
 0xf9e   :  { %v4097_v17 = vsel %vm4096_vm14, %v6083_v51, %v4093_v45  ;;  %v5726_v45 = vld [vmem:[%s9971_s16 + $0x30] sm:$0xff] }
 0xf9f   :  { %v4128_v35 = vmul.f32 %v4097_v17, %v4053_v57 }
 0xfa1   :  { %v4137_v44 = vmul.f32 %v5989_v42, %v4128_v35 }
 0xfa2   :  { %v4073_v12 = vpop.xlane.xlu1 %4072 }
 0xfa3   :  { %v4081_v46 = vmul.f32 %v4073_v12, %v9301_v0  ;;  %5716 = vmatmul.msk.f32.vlgmr.msra.gmra.mxu1 %vm2945_vm15, %v4137_v44 }
 0xfa5   :  { %v4085_v41 = vadd.f32 1e-05, %v4081_v46 }
 0xfa7   :  { %6084 = vrsqrt.f32 %v4085_v41  ;;  %vm4104_vm8 = vweird.f32 %v4085_v41 }
 0xfaa   :  { %v4076_v5 = vpop.xlane.xlu2 %4075 }
 0xfab   :  { %v4082_v61 = vmul.f32 %v4076_v5, %v9301_v0 }
 0xfad   :  { %v6085_v39 = vpop.eup %6084  ;;  %v4086_v31 = vadd.f32 1e-05, %v4082_v61 }
 0xfae   :  { %v4099_v14 = vmul.f32 %v6085_v39, %v4085_v41  ;;  %vm4105_vm6 = vweird.f32 %v6085_v39 }
 0xfaf   :  { %6086 = vrsqrt.f32 %v4086_v31  ;;  %vm4106_vm9 = vmor %vm4104_vm8, %vm4105_vm6  ;;  %vm4114_vm11 = vweird.f32 %v4086_v31 }
 0xfb0   :  { %v4100_v60 = vmul.f32 %v6085_v39, %v4099_v14 }
 0xfb2   :  { %v4101_v16 = vmul.f32 0.5, %v4100_v60  ;;  %v4079_v4 = vpop.xlane.xlu0 %4078  ;;  %v5720_v60 = vld [vmem:[%s9970_s15 + $0x20] sm:$0xff] }
 0xfb3   :  { %v4083_v56 = vmul.f32 %v4079_v4, %v9301_v0  ;;  %v5722_v4 = vld [vmem:[%s9970_s15 + $0x30] sm:$0xff] }
 0xfb4   :  { %v4102_v37 = vsub.f32 1.5, %v4101_v16  ;;  %v5721_v16 = vld [vmem:[%s9970_s15 + $0x28] sm:$0xff] }
 0xfb5   :  { %v6087_v20 = vpop.eup %6086  ;;  %v4087_v53 = vadd.f32 1e-05, %v4083_v56  ;;  %v5723_v56 = vld [vmem:[%s9970_s15 + $0x38] sm:$0xff] }
 0xfb6   :  { %v4103_v47 = vmul.f32 %v6085_v39, %v4102_v37  ;;  %v4109_v52 = vmul.f32 %v6087_v20, %v4086_v31  ;;  %vm4115_vm10 = vweird.f32 %v6087_v20 }
 0xfb7   :  { %6088 = vrsqrt.f32 %v4087_v53  ;;  %vm4116_vm12 = vmor %vm4114_vm11, %vm4115_vm10  ;;  %vm4124_vm13 = vweird.f32 %v4087_v53 }
 0xfb8   :  { %v4110_v6 = vmul.f32 %v6087_v20, %v4109_v52  ;;  %v4107_v30 = vsel %vm4106_vm9, %v6085_v39, %v4103_v47 }
 0xfb9   :  { %v4129_v28 = vmul.f32 %v4107_v30, %v4056_v40  ;;  %v5990_v40 = vld [vmem:[#allocation17 + $0x1] ss:$0 sm:$0xff] }
 0xfba   :  { %v4111_v21 = vmul.f32 0.5, %v4110_v6 }
 0xfbb   :  { %v4138_v23 = vmul.f32 %v5989_v42, %v4129_v28 }
 0xfbc   :  { %v4112_v19 = vsub.f32 1.5, %v4111_v21  ;;  %v5735_v21 = vld [vmem:[%s9972_s17 + $0x38] sm:$0xff] }
 0xfbd   :  { %v6089_v38 = vpop.eup %6088  ;;  %5717 = vmatmul.msk.f32.gmra.mxu1 %vm2945_vm15, %v4138_v23  ;;  %4427 = vmatpush.msrb.mxu0 %v5735_v21 }
 0xfbe   :  { %v4113_v54 = vmul.f32 %v6087_v20, %v4112_v19  ;;  %v4119_v27 = vmul.f32 %v6089_v38, %v4087_v53  ;;  %vm4125_vm2 = vweird.f32 %v6089_v38 }
 0xfbf   :  { %vm4126_vm3 = vmor %vm4124_vm13, %vm4125_vm2 }
 0xfc0   :  { %v4120_v55 = vmul.f32 %v6089_v38, %v4119_v27  ;;  %v4117_v2 = vsel %vm4116_vm12, %v6087_v20, %v4113_v54 }
 0xfc1   :  { %v4130_v59 = vmul.f32 %v4117_v2, %v9506_v24 }
 0xfc2   :  { %v4121_v10 = vmul.f32 0.5, %v4120_v55 }
 0xfc3   :  { %v4139_v50 = vmul.f32 %v5989_v42, %v4130_v59  ;;  %v5734_v59 = vld [vmem:[%s9972_s17 + $0x30] sm:$0xff] }
 0xfc4   :  { %v4122_v8 = vsub.f32 1.5, %v4121_v10  ;;  %4428 = vmatpush.msrb.mxu0 %v5734_v59 }
 0xfc5   :  { %5718 = vmatmul.msk.f32.gmra.mxu1 %vm2945_vm15, %v4139_v50 }
 0xfc6   :  { %v4123_v1 = vmul.f32 %v6089_v38, %v4122_v8 }
 0xfc8   :  { %v4127_v57 = vsel %vm4126_vm3, %v6089_v38, %v4123_v1 }
 0xfc9   :  { %v4131_v26 = vmul.f32 %v4127_v57, %v9511_v25 }
 0xfcb   :  { %v4140_v49 = vmul.f32 %v5989_v42, %v4131_v26 }
 0xfcd   :  { %5719 = vmatmul.msk.f32.gmra.mxu1 %vm2945_vm15, %v4140_v49 }
0x1020   :  { %v4178_v62 = vpop.f32.mrf.mxu1 }
0x1021   :  { %v9536_v24 = vadd.f32 %v5990_v40, %v4178_v62 }
0x103a   :  { %v4181_v9 = vpop.f32.mrf.mxu1 }
0x103b   :  { %v9532_v3 = vadd.f32 %v5990_v40, %v4181_v9 }
0x103d   :  { %4196 = vrot.lane.b32.xlu0 %v9532_v3, %s10179_s27 }
0x1042   :  { %v4184_v15 = vpop.f32.mrf.mxu1 }
0x1043   :  { %v9538_v13 = vadd.f32 %v5990_v40, %v4184_v15  ;;  %v5733_v15 = vld [vmem:[%s9972_s17 + $0x28] sm:$0xff] }
0x1044   :  { %4429 = vmatpush.msrb.mxu0 %v5733_v15 }
0x1045   :  { %4194 = vrot.lane.b32.xlu0 %v9536_v24, %s10179_s27  ;;  %4198 = vrot.lane.b32.xlu2 %v9538_v13, %s10179_s27 }
0x104a   :  { %v4187_v48 = vpop.f32.mrf.mxu1 }
0x104b   :  { %v9544_v43 = vadd.f32 %v5990_v40, %v4187_v48  ;;  %v5732_v48 = vld [vmem:[%s9972_s17 + $0x20] sm:$0xff] }
0x104c   :  { %4430 = vmatpush.msrb.mxu0 %v5732_v48 }
0x104d   :  { %4200 = vrot.lane.b32.xlu1 %v9544_v43, %s10179_s27 }
0x109f   :  { %v4199_v25 = vpop.permute.xlu2 %4198 }
0x10a0   :  { %4208 = vst.msk [vmem:[#allocation4 + $0x10] sm:$0xff] %vm3464_vm0, %v4199_v25 }
0x10a7   :  { %v4212_v51 = vld [vmem:[#allocation4 + $0x10] sm:$0xff] }
0x10af   :  { %v4197_v22 = vpop.permute.xlu0 %4196 }
0x10b0   :  { %4207 = vst.msk [vmem:[#allocation4 + $0x8] sm:$0xff] %vm3464_vm0, %v4197_v22 }
0x10b7   :  { %v4195_v7 = vpop.permute.xlu0 %4194  ;;  %v4211_v63 = vld [vmem:[#allocation4 + $0x8] sm:$0xff] }
0x10b8   :  { %4206 = vst.msk [vmem:[#allocation4] sm:$0xff] %vm3464_vm0, %v4195_v7 }
0x10bf   :  { %v4201_v34 = vpop.permute.xlu1 %4200  ;;  %v4210_v11 = vld [vmem:[#allocation4] sm:$0xff] }
0x10c0   :  { %4209 = vst.msk [vmem:[#allocation4 + $0x18] sm:$0xff] %vm3464_vm0, %v4201_v34  ;;  %v5947_v58 = vpack.i.bf16 %v4210_v11, %v4211_v63 }
0x10c2   :  { %5948 = vrot.lane.b32.xlu2 %v5947_v58, %s6577_s28 }
0x10c7   :  { %v4213_v36 = vld [vmem:[#allocation4 + $0x18] sm:$0xff] }
0x10c8   :  { %v5952_v32 = vpack.i.bf16 %v4212_v51, %v4213_v36 }
0x10ca   :  { %4254 = vperm.xlu2 %5919, %v5724_v29   ;;  %5953 = vrot.lane.b32.xlu0 %v5952_v32, %s6578_s4 }
0x10cb   :  { %5943 = vrot.lane.b32.xlu1 %v5952_v32, %s6577_s28 }
0x10d2   :  { %4269 = vperm.xlu2 %5919, %v5727_v18   ;;  %4259 = vperm.xlu0 %5921, %v5725_v33  }
0x10d3   :  { %5958 = vrot.lane.b32.xlu1 %v5947_v58, %s6578_s4 }
0x10db   :  { %4264 = vperm.xlu1 %5920, %v5726_v45  }
0x111c   :  { %v5949_v46 = vpop.permute.xlu2 %5948 }
0x111d   :  { %v5950_v35 = vunpack.i.l.bf16 %v5949_v46  ;;  %v5951_v44 = vunpack.i.h.bf16 %v5949_v46 }
0x1124   :  { %v4255_v37 = vpop.permute.xlu2 %4254 }
0x112c   :  { %v4270_v49 = vpop.permute.xlu2 %4269 }
0x113c   :  { %v5954_v41 = vpop.permute.xlu0 %5953 }
0x113d   :  { %v5944_v12 = vpop.permute.xlu1 %5943  ;;  %v5955_v5 = vunpack.i.l.bf16 %v5954_v41  ;;  %v5956_v39 = vunpack.i.h.bf16 %v5954_v41 }
0x113e   :  { %v5945_v42 = vunpack.i.l.bf16 %v5944_v12  ;;  %v5946_v17 = vunpack.i.h.bf16 %v5944_v12 }
0x1140   :  { %4288 = vmatpush.msra.mxu2 %v5945_v42 }
0x1142   :  { %4289 = vmatpush.msra.mxu2 %v5946_v17 }
0x1144   :  { %4290 = vmatpush.msra.mxu2 %v5950_v35  ;;  %v4260_v6 = vpop.permute.xlu0 %4259 }
0x1145   :  { %v5959_v61 = vpop.permute.xlu1 %5958 }
0x1146   :  { %4291 = vmatpush.msra.mxu2 %v5951_v44  ;;  %v5960_v31 = vunpack.i.l.bf16 %v5959_v61  ;;  %v5961_v14 = vunpack.i.h.bf16 %v5959_v61 }
0x1148   :  { %4292 = vmatpush.msra.mxu2 %v5955_v5 }
0x114a   :  { %4293 = vmatpush.msra.mxu2 %v5956_v39 }
0x114c   :  { %4294 = vmatpush.msra.mxu2 %v5960_v31 }
0x114d   :  { %v4265_v27 = vpop.permute.xlu1 %4264 }
0x114e   :  { %4295 = vmatpush.msra.mxu2 %v5961_v14 }
0x1150   :  { %4296 = vmatpush.msra.mxu2 %v4213_v36  ;;  %v4446_v36 = vld [vmem:[#allocation20 + $0x28] sm:$0xff] }
0x1152   :  { %4297 = vmatpush.msra.mxu2 %v4212_v51 }
0x1154   :  { %4298 = vmatpush.msra.mxu2 %v4211_v63  ;;  %v4447_v63 = vld [vmem:[#allocation20 + $0x30] sm:$0xff] }
0x1156   :  { %4299 = vmatpush.msra.mxu2 %v4210_v11  ;;  %v4448_v11 = vld [vmem:[#allocation20 + $0x38] sm:$0xff] }
0x1157   :  { %5728 = vmatmul.msk.f32.vlgmr.msra.gmra.mxu2 %vm3529_vm1, %v5720_v60  ;;  %4478 = vmatpush.msrb.mxu3 %v4448_v11 }
0x1159   :  { %4479 = vmatpush.msrb.mxu3 %v4447_v63 }
0x115b   :  { %4480 = vmatpush.msrb.mxu3 %v4446_v36 }
0x115f   :  { %5729 = vmatmul.msk.f32.gmra.mxu2 %vm3529_vm1, %v5721_v16 }
0x1167   :  { %5730 = vmatmul.msk.f32.gmra.mxu2 %vm3529_vm1, %v5722_v4 }
0x116f   :  { %5731 = vmatmul.msk.f32.gmra.mxu2 %vm3529_vm1, %v5723_v56 }
0x11da   :  { %v4301_v20 = vpop.f32.mrf.mxu2 }
0x11db   :  { %v4302_v53 = vadd.f32 %v4301_v20, %v4255_v37 }
0x11dd   :  { %v4313_v47 = vsub.f32 0.0, %v4302_v53 }
0x11df   :  { %v4317_v52 = vmul.f32 1.442695, %v4313_v47 }
0x11e1   :  { %6090 = vpow2.f32 %v4317_v52 }
0x11e2   :  { %v4304_v30 = vpop.f32.mrf.mxu2 }
0x11e3   :  { %v9584_v28 = vadd.f32 %v4304_v30, %v4260_v6 }
0x11e5   :  { %v4314_v23 = vsub.f32 0.0, %v9584_v28 }
0x11e7   :  { %v6091_v19 = vpop.eup %6090  ;;  %v4319_v38 = vmul.f32 1.442695, %v4314_v23 }
0x11e8   :  { %v4325_v54 = vadd.f32 1.0, %v6091_v19 }
0x11e9   :  { %6092 = vpow2.f32 %v4319_v38 }
0x11ea   :  { %6094 = vrcp.f32 %v4325_v54  ;;  %v4307_v55 = vpop.f32.mrf.mxu2  ;;  %v4340_v25 = vand.u32 2147483648, %v4325_v54  ;;  %v4338_v7 = vand.u32 2147483647, %v4325_v54  ;;  %vm4334_vm6 = vweird.f32 %v4325_v54 }
0x11eb   :  { %v9590_v2 = vadd.f32 %v4307_v55, %v4265_v27 }
0x11ec   :  { %v4341_v18 = vor.u32 1.1754944e-38, %v4340_v25  ;;  %vm4339_vm9 = vcmp.eq.f32.partialorder %v4338_v7, 8.507059e+37 }
0x11ed   :  { %v4315_v10 = vsub.f32 0.0, %v9590_v2 }
0x11ef   :  { %v6093_v50 = vpop.eup %6092  ;;  %v4321_v8 = vmul.f32 1.442695, %v4315_v10 }
0x11f0   :  { %v6095_v1 = vpop.eup %6094  ;;  %v4326_v57 = vadd.f32 1.0, %v6093_v50 }
0x11f1   :  { %v4330_v26 = vmul.f32 %v6095_v1, %v4325_v54  ;;  %6096 = vpow2.f32 %v4321_v8  ;;  %vm4335_vm14 = vweird.f32 %v6095_v1 }
0x11f2   :  { %6098 = vrcp.f32 %v4326_v57  ;;  %v4310_v62 = vpop.f32.mrf.mxu2  ;;  %vm4336_vm8 = vmor %vm4334_vm6, %vm4335_vm14  ;;  %v4355_v35 = vand.u32 2147483648, %v4326_v57  ;;  %v4353_v44 = vand.u32 2147483647, %v4326_v57  ;;  %vm4349_vm11 = vweird.f32 %v4326_v57 }
0x11f3   :  { %v4331_v40 = vsub.f32 1.0, %v4330_v26  ;;  %v9596_v9 = vadd.f32 %v4310_v62, %v4270_v49 }
0x11f4   :  { %v4356_v31 = vor.u32 1.1754944e-38, %v4355_v35  ;;  %vm4354_vm2 = vcmp.eq.f32.partialorder %v4353_v44, 8.507059e+37  ;;  %v4660_v35 = vsub.f32 0.0, %v9532_v3  ;;  %v4662_v44 = vsub.f32 0.0, %v9544_v43 }
0x11f5   :  { %v4332_v22 = vmul.f32 %v6095_v1, %v4331_v40  ;;  %v4316_v34 = vsub.f32 0.0, %v9596_v9 }
0x11f7   :  { %v6097_v58 = vpop.eup %6096  ;;  %v4333_v29 = vadd.f32 %v6095_v1, %v4332_v22  ;;  %v4323_v51 = vmul.f32 1.442695, %v4316_v34  ;;  %v5992_v22 = vld [vmem:[#allocation21 + $0x1] ss:$0 sm:$0xff] }
0x11f8   :  { %v6099_v32 = vpop.eup %6098  ;;  %v4327_v33 = vadd.f32 1.0, %v6097_v58 }
0x11f9   :  { %v4337_v45 = vsel %vm4336_vm8, %v6095_v1, %v4333_v29  ;;  %v4345_v12 = vmul.f32 %v6099_v32, %v4326_v57  ;;  %6100 = vpow2.f32 %v4323_v51  ;;  %vm4350_vm10 = vweird.f32 %v6099_v32  ;;  %v4445_v57 = vld [vmem:[#allocation20 + $0x20] sm:$0xff] }
0x11fa   :  { %v4342_v42 = vsel %vm4339_vm9, %v4341_v18, %v4337_v45  ;;  %6102 = vrcp.f32 %v4327_v33  ;;  %vm4351_vm12 = vmor %vm4349_vm11, %vm4350_vm10  ;;  %v4370_v20 = vand.u32 2147483648, %v4327_v33  ;;  %v4368_v47 = vand.u32 2147483647, %v4327_v33  ;;  %4481 = vmatpush.msrb.mxu3 %v4445_v57 }
0x11fb   :  { %v4389_v46 = vmul.f32 %v4342_v42, %v4302_v53  ;;  %v4346_v17 = vsub.f32 1.0, %v4345_v12  ;;  %vm4364_vm3 = vweird.f32 %v4327_v33 }
0x11fc   :  { %v4371_v30 = vor.u32 1.1754944e-38, %v4370_v20  ;;  %vm4369_vm6 = vcmp.eq.f32.partialorder %v4368_v47, 8.507059e+37 }
0x11fd   :  { %v4347_v41 = vmul.f32 %v6099_v32, %v4346_v17  ;;  %5736 = vmatmul.msk.f32.vlgmr.msrb.gmra.mxu0 %vm3659_vm5, %v4389_v46 }
0x11ff   :  { %v6101_v5 = vpop.eup %6100  ;;  %v4348_v61 = vadd.f32 %v6099_v32, %v4347_v41  ;;  %v4665_v41 = vmul.f32 1.442695, %v4660_v35 }
0x1200   :  { %v6103_v39 = vpop.eup %6102  ;;  %v4328_v14 = vadd.f32 1.0, %v6101_v5  ;;  %v4661_v5 = vsub.f32 0.0, %v9538_v13 }
0x1201   :  { %v4352_v60 = vsel %vm4351_vm12, %v6099_v32, %v4348_v61  ;;  %v4360_v16 = vmul.f32 %v6103_v39, %v4327_v33  ;;  %vm4365_vm13 = vweird.f32 %v6103_v39  ;;  %v4669_v61 = vmul.f32 1.442695, %v4662_v44 }
0x1202   :  { %v4357_v4 = vsel %vm4354_vm2, %v4356_v31, %v4352_v60  ;;  %6104 = vrcp.f32 %v4328_v14  ;;  %vm4366_vm14 = vmor %vm4364_vm3, %vm4365_vm13  ;;  %v4383_v55 = vand.u32 2147483647, %v4328_v14  ;;  %vm4379_vm9 = vweird.f32 %v4328_v14 }
0x1203   :  { %v4390_v56 = vmul.f32 %v4357_v4, %v9584_v28  ;;  %v4361_v37 = vsub.f32 1.0, %v4360_v16  ;;  %v4385_v28 = vand.u32 2147483648, %v4328_v14  ;;  %6106 = vpow2.f32 %v4665_v41 }
0x1204   :  { %vm4384_vm11 = vcmp.eq.f32.partialorder %v4383_v55, 8.507059e+37  ;;  %v4667_v31 = vmul.f32 1.442695, %v4661_v5  ;;  %6108 = vpow2.f32 %v4669_v61 }
0x1205   :  { %v4362_v53 = vmul.f32 %v6103_v39, %v4361_v37  ;;  %5737 = vmatmul.msk.f32.gmra.mxu0 %vm3659_vm5, %v4390_v56  ;;  %v4386_v10 = vor.u32 1.1754944e-38, %v4385_v28 }
0x1206   :  { %6110 = vpow2.f32 %v4667_v31 }
0x1207   :  { %v4363_v52 = vadd.f32 %v6103_v39, %v4362_v53 }
0x1208   :  { %v6105_v6 = vpop.eup %6104 }
0x1209   :  { %v4367_v21 = vsel %vm4366_vm14, %v6103_v39, %v4363_v52  ;;  %v4375_v23 = vmul.f32 %v6105_v6, %v4328_v14  ;;  %vm4380_vm8 = vweird.f32 %v6105_v6  ;;  %v6107_v39 = vpop.eup %6106 }
0x120a   :  { %v4372_v19 = vsel %vm4369_vm6, %v4371_v30, %v4367_v21  ;;  %vm4381_vm10 = vmor %vm4379_vm9, %vm4380_vm8  ;;  %v4672_v14 = vadd.f32 1.0, %v6107_v39  ;;  %v6109_v60 = vpop.eup %6108 }
0x120b   :  { %v4391_v38 = vmul.f32 %v4372_v19, %v9590_v2  ;;  %v4376_v54 = vsub.f32 1.0, %v4375_v23  ;;  %v5991_v2 = vld [vmem:[#allocation18 + $0x1] ss:$0 sm:$0xff]  ;;  %v4674_v16 = vadd.f32 1.0, %v6109_v60 }
0x120c   :  { %6112 = vrcp.f32 %v4672_v14  ;;  %v6111_v4 = vpop.eup %6110  ;;  %vm4695_vm2 = vweird.f32 %v4672_v14 }
0x120d   :  { %v4377_v27 = vmul.f32 %v6105_v6, %v4376_v54  ;;  %5738 = vmatmul.msk.f32.gmra.mxu0 %vm3659_vm5, %v4391_v38  ;;  %6114 = vrcp.f32 %v4674_v16  ;;  %v4673_v20 = vadd.f32 1.0, %v6111_v4  ;;  %vm4725_vm6 = vweird.f32 %v4674_v16 }
0x120f   :  { %v4378_v59 = vadd.f32 %v6105_v6, %v4377_v27  ;;  %6116 = vrcp.f32 %v4673_v20  ;;  %v4701_v27 = vand.u32 2147483648, %v4672_v14 }
0x1211   :  { %v4382_v50 = vsel %vm4381_vm10, %v6105_v6, %v4378_v59  ;;  %v4659_v59 = vsub.f32 0.0, %v9536_v24 }
0x1212   :  { %v4387_v8 = vsel %vm4384_vm11, %v4386_v10, %v4382_v50  ;;  %v6113_v56 = vpop.eup %6112  ;;  %v4699_v10 = vand.u32 2147483647, %v4672_v14  ;;  %vm4710_vm11 = vweird.f32 %v4673_v20 }
0x1213   :  { %v4392_v1 = vmul.f32 %v4387_v8, %v9596_v9  ;;  %v4691_v37 = vmul.f32 %v6113_v56, %v4672_v14  ;;  %v6115_v6 = vpop.eup %6114  ;;  %vm4696_vm12 = vweird.f32 %v6113_v56 }
0x1214   :  { %v4721_v21 = vmul.f32 %v6115_v6, %v4674_v16  ;;  %vm4697_vm13 = vmor %vm4695_vm2, %vm4696_vm12  ;;  %vm4700_vm3 = vcmp.eq.f32.partialorder %v4699_v10, 8.507059e+37  ;;  %vm4726_vm14 = vweird.f32 %v6115_v6 }
0x1215   :  { %5739 = vmatmul.msk.f32.gmra.mxu0 %vm3659_vm5, %v4392_v1  ;;  %v4692_v52 = vsub.f32 1.0, %v4691_v37  ;;  %v6117_v23 = vpop.eup %6116  ;;  %v4702_v1 = vor.u32 1.1754944e-38, %v4701_v27  ;;  %vm4727_vm8 = vmor %vm4725_vm6, %vm4726_vm14 }
0x1216   :  { %v4722_v28 = vsub.f32 1.0, %v4721_v21  ;;  %v4706_v55 = vmul.f32 %v6117_v23, %v4673_v20  ;;  %vm4711_vm9 = vweird.f32 %v6117_v23 }
0x1217   :  { %v4693_v30 = vmul.f32 %v6113_v56, %v4692_v52  ;;  %vm4712_vm12 = vmor %vm4710_vm11, %vm4711_vm9 }
0x1218   :  { %v4723_v8 = vmul.f32 %v6115_v6, %v4722_v28  ;;  %v4707_v57 = vsub.f32 1.0, %v4706_v55 }
0x1219   :  { %v4694_v54 = vadd.f32 %v6113_v56, %v4693_v30 }
0x121b   :  { %v4698_v50 = vsel %vm4697_vm13, %v6113_v56, %v4694_v54 }
0x127a   :  { %v4432_v26 = vpop.f32.mrf.mxu0 }
0x127b   :  { %v9612_v49 = vadd.f32 %v5991_v2, %v4432_v26 }
0x127d   :  { %5740 = vmatmul.msk.f32.vlgmr.msrb.gmra.mxu3 %vm3659_vm5, %v9612_v49 }
0x1282   :  { %v4435_v62 = vpop.f32.mrf.mxu0 }
0x1283   :  { %v9616_v40 = vadd.f32 %v5991_v2, %v4435_v62  ;;  %v4703_v62 = vsel %vm4700_vm3, %v4702_v1, %v4698_v50 }
0x1285   :  { %5741 = vmatmul.msk.f32.gmra.mxu3 %vm3659_vm5, %v9616_v40 }
0x128a   :  { %v4438_v15 = vpop.f32.mrf.mxu0 }
0x128b   :  { %v9620_v48 = vadd.f32 %v5991_v2, %v4438_v15 }
0x128d   :  { %5742 = vmatmul.msk.f32.gmra.mxu3 %vm3659_vm5, %v9620_v48 }
0x1292   :  { %v4441_v9 = vpop.f32.mrf.mxu0 }
0x1293   :  { %v9624_v25 = vadd.f32 %v5991_v2, %v4441_v9  ;;  %v4663_v2 = vmul.f32 1.442695, %v4659_v59  ;;  %v4724_v9 = vadd.f32 %v6115_v6, %v4723_v8  ;;  %v5747_v8 = vld [vmem:[%s9976_s21 + $0x38] sm:$0xff] }
0x1294   :  { %4793 = vmatpush.msrb.mxu1 %v5747_v8 }
0x1295   :  { %5743 = vmatmul.msk.f32.gmra.mxu3 %vm3659_vm5, %v9624_v25  ;;  %6118 = vpow2.f32 %v4663_v2 }
0x1300   :  { %v4483_v7 = vpop.f32.mrf.mxu3 }
0x1301   :  { %v9628_v34 = vadd.f32 %v5992_v22, %v4483_v7  ;;  %v4731_v7 = vand.u32 2147483648, %v4674_v16 }
0x1303   :  { %4531 = vrot.lane.b32.xlu0 %v9628_v34, %s6569_s18  ;;  %v4499_v30 = vmul.f32 1.442695, %v9628_v34 }
0x1308   :  { %v4486_v11 = vpop.f32.mrf.mxu3 }
0x1309   :  { %v9632_v63 = vadd.f32 %v5992_v22, %v4486_v11  ;;  %v4736_v11 = vmul.f32 %v4703_v62, %v9532_v3 }
0x130b   :  { %4533 = vrot.lane.b32.xlu1 %v9632_v63, %s6569_s18 }
0x1310   :  { %v4489_v58 = vpop.f32.mrf.mxu3 }
0x1311   :  { %v9636_v29 = vadd.f32 %v5992_v22, %v4489_v58  ;;  %v4729_v58 = vand.u32 2147483647, %v4674_v16 }
0x1313   :  { %4535 = vrot.lane.b32.xlu2 %v9636_v29, %s6569_s18  ;;  %vm4730_vm10 = vcmp.eq.f32.partialorder %v4729_v58, 8.507059e+37  ;;  %vm4497_vm9 = vcmp.gt.f32.partialorder %v9636_v29, 20.0 }
0x1318   :  { %v4492_v51 = vpop.f32.mrf.mxu3 }
0x1319   :  { %v9640_v36 = vadd.f32 %v5992_v22, %v4492_v51  ;;  %v4708_v22 = vmul.f32 %v6117_v23, %v4707_v57  ;;  %v4728_v51 = vsel %vm4727_vm8, %v6115_v6, %v4724_v9  ;;  %vm4496_vm8 = vcmp.gt.f32.partialorder %v9632_v63, 20.0 }
0x131b   :  { %4537 = vrot.lane.b32.xlu0 %v9640_v36, %s6569_s18  ;;  %v4505_v2 = vmul.f32 1.442695, %v9640_v36  ;;  %vm4498_vm11 = vcmp.gt.f32.partialorder %v9640_v36, 20.0 }
0x136d   :  { %v4536_v32 = vpop.permute.xlu2 %4535 }
0x136e   :  { %v4545_v18 = vmul.f32 %v4536_v32, %v9636_v29  ;;  %v4709_v32 = vadd.f32 %v6117_v23, %v4708_v22  ;;  %v5746_v22 = vld [vmem:[%s9976_s21 + $0x30] sm:$0xff] }
0x136f   :  { %4794 = vmatpush.msrb.mxu1 %v5746_v22 }
0x1370   :  { %4555 = vrot.lane.b32.xlu0 %v4545_v18, %s10180_s24  ;;  %v4732_v18 = vor.u32 1.1754944e-38, %v4731_v7 }
0x1375   :  { %v4532_v33 = vpop.permute.xlu0 %4531 }
0x1376   :  { %v4543_v45 = vmul.f32 %v4532_v33, %v9628_v34  ;;  %v4716_v33 = vand.u32 2147483648, %v4673_v20 }
0x1378   :  { %4551 = vrot.lane.b32.xlu1 %v4543_v45, %s10180_s24  ;;  %v4714_v45 = vand.u32 2147483647, %v4673_v20 }
0x137a   :  { %vm4715_vm2 = vcmp.eq.f32.partialorder %v4714_v45, 8.507059e+37 }
0x137d   :  { %v4534_v12 = vpop.permute.xlu1 %4533 }
0x137e   :  { %v4544_v42 = vmul.f32 %v4534_v12, %v9632_v63  ;;  %v4733_v12 = vsel %vm4730_vm10, %v4732_v18, %v4728_v51  ;;  %vm4495_vm10 = vcmp.gt.f32.partialorder %v9628_v34, 20.0 }
0x137f   :  { %v4738_v3 = vmul.f32 %v4733_v12, %v9544_v43 }
0x1380   :  { %4553 = vrot.lane.b32.xlu2 %v4544_v42, %s10180_s24  ;;  %v6119_v42 = vpop.eup %6118 }
0x1381   :  { %v4671_v35 = vadd.f32 1.0, %v6119_v42 }
0x1383   :  { %6120 = vrcp.f32 %v4671_v35  ;;  %v4686_v43 = vand.u32 2147483648, %v4671_v35  ;;  %vm4680_vm3 = vweird.f32 %v4671_v35  ;;  %v4684_v4 = vand.u32 2147483647, %v4671_v35 }
0x1385   :  { %v4687_v37 = vor.u32 1.1754944e-38, %v4686_v43  ;;  %vm4685_vm6 = vcmp.eq.f32.partialorder %v4684_v4, 8.507059e+37  ;;  %v5745_v43 = vld [vmem:[%s9976_s21 + $0x28] sm:$0xff] }
0x1386   :  { %4795 = vmatpush.msrb.mxu1 %v5745_v43 }
0x1389   :  { %v6121_v5 = vpop.eup %6120 }
0x138a   :  { %v4676_v31 = vmul.f32 %v6121_v5, %v4671_v35  ;;  %vm4681_vm13 = vweird.f32 %v6121_v5 }
0x138b   :  { %vm4682_vm14 = vmor %vm4680_vm3, %vm4681_vm13 }
0x138c   :  { %v4677_v14 = vsub.f32 1.0, %v4676_v31 }
0x138d   :  { %v4538_v46 = vpop.permute.xlu0 %4537 }
0x138e   :  { %v4546_v17 = vmul.f32 %v4538_v46, %v9640_v36  ;;  %v4713_v46 = vsel %vm4712_vm12, %v6117_v23, %v4709_v32  ;;  %v4678_v60 = vmul.f32 %v6121_v5, %v4677_v14 }
0x1390   :  { %4557 = vrot.lane.b32.xlu1 %v4546_v17, %s10180_s24  ;;  %v4717_v17 = vor.u32 1.1754944e-38, %v4716_v33  ;;  %v4679_v16 = vadd.f32 %v6121_v5, %v4678_v60 }
0x1392   :  { %v4718_v41 = vsel %vm4715_vm2, %v4717_v17, %v4713_v46  ;;  %v4683_v56 = vsel %vm4682_vm14, %v6121_v5, %v4679_v16 }
0x1393   :  { %v4737_v44 = vmul.f32 %v4718_v41, %v9538_v13  ;;  %v4688_v13 = vsel %vm4685_vm6, %v4687_v37, %v4683_v56  ;;  %v5744_v56 = vld [vmem:[%s9976_s21 + $0x20] sm:$0xff] }
0x1394   :  { %v4735_v20 = vmul.f32 %v4688_v13, %v9536_v24  ;;  %4796 = vmatpush.msrb.mxu1 %v5744_v56 }
0x13da   :  { %v4554_v53 = vpop.permute.xlu2 %4553 }
0x13db   :  { %v4566_v47 = vsel %vm3818_vm7, %v4554_v53, 0.0  ;;  %v4501_v53 = vmul.f32 1.442695, %v9632_v63 }
0x13dc   :  { %4567 = vadd.xlane.f32.xlu0 %v4566_v47  ;;  %v4503_v47 = vmul.f32 1.442695, %v9636_v29 }
0x13dd   :  { %6122 = vpow2.f32 %v4501_v53 }
0x13de   :  { %6124 = vpow2.f32 %v4503_v47 }
0x13e2   :  { %v4556_v19 = vpop.permute.xlu0 %4555 }
0x13e3   :  { %v4569_v38 = vsel %vm3818_vm7, %v4556_v19, 0.0  ;;  %v6123_v52 = vpop.eup %6122 }
0x13e4   :  { %4570 = vadd.xlane.f32.xlu1 %v4569_v38  ;;  %v4508_v6 = vadd.f32 1.0, %v6123_v52  ;;  %v6125_v21 = vpop.eup %6124 }
0x13e5   :  { %v4509_v23 = vadd.f32 1.0, %v6125_v21 }
0x13e6   :  { %6126 = vlog2.f32 %v4508_v6 }
0x13e7   :  { %6128 = vpow2.f32 %v4499_v30 }
0x13e8   :  { %6130 = vlog2.f32 %v4509_v23 }
0x13ea   :  { %v4552_v26 = vpop.permute.xlu1 %4551 }
0x13eb   :  { %v4563_v15 = vsel %vm3818_vm7, %v4552_v26, 0.0 }
0x13ec   :  { %4564 = vadd.xlane.f32.xlu2 %v4563_v15  ;;  %v6127_v19 = vpop.eup %6126 }
0x13ed   :  { %v6129_v38 = vpop.eup %6128  ;;  %v4514_v24 = vmul.f32 0.6931472, %v6127_v19 }
0x13ee   :  { %v4507_v54 = vadd.f32 1.0, %v6129_v38  ;;  %v6131_v27 = vpop.eup %6130 }
0x13ef   :  { %v4520_v28 = vsel %vm4496_vm8, %v9632_v63, %v4514_v24  ;;  %v4516_v10 = vmul.f32 0.6931472, %v6131_v27 }
0x13f0   :  { %4745 = vrot.lane.b32.xlu0 %v4736_v11, %s6606_s7  ;;  %v4524_v55 = vmul.f32 %v4520_v28, %v9616_v40  ;;  %6132 = vlog2.f32 %v4507_v54 }
0x13f1   :  { %v4521_v57 = vsel %vm4497_vm9, %v9636_v29, %v4516_v10  ;;  %6134 = vpow2.f32 %v4505_v2 }
0x13f2   :  { %v4525_v40 = vmul.f32 %v4521_v57, %v9620_v48 }
0x13f6   :  { %v6133_v63 = vpop.eup %6132 }
0x13f7   :  { %v4512_v15 = vmul.f32 0.6931472, %v6133_v63  ;;  %v6135_v11 = vpop.eup %6134 }
0x13f8   :  { %4749 = vrot.lane.b32.xlu0 %v4738_v3, %s6606_s7  ;;  %v4510_v33 = vadd.f32 1.0, %v6135_v11 }
0x13f9   :  { %v4519_v29 = vsel %vm4495_vm10, %v9628_v34, %v4512_v15 }
0x13fa   :  { %v4523_v48 = vmul.f32 %v4519_v29, %v9612_v49 }
0x13fd   :  { %4747 = vrot.lane.b32.xlu1 %v4737_v44, %s6606_s7 }
0x1402   :  { %v4558_v61 = vpop.permute.xlu1 %4557 }
0x1403   :  { %v4572_v39 = vsel %vm3818_vm7, %v4558_v61, 0.0 }
0x1404   :  { %4573 = vadd.xlane.f32.xlu2 %v4572_v39 }
0x141c   :  { %4743 = vrot.lane.b32.xlu2 %v4735_v20, %s6606_s7 }
0x144f   :  { %v4568_v59 = vpop.xlane.xlu0 %4567 }
0x1450   :  { %v9674_v50 = vmul.f32 %v4568_v59, %v4524_v55 }
0x1452   :  { %v4580_v1 = vsub.f32 0.0, %v9674_v50 }
0x1454   :  { %v4585_v26 = vmul.f32 1.442695, %v4580_v1 }
0x1456   :  { %6136 = vpow2.f32 %v4585_v26 }
0x1457   :  { %v4571_v62 = vpop.xlane.xlu1 %4570 }
0x1458   :  { %v9684_v9 = vmul.f32 %v4571_v62, %v4525_v40 }
0x145a   :  { %v4581_v7 = vsub.f32 0.0, %v9684_v9 }
0x145c   :  { %v4587_v51 = vmul.f32 1.442695, %v4581_v7  ;;  %v6137_v18 = vpop.eup %6136 }
0x145d   :  { %v4592_v12 = vadd.f32 1.0, %v6137_v18 }
0x145e   :  { %6138 = vpow2.f32 %v4587_v51 }
0x145f   :  { %v4565_v58 = vpop.xlane.xlu2 %4564  ;;  %6140 = vlog2.f32 %v4510_v33  ;;  %v4621_v23 = vand.u32 2147483648, %v4592_v12  ;;  %vm4615_vm14 = vweird.f32 %v4592_v12  ;;  %v4619_v38 = vand.u32 2147483647, %v4592_v12 }
0x1460   :  { %v4575_v32 = vmul.f32 %v4565_v58, %v4523_v48 }
0x1461   :  { %v4622_v59 = vor.u32 1.1754944e-38, %v4621_v23  ;;  %vm4620_vm9 = vcmp.eq.f32.partialorder %v4619_v38, 8.507059e+37 }
0x1462   :  { %v4579_v45 = vsub.f32 0.0, %v4575_v32  ;;  %v4746_v22 = vpop.permute.xlu0 %4745 }
0x1464   :  { %v4583_v42 = vmul.f32 1.442695, %v4579_v45  ;;  %v6139_v46 = vpop.eup %6138 }
0x1465   :  { %v6141_v34 = vpop.eup %6140  ;;  %v9693_v3 = vadd.f32 1.0, %v6139_v46 }
0x1466   :  { %6142 = vpow2.f32 %v4583_v42  ;;  %v4518_v49 = vmul.f32 0.6931472, %v6141_v34 }
0x1467   :  { %6144 = vrcp.f32 %v4592_v12  ;;  %v4636_v40 = vand.u32 2147483648, %v9693_v3  ;;  %v4634_v62 = vand.u32 2147483647, %v9693_v3 }
0x1468   :  { %v4522_v5 = vsel %vm4498_vm11, %v9640_v36, %v4518_v49  ;;  %vm4630_vm11 = vweird.f32 %v9693_v3 }
0x1469   :  { %v4526_v31 = vmul.f32 %v4522_v5, %v9624_v25  ;;  %v4637_v29 = vor.u32 1.1754944e-38, %v4636_v40 }
0x146c   :  { %v6143_v17 = vpop.eup %6142 }
0x146d   :  { %v4591_v35 = vadd.f32 1.0, %v6143_v17  ;;  %v6145_v41 = vpop.eup %6144 }
0x146e   :  { %v4611_v44 = vmul.f32 %v6145_v41, %v4592_v12  ;;  %vm4616_vm2 = vweird.f32 %v6145_v41 }
0x146f   :  { %6146 = vrcp.f32 %v4591_v35  ;;  %v4606_v20 = vand.u32 2147483648, %v4591_v35  ;;  %v4604_v52 = vand.u32 2147483647, %v4591_v35  ;;  %vm4600_vm13 = vweird.f32 %v4591_v35  ;;  %vm4617_vm8 = vmor %vm4615_vm14, %vm4616_vm2  ;;  %v4748_v45 = vpop.permute.xlu1 %4747 }
0x1470   :  { %6148 = vrcp.f32 %v9693_v3  ;;  %v4612_v39 = vsub.f32 1.0, %v4611_v44  ;;  %vm4635_vm2 = vcmp.eq.f32.partialorder %v4634_v62, 8.507059e+37 }
0x1471   :  { %v4607_v19 = vor.u32 1.1754944e-38, %v4606_v20  ;;  %vm4605_vm6 = vcmp.eq.f32.partialorder %v4604_v52, 8.507059e+37  ;;  %v5753_v20 = vld [vmem:[%s9968_s13 + $0x28] sm:$0xff] }
0x1472   :  { %v4613_v37 = vmul.f32 %v6145_v41, %v4612_v39  ;;  %4921 = vmatpush.msrb.mxu2 %v5753_v20 }
0x1474   :  { %v4614_v6 = vadd.f32 %v6145_v41, %v4613_v37 }
0x1475   :  { %v6147_v61 = vpop.eup %6146 }
0x1476   :  { %v6149_v14 = vpop.eup %6148  ;;  %v4596_v4 = vmul.f32 %v6147_v61, %v4591_v35  ;;  %vm4601_vm12 = vweird.f32 %v6147_v61  ;;  %v4618_v28 = vsel %vm4617_vm8, %v6145_v41, %v4614_v6  ;;  %v4750_v35 = vpop.permute.xlu0 %4749  ;;  %v5993_v41 = vld [vmem:[#allocation23 + $0x1] ss:$0 sm:$0xff]  ;;  %v5752_v6 = vld [vmem:[%s9968_s13 + $0x20] sm:$0xff] }
0x1477   :  { %v4574_v60 = vpop.xlane.xlu2 %4573  ;;  %v4626_v36 = vmul.f32 %v6149_v14, %v9693_v3  ;;  %vm4602_vm3 = vmor %vm4600_vm13, %vm4601_vm12  ;;  %v4623_v57 = vsel %vm4620_vm9, %v4622_v59, %v4618_v28  ;;  %vm4631_vm10 = vweird.f32 %v6149_v14  ;;  %4922 = vmatpush.msrb.mxu2 %v5752_v6 }
0x1478   :  { %v9699_v16 = vmul.f32 %v4574_v60, %v4526_v31  ;;  %v4597_v25 = vsub.f32 1.0, %v4596_v4  ;;  %v4656_v26 = vmul.f32 %v4623_v57, %v9674_v50  ;;  %vm4632_vm12 = vmor %vm4630_vm11, %vm4631_vm10  ;;  %v5994_v57 = vld [vmem:[#allocation15 + $0x2] ss:$0 sm:$0xff] }
0x1479   :  { %v4627_v30 = vsub.f32 1.0, %v4626_v36 }
0x147a   :  { %v4582_v13 = vsub.f32 0.0, %v9699_v16  ;;  %v4598_v47 = vmul.f32 %v6147_v61, %v4597_v25  ;;  %v4756_v7 = vmul.f32 %v4746_v22, %v4656_v26 }
0x147b   :  { %v4628_v27 = vmul.f32 %v6149_v14, %v4627_v30 }
0x147c   :  { %v4589_v53 = vmul.f32 1.442695, %v4582_v13  ;;  %v4599_v21 = vadd.f32 %v6147_v61, %v4598_v47 }
0x147d   :  { %v4629_v2 = vadd.f32 %v6149_v14, %v4628_v27 }
0x147e   :  { %6150 = vpow2.f32 %v4589_v53  ;;  %v4603_v24 = vsel %vm4602_vm3, %v6147_v61, %v4599_v21 }
0x147f   :  { %v4608_v54 = vsel %vm4605_vm6, %v4607_v19, %v4603_v24  ;;  %v4744_v10 = vpop.permute.xlu2 %4743  ;;  %v4633_v15 = vsel %vm4632_vm12, %v6149_v14, %v4629_v2 }
0x1480   :  { %v4655_v55 = vmul.f32 %v4608_v54, %v4575_v32  ;;  %v4638_v48 = vsel %vm4635_vm2, %v4637_v29, %v4633_v15 }
0x1481   :  { %v4657_v51 = vmul.f32 %v4638_v48, %v9684_v9 }
0x1482   :  { %v4755_v1 = vmul.f32 %v4744_v10, %v4655_v55 }
0x1483   :  { %v4757_v12 = vmul.f32 %v4748_v45, %v4657_v51 }
0x1484   :  { %v6151_v8 = vpop.eup %6150  ;;  %5748 = vmatmul.msk.f32.vlgmr.msrb.gmra.mxu1 %vm3659_vm5, %v4755_v1 }
0x1485   :  { %v4594_v63 = vadd.f32 1.0, %v6151_v8 }
0x1487   :  { %6152 = vrcp.f32 %v4594_v63  ;;  %v4651_v18 = vand.u32 2147483648, %v4594_v63  ;;  %v4649_v33 = vand.u32 2147483647, %v4594_v63  ;;  %vm4645_vm3 = vweird.f32 %v4594_v63 }
0x1489   :  { %v4652_v46 = vor.u32 1.1754944e-38, %v4651_v18  ;;  %vm4650_vm6 = vcmp.eq.f32.partialorder %v4649_v33, 8.507059e+37 }
0x148c   :  { %5749 = vmatmul.msk.f32.gmra.mxu1 %vm3659_vm5, %v4756_v7 }
0x148d   :  { %v6153_v11 = vpop.eup %6152 }
0x148e   :  { %v4641_v58 = vmul.f32 %v6153_v11, %v4594_v63  ;;  %vm4646_vm13 = vweird.f32 %v6153_v11 }
0x148f   :  { %vm4647_vm14 = vmor %vm4645_vm3, %vm4646_vm13 }
0x1490   :  { %v4642_v32 = vsub.f32 1.0, %v4641_v58 }
0x1492   :  { %v4643_v50 = vmul.f32 %v6153_v11, %v4642_v32 }
0x1494   :  { %v4644_v42 = vadd.f32 %v6153_v11, %v4643_v50  ;;  %5750 = vmatmul.msk.f32.gmra.mxu1 %vm3659_vm5, %v4757_v12 }
0x1496   :  { %v4648_v34 = vsel %vm4647_vm14, %v6153_v11, %v4644_v42 }
0x1497   :  { %v4653_v17 = vsel %vm4650_vm6, %v4652_v46, %v4648_v34 }
0x1498   :  { %v4658_v3 = vmul.f32 %v4653_v17, %v9699_v16 }
0x149a   :  { %v4758_v9 = vmul.f32 %v4750_v35, %v4658_v3 }
0x149c   :  { %5751 = vmatmul.msk.f32.gmra.mxu1 %vm3659_vm5, %v4758_v9 }
0x1501   :  { %v4798_v49 = vpop.f32.mrf.mxu1 }
0x1502   :  { %v4799_v44 = vadd.f32 %v5993_v41, %v4798_v49 }
0x1504   :  { %v4810_v5 = vmul.f32 %v4799_v44, %v4799_v44 }
0x1506   :  { %v4814_v61 = vsel %vm2945_vm15, %v4810_v5, 0.0 }
0x1507   :  { %4815 = vadd.xlane.f32.xlu2 %v4814_v61 }
0x1509   :  { %v4801_v39 = vpop.f32.mrf.mxu1 }
0x150a   :  { %v4802_v31 = vadd.f32 %v5993_v41, %v4801_v39 }
0x150c   :  { %v4811_v14 = vmul.f32 %v4802_v31, %v4802_v31 }
0x150e   :  { %v4817_v60 = vsel %vm2945_vm15, %v4811_v14, 0.0 }
0x150f   :  { %4818 = vadd.xlane.f32.xlu1 %v4817_v60 }
0x1511   :  { %v4804_v43 = vpop.f32.mrf.mxu1 }
0x1512   :  { %v9721_v4 = vadd.f32 %v5993_v41, %v4804_v43 }
0x1514   :  { %v4812_v16 = vmul.f32 %v9721_v4, %v9721_v4 }
0x1516   :  { %v4820_v56 = vsel %vm2945_vm15, %v4812_v16, 0.0 }
0x1517   :  { %4821 = vadd.xlane.f32.xlu0 %v4820_v56 }
0x1519   :  { %v4807_v37 = vpop.f32.mrf.mxu1 }
0x151a   :  { %v9726_v36 = vadd.f32 %v5993_v41, %v4807_v37 }
0x151c   :  { %v4813_v13 = vmul.f32 %v9726_v36, %v9726_v36 }
0x151e   :  { %v4823_v25 = vsel %vm2945_vm15, %v4813_v13, 0.0 }
0x151f   :  { %4824 = vadd.xlane.f32.xlu2 %v4823_v25 }
0x157a   :  { %v4816_v53 = vpop.xlane.xlu2 %4815 }
0x157b   :  { %v4826_v47 = vmul.f32 %v4816_v53, %v9301_v0 }
0x157d   :  { %v4830_v52 = vadd.f32 1e-05, %v4826_v47 }
0x157f   :  { %6154 = vrsqrt.f32 %v4830_v52  ;;  %vm4840_vm9 = vweird.f32 %v4830_v52 }
0x1582   :  { %v4819_v30 = vpop.xlane.xlu1 %4818 }
0x1583   :  { %v4827_v21 = vmul.f32 %v4819_v30, %v9301_v0 }
0x1585   :  { %v6155_v23 = vpop.eup %6154  ;;  %v4831_v19 = vadd.f32 1e-05, %v4827_v21 }
0x1586   :  { %v4835_v38 = vmul.f32 %v6155_v23, %v4830_v52  ;;  %vm4841_vm8 = vweird.f32 %v6155_v23 }
0x1587   :  { %6156 = vrsqrt.f32 %v4831_v19  ;;  %vm4842_vm10 = vmor %vm4840_vm9, %vm4841_vm8  ;;  %vm4850_vm12 = vweird.f32 %v4831_v19 }
0x1588   :  { %v4836_v24 = vmul.f32 %v6155_v23, %v4835_v38  ;;  %v5764_v38 = vld [vmem:[%s9971_s16 + $0x50] sm:$0xff] }
0x158a   :  { %v4837_v54 = vmul.f32 0.5, %v4836_v24  ;;  %v4822_v28 = vpop.xlane.xlu0 %4821  ;;  %v5765_v24 = vld [vmem:[%s9971_s16 + $0x58] sm:$0xff] }
0x158b   :  { %v4828_v27 = vmul.f32 %v4822_v28, %v9301_v0 }
0x158c   :  { %v4838_v55 = vsub.f32 1.5, %v4837_v54 }
0x158d   :  { %v6157_v59 = vpop.eup %6156  ;;  %v4832_v10 = vadd.f32 1e-05, %v4828_v27 }
0x158e   :  { %v4839_v8 = vmul.f32 %v6155_v23, %v4838_v55  ;;  %v4845_v1 = vmul.f32 %v6157_v59, %v4831_v19  ;;  %vm4851_vm11 = vweird.f32 %v6157_v59  ;;  %v5762_v19 = vld [vmem:[%s9971_s16 + $0x40] sm:$0xff] }
0x158f   :  { %6158 = vrsqrt.f32 %v4832_v10  ;;  %vm4852_vm2 = vmor %vm4850_vm12, %vm4851_vm11  ;;  %vm4860_vm3 = vweird.f32 %v4832_v10 }
0x1590   :  { %v4843_v63 = vsel %vm4842_vm10, %v6155_v23, %v4839_v8  ;;  %v4846_v2 = vmul.f32 %v6157_v59, %v4845_v1  ;;  %v5763_v23 = vld [vmem:[%s9971_s16 + $0x48] sm:$0xff] }
0x1591   :  { %v4874_v40 = vmul.f32 %v4843_v63, %v4799_v44 }
0x1592   :  { %v4847_v26 = vmul.f32 0.5, %v4846_v2  ;;  %v4825_v62 = vpop.xlane.xlu2 %4824 }
0x1593   :  { %v4883_v15 = vmul.f32 %v5994_v57, %v4874_v40  ;;  %v4829_v22 = vmul.f32 %v4825_v62, %v9301_v0  ;;  %v5759_v62 = vld [vmem:[%s9970_s15 + $0x48] sm:$0xff] }
0x1594   :  { %v4848_v29 = vsub.f32 1.5, %v4847_v26  ;;  %v5758_v26 = vld [vmem:[%s9970_s15 + $0x40] sm:$0xff] }
0x1595   :  { %v6159_v7 = vpop.eup %6158  ;;  %v4833_v11 = vadd.f32 1e-05, %v4829_v22  ;;  %5754 = vmatmul.msk.f32.vlgmr.msrb.gmra.mxu2 %vm2945_vm15, %v4883_v15  ;;  %v5760_v15 = vld [vmem:[%s9970_s15 + $0x50] sm:$0xff]  ;;  %v5761_v22 = vld [vmem:[%s9970_s15 + $0x58] sm:$0xff] }
0x1596   :  { %v4849_v48 = vmul.f32 %v6157_v59, %v4848_v29  ;;  %v4855_v58 = vmul.f32 %v6159_v7, %v4832_v10  ;;  %vm4861_vm13 = vweird.f32 %v6159_v7 }
0x1597   :  { %6160 = vrsqrt.f32 %v4833_v11  ;;  %vm4862_vm14 = vmor %vm4860_vm3, %vm4861_vm13  ;;  %vm4870_vm8 = vweird.f32 %v4833_v11 }
0x1598   :  { %v4856_v51 = vmul.f32 %v6159_v7, %v4855_v58  ;;  %v4853_v32 = vsel %vm4852_vm2, %v6157_v59, %v4849_v48 }
0x1599   :  { %v4875_v18 = vmul.f32 %v4853_v32, %v4802_v31  ;;  %v5995_v31 = vld [vmem:[#allocation17 + $0x2] ss:$0 sm:$0xff] }
0x159a   :  { %v4857_v50 = vmul.f32 0.5, %v4856_v51 }
0x159b   :  { %v4884_v33 = vmul.f32 %v5994_v57, %v4875_v18 }
0x159c   :  { %v4858_v45 = vsub.f32 1.5, %v4857_v50  ;;  %v5773_v50 = vld [vmem:[%s9972_s17 + $0x58] sm:$0xff] }
0x159d   :  { %v6161_v12 = vpop.eup %6160  ;;  %5755 = vmatmul.msk.f32.gmra.mxu2 %vm2945_vm15, %v4884_v33  ;;  %5173 = vmatpush.msra.mxu3 %v5773_v50 }
0x159e   :  { %v4859_v42 = vmul.f32 %v6159_v7, %v4858_v45  ;;  %v4865_v46 = vmul.f32 %v6161_v12, %v4833_v11  ;;  %vm4871_vm6 = vweird.f32 %v6161_v12 }
0x159f   :  { %vm4872_vm9 = vmor %vm4870_vm8, %vm4871_vm6 }
0x15a0   :  { %v4866_v34 = vmul.f32 %v6161_v12, %v4865_v46  ;;  %v4863_v17 = vsel %vm4862_vm14, %v6159_v7, %v4859_v42 }
0x15a1   :  { %v4876_v3 = vmul.f32 %v4863_v17, %v9721_v4 }
0x15a2   :  { %v4867_v35 = vmul.f32 0.5, %v4866_v34 }
0x15a3   :  { %v4885_v9 = vmul.f32 %v5994_v57, %v4876_v3  ;;  %v5772_v3 = vld [vmem:[%s9972_s17 + $0x50] sm:$0xff] }
0x15a4   :  { %v4868_v41 = vsub.f32 1.5, %v4867_v35  ;;  %5174 = vmatpush.msra.mxu3 %v5772_v3 }
0x15a5   :  { %5756 = vmatmul.msk.f32.gmra.mxu2 %vm2945_vm15, %v4885_v9 }
0x15a6   :  { %v4869_v49 = vmul.f32 %v6161_v12, %v4868_v41 }
0x15a8   :  { %v4873_v44 = vsel %vm4872_vm9, %v6161_v12, %v4869_v49 }
0x15a9   :  { %v4877_v5 = vmul.f32 %v4873_v44, %v9726_v36 }
0x15ab   :  { %v4886_v61 = vmul.f32 %v5994_v57, %v4877_v5 }
0x15ad   :  { %5757 = vmatmul.msk.f32.gmra.mxu2 %vm2945_vm15, %v4886_v61 }
0x1618   :  { %v4924_v39 = vpop.f32.mrf.mxu2 }
0x1619   :  { %v9755_v56 = vadd.f32 %v5995_v31, %v4924_v39 }
0x1620   :  { %v4927_v14 = vpop.f32.mrf.mxu2 }
0x1621   :  { %v9747_v60 = vadd.f32 %v5995_v31, %v4927_v14 }
0x1623   :  { %4942 = vrot.lane.b32.xlu2 %v9747_v60, %s10179_s27 }
0x1628   :  { %v4930_v43 = vpop.f32.mrf.mxu2 }
0x1629   :  { %v9751_v4 = vadd.f32 %v5995_v31, %v4930_v43  ;;  %v5771_v43 = vld [vmem:[%s9972_s17 + $0x48] sm:$0xff] }
0x162a   :  { %5175 = vmatpush.msra.mxu3 %v5771_v43 }
0x162b   :  { %4944 = vrot.lane.b32.xlu0 %v9751_v4, %s10179_s27 }
0x1630   :  { %v4933_v16 = vpop.f32.mrf.mxu2 }
0x1631   :  { %v9757_v37 = vadd.f32 %v5995_v31, %v4933_v16  ;;  %v5770_v16 = vld [vmem:[%s9972_s17 + $0x40] sm:$0xff] }
0x1632   :  { %5176 = vmatpush.msra.mxu3 %v5770_v16 }
0x1633   :  { %4946 = vrot.lane.b32.xlu1 %v9757_v37, %s10179_s27  ;;  %4940 = vrot.lane.b32.xlu0 %v9755_v56, %s10179_s27 }
0x167d   :  { %v4943_v36 = vpop.permute.xlu2 %4942 }
0x167e   :  { %4953 = vst.msk [vmem:[#allocation4 + $0x8] sm:$0xff] %vm3464_vm0, %v4943_v36 }
0x1685   :  { %v4957_v30 = vld [vmem:[#allocation4 + $0x8] sm:$0xff] }
0x169d   :  { %v4945_v13 = vpop.permute.xlu0 %4944 }
0x169e   :  { %4954 = vst.msk [vmem:[#allocation4 + $0x10] sm:$0xff] %vm3464_vm0, %v4945_v13 }
0x16a5   :  { %v4947_v25 = vpop.permute.xlu1 %4946  ;;  %v4941_v20 = vpop.permute.xlu0 %4940  ;;  %v4958_v53 = vld [vmem:[#allocation4 + $0x10] sm:$0xff] }
0x16a6   :  { %4955 = vst.msk [vmem:[#allocation4 + $0x18] sm:$0xff] %vm3464_vm0, %v4947_v25 }
0x16a7   :  { %4952 = vst.msk [vmem:[#allocation4] sm:$0xff] %vm3464_vm0, %v4941_v20 }
0x16ad   :  { %v4959_v47 = vld [vmem:[#allocation4 + $0x18] sm:$0xff] }
0x16ae   :  { %v5972_v52 = vpack.i.bf16 %v4958_v53, %v4959_v47  ;;  %v4956_v6 = vld [vmem:[#allocation4] sm:$0xff] }
0x16af   :  { %v5967_v21 = vpack.i.bf16 %v4956_v6, %v4957_v30 }
0x16b0   :  { %5973 = vrot.lane.b32.xlu0 %v5972_v52, %s6578_s4  ;;  %5963 = vrot.lane.b32.xlu1 %v5972_v52, %s6577_s28 }
0x16b1   :  { %5968 = vrot.lane.b32.xlu2 %v5967_v21, %s6577_s28 }
0x16b8   :  { %5005 = vperm.xlu0 %5921, %v5763_v23   ;;  %5978 = vrot.lane.b32.xlu1 %v5967_v21, %s6578_s4  ;;  %v5192_v21 = vld [vmem:[#allocation20 + $0x48] sm:$0xff]  ;;  %s5617_s4 = sshll.u32 %s9980_s25, 4  ;;  %s5618_s4 = int_to_ptr.hbm [resolvable:$true] %s5617_s4 }
0x16b9   :  { %5000 = vperm.xlu2 %5919, %v5762_v19  }
0x16c0   :  { %5010 = vperm.xlu1 %5920, %v5764_v38  }
0x16c1   :  { %5015 = vperm.xlu2 %5919, %v5765_v24  }
0x170b   :  { %v5969_v27 = vpop.permute.xlu2 %5968 }
0x170c   :  { %v5970_v59 = vunpack.i.l.bf16 %v5969_v27  ;;  %v5971_v8 = vunpack.i.h.bf16 %v5969_v27 }
0x1713   :  { %v5001_v29 = vpop.permute.xlu2 %5000 }
0x171b   :  { %v5016_v61 = vpop.permute.xlu2 %5015 }
0x1722   :  { %v5964_v54 = vpop.permute.xlu1 %5963  ;;  %v5974_v10 = vpop.permute.xlu0 %5973 }
0x1723   :  { %v5965_v28 = vunpack.i.l.bf16 %v5964_v54  ;;  %v5966_v55 = vunpack.i.h.bf16 %v5964_v54  ;;  %v5975_v1 = vunpack.i.l.bf16 %v5974_v10  ;;  %v5976_v63 = vunpack.i.h.bf16 %v5974_v10 }
0x1725   :  { %5034 = vmatpush.msra.mxu0 %v5965_v28 }
0x1727   :  { %5035 = vmatpush.msra.mxu0 %v5966_v55 }
0x1729   :  { %5036 = vmatpush.msra.mxu0 %v5970_v59 }
0x172a   :  { %v5979_v57 = vpop.permute.xlu1 %5978  ;;  %v5006_v51 = vpop.permute.xlu0 %5005 }
0x172b   :  { %5037 = vmatpush.msra.mxu0 %v5971_v8  ;;  %v5980_v2 = vunpack.i.l.bf16 %v5979_v57  ;;  %v5981_v40 = vunpack.i.h.bf16 %v5979_v57 }
0x172d   :  { %5038 = vmatpush.msra.mxu0 %v5975_v1 }
0x172f   :  { %5039 = vmatpush.msra.mxu0 %v5976_v63 }
0x1731   :  { %5040 = vmatpush.msra.mxu0 %v5980_v2 }
0x1732   :  { %v5011_v46 = vpop.permute.xlu1 %5010 }
0x1733   :  { %5041 = vmatpush.msra.mxu0 %v5981_v40 }
0x1735   :  { %5042 = vmatpush.msra.mxu0 %v4959_v47  ;;  %v5193_v47 = vld [vmem:[#allocation20 + $0x50] sm:$0xff] }
0x1737   :  { %5043 = vmatpush.msra.mxu0 %v4958_v53  ;;  %v5194_v53 = vld [vmem:[#allocation20 + $0x58] sm:$0xff] }
0x1738   :  { %5224 = vmatpush.msra.mxu1 %v5194_v53 }
0x1739   :  { %5044 = vmatpush.msra.mxu0 %v4957_v30 }
0x173a   :  { %5225 = vmatpush.msra.mxu1 %v5193_v47 }
0x173b   :  { %5045 = vmatpush.msra.mxu0 %v4956_v6 }
0x173c   :  { %5766 = vmatmul.msk.f32.vlgmr.msra.gmra.mxu0 %vm3529_vm1, %v5758_v26  ;;  %5226 = vmatpush.msra.mxu1 %v5192_v21 }
0x1744   :  { %5767 = vmatmul.msk.f32.gmra.mxu0 %vm3529_vm1, %v5759_v62 }
0x174c   :  { %5768 = vmatmul.msk.f32.gmra.mxu0 %vm3529_vm1, %v5760_v15 }
0x1754   :  { %5769 = vmatmul.msk.f32.gmra.mxu0 %vm3529_vm1, %v5761_v22 }
0x17b9   :  { %v5047_v7 = vpop.f32.mrf.mxu0 }
0x17ba   :  { %v5048_v11 = vadd.f32 %v5047_v7, %v5001_v29 }
0x17bc   :  { %v5059_v48 = vsub.f32 0.0, %v5048_v11 }
0x17be   :  { %v5063_v58 = vmul.f32 1.442695, %v5059_v48 }
0x17c0   :  { %6162 = vpow2.f32 %v5063_v58 }
0x17c1   :  { %v5050_v32 = vpop.f32.mrf.mxu0 }
0x17c2   :  { %v9799_v18 = vadd.f32 %v5050_v32, %v5006_v51 }
0x17c4   :  { %v5060_v33 = vsub.f32 0.0, %v9799_v18 }
0x17c6   :  { %v6163_v45 = vpop.eup %6162  ;;  %v5065_v12 = vmul.f32 1.442695, %v5060_v33 }
0x17c7   :  { %v5071_v42 = vadd.f32 1.0, %v6163_v45 }
0x17c8   :  { %6164 = vpow2.f32 %v5065_v12 }
0x17c9   :  { %6166 = vrcp.f32 %v5071_v42  ;;  %v5053_v34 = vpop.f32.mrf.mxu0  ;;  %v5086_v36 = vand.u32 2147483648, %v5071_v42  ;;  %v5084_v25 = vand.u32 2147483647, %v5071_v42  ;;  %vm5080_vm1 = vweird.f32 %v5071_v42 }
0x17ca   :  { %v9805_v17 = vadd.f32 %v5053_v34, %v5011_v46 }
0x17cb   :  { %v5087_v19 = vor.u32 1.1754944e-38, %v5086_v36  ;;  %vm5085_vm11 = vcmp.eq.f32.partialorder %v5084_v25, 8.507059e+37 }
0x17cc   :  { %v5061_v35 = vsub.f32 0.0, %v9805_v17 }
0x17ce   :  { %v6165_v9 = vpop.eup %6164  ;;  %v5067_v41 = vmul.f32 1.442695, %v5061_v35 }
0x17cf   :  { %v6167_v49 = vpop.eup %6166  ;;  %v5072_v44 = vadd.f32 1.0, %v6165_v9 }
0x17d0   :  { %v5076_v5 = vmul.f32 %v6167_v49, %v5071_v42  ;;  %6168 = vpow2.f32 %v5067_v41  ;;  %vm5081_vm0 = vweird.f32 %v6167_v49 }
0x17d1   :  { %6170 = vrcp.f32 %v5072_v44  ;;  %v5056_v39 = vpop.f32.mrf.mxu0  ;;  %vm5082_vm10 = vmor %vm5080_vm1, %vm5081_vm0  ;;  %v5101_v59 = vand.u32 2147483648, %v5072_v44  ;;  %v5099_v8 = vand.u32 2147483647, %v5072_v44  ;;  %vm5095_vm2 = vweird.f32 %v5072_v44 }
0x17d2   :  { %v5077_v31 = vsub.f32 1.0, %v5076_v5  ;;  %v9811_v14 = vadd.f32 %v5056_v39, %v5016_v61 }
0x17d3   :  { %v5102_v2 = vor.u32 1.1754944e-38, %v5101_v59  ;;  %vm5100_vm3 = vcmp.eq.f32.partialorder %v5099_v8, 8.507059e+37  ;;  %v5405_v59 = vsub.f32 0.0, %v9755_v56  ;;  %v5408_v8 = vsub.f32 0.0, %v9757_v37 }
0x17d4   :  { %v5078_v13 = vmul.f32 %v6167_v49, %v5077_v31  ;;  %v5062_v20 = vsub.f32 0.0, %v9811_v14 }
0x17d6   :  { %v6169_v52 = vpop.eup %6168  ;;  %v5079_v6 = vadd.f32 %v6167_v49, %v5078_v13  ;;  %v5069_v30 = vmul.f32 1.442695, %v5062_v20  ;;  %v5997_v13 = vld [vmem:[#allocation21 + $0x2] ss:$0 sm:$0xff] }
0x17d7   :  { %v6171_v23 = vpop.eup %6170  ;;  %v5073_v38 = vadd.f32 1.0, %v6169_v52 }
0x17d8   :  { %v5083_v24 = vsel %vm5082_vm10, %v6167_v49, %v5079_v6  ;;  %v5091_v54 = vmul.f32 %v6171_v23, %v5072_v44  ;;  %6172 = vpow2.f32 %v5069_v30  ;;  %vm5096_vm12 = vweird.f32 %v6171_v23  ;;  %v5191_v44 = vld [vmem:[#allocation20 + $0x40] sm:$0xff] }
0x17d9   :  { %v5088_v28 = vsel %vm5085_vm11, %v5087_v19, %v5083_v24  ;;  %6174 = vrcp.f32 %v5073_v38  ;;  %vm5097_vm13 = vmor %vm5095_vm2, %vm5096_vm12  ;;  %v5116_v7 = vand.u32 2147483648, %v5073_v38  ;;  %v5114_v48 = vand.u32 2147483647, %v5073_v38  ;;  %5227 = vmatpush.msra.mxu1 %v5191_v44 }
0x17da   :  { %v5135_v27 = vmul.f32 %v5088_v28, %v5048_v11  ;;  %v5092_v55 = vsub.f32 1.0, %v5091_v54  ;;  %vm5110_vm6 = vweird.f32 %v5073_v38 }
0x17db   :  { %v5117_v32 = vor.u32 1.1754944e-38, %v5116_v7  ;;  %vm5115_vm9 = vcmp.eq.f32.partialorder %v5114_v48, 8.507059e+37 }
0x17dc   :  { %v5093_v10 = vmul.f32 %v6171_v23, %v5092_v55  ;;  %5774 = vmatmul.msk.f32.vlgmr.msra.gmra.mxu3 %vm3659_vm5, %v5135_v27 }
0x17de   :  { %v6173_v1 = vpop.eup %6172  ;;  %v5094_v57 = vadd.f32 %v6171_v23, %v5093_v10  ;;  %v5409_v10 = vmul.f32 1.442695, %v5405_v59 }
0x17df   :  { %v6175_v63 = vpop.eup %6174  ;;  %v5074_v40 = vadd.f32 1.0, %v6173_v1  ;;  %v5406_v1 = vsub.f32 0.0, %v9747_v60 }
0x17e0   :  { %v5098_v26 = vsel %vm5097_vm13, %v6171_v23, %v5094_v57  ;;  %v5106_v62 = vmul.f32 %v6175_v63, %v5073_v38  ;;  %vm5111_vm14 = vweird.f32 %v6175_v63  ;;  %v5415_v57 = vmul.f32 1.442695, %v5408_v8 }
0x17e1   :  { %v5103_v15 = vsel %vm5100_vm3, %v5102_v2, %v5098_v26  ;;  %6176 = vrcp.f32 %v5074_v40  ;;  %vm5112_vm8 = vmor %vm5110_vm6, %vm5111_vm14  ;;  %v5129_v34 = vand.u32 2147483647, %v5074_v40  ;;  %vm5125_vm1 = vweird.f32 %v5074_v40 }
0x17e2   :  { %v5136_v22 = vmul.f32 %v5103_v15, %v9799_v18  ;;  %v5107_v29 = vsub.f32 1.0, %v5106_v62  ;;  %v5131_v18 = vand.u32 2147483648, %v5074_v40  ;;  %6178 = vpow2.f32 %v5409_v10 }
0x17e3   :  { %vm5130_vm11 = vcmp.eq.f32.partialorder %v5129_v34, 8.507059e+37  ;;  %v5411_v2 = vmul.f32 1.442695, %v5406_v1  ;;  %6180 = vpow2.f32 %v5415_v57 }
0x17e4   :  { %v5108_v11 = vmul.f32 %v6175_v63, %v5107_v29  ;;  %5775 = vmatmul.msk.f32.gmra.mxu3 %vm3659_vm5, %v5136_v22  ;;  %v5132_v35 = vor.u32 1.1754944e-38, %v5131_v18 }
0x17e5   :  { %6182 = vpow2.f32 %v5411_v2 }
0x17e6   :  { %v5109_v58 = vadd.f32 %v6175_v63, %v5108_v11 }
0x17e7   :  { %v6177_v51 = vpop.eup %6176 }
0x17e8   :  { %v5113_v50 = vsel %vm5112_vm8, %v6175_v63, %v5109_v58  ;;  %v5121_v33 = vmul.f32 %v6177_v51, %v5074_v40  ;;  %vm5126_vm0 = vweird.f32 %v6177_v51  ;;  %v6179_v63 = vpop.eup %6178 }
0x17e9   :  { %v5118_v45 = vsel %vm5115_vm9, %v5117_v32, %v5113_v50  ;;  %vm5127_vm10 = vmor %vm5125_vm1, %vm5126_vm0  ;;  %v5417_v40 = vadd.f32 1.0, %v6179_v63  ;;  %v6181_v26 = vpop.eup %6180 }
0x17ea   :  { %v5137_v12 = vmul.f32 %v5118_v45, %v9805_v17  ;;  %v5122_v42 = vsub.f32 1.0, %v5121_v33  ;;  %v5996_v17 = vld [vmem:[#allocation18 + $0x2] ss:$0 sm:$0xff]  ;;  %v5420_v62 = vadd.f32 1.0, %v6181_v26 }
0x17eb   :  { %6184 = vrcp.f32 %v5417_v40  ;;  %v6183_v15 = vpop.eup %6182  ;;  %vm5426_vm2 = vweird.f32 %v5417_v40 }
0x17ec   :  { %v5123_v46 = vmul.f32 %v6177_v51, %v5122_v42  ;;  %5776 = vmatmul.msk.f32.gmra.mxu3 %vm3659_vm5, %v5137_v12  ;;  %6186 = vrcp.f32 %v5420_v62  ;;  %v5418_v7 = vadd.f32 1.0, %v6183_v15  ;;  %vm5471_vm6 = vweird.f32 %v5420_v62 }
0x17ee   :  { %v5124_v3 = vadd.f32 %v6177_v51, %v5123_v46  ;;  %6188 = vrcp.f32 %v5418_v7  ;;  %v5432_v46 = vand.u32 2147483648, %v5417_v40  ;;  %vm5441_vm1 = vweird.f32 %v5418_v7 }
0x17f0   :  { %v5128_v9 = vsel %vm5127_vm10, %v6177_v51, %v5124_v3  ;;  %v5430_v3 = vand.u32 2147483647, %v5417_v40 }
0x17f1   :  { %v5133_v41 = vsel %vm5130_vm11, %v5132_v35, %v5128_v9  ;;  %v6185_v22 = vpop.eup %6184  ;;  %v5407_v35 = vsub.f32 0.0, %v9751_v4 }
0x17f2   :  { %v5138_v49 = vmul.f32 %v5133_v41, %v9811_v14  ;;  %v5422_v29 = vmul.f32 %v6185_v22, %v5417_v40  ;;  %v6187_v51 = vpop.eup %6186  ;;  %vm5427_vm12 = vweird.f32 %v6185_v22  ;;  %vm5431_vm3 = vcmp.eq.f32.partialorder %v5430_v3, 8.507059e+37 }
0x17f3   :  { %v5467_v50 = vmul.f32 %v6187_v51, %v5420_v62  ;;  %vm5428_vm13 = vmor %vm5426_vm2, %vm5427_vm12  ;;  %vm5472_vm14 = vweird.f32 %v6187_v51 }
0x17f4   :  { %5777 = vmatmul.msk.f32.gmra.mxu3 %vm3659_vm5, %v5138_v49  ;;  %v5423_v58 = vsub.f32 1.0, %v5422_v29  ;;  %v6189_v33 = vpop.eup %6188  ;;  %v5433_v49 = vor.u32 1.1754944e-38, %v5432_v46  ;;  %vm5473_vm8 = vmor %vm5471_vm6, %vm5472_vm14 }
0x17f5   :  { %v5468_v18 = vsub.f32 1.0, %v5467_v50  ;;  %v5437_v34 = vmul.f32 %v6189_v33, %v5418_v7  ;;  %vm5442_vm9 = vweird.f32 %v6189_v33 }
0x17f6   :  { %v5424_v32 = vmul.f32 %v6185_v22, %v5423_v58  ;;  %vm5443_vm10 = vmor %vm5441_vm1, %vm5442_vm9 }
0x17f7   :  { %v5469_v41 = vmul.f32 %v6187_v51, %v5468_v18  ;;  %v5438_v44 = vsub.f32 1.0, %v5437_v34 }
0x17f8   :  { %v5425_v42 = vadd.f32 %v6185_v22, %v5424_v32 }
0x17fa   :  { %v5429_v9 = vsel %vm5428_vm13, %v6185_v22, %v5425_v42 }
0x185f   :  { %v5178_v5 = vpop.f32.mrf.mxu3 }
0x1860   :  { %v9827_v61 = vadd.f32 %v5996_v17, %v5178_v5 }
0x1862   :  { %5778 = vmatmul.msk.f32.vlgmr.msra.gmra.mxu1 %vm3659_vm5, %v9827_v61 }
0x1867   :  { %v5181_v39 = vpop.f32.mrf.mxu3 }
0x1868   :  { %v9831_v31 = vadd.f32 %v5996_v17, %v5181_v39  ;;  %v5434_v39 = vsel %vm5431_vm3, %v5433_v49, %v5429_v9 }
0x186a   :  { %5779 = vmatmul.msk.f32.gmra.mxu1 %vm3659_vm5, %v9831_v31 }
0x186f   :  { %v5184_v43 = vpop.f32.mrf.mxu3 }
0x1870   :  { %v9835_v16 = vadd.f32 %v5996_v17, %v5184_v43 }
0x1872   :  { %5780 = vmatmul.msk.f32.gmra.mxu1 %vm3659_vm5, %v9835_v16 }
0x1877   :  { %v5187_v14 = vpop.f32.mrf.mxu3 }
0x1878   :  { %v9839_v36 = vadd.f32 %v5996_v17, %v5187_v14  ;;  %v5413_v17 = vmul.f32 1.442695, %v5407_v35  ;;  %v5470_v14 = vadd.f32 %v6187_v51, %v5469_v41 }
0x187a   :  { %5781 = vmatmul.msk.f32.gmra.mxu1 %vm3659_vm5, %v9839_v36  ;;  %6190 = vpow2.f32 %v5413_v17 }
0x18df   :  { %v5229_v25 = vpop.f32.mrf.mxu1 }
0x18e0   :  { %v9843_v20 = vadd.f32 %v5997_v13, %v5229_v25  ;;  %v5477_v25 = vand.u32 2147483648, %v5420_v62 }
0x18e2   :  { %5277 = vrot.lane.b32.xlu0 %v9843_v20, %s6569_s18  ;;  %v5245_v32 = vmul.f32 1.442695, %v9843_v20  ;;  %vm5241_vm6 = vcmp.gt.f32.partialorder %v9843_v20, 20.0 }
0x18e7   :  { %v5232_v53 = vpop.f32.mrf.mxu1 }
0x18e8   :  { %v9847_v47 = vadd.f32 %v5997_v13, %v5232_v53  ;;  %v5481_v53 = vmul.f32 %v5434_v39, %v9755_v56 }
0x18ea   :  { %5279 = vrot.lane.b32.xlu1 %v9847_v47, %s6569_s18 }
0x18ef   :  { %v5235_v52 = vpop.f32.mrf.mxu1 }
0x18f0   :  { %v9851_v6 = vadd.f32 %v5997_v13, %v5235_v52  ;;  %v5475_v52 = vand.u32 2147483647, %v5420_v62 }
0x18f2   :  { %5281 = vrot.lane.b32.xlu2 %v9851_v6, %s6569_s18  ;;  %vm5476_vm0 = vcmp.eq.f32.partialorder %v5475_v52, 8.507059e+37  ;;  %vm5243_vm14 = vcmp.gt.f32.partialorder %v9851_v6, 20.0 }
0x18f7   :  { %v5238_v30 = vpop.f32.mrf.mxu1 }
0x18f8   :  { %v9855_v21 = vadd.f32 %v5997_v13, %v5238_v30  ;;  %v5439_v13 = vmul.f32 %v6189_v33, %v5438_v44  ;;  %v5474_v30 = vsel %vm5473_vm8, %v6187_v51, %v5470_v14 }
0x18fa   :  { %5283 = vrot.lane.b32.xlu0 %v9855_v21, %s6569_s18  ;;  %v5251_v17 = vmul.f32 1.442695, %v9855_v21  ;;  %vm5244_vm8 = vcmp.gt.f32.partialorder %v9855_v21, 20.0 }
0x194c   :  { %v5282_v23 = vpop.permute.xlu2 %5281 }
0x194d   :  { %v5291_v19 = vmul.f32 %v5282_v23, %v9851_v6  ;;  %v5440_v23 = vadd.f32 %v6189_v33, %v5439_v13 }
0x194f   :  { %5301 = vrot.lane.b32.xlu0 %v5291_v19, %s10180_s24  ;;  %v5478_v19 = vor.u32 1.1754944e-38, %v5477_v25 }
0x1954   :  { %v5278_v38 = vpop.permute.xlu0 %5277 }
0x1955   :  { %v5289_v24 = vmul.f32 %v5278_v38, %v9843_v20  ;;  %v5447_v38 = vand.u32 2147483648, %v5418_v7 }
0x1957   :  { %5297 = vrot.lane.b32.xlu1 %v5289_v24, %s10180_s24  ;;  %v5445_v24 = vand.u32 2147483647, %v5418_v7 }
0x1959   :  { %vm5446_vm11 = vcmp.eq.f32.partialorder %v5445_v24, 8.507059e+37  ;;  %v5784_v24 = vld [vmem:[%s9976_s21 + $0x50] sm:$0xff] }
0x195c   :  { %v5280_v54 = vpop.permute.xlu1 %5279 }
0x195d   :  { %v5290_v28 = vmul.f32 %v5280_v54, %v9847_v47  ;;  %v5479_v54 = vsel %vm5476_vm0, %v5478_v19, %v5474_v30 }
0x195e   :  { %v5484_v56 = vmul.f32 %v5479_v54, %v9757_v37 }
0x195f   :  { %5299 = vrot.lane.b32.xlu2 %v5290_v28, %s10180_s24  ;;  %v6191_v28 = vpop.eup %6190 }
0x1960   :  { %v5419_v59 = vadd.f32 1.0, %v6191_v28 }
0x1962   :  { %6192 = vrcp.f32 %v5419_v59  ;;  %v5462_v37 = vand.u32 2147483648, %v5419_v59  ;;  %vm5456_vm2 = vweird.f32 %v5419_v59  ;;  %v5460_v15 = vand.u32 2147483647, %v5419_v59 }
0x1964   :  { %v5463_v29 = vor.u32 1.1754944e-38, %v5462_v37  ;;  %vm5461_vm3 = vcmp.eq.f32.partialorder %v5460_v15, 8.507059e+37 }
0x1968   :  { %v6193_v1 = vpop.eup %6192 }
0x1969   :  { %v5452_v2 = vmul.f32 %v6193_v1, %v5419_v59  ;;  %vm5457_vm12 = vweird.f32 %v6193_v1 }
0x196a   :  { %vm5458_vm13 = vmor %vm5456_vm2, %vm5457_vm12 }
0x196b   :  { %v5453_v40 = vsub.f32 1.0, %v5452_v2 }
0x196c   :  { %v5284_v27 = vpop.permute.xlu0 %5283 }
0x196d   :  { %v5292_v55 = vmul.f32 %v5284_v27, %v9855_v21  ;;  %v5444_v27 = vsel %vm5443_vm10, %v6189_v33, %v5440_v23  ;;  %v5454_v26 = vmul.f32 %v6193_v1, %v5453_v40 }
0x196f   :  { %5303 = vrot.lane.b32.xlu1 %v5292_v55, %s10180_s24  ;;  %v5448_v55 = vor.u32 1.1754944e-38, %v5447_v38  ;;  %v5455_v62 = vadd.f32 %v6193_v1, %v5454_v26  ;;  %v5785_v38 = vld [vmem:[%s9976_s21 + $0x58] sm:$0xff] }
0x1970   :  { %5539 = vmatpush.msra.mxu2 %v5785_v38 }
0x1971   :  { %v5449_v10 = vsel %vm5446_vm11, %v5448_v55, %v5444_v27  ;;  %v5459_v22 = vsel %vm5458_vm13, %v6193_v1, %v5455_v62 }
0x1972   :  { %v5482_v8 = vmul.f32 %v5449_v10, %v9747_v60  ;;  %v5464_v60 = vsel %vm5461_vm3, %v5463_v29, %v5459_v22  ;;  %5540 = vmatpush.msra.mxu2 %v5784_v24  ;;  %v5783_v29 = vld [vmem:[%s9976_s21 + $0x48] sm:$0xff] }
0x1973   :  { %v5483_v7 = vmul.f32 %v5464_v60, %v9751_v4  ;;  %v5782_v60 = vld [vmem:[%s9976_s21 + $0x40] sm:$0xff] }
0x1974   :  { %5541 = vmatpush.msra.mxu2 %v5783_v29 }
0x1976   :  { %5542 = vmatpush.msra.mxu2 %v5782_v60 }
0x19b9   :  { %v5300_v11 = vpop.permute.xlu2 %5299 }
0x19ba   :  { %v5312_v48 = vsel %vm3818_vm7, %v5300_v11, 0.0  ;;  %v5247_v11 = vmul.f32 1.442695, %v9847_v47 }
0x19bb   :  { %5313 = vadd.xlane.f32.xlu0 %v5312_v48  ;;  %v5249_v48 = vmul.f32 1.442695, %v9851_v6 }
0x19bc   :  { %6194 = vpow2.f32 %v5247_v11 }
0x19bd   :  { %6196 = vpow2.f32 %v5249_v48 }
0x19c1   :  { %v5302_v45 = vpop.permute.xlu0 %5301 }
0x19c2   :  { %v5315_v12 = vsel %vm3818_vm7, %v5302_v45, 0.0  ;;  %v6195_v58 = vpop.eup %6194 }
0x19c3   :  { %5316 = vadd.xlane.f32.xlu1 %v5315_v12  ;;  %v5254_v51 = vadd.f32 1.0, %v6195_v58  ;;  %v6197_v50 = vpop.eup %6196 }
0x19c4   :  { %v5255_v33 = vadd.f32 1.0, %v6197_v50 }
0x19c5   :  { %6198 = vlog2.f32 %v5254_v51 }
0x19c6   :  { %6200 = vpow2.f32 %v5245_v32 }
0x19c7   :  { %6202 = vlog2.f32 %v5255_v33 }
0x19c9   :  { %v5298_v5 = vpop.permute.xlu1 %5297 }
0x19ca   :  { %v5309_v43 = vsel %vm3818_vm7, %v5298_v5, 0.0 }
0x19cb   :  { %5310 = vadd.xlane.f32.xlu2 %v5309_v43  ;;  %v6199_v45 = vpop.eup %6198 }
0x19cc   :  { %v6201_v12 = vpop.eup %6200  ;;  %v5260_v4 = vmul.f32 0.6931472, %v6199_v45 }
0x19cd   :  { %v5253_v42 = vadd.f32 1.0, %v6201_v12  ;;  %v6203_v46 = vpop.eup %6202 }
0x19ce   :  { %v5262_v35 = vmul.f32 0.6931472, %v6203_v46 }
0x19cf   :  { %5489 = vrot.lane.b32.xlu0 %v5481_v53, %s6606_s7  ;;  %6204 = vlog2.f32 %v5253_v42 }
0x19d0   :  { %v5267_v49 = vsel %vm5243_vm14, %v9851_v6, %v5262_v35  ;;  %6206 = vpow2.f32 %v5251_v17 }
0x19d5   :  { %v6205_v44 = vpop.eup %6204 }
0x19d6   :  { %v5258_v43 = vmul.f32 0.6931472, %v6205_v44  ;;  %v6207_v25 = vpop.eup %6206 }
0x19d7   :  { %5495 = vrot.lane.b32.xlu0 %v5484_v56, %s6606_s7 }
0x19d8   :  { %v5265_v14 = vsel %vm5241_vm6, %v9843_v20, %v5258_v43 }
0x19d9   :  { %v5269_v6 = vmul.f32 %v5265_v14, %v9827_v61 }
0x19dc   :  { %5491 = vrot.lane.b32.xlu1 %v5482_v8, %s6606_s7 }
0x19e1   :  { %v5304_v57 = vpop.permute.xlu1 %5303 }
0x19e2   :  { %v5318_v63 = vsel %vm3818_vm7, %v5304_v57, 0.0  ;;  %vm5242_vm7 = vcmp.gt.f32.partialorder %v9847_v47, 20.0 }
0x19e3   :  { %5319 = vadd.xlane.f32.xlu2 %v5318_v63  ;;  %v5266_v18 = vsel %vm5242_vm7, %v9847_v47, %v5260_v4  ;;  %v5271_v47 = vmul.f32 %v5267_v49, %v9835_v16  ;;  %v5256_v16 = vadd.f32 1.0, %v6207_v25 }
0x19e4   :  { %v5270_v34 = vmul.f32 %v5266_v18, %v9831_v31 }
0x19fb   :  { %5493 = vrot.lane.b32.xlu2 %v5483_v7, %s6606_s7 }
0x1a2e   :  { %v5314_v3 = vpop.xlane.xlu0 %5313 }
0x1a2f   :  { %v9889_v9 = vmul.f32 %v5314_v3, %v5270_v34 }
0x1a31   :  { %v5326_v41 = vsub.f32 0.0, %v9889_v9 }
0x1a33   :  { %v5331_v5 = vmul.f32 1.442695, %v5326_v41 }
0x1a35   :  { %6208 = vpow2.f32 %v5331_v5 }
0x1a36   :  { %v5317_v39 = vpop.xlane.xlu1 %5316 }
0x1a37   :  { %v9896_v31 = vmul.f32 %v5317_v39, %v5271_v47 }
0x1a39   :  { %v5327_v13 = vsub.f32 0.0, %v9896_v31 }
0x1a3b   :  { %v6209_v52 = vpop.eup %6208  ;;  %v5333_v30 = vmul.f32 1.442695, %v5327_v13 }
0x1a3c   :  { %v5338_v20 = vadd.f32 1.0, %v6209_v52 }
0x1a3d   :  { %6210 = vpow2.f32 %v5333_v30 }
0x1a3e   :  { %v5311_v53 = vpop.xlane.xlu2 %5310  ;;  %6212 = vlog2.f32 %v5256_v16  ;;  %vm5361_vm11 = vweird.f32 %v5338_v20  ;;  %v5365_v33 = vand.u32 2147483647, %v5338_v20  ;;  %v5367_v45 = vand.u32 2147483648, %v5338_v20 }
0x1a3f   :  { %v5321_v23 = vmul.f32 %v5311_v53, %v5269_v6 }
0x1a40   :  { %v5368_v3 = vor.u32 1.1754944e-38, %v5367_v45  ;;  %vm5366_vm13 = vcmp.eq.f32.partialorder %v5365_v33, 8.507059e+37 }
0x1a41   :  { %v5325_v19 = vsub.f32 0.0, %v5321_v23  ;;  %v5490_v34 = vpop.permute.xlu0 %5489 }
0x1a43   :  { %v5329_v54 = vmul.f32 1.442695, %v5325_v19  ;;  %v6211_v61 = vpop.eup %6210 }
0x1a44   :  { %v6213_v28 = vpop.eup %6212  ;;  %v9908_v56 = vadd.f32 1.0, %v6211_v61 }
0x1a45   :  { %6214 = vpow2.f32 %v5329_v54  ;;  %v5264_v10 = vmul.f32 0.6931472, %v6213_v28 }
0x1a46   :  { %6216 = vrcp.f32 %v5338_v20  ;;  %v5382_v39 = vand.u32 2147483648, %v9908_v56  ;;  %vm5376_vm7 = vweird.f32 %v9908_v56  ;;  %v5380_v43 = vand.u32 2147483647, %v9908_v56 }
0x1a47   :  { %v5268_v1 = vsel %vm5244_vm8, %v9855_v21, %v5264_v10 }
0x1a48   :  { %v5272_v40 = vmul.f32 %v5268_v1, %v9839_v36  ;;  %v5383_v6 = vor.u32 1.1754944e-38, %v5382_v39  ;;  %vm5381_vm6 = vcmp.eq.f32.partialorder %v5380_v43, 8.507059e+37 }
0x1a4b   :  { %v6215_v27 = vpop.eup %6214 }
0x1a4c   :  { %v6217_v55 = vpop.eup %6216  ;;  %v5337_v59 = vadd.f32 1.0, %v6215_v27 }
0x1a4d   :  { %v5357_v8 = vmul.f32 %v6217_v55, %v5338_v20  ;;  %vm5362_vm0 = vweird.f32 %v6217_v55 }
0x1a4e   :  { %6218 = vrcp.f32 %v5337_v59  ;;  %v5350_v21 = vand.u32 2147483647, %v5337_v59  ;;  %v5352_v7 = vand.u32 2147483648, %v5337_v59  ;;  %vm5346_vm1 = vweird.f32 %v5337_v59  ;;  %vm5363_vm2 = vmor %vm5361_vm11, %vm5362_vm0  ;;  %v5492_v14 = vpop.permute.xlu1 %5491 }
0x1a4f   :  { %6220 = vrcp.f32 %v9908_v56  ;;  %v5358_v57 = vsub.f32 1.0, %v5357_v8  ;;  %v5998_v8 = vld [vmem:[#allocation23 + $0x2] ss:$0 sm:$0xff] }
0x1a50   :  { %v5353_v50 = vor.u32 1.1754944e-38, %v5352_v7  ;;  %vm5351_vm12 = vcmp.eq.f32.partialorder %v5350_v21, 8.507059e+37 }
0x1a51   :  { %v5359_v15 = vmul.f32 %v6217_v55, %v5358_v57  ;;  %v5579_v57 = vld [vmem:[%s9978_s23] sm:$0xff] }
0x1a53   :  { %v5360_v51 = vadd.f32 %v6217_v55, %v5359_v15 }
0x1a54   :  { %v6219_v63 = vpop.eup %6218 }
0x1a55   :  { %v5342_v2 = vmul.f32 %v6219_v63, %v5337_v59  ;;  %v6221_v26 = vpop.eup %6220  ;;  %vm5347_vm9 = vweird.f32 %v6219_v63  ;;  %v5364_v46 = vsel %vm5363_vm2, %v6217_v55, %v5360_v51 }
0x1a56   :  { %v5320_v62 = vpop.xlane.xlu2 %5319  ;;  %v5372_v48 = vmul.f32 %v6221_v26, %v9908_v56  ;;  %vm5348_vm10 = vmor %vm5346_vm1, %vm5347_vm9  ;;  %v5369_v49 = vsel %vm5366_vm13, %v5368_v3, %v5364_v46  ;;  %vm5377_vm3 = vweird.f32 %v6221_v26  ;;  %v5496_v56 = vpop.permute.xlu0 %5495  ;;  %v5999_v3 = vld [vmem:[#allocation24] ss:$0 sm:$0xff] }
0x1a57   :  { %v5343_v37 = vsub.f32 1.0, %v5342_v2  ;;  %v9914_v22 = vmul.f32 %v5320_v62, %v5272_v40  ;;  %v5402_v5 = vmul.f32 %v5369_v49, %v9889_v9  ;;  %vm5378_vm14 = vmor %vm5376_vm7, %vm5377_vm3 }
0x1a58   :  { %v5373_v4 = vsub.f32 1.0, %v5372_v48 }
0x1a59   :  { %v5344_v11 = vmul.f32 %v6219_v63, %v5343_v37  ;;  %v5328_v36 = vsub.f32 0.0, %v9914_v22  ;;  %v5502_v13 = vmul.f32 %v5492_v14, %v5402_v5 }
0x1a5a   :  { %v5374_v41 = vmul.f32 %v6221_v26, %v5373_v4 }
0x1a5b   :  { %v5345_v58 = vadd.f32 %v6219_v63, %v5344_v11  ;;  %v5335_v32 = vmul.f32 1.442695, %v5328_v36 }
0x1a5c   :  { %v5375_v47 = vadd.f32 %v6221_v26, %v5374_v41 }
0x1a5d   :  { %v5349_v12 = vsel %vm5348_vm10, %v6219_v63, %v5345_v58  ;;  %6222 = vpow2.f32 %v5335_v32 }
0x1a5e   :  { %v5354_v42 = vsel %vm5351_vm12, %v5353_v50, %v5349_v12  ;;  %v5379_v25 = vsel %vm5378_vm14, %v6221_v26, %v5375_v47  ;;  %v5494_v30 = vpop.permute.xlu2 %5493 }
0x1a5f   :  { %v5401_v18 = vmul.f32 %v5354_v42, %v5321_v23  ;;  %v5384_v52 = vsel %vm5381_vm6, %v5383_v6, %v5379_v25 }
0x1a60   :  { %v5403_v16 = vmul.f32 %v5384_v52, %v9896_v31  ;;  %v5580_v31 = vld [vmem:[%s9978_s23 + $0x8] sm:$0xff]  ;;  %s6639_s23 = smov [#allocation26]  }
0x1a61   :  { %v5501_v35 = vmul.f32 %v5490_v34, %v5401_v18  ;;  %5602 = vmatpush.msrb.mxu0 %v5580_v31  ;;  %s5615_s22 = sshll.u32 %s6639_s23, 4  ;;  %s5616_s22 = int_to_ptr.vmem [resolvable:$true] %s5615_s22 }
0x1a62   :  { %v5503_v20 = vmul.f32 %v5494_v30, %v5403_v16 }
0x1a63   :  { %v6223_v44 = vpop.eup %6222  ;;  %5786 = vmatmul.msk.f32.vlgmr.msra.gmra.mxu2 %vm3659_vm5, %v5501_v35  ;;  %5603 = vmatpush.msrb.mxu0 %v5579_v57 }
0x1a64   :  { %v5340_v17 = vadd.f32 1.0, %v6223_v44 }
0x1a66   :  { %6224 = vrcp.f32 %v5340_v17  ;;  %v5397_v19 = vand.u32 2147483648, %v5340_v17  ;;  %v5395_v24 = vand.u32 2147483647, %v5340_v17  ;;  %vm5391_vm9 = vweird.f32 %v5340_v17 }
0x1a68   :  { %v5398_v61 = vor.u32 1.1754944e-38, %v5397_v19  ;;  %vm5396_vm1 = vcmp.eq.f32.partialorder %v5395_v24, 8.507059e+37 }
0x1a6b   :  { %5787 = vmatmul.msk.f32.gmra.mxu2 %vm3659_vm5, %v5502_v13 }
0x1a6c   :  { %v6225_v53 = vpop.eup %6224 }
0x1a6d   :  { %v5387_v9 = vmul.f32 %v6225_v53, %v5340_v17  ;;  %vm5392_vm8 = vweird.f32 %v6225_v53 }
0x1a6e   :  { %vm5393_vm0 = vmor %vm5391_vm9, %vm5392_vm8 }
0x1a6f   :  { %v5388_v23 = vsub.f32 1.0, %v5387_v9 }
0x1a71   :  { %v5389_v38 = vmul.f32 %v6225_v53, %v5388_v23 }
0x1a73   :  { %v5390_v54 = vadd.f32 %v6225_v53, %v5389_v38  ;;  %5788 = vmatmul.msk.f32.gmra.mxu2 %vm3659_vm5, %v5503_v20 }
0x1a75   :  { %v5394_v28 = vsel %vm5393_vm0, %v6225_v53, %v5390_v54 }
0x1a76   :  { %v5399_v27 = vsel %vm5396_vm1, %v5398_v61, %v5394_v28 }
0x1a77   :  { %v5404_v55 = vmul.f32 %v5399_v27, %v9914_v22 }
0x1a79   :  { %v5504_v59 = vmul.f32 %v5496_v56, %v5404_v55 }
0x1a7b   :  { %5789 = vmatmul.msk.f32.gmra.mxu2 %vm3659_vm5, %v5504_v59  ;;  %vm5577_vm5 = vcmask 123904  }
0x1ae6   :  { %v5544_v10 = vpop.f32.mrf.mxu2 }
0x1ae7   :  { %v5545_v63 = vadd.f32 %v5998_v8, %v5544_v10 }
0x1ae9   :  { %v5556_v26 = vsel %vm2945_vm15, %v5545_v63, 0.0 }
0x1aee   :  { %v5547_v1 = vpop.f32.mrf.mxu2 }
0x1aef   :  { %v5548_v2 = vadd.f32 %v5998_v8, %v5547_v1 }
0x1af1   :  { %v5557_v40 = vsel %vm2945_vm15, %v5548_v2, 0.0 }
0x1af2   :  { %v5558_v62 = vadd.f32 %v5557_v40, %v5556_v26 }
0x1af4   :  { %v5559_v15 = vrot.slane %v5558_v62, 4 }
0x1af6   :  { %v5550_v37 = vpop.f32.mrf.mxu2  ;;  %v5560_v22 = vadd.f32 %v5559_v15, %v5558_v62 }
0x1af7   :  { %v5551_v29 = vadd.f32 %v5998_v8, %v5550_v37 }
0x1af8   :  { %v5561_v7 = vrot.slane %v5560_v22, 2 }
0x1af9   :  { %v5566_v11 = vsel %vm2945_vm15, %v5551_v29, 0.0 }
0x1afa   :  { %v5562_v58 = vadd.f32 %v5561_v7, %v5560_v22 }
0x1afc   :  { %v5563_v50 = vrot.slane %v5562_v58, 1 }
0x1afe   :  { %v5553_v60 = vpop.f32.mrf.mxu2  ;;  %v5564_v12 = vadd.f32 %v5563_v50, %v5562_v58 }
0x1aff   :  { %v5554_v21 = vadd.f32 %v5998_v8, %v5553_v60 }
0x1b00   :  { %v5565_v18 = vmul.f32 %v5564_v12, %v9301_v0 }
0x1b01   :  { %v5567_v36 = vsel %vm2945_vm15, %v5554_v21, 0.0 }
0x1b02   :  { %v5568_v48 = vadd.f32 %v5567_v36, %v5566_v11 }
0x1b04   :  { %v5569_v51 = vrot.slane %v5568_v48, 4 }
0x1b06   :  { %v5570_v32 = vadd.f32 %v5569_v51, %v5568_v48 }
0x1b08   :  { %v5571_v33 = vrot.slane %v5570_v32, 2 }
0x1b0a   :  { %v5572_v45 = vadd.f32 %v5571_v33, %v5570_v32 }
0x1b0c   :  { %v5573_v4 = vrot.slane %v5572_v45, 1 }
0x1b0e   :  { %v5574_v42 = vadd.f32 %v5573_v4, %v5572_v45 }
0x1b10   :  { %v5575_v46 = vmul.f32 %v5574_v42, %v9301_v0 }
0x1b12   :  { %v5576_v34 = vsel %vm3309_vm4, %v5565_v18, %v5575_v46 }
0x1b13   :  { %5790 = vmatmul.msk.f32.vlgmr.msrb.gmra.mxu0 %vm2945_vm15, %v5576_v34  ;;  %5578 = vst.msk [vmem:[#allocation26] sm:$0x3] %vm5577_vm5, %v5576_v34  ;;  %vm5608_vm15 = vcmask 25600  }
0x1b14   :  { %5620 = dma.vmem_to_hbm [thread:$0]  %s5616_s22, 32, %s5618_s4, [#allocation7]  }
0x1b90   :  { %v5605_v0 = vpop.f32.mrf.mxu0 }
0x1b91   :  { %v5606_v35 = vadd.f32 %v5999_v3, %v5605_v0 }
0x1b93   :  { %5609 = vst.msk [vmem:[#allocation27] sm:$0x3] %vm5608_vm15, %v5606_v35 }
0x1b94   :  { %5631 = dma.vmem_to_hbm [thread:$0]  %s5627_s5, 32, %s5629_s6, [#allocation28]  }
0x1b95   :  { %6555 = dma.done.wait [#allocation7], 32  }
0x1b96   :  { %6556 = vsyncadd [#allocation7], 4294967264 }
0x1b97   :  { %6557 = dma.done.wait [#allocation28], 32  }
0x1b98   :  { %6558 = vsyncadd [#allocation28], 4294967264 }
0x1b99   :  { %5640 = vsyncpa [#allocation6], 1 }
0x1b9a   :  { %5641 = vsyncpa [#allocation13], 1 }
0x1b9b   :  { %5642 = vsyncpa [#allocation16], 1 }
0x1b9c   :  { %5643 = vsyncpa [#allocation19], 1 }
0x1b9d   :  { %5644 = vsyncpa [#allocation22], 1 }
0x1b9e   :  { %5645 = vsyncpa [#allocation25], 1 }
0x1b9f   :  { %5646 = vsyncpa [#allocation7], 1 }
0x1ba0   :  { %5647 = vsyncpa [#allocation28], 1 }
0x1ba1   :  { %5648 = vsyncpa [#allocation8], 1 }
0x1ba2   :  { %5649 = vsyncpa [#allocation10], 1 }

</bundles_post_ra>
